<compile_context>
chip_gen: v6e
topology: v6e:2x2x1
jax: 0.10.0
libtpu: 0.0.40
codegen_flags: <defaults>
</compile_context>

<pallas_src>
import functools
import math

import jax
import jax.numpy as jnp
from jax.experimental import pallas as pl
from jax.experimental.pallas import tpu as pltpu


# --------------------------------------------------------------------------- #
# Kernel: per-batch-block / per-layer feature statistics.
#   - feature normalization (per-channel mean / unbiased std over spatial)
#   - difficulty estimate (separable product of spatial/channel stat terms)
#   - IoU term (1 - I/U) per sample
#   - mean cosine similarity over spatial positions (channel dim)
#   - adaptive-average-pooled normalized features (for the estimator head)
# --------------------------------------------------------------------------- #
def _layer_stats_kernel(d_ref, s_ref, out_ref, *, eps):
    """d_ref / s_ref: (Bb, C, HW) feature tiles (any float dtype).

    out_ref: (Bb, C, 8) f32 packed output:
      [:, :, 0] pooled normalized d-features   [:, :, 1] pooled s-features
      [:, 0, 2] difficulty(d)   [:, 0, 3] difficulty(s)
      [:, 0, 4] 1 - IoU         [:, 0, 5] mean cosine similarity
    """
    d = d_ref[...].astype(jnp.float32)          # cast-on-load (bf16 inputs DMA
    s = s_ref[...].astype(jnp.float32)          # at half the HBM bytes)
    _, C, HW = d.shape
    inv_hw = 1.0 / HW
    inv_hw1 = 1.0 / max(HW - 1, 1)
    inv_c = 1.0 / C
    inv_c1 = 1.0 / max(C - 1, 1)

    def stats(x):
        # torch normalize_feature: (x - mean) / (std_unbiased + eps) per
        # channel over spatial.
        m = jnp.sum(x, axis=2, keepdims=True) * inv_hw              # (Bb,C,1)
        xc = x - m
        var_u = jnp.sum(xc * xc, axis=2, keepdims=True) * inv_hw1
        inv_std = 1.0 / (jnp.sqrt(var_u) + eps)
        xn = xc * inv_std                                           # normalized
        # Spatial variance of xn: its spatial mean is 0 by construction, so
        # its unbiased spatial variance is var_u * inv_std^2 (no second pass).
        sp_var = jnp.maximum(var_u * (inv_std * inv_std), eps)

        ax = jnp.abs(xn)
        sp_l1 = jnp.sum(ax, axis=2, keepdims=True) * inv_hw         # (Bb,C,1)
        ch_l1 = jnp.sum(ax, axis=1, keepdims=True) * inv_c          # (Bb,1,HW)
        ch_sum = jnp.sum(xn, axis=1, keepdims=True)                 # (Bb,1,HW)
        ch_sq = jnp.sum(xn * xn, axis=1, keepdims=True)             # (Bb,1,HW)

        # difficulty = mean over (c,h,w) of
        #   log(1+sp_var[c]) * log(1+ch_var[hw]) * sp_l1[c] * ch_l1[hw]
        # which is separable into a (channel) factor times an (hw) factor.
        a = jnp.sum(jnp.log(1.0 + sp_var) * sp_l1,
                    axis=1, keepdims=True) * inv_c                  # (Bb,1,1)
        ch_var = jnp.maximum(
            (ch_sq - ch_sum * ch_sum * inv_c) * inv_c1, eps)
        b = jnp.sum(jnp.log(1.0 + ch_var) * ch_l1,
                    axis=2, keepdims=True) * inv_hw                 # (Bb,1,1)
        diff = a * b                                                # (Bb,1,1)

        total = jnp.sum(ch_sum, axis=2, keepdims=True)              # (Bb,1,1)
        pool = jnp.sum(xn, axis=2, keepdims=True) * inv_hw          # (Bb,C,1)
        return xn, pool, diff, total, ch_sq

    dn, pool_d, d_diff, d_total, d_chsq = stats(d)
    sn, pool_s, s_diff, s_total, s_chsq = stats(s)

    # Cross term shared by the IoU and cosine losses.
    ds_chdot = jnp.sum(dn * sn, axis=1, keepdims=True)              # (Bb,1,HW)

    # IoU term per sample (symmetric forward value).
    # TODO(synk): iou_loss(d, s.detach()) + iou_loss(s, d.detach()) gradient
    # asymmetry (stop_gradient) is not modeled; forward values are equal.
    iand = jnp.sum(ds_chdot, axis=2, keepdims=True)                 # (Bb,1,1)
    ior = d_total + s_total - iand
    iou_term = 1.0 - iand / ior

    # Mean cosine similarity along channels (F.normalize + cosine_similarity),
    # factored so the channel-normalized tensors are never materialized.
    nd = jnp.sqrt(d_chsq)
    ns = jnp.sqrt(s_chsq)
    inv_nd = 1.0 / jnp.maximum(nd, 1e-12)
    inv_ns = 1.0 / jnp.maximum(ns, 1e-12)
    dot = ds_chdot * (inv_nd * inv_ns)
    den = jnp.maximum((nd * inv_nd) * (ns * inv_ns), 1e-8)
    cos_mean = jnp.sum(dot / den, axis=2, keepdims=True) * inv_hw   # (Bb,1,1)

    # Single packed output stream.
    out_ref[...] = jnp.zeros_like(out_ref)
    out_ref[:, :, 0:1] = pool_d
    out_ref[:, :, 1:2] = pool_s
    out_ref[:, 0:1, 2:3] = d_diff
    out_ref[:, 0:1, 3:4] = s_diff
    out_ref[:, 0:1, 4:5] = iou_term
    out_ref[:, 0:1, 5:6] = cos_mean


def _layer_stats(d, s, eps):
    """d, s: (B, C, H, W) feature maps (any float dtype; no pre-cast).

    Returns pooled normalized features (B, C) for both nets plus the
    per-sample scalars (d_diff, s_diff, 1-IoU, mean cosine)."""
    B, C, H, W = d.shape
    HW = H * W
    d2 = jnp.reshape(d, (B, C, HW))      # free: contiguity preserved, no copy
    s2 = jnp.reshape(s, (B, C, HW))

    # Batch-block sizing: biggest divisor of B whose per-step working set
    # (2 nets x double-buffered inputs + ~8 full-tile f32 temporaries) stays
    # inside the VMEM budget.
    tile_bytes = C * HW * 4
    budget = 24 * 1024 * 1024
    b_block = 1
    for cand in range(B, 0, -1):
        if B % cand == 0 and cand * tile_bytes * 12 <= budget:
            b_block = cand
            break

    kernel = functools.partial(_layer_stats_kernel, eps=eps)
    out = pl.pallas_call(
        kernel,
        out_shape=jax.ShapeDtypeStruct((B, C, 8), jnp.float32),
        grid=(B // b_block,),
        in_specs=[pl.BlockSpec((b_block, C, HW), lambda i: (i, 0, 0)),
                  pl.BlockSpec((b_block, C, HW), lambda i: (i, 0, 0))],
        out_specs=pl.BlockSpec((b_block, C, 8), lambda i: (i, 0, 0)),
        compiler_params=pltpu.CompilerParams(
            dimension_semantics=("parallel",),
            vmem_limit_bytes=48 * 1024 * 1024),
    )(d2, s2)

    pool_d = out[:, :, 0]
    pool_s = out[:, :, 1]
    return (pool_d, pool_s,
            out[:, 0, 2], out[:, 0, 3], out[:, 0, 4], out[:, 0, 5])


# --------------------------------------------------------------------------- #
# Difficulty-estimator head (tiny: (B, C) x (C, C//16)) — plain jnp; a
# separate pallas_call here would be pure launch/DMA overhead.
# --------------------------------------------------------------------------- #
def _estimator_head(pool, p):
    h = jnp.dot(pool, p["w1"]) + p["b1"]                       # 1x1 conv
    mu = jnp.mean(h, axis=0, keepdims=True)                    # BN (batch stats)
    var = jnp.mean((h - mu) ** 2, axis=0, keepdims=True)
    hn = p["gamma"] * (h - mu) / jnp.sqrt(var + 1e-5) + p["beta"]
    hr = jnp.maximum(hn, 0.0)                                  # ReLU
    o = jnp.sum(hr * p["w2"], axis=1, keepdims=True) + p["b2"]   # 1x1 conv -> 1
    return jax.nn.sigmoid(o)                                   # (B, 1)


# --------------------------------------------------------------------------- #
# Whole-loss forward (jitted once; no per-layer host syncs).
# --------------------------------------------------------------------------- #
def _forward_impl(dnet_features, snet_features, feature_weights, params,
                  threshold, *, eps, min_weight):
    norm_weights = jnp.maximum(jax.nn.softmax(feature_weights), min_weight)
    total = jnp.float32(0.0)
    w_prods = []
    for idx, (d, s) in enumerate(zip(dnet_features, snet_features)):
        pool_d, pool_s, dd_b, sd_b, iou_b, cos_b = _layer_stats(d, s, eps)

        d_diff = jnp.minimum(jnp.mean(dd_b), 100.0)
        s_diff = jnp.minimum(jnp.mean(sd_b), 100.0)
        d_w = jnp.maximum(jnp.exp(-d_diff / (threshold + eps)), min_weight)
        s_w = jnp.maximum(jnp.exp(-s_diff / (threshold + eps)), min_weight)

        kl_loss = 2.0 * jnp.mean(iou_b)
        cos_loss = 1.0 - jnp.mean(cos_b)

        imp_d = _estimator_head(pool_d, params[idx])
        imp_s = _estimator_head(pool_s, params[idx])

        layer_loss = (kl_loss + cos_loss) * (d_w * s_w) * jnp.mean(imp_d * imp_s)
        total = total + norm_weights[idx] * layer_loss
        w_prods.append(d_w * s_w)
    return total, jnp.stack(w_prods)


# --------------------------------------------------------------------------- #
# Module wrapper
# --------------------------------------------------------------------------- #
class AdvancedSPLFeatureLossPallas:
    def __init__(self, channels_list=(32, 128), init_threshold=0.5,
                 growth_rate=1.05, min_weight=0.1, eps=1e-6, seed=42):
        self.channels_list = list(channels_list)
        self.threshold = float(init_threshold)
        self.growth_rate = growth_rate
        self.min_weight = min_weight
        self.eps = eps
        # nn.Parameter(torch.ones(len(channels_list)))
        self.feature_weights = jnp.ones(len(channels_list), jnp.float32)
        # deterministic synthetic init of the estimator heads
        key = jax.random.PRNGKey(seed)
        self.params = []
        for ch in channels_list:
            hid = max(ch // 16, 1)
            key, k1, k2 = jax.random.split(key, 3)
            self.params.append(dict(
                w1=jax.random.normal(k1, (ch, hid), jnp.float32) / math.sqrt(ch),
                b1=jnp.zeros((1, hid), jnp.float32),
                gamma=jnp.ones((1, hid), jnp.float32),
                beta=jnp.zeros((1, hid), jnp.float32),
                w2=jax.random.normal(k2, (1, hid), jnp.float32) / math.sqrt(hid),
                b2=jnp.zeros((1, 1), jnp.float32),
            ))
        # One jitted forward for the whole multi-layer loss.  threshold is a
        # traced scalar, so host-side updates do not trigger a retrace.
        self._forward = jax.jit(functools.partial(
            _forward_impl, eps=self.eps, min_weight=self.min_weight))

    def __call__(self, dnet_features, snet_features, current_epoch):
        total, w_prod = self._forward(
            tuple(dnet_features), tuple(snet_features),
            self.feature_weights, self.params,
            jnp.asarray(self.threshold, jnp.float32))
        if current_epoch % 5 == 0:
            # Single host sync, only on threshold-update epochs.
            # TODO(synk): BatchNorm running-stat updates (training-time side
            # effect of the PyTorch module) are not modeled.
            self.threshold = min(self.threshold * self.growth_rate,
                                 float(jnp.max(w_prod)) * 2.0)
        return total


# --------------------------------------------------------------------------- #
# Pure-JAX reference (PyTorch semantics) used to validate the Pallas path.
# --------------------------------------------------------------------------- #
def _reference_forward(module, dnet_features, snet_features):
    eps = module.eps
    norm_w = jnp.maximum(jax.nn.softmax(module.feature_weights), module.min_weight)
    total = jnp.float32(0.0)
    for idx, (d, s) in enumerate(zip(dnet_features, snet_features)):
        d = d.astype(jnp.float32)
        s = s.astype(jnp.float32)
        B, C, H, W = d.shape

        def normalize(x):
            xf = jnp.reshape(x, (B, C, H * W))
            m = jnp.mean(xf, axis=2, keepdims=True)
            std = jnp.std(xf, axis=2, keepdims=True, ddof=1) + eps
            return jnp.reshape((xf - m) / std, (B, C, H, W))

        dn, sn = normalize(d), normalize(s)

        def difficulty(x):
            sv = jnp.maximum(jnp.var(x, axis=(2, 3), keepdims=True, ddof=1), eps)
            cv = jnp.maximum(jnp.var(x, axis=1, keepdims=True, ddof=1), eps)
            sl1 = jnp.mean(jnp.abs(x), axis=(2, 3), keepdims=True)
            cl1 = jnp.mean(jnp.abs(x), axis=1, keepdims=True)
            dd = jnp.log(1.0 + sv) * jnp.log(1.0 + cv) * sl1 * cl1
            return jnp.minimum(jnp.mean(dd), 100.0)

        d_diff, s_diff = difficulty(dn), difficulty(sn)
        d_w = jnp.maximum(jnp.exp(-d_diff / (module.threshold + eps)), module.min_weight)
        s_w = jnp.maximum(jnp.exp(-s_diff / (module.threshold + eps)), module.min_weight)

        p = module.params[idx]

        def estim(x):
            pool = jnp.mean(x, axis=(2, 3))
            h = pool @ p["w1"] + p["b1"]
            mu = jnp.mean(h, axis=0, keepdims=True)
            var = jnp.mean((h - mu) ** 2, axis=0, keepdims=True)
            hn = p["gamma"] * (h - mu) / jnp.sqrt(var + 1e-5) + p["beta"]
            hr = jnp.maximum(hn, 0.0)
            return jax.nn.sigmoid(jnp.sum(hr * p["w2"], axis=1, keepdims=True) + p["b2"])

        imp_d, imp_s = estim(dn), estim(sn)

        def iou(a, b):
            iand = jnp.sum(a * b, axis=(1, 2, 3))
            ior = jnp.sum(a, axis=(1, 2, 3)) + jnp.sum(b, axis=(1, 2, 3)) - iand
            return jnp.mean(1.0 - iand / ior)

        kl = iou(dn, sn) + iou(sn, dn)

        n1 = jnp.sqrt(jnp.sum(dn * dn, axis=1, keepdims=True))
        n2 = jnp.sqrt(jnp.sum(sn * sn, axis=1, keepdims=True))
        f1n = dn / jnp.maximum(n1, 1e-12)
        f2n = sn / jnp.maximum(n2, 1e-12)
        dot = jnp.sum(f1n * f2n, axis=1)
        den = jnp.maximum(jnp.sqrt(jnp.sum(f1n * f1n, axis=1)) *
                          jnp.sqrt(jnp.sum(f2n * f2n, axis=1)), 1e-8)
        cos_loss = 1.0 - jnp.mean(dot / den)

        layer_loss = (kl + cos_loss) * (d_w * s_w) * jnp.mean(imp_d * imp_s)
        total = total + norm_w[idx] * layer_loss
    return total


if __name__ == "__main__":
    key = jax.random.PRNGKey(0)
    k = jax.random.split(key, 4)
    B = 2
    # small multi-scale NCHW features; layer 1 is bf16 (half the HBM bytes in,
    # cast to f32 on load inside the kernel).
    dnet_features = [
        jax.random.normal(k[0], (B, 32, 16, 16), jnp.float32),
        jax.random.normal(k[2], (B, 128, 8, 8), jnp.float32).astype(jnp.bfloat16),
    ]
    snet_features = [
        jax.random.normal(k[1], (B, 32, 16, 16), jnp.float32),
        jax.random.normal(k[3], (B, 128, 8, 8), jnp.float32).astype(jnp.bfloat16),
    ]

    module = AdvancedSPLFeatureLossPallas(channels_list=(32, 128))

    ref_loss = jax.block_until_ready(
        _reference_forward(module, dnet_features, snet_features))
    loss = jax.block_until_ready(
        module(dnet_features, snet_features, current_epoch=1))

    assert jnp.isfinite(loss), "non-finite loss"
    assert abs(float(loss) - float(ref_loss)) <= 1e-3 * abs(float(ref_loss)) + 1e-4, \
        f"mismatch: pallas={float(loss)} ref={float(ref_loss)}"

    # Exercise the (host-side) SPL threshold-update path once as well.
    loss2 = jax.block_until_ready(
        module(dnet_features, snet_features, current_epoch=5))
    assert jnp.isfinite(loss2), "non-finite loss (epoch 5)"

    print("KERNEL_OK")
</pallas_src>

<mosaic_0001>
module attributes {stable_mosaic.version = 11 : i64} {
  func.func @_layer_stats_kernel(%arg0: i32, %arg1: memref<2x128x64xbf16, #tpu.memory_space<vmem>>, %arg2: memref<2x128x64xbf16, #tpu.memory_space<vmem>>, %arg3: memref<2x128x8xf32, #tpu.memory_space<vmem>>) attributes {dimension_semantics = [#tpu.dimension_semantics<parallel>], iteration_bounds = array<i64: 1>, scalar_prefetch = 0 : i64, scratch_operands = 0 : i64, tpu.core_type = #tpu.core_type<tc>, window_params = [{transform_indices = @transform_0, window_bounds = array<i64: 2, 128, 64>}, {transform_indices = @transform_1, window_bounds = array<i64: 2, 128, 64>}, {transform_indices = @transform_2, window_bounds = array<i64: 2, 128, 8>}]} {
    %c0 = arith.constant 0 : index
    %c0_0 = arith.constant 0 : index
    %c0_1 = arith.constant 0 : index
    %0 = vector.load %arg1[%c0, %c0_0, %c0_1] : memref<2x128x64xbf16, #tpu.memory_space<vmem>>, vector<2x128x64xbf16>
    %1 = arith.extf %0 : vector<2x128x64xbf16> to vector<2x128x64xf32>
    %c0_2 = arith.constant 0 : index
    %c0_3 = arith.constant 0 : index
    %c0_4 = arith.constant 0 : index
    %2 = vector.load %arg2[%c0_2, %c0_3, %c0_4] : memref<2x128x64xbf16, #tpu.memory_space<vmem>>, vector<2x128x64xbf16>
    %3 = arith.extf %2 : vector<2x128x64xbf16> to vector<2x128x64xf32>
    %cst = arith.constant dense<0.000000e+00> : vector<2x128xf32>
    %4 = vector.multi_reduction <add>, %1, %cst [2] : vector<2x128x64xf32> to vector<2x128xf32>
    %5 = vector.shape_cast %4 : vector<2x128xf32> to vector<2x128x1xf32>
    %cst_5 = arith.constant 1.562500e-02 : f32
    %6 = vector.broadcast %cst_5 : f32 to vector<2x128x1xf32>
    %7 = arith.mulf %5, %6 : vector<2x128x1xf32>
    %8 = vector.broadcast %7 : vector<2x128x1xf32> to vector<2x128x64xf32>
    %9 = arith.subf %1, %8 : vector<2x128x64xf32>
    %10 = arith.mulf %9, %9 : vector<2x128x64xf32>
    %cst_6 = arith.constant dense<0.000000e+00> : vector<2x128xf32>
    %11 = vector.multi_reduction <add>, %10, %cst_6 [2] : vector<2x128x64xf32> to vector<2x128xf32>
    %12 = vector.shape_cast %11 : vector<2x128xf32> to vector<2x128x1xf32>
    %cst_7 = arith.constant 0.0158730168 : f32
    %13 = vector.broadcast %cst_7 : f32 to vector<2x128x1xf32>
    %14 = arith.mulf %12, %13 : vector<2x128x1xf32>
    %15 = math.sqrt %14 : vector<2x128x1xf32>
    %cst_8 = arith.constant 9.99999997E-7 : f32
    %16 = vector.broadcast %cst_8 : f32 to vector<2x128x1xf32>
    %17 = arith.addf %15, %16 : vector<2x128x1xf32>
    %cst_9 = arith.constant 1.000000e+00 : f32
    %18 = vector.broadcast %cst_9 : f32 to vector<2x128x1xf32>
    %19 = arith.divf %18, %17 : vector<2x128x1xf32>
    %20 = vector.broadcast %19 : vector<2x128x1xf32> to vector<2x128x64xf32>
    %21 = arith.mulf %9, %20 : vector<2x128x64xf32>
    %22 = arith.mulf %19, %19 : vector<2x128x1xf32>
    %23 = arith.mulf %14, %22 : vector<2x128x1xf32>
    %cst_10 = arith.constant 9.99999997E-7 : f32
    %24 = vector.broadcast %cst_10 : f32 to vector<2x128x1xf32>
    %25 = arith.maximumf %23, %24 : vector<2x128x1xf32>
    %26 = math.absf %21 : vector<2x128x64xf32>
    %cst_11 = arith.constant dense<0.000000e+00> : vector<2x128xf32>
    %27 = vector.multi_reduction <add>, %26, %cst_11 [2] : vector<2x128x64xf32> to vector<2x128xf32>
    %28 = vector.shape_cast %27 : vector<2x128xf32> to vector<2x128x1xf32>
    %cst_12 = arith.constant 1.562500e-02 : f32
    %29 = vector.broadcast %cst_12 : f32 to vector<2x128x1xf32>
    %30 = arith.mulf %28, %29 : vector<2x128x1xf32>
    %cst_13 = arith.constant dense<0.000000e+00> : vector<2x64xf32>
    %31 = vector.multi_reduction <add>, %26, %cst_13 [1] : vector<2x128x64xf32> to vector<2x64xf32>
    %32 = vector.shape_cast %31 : vector<2x64xf32> to vector<2x1x64xf32>
    %cst_14 = arith.constant 7.812500e-03 : f32
    %33 = vector.broadcast %cst_14 : f32 to vector<2x1x64xf32>
    %34 = arith.mulf %32, %33 : vector<2x1x64xf32>
    %cst_15 = arith.constant dense<0.000000e+00> : vector<2x64xf32>
    %35 = vector.multi_reduction <add>, %21, %cst_15 [1] : vector<2x128x64xf32> to vector<2x64xf32>
    %36 = vector.shape_cast %35 : vector<2x64xf32> to vector<2x1x64xf32>
    %37 = arith.mulf %21, %21 : vector<2x128x64xf32>
    %cst_16 = arith.constant dense<0.000000e+00> : vector<2x64xf32>
    %38 = vector.multi_reduction <add>, %37, %cst_16 [1] : vector<2x128x64xf32> to vector<2x64xf32>
    %39 = vector.shape_cast %38 : vector<2x64xf32> to vector<2x1x64xf32>
    %cst_17 = arith.constant 1.000000e+00 : f32
    %40 = vector.broadcast %cst_17 : f32 to vector<2x128x1xf32>
    %41 = arith.addf %40, %25 : vector<2x128x1xf32>
    %42 = math.log %41 : vector<2x128x1xf32>
    %43 = arith.mulf %42, %30 : vector<2x128x1xf32>
    %cst_18 = arith.constant dense<0.000000e+00> : vector<2x1xf32>
    %44 = vector.multi_reduction <add>, %43, %cst_18 [1] : vector<2x128x1xf32> to vector<2x1xf32>
    %45 = vector.shape_cast %44 : vector<2x1xf32> to vector<2x1x1xf32>
    %cst_19 = arith.constant 7.812500e-03 : f32
    %46 = vector.broadcast %cst_19 : f32 to vector<2x1x1xf32>
    %47 = arith.mulf %45, %46 : vector<2x1x1xf32>
    %48 = arith.mulf %36, %36 : vector<2x1x64xf32>
    %cst_20 = arith.constant 7.812500e-03 : f32
    %49 = vector.broadcast %cst_20 : f32 to vector<2x1x64xf32>
    %50 = arith.mulf %48, %49 : vector<2x1x64xf32>
    %51 = arith.subf %39, %50 : vector<2x1x64xf32>
    %cst_21 = arith.constant 0.00787401571 : f32
    %52 = vector.broadcast %cst_21 : f32 to vector<2x1x64xf32>
    %53 = arith.mulf %51, %52 : vector<2x1x64xf32>
    %cst_22 = arith.constant 9.99999997E-7 : f32
    %54 = vector.broadcast %cst_22 : f32 to vector<2x1x64xf32>
    %55 = arith.maximumf %53, %54 : vector<2x1x64xf32>
    %cst_23 = arith.constant 1.000000e+00 : f32
    %56 = vector.broadcast %cst_23 : f32 to vector<2x1x64xf32>
    %57 = arith.addf %56, %55 : vector<2x1x64xf32>
    %58 = math.log %57 : vector<2x1x64xf32>
    %59 = arith.mulf %58, %34 : vector<2x1x64xf32>
    %cst_24 = arith.constant dense<0.000000e+00> : vector<2x1xf32>
    %60 = vector.multi_reduction <add>, %59, %cst_24 [2] : vector<2x1x64xf32> to vector<2x1xf32>
    %61 = vector.shape_cast %60 : vector<2x1xf32> to vector<2x1x1xf32>
    %cst_25 = arith.constant 1.562500e-02 : f32
    %62 = vector.broadcast %cst_25 : f32 to vector<2x1x1xf32>
    %63 = arith.mulf %61, %62 : vector<2x1x1xf32>
    %64 = arith.mulf %47, %63 : vector<2x1x1xf32>
    %cst_26 = arith.constant dense<0.000000e+00> : vector<2x1xf32>
    %65 = vector.multi_reduction <add>, %36, %cst_26 [2] : vector<2x1x64xf32> to vector<2x1xf32>
    %66 = vector.shape_cast %65 : vector<2x1xf32> to vector<2x1x1xf32>
    %cst_27 = arith.constant dense<0.000000e+00> : vector<2x128xf32>
    %67 = vector.multi_reduction <add>, %21, %cst_27 [2] : vector<2x128x64xf32> to vector<2x128xf32>
    %68 = vector.shape_cast %67 : vector<2x128xf32> to vector<2x128x1xf32>
    %cst_28 = arith.constant 1.562500e-02 : f32
    %69 = vector.broadcast %cst_28 : f32 to vector<2x128x1xf32>
    %70 = arith.mulf %68, %69 : vector<2x128x1xf32>
    %cst_29 = arith.constant dense<0.000000e+00> : vector<2x128xf32>
    %71 = vector.multi_reduction <add>, %3, %cst_29 [2] : vector<2x128x64xf32> to vector<2x128xf32>
    %72 = vector.shape_cast %71 : vector<2x128xf32> to vector<2x128x1xf32>
    %cst_30 = arith.constant 1.562500e-02 : f32
    %73 = vector.broadcast %cst_30 : f32 to vector<2x128x1xf32>
    %74 = arith.mulf %72, %73 : vector<2x128x1xf32>
    %75 = vector.broadcast %74 : vector<2x128x1xf32> to vector<2x128x64xf32>
    %76 = arith.subf %3, %75 : vector<2x128x64xf32>
    %77 = arith.mulf %76, %76 : vector<2x128x64xf32>
    %cst_31 = arith.constant dense<0.000000e+00> : vector<2x128xf32>
    %78 = vector.multi_reduction <add>, %77, %cst_31 [2] : vector<2x128x64xf32> to vector<2x128xf32>
    %79 = vector.shape_cast %78 : vector<2x128xf32> to vector<2x128x1xf32>
    %cst_32 = arith.constant 0.0158730168 : f32
    %80 = vector.broadcast %cst_32 : f32 to vector<2x128x1xf32>
    %81 = arith.mulf %79, %80 : vector<2x128x1xf32>
    %82 = math.sqrt %81 : vector<2x128x1xf32>
    %cst_33 = arith.constant 9.99999997E-7 : f32
    %83 = vector.broadcast %cst_33 : f32 to vector<2x128x1xf32>
    %84 = arith.addf %82, %83 : vector<2x128x1xf32>
    %cst_34 = arith.constant 1.000000e+00 : f32
    %85 = vector.broadcast %cst_34 : f32 to vector<2x128x1xf32>
    %86 = arith.divf %85, %84 : vector<2x128x1xf32>
    %87 = vector.broadcast %86 : vector<2x128x1xf32> to vector<2x128x64xf32>
    %88 = arith.mulf %76, %87 : vector<2x128x64xf32>
    %89 = arith.mulf %86, %86 : vector<2x128x1xf32>
    %90 = arith.mulf %81, %89 : vector<2x128x1xf32>
    %cst_35 = arith.constant 9.99999997E-7 : f32
    %91 = vector.broadcast %cst_35 : f32 to vector<2x128x1xf32>
    %92 = arith.maximumf %90, %91 : vector<2x128x1xf32>
    %93 = math.absf %88 : vector<2x128x64xf32>
    %cst_36 = arith.constant dense<0.000000e+00> : vector<2x128xf32>
    %94 = vector.multi_reduction <add>, %93, %cst_36 [2] : vector<2x128x64xf32> to vector<2x128xf32>
    %95 = vector.shape_cast %94 : vector<2x128xf32> to vector<2x128x1xf32>
    %cst_37 = arith.constant 1.562500e-02 : f32
    %96 = vector.broadcast %cst_37 : f32 to vector<2x128x1xf32>
    %97 = arith.mulf %95, %96 : vector<2x128x1xf32>
    %cst_38 = arith.constant dense<0.000000e+00> : vector<2x64xf32>
    %98 = vector.multi_reduction <add>, %93, %cst_38 [1] : vector<2x128x64xf32> to vector<2x64xf32>
    %99 = vector.shape_cast %98 : vector<2x64xf32> to vector<2x1x64xf32>
    %cst_39 = arith.constant 7.812500e-03 : f32
    %100 = vector.broadcast %cst_39 : f32 to vector<2x1x64xf32>
    %101 = arith.mulf %99, %100 : vector<2x1x64xf32>
    %cst_40 = arith.constant dense<0.000000e+00> : vector<2x64xf32>
    %102 = vector.multi_reduction <add>, %88, %cst_40 [1] : vector<2x128x64xf32> to vector<2x64xf32>
    %103 = vector.shape_cast %102 : vector<2x64xf32> to vector<2x1x64xf32>
    %104 = arith.mulf %88, %88 : vector<2x128x64xf32>
    %cst_41 = arith.constant dense<0.000000e+00> : vector<2x64xf32>
    %105 = vector.multi_reduction <add>, %104, %cst_41 [1] : vector<2x128x64xf32> to vector<2x64xf32>
    %106 = vector.shape_cast %105 : vector<2x64xf32> to vector<2x1x64xf32>
    %cst_42 = arith.constant 1.000000e+00 : f32
    %107 = vector.broadcast %cst_42 : f32 to vector<2x128x1xf32>
    %108 = arith.addf %107, %92 : vector<2x128x1xf32>
    %109 = math.log %108 : vector<2x128x1xf32>
    %110 = arith.mulf %109, %97 : vector<2x128x1xf32>
    %cst_43 = arith.constant dense<0.000000e+00> : vector<2x1xf32>
    %111 = vector.multi_reduction <add>, %110, %cst_43 [1] : vector<2x128x1xf32> to vector<2x1xf32>
    %112 = vector.shape_cast %111 : vector<2x1xf32> to vector<2x1x1xf32>
    %cst_44 = arith.constant 7.812500e-03 : f32
    %113 = vector.broadcast %cst_44 : f32 to vector<2x1x1xf32>
    %114 = arith.mulf %112, %113 : vector<2x1x1xf32>
    %115 = arith.mulf %103, %103 : vector<2x1x64xf32>
    %cst_45 = arith.constant 7.812500e-03 : f32
    %116 = vector.broadcast %cst_45 : f32 to vector<2x1x64xf32>
    %117 = arith.mulf %115, %116 : vector<2x1x64xf32>
    %118 = arith.subf %106, %117 : vector<2x1x64xf32>
    %cst_46 = arith.constant 0.00787401571 : f32
    %119 = vector.broadcast %cst_46 : f32 to vector<2x1x64xf32>
    %120 = arith.mulf %118, %119 : vector<2x1x64xf32>
    %cst_47 = arith.constant 9.99999997E-7 : f32
    %121 = vector.broadcast %cst_47 : f32 to vector<2x1x64xf32>
    %122 = arith.maximumf %120, %121 : vector<2x1x64xf32>
    %cst_48 = arith.constant 1.000000e+00 : f32
    %123 = vector.broadcast %cst_48 : f32 to vector<2x1x64xf32>
    %124 = arith.addf %123, %122 : vector<2x1x64xf32>
    %125 = math.log %124 : vector<2x1x64xf32>
    %126 = arith.mulf %125, %101 : vector<2x1x64xf32>
    %cst_49 = arith.constant dense<0.000000e+00> : vector<2x1xf32>
    %127 = vector.multi_reduction <add>, %126, %cst_49 [2] : vector<2x1x64xf32> to vector<2x1xf32>
    %128 = vector.shape_cast %127 : vector<2x1xf32> to vector<2x1x1xf32>
    %cst_50 = arith.constant 1.562500e-02 : f32
    %129 = vector.broadcast %cst_50 : f32 to vector<2x1x1xf32>
    %130 = arith.mulf %128, %129 : vector<2x1x1xf32>
    %131 = arith.mulf %114, %130 : vector<2x1x1xf32>
    %cst_51 = arith.constant dense<0.000000e+00> : vector<2x1xf32>
    %132 = vector.multi_reduction <add>, %103, %cst_51 [2] : vector<2x1x64xf32> to vector<2x1xf32>
    %133 = vector.shape_cast %132 : vector<2x1xf32> to vector<2x1x1xf32>
    %cst_52 = arith.constant dense<0.000000e+00> : vector<2x128xf32>
    %134 = vector.multi_reduction <add>, %88, %cst_52 [2] : vector<2x128x64xf32> to vector<2x128xf32>
    %135 = vector.shape_cast %134 : vector<2x128xf32> to vector<2x128x1xf32>
    %cst_53 = arith.constant 1.562500e-02 : f32
    %136 = vector.broadcast %cst_53 : f32 to vector<2x128x1xf32>
    %137 = arith.mulf %135, %136 : vector<2x128x1xf32>
    %138 = arith.mulf %21, %88 : vector<2x128x64xf32>
    %cst_54 = arith.constant dense<0.000000e+00> : vector<2x64xf32>
    %139 = vector.multi_reduction <add>, %138, %cst_54 [1] : vector<2x128x64xf32> to vector<2x64xf32>
    %140 = vector.shape_cast %139 : vector<2x64xf32> to vector<2x1x64xf32>
    %cst_55 = arith.constant dense<0.000000e+00> : vector<2x1xf32>
    %141 = vector.multi_reduction <add>, %140, %cst_55 [2] : vector<2x1x64xf32> to vector<2x1xf32>
    %142 = vector.shape_cast %141 : vector<2x1xf32> to vector<2x1x1xf32>
    %143 = arith.addf %66, %133 : vector<2x1x1xf32>
    %144 = arith.subf %143, %142 : vector<2x1x1xf32>
    %145 = arith.divf %142, %144 : vector<2x1x1xf32>
    %cst_56 = arith.constant 1.000000e+00 : f32
    %146 = vector.broadcast %cst_56 : f32 to vector<2x1x1xf32>
    %147 = arith.subf %146, %145 : vector<2x1x1xf32>
    %148 = math.sqrt %39 : vector<2x1x64xf32>
    %149 = math.sqrt %106 : vector<2x1x64xf32>
    %cst_57 = arith.constant 9.99999996E-13 : f32
    %150 = vector.broadcast %cst_57 : f32 to vector<2x1x64xf32>
    %151 = arith.maximumf %148, %150 : vector<2x1x64xf32>
    %cst_58 = arith.constant 1.000000e+00 : f32
    %152 = vector.broadcast %cst_58 : f32 to vector<2x1x64xf32>
    %153 = arith.divf %152, %151 : vector<2x1x64xf32>
    %cst_59 = arith.constant 9.99999996E-13 : f32
    %154 = vector.broadcast %cst_59 : f32 to vector<2x1x64xf32>
    %155 = arith.maximumf %149, %154 : vector<2x1x64xf32>
    %cst_60 = arith.constant 1.000000e+00 : f32
    %156 = vector.broadcast %cst_60 : f32 to vector<2x1x64xf32>
    %157 = arith.divf %156, %155 : vector<2x1x64xf32>
    %158 = arith.mulf %153, %157 : vector<2x1x64xf32>
    %159 = arith.mulf %140, %158 : vector<2x1x64xf32>
    %160 = arith.mulf %148, %153 : vector<2x1x64xf32>
    %161 = arith.mulf %149, %157 : vector<2x1x64xf32>
    %162 = arith.mulf %160, %161 : vector<2x1x64xf32>
    %cst_61 = arith.constant 9.99999993E-9 : f32
    %163 = vector.broadcast %cst_61 : f32 to vector<2x1x64xf32>
    %164 = arith.maximumf %162, %163 : vector<2x1x64xf32>
    %165 = arith.divf %159, %164 : vector<2x1x64xf32>
    %cst_62 = arith.constant dense<0.000000e+00> : vector<2x1xf32>
    %166 = vector.multi_reduction <add>, %165, %cst_62 [2] : vector<2x1x64xf32> to vector<2x1xf32>
    %167 = vector.shape_cast %166 : vector<2x1xf32> to vector<2x1x1xf32>
    %cst_63 = arith.constant 1.562500e-02 : f32
    %168 = vector.broadcast %cst_63 : f32 to vector<2x1x1xf32>
    %169 = arith.mulf %167, %168 : vector<2x1x1xf32>
    %cst_64 = arith.constant 0.000000e+00 : f32
    %170 = vector.broadcast %cst_64 : f32 to vector<2x128x8xf32>
    %c0_65 = arith.constant 0 : index
    %c0_66 = arith.constant 0 : index
    %c0_67 = arith.constant 0 : index
    %171 = vector.load %arg3[%c0_65, %c0_66, %c0_67] : memref<2x128x8xf32, #tpu.memory_space<vmem>>, vector<2x128x8xf32>
    tpu.vector_store %arg3[%c0_65, %c0_66, %c0_67], %170 {strides = array<i32>} : memref<2x128x8xf32, #tpu.memory_space<vmem>>, vector<2x128x8xf32>,
    %c0_68 = arith.constant 0 : index
    %c0_69 = arith.constant 0 : index
    %c0_70 = arith.constant 0 : index
    %172 = vector.load %arg3[%c0_68, %c0_69, %c0_70] : memref<2x128x8xf32, #tpu.memory_space<vmem>>, vector<2x128x1xf32>
    tpu.vector_store %arg3[%c0_68, %c0_69, %c0_70], %70 {strides = array<i32>} : memref<2x128x8xf32, #tpu.memory_space<vmem>>, vector<2x128x1xf32>,
    %c0_71 = arith.constant 0 : index
    %c0_72 = arith.constant 0 : index
    %c1 = arith.constant 1 : index
    %173 = vector.load %arg3[%c0_71, %c0_72, %c1] : memref<2x128x8xf32, #tpu.memory_space<vmem>>, vector<2x128x1xf32>
    tpu.vector_store %arg3[%c0_71, %c0_72, %c1], %137 {strides = array<i32>} : memref<2x128x8xf32, #tpu.memory_space<vmem>>, vector<2x128x1xf32>,
    %c0_73 = arith.constant 0 : index
    %c0_74 = arith.constant 0 : index
    %c2 = arith.constant 2 : index
    %174 = vector.load %arg3[%c0_73, %c0_74, %c2] : memref<2x128x8xf32, #tpu.memory_space<vmem>>, vector<2x1x1xf32>
    tpu.vector_store %arg3[%c0_73, %c0_74, %c2], %64 {strides = array<i32>} : memref<2x128x8xf32, #tpu.memory_space<vmem>>, vector<2x1x1xf32>,
    %c0_75 = arith.constant 0 : index
    %c0_76 = arith.constant 0 : index
    %c3 = arith.constant 3 : index
    %175 = vector.load %arg3[%c0_75, %c0_76, %c3] : memref<2x128x8xf32, #tpu.memory_space<vmem>>, vector<2x1x1xf32>
    tpu.vector_store %arg3[%c0_75, %c0_76, %c3], %131 {strides = array<i32>} : memref<2x128x8xf32, #tpu.memory_space<vmem>>, vector<2x1x1xf32>,
    %c0_77 = arith.constant 0 : index
    %c0_78 = arith.constant 0 : index
    %c4 = arith.constant 4 : index
    %176 = vector.load %arg3[%c0_77, %c0_78, %c4] : memref<2x128x8xf32, #tpu.memory_space<vmem>>, vector<2x1x1xf32>
    tpu.vector_store %arg3[%c0_77, %c0_78, %c4], %147 {strides = array<i32>} : memref<2x128x8xf32, #tpu.memory_space<vmem>>, vector<2x1x1xf32>,
    %c0_79 = arith.constant 0 : index
    %c0_80 = arith.constant 0 : index
    %c5 = arith.constant 5 : index
    %177 = vector.load %arg3[%c0_79, %c0_80, %c5] : memref<2x128x8xf32, #tpu.memory_space<vmem>>, vector<2x1x1xf32>
    tpu.vector_store %arg3[%c0_79, %c0_80, %c5], %169 {strides = array<i32>} : memref<2x128x8xf32, #tpu.memory_space<vmem>>, vector<2x1x1xf32>,
    return
  }
  func.func @transform_0(%arg0: i32) -> (i32, i32, i32) {
    %c0_i32 = arith.constant 0 : i32
    %c0_i32_0 = arith.constant 0 : i32
    %c0_i32_1 = arith.constant 0 : i32
    return %arg0, %c0_i32, %c0_i32_0 : i32, i32, i32
  }
  func.func @transform_1(%arg0: i32) -> (i32, i32, i32) {
    %c0_i32 = arith.constant 0 : i32
    %c0_i32_0 = arith.constant 0 : i32
    %c0_i32_1 = arith.constant 0 : i32
    return %arg0, %c0_i32, %c0_i32_0 : i32, i32, i32
  }
  func.func @transform_2(%arg0: i32) -> (i32, i32, i32) {
    %c0_i32 = arith.constant 0 : i32
    %c0_i32_0 = arith.constant 0 : i32
    %c0_i32_1 = arith.constant 0 : i32
    return %arg0, %c0_i32, %c0_i32_0 : i32, i32, i32
  }
}

module attributes {stable_mosaic.version = 11 : i64} {
  func.func @_layer_stats_kernel(%arg0: i32, %arg1: memref<2x32x256xf32, #tpu.memory_space<vmem>>, %arg2: memref<2x32x256xf32, #tpu.memory_space<vmem>>, %arg3: memref<2x32x8xf32, #tpu.memory_space<vmem>>) attributes {dimension_semantics = [#tpu.dimension_semantics<parallel>], iteration_bounds = array<i64: 1>, scalar_prefetch = 0 : i64, scratch_operands = 0 : i64, tpu.core_type = #tpu.core_type<tc>, window_params = [{transform_indices = @transform_0, window_bounds = array<i64: 2, 32, 256>}, {transform_indices = @transform_1, window_bounds = array<i64: 2, 32, 256>}, {transform_indices = @transform_2, window_bounds = array<i64: 2, 32, 8>}]} {
    %c0 = arith.constant 0 : index
    %c0_0 = arith.constant 0 : index
    %c0_1 = arith.constant 0 : index
    %0 = vector.load %arg1[%c0, %c0_0, %c0_1] : memref<2x32x256xf32, #tpu.memory_space<vmem>>, vector<2x32x256xf32>
    %c0_2 = arith.constant 0 : index
    %c0_3 = arith.constant 0 : index
    %c0_4 = arith.constant 0 : index
    %1 = vector.load %arg2[%c0_2, %c0_3, %c0_4] : memref<2x32x256xf32, #tpu.memory_space<vmem>>, vector<2x32x256xf32>
    %cst = arith.constant dense<0.000000e+00> : vector<2x32xf32>
    %2 = vector.multi_reduction <add>, %0, %cst [2] : vector<2x32x256xf32> to vector<2x32xf32>
    %3 = vector.shape_cast %2 : vector<2x32xf32> to vector<2x32x1xf32>
    %cst_5 = arith.constant 3.906250e-03 : f32
    %4 = vector.broadcast %cst_5 : f32 to vector<2x32x1xf32>
    %5 = arith.mulf %3, %4 : vector<2x32x1xf32>
    %6 = vector.broadcast %5 : vector<2x32x1xf32> to vector<2x32x256xf32>
    %7 = arith.subf %0, %6 : vector<2x32x256xf32>
    %8 = arith.mulf %7, %7 : vector<2x32x256xf32>
    %cst_6 = arith.constant dense<0.000000e+00> : vector<2x32xf32>
    %9 = vector.multi_reduction <add>, %8, %cst_6 [2] : vector<2x32x256xf32> to vector<2x32xf32>
    %10 = vector.shape_cast %9 : vector<2x32xf32> to vector<2x32x1xf32>
    %cst_7 = arith.constant 0.00392156886 : f32
    %11 = vector.broadcast %cst_7 : f32 to vector<2x32x1xf32>
    %12 = arith.mulf %10, %11 : vector<2x32x1xf32>
    %13 = math.sqrt %12 : vector<2x32x1xf32>
    %cst_8 = arith.constant 9.99999997E-7 : f32
    %14 = vector.broadcast %cst_8 : f32 to vector<2x32x1xf32>
    %15 = arith.addf %13, %14 : vector<2x32x1xf32>
    %cst_9 = arith.constant 1.000000e+00 : f32
    %16 = vector.broadcast %cst_9 : f32 to vector<2x32x1xf32>
    %17 = arith.divf %16, %15 : vector<2x32x1xf32>
    %18 = vector.broadcast %17 : vector<2x32x1xf32> to vector<2x32x256xf32>
    %19 = arith.mulf %7, %18 : vector<2x32x256xf32>
    %20 = arith.mulf %17, %17 : vector<2x32x1xf32>
    %21 = arith.mulf %12, %20 : vector<2x32x1xf32>
    %cst_10 = arith.constant 9.99999997E-7 : f32
    %22 = vector.broadcast %cst_10 : f32 to vector<2x32x1xf32>
    %23 = arith.maximumf %21, %22 : vector<2x32x1xf32>
    %24 = math.absf %19 : vector<2x32x256xf32>
    %cst_11 = arith.constant dense<0.000000e+00> : vector<2x32xf32>
    %25 = vector.multi_reduction <add>, %24, %cst_11 [2] : vector<2x32x256xf32> to vector<2x32xf32>
    %26 = vector.shape_cast %25 : vector<2x32xf32> to vector<2x32x1xf32>
    %cst_12 = arith.constant 3.906250e-03 : f32
    %27 = vector.broadcast %cst_12 : f32 to vector<2x32x1xf32>
    %28 = arith.mulf %26, %27 : vector<2x32x1xf32>
    %cst_13 = arith.constant dense<0.000000e+00> : vector<2x256xf32>
    %29 = vector.multi_reduction <add>, %24, %cst_13 [1] : vector<2x32x256xf32> to vector<2x256xf32>
    %30 = vector.shape_cast %29 : vector<2x256xf32> to vector<2x1x256xf32>
    %cst_14 = arith.constant 3.125000e-02 : f32
    %31 = vector.broadcast %cst_14 : f32 to vector<2x1x256xf32>
    %32 = arith.mulf %30, %31 : vector<2x1x256xf32>
    %cst_15 = arith.constant dense<0.000000e+00> : vector<2x256xf32>
    %33 = vector.multi_reduction <add>, %19, %cst_15 [1] : vector<2x32x256xf32> to vector<2x256xf32>
    %34 = vector.shape_cast %33 : vector<2x256xf32> to vector<2x1x256xf32>
    %35 = arith.mulf %19, %19 : vector<2x32x256xf32>
    %cst_16 = arith.constant dense<0.000000e+00> : vector<2x256xf32>
    %36 = vector.multi_reduction <add>, %35, %cst_16 [1] : vector<2x32x256xf32> to vector<2x256xf32>
    %37 = vector.shape_cast %36 : vector<2x256xf32> to vector<2x1x256xf32>
    %cst_17 = arith.constant 1.000000e+00 : f32
    %38 = vector.broadcast %cst_17 : f32 to vector<2x32x1xf32>
    %39 = arith.addf %38, %23 : vector<2x32x1xf32>
    %40 = math.log %39 : vector<2x32x1xf32>
    %41 = arith.mulf %40, %28 : vector<2x32x1xf32>
    %cst_18 = arith.constant dense<0.000000e+00> : vector<2x1xf32>
    %42 = vector.multi_reduction <add>, %41, %cst_18 [1] : vector<2x32x1xf32> to vector<2x1xf32>
    %43 = vector.shape_cast %42 : vector<2x1xf32> to vector<2x1x1xf32>
    %cst_19 = arith.constant 3.125000e-02 : f32
    %44 = vector.broadcast %cst_19 : f32 to vector<2x1x1xf32>
    %45 = arith.mulf %43, %44 : vector<2x1x1xf32>
    %46 = arith.mulf %34, %34 : vector<2x1x256xf32>
    %cst_20 = arith.constant 3.125000e-02 : f32
    %47 = vector.broadcast %cst_20 : f32 to vector<2x1x256xf32>
    %48 = arith.mulf %46, %47 : vector<2x1x256xf32>
    %49 = arith.subf %37, %48 : vector<2x1x256xf32>
    %cst_21 = arith.constant 0.0322580636 : f32
    %50 = vector.broadcast %cst_21 : f32 to vector<2x1x256xf32>
    %51 = arith.mulf %49, %50 : vector<2x1x256xf32>
    %cst_22 = arith.constant 9.99999997E-7 : f32
    %52 = vector.broadcast %cst_22 : f32 to vector<2x1x256xf32>
    %53 = arith.maximumf %51, %52 : vector<2x1x256xf32>
    %cst_23 = arith.constant 1.000000e+00 : f32
    %54 = vector.broadcast %cst_23 : f32 to vector<2x1x256xf32>
    %55 = arith.addf %54, %53 : vector<2x1x256xf32>
    %56 = math.log %55 : vector<2x1x256xf32>
    %57 = arith.mulf %56, %32 : vector<2x1x256xf32>
    %cst_24 = arith.constant dense<0.000000e+00> : vector<2x1xf32>
    %58 = vector.multi_reduction <add>, %57, %cst_24 [2] : vector<2x1x256xf32> to vector<2x1xf32>
    %59 = vector.shape_cast %58 : vector<2x1xf32> to vector<2x1x1xf32>
    %cst_25 = arith.constant 3.906250e-03 : f32
    %60 = vector.broadcast %cst_25 : f32 to vector<2x1x1xf32>
    %61 = arith.mulf %59, %60 : vector<2x1x1xf32>
    %62 = arith.mulf %45, %61 : vector<2x1x1xf32>
    %cst_26 = arith.constant dense<0.000000e+00> : vector<2x1xf32>
    %63 = vector.multi_reduction <add>, %34, %cst_26 [2] : vector<2x1x256xf32> to vector<2x1xf32>
    %64 = vector.shape_cast %63 : vector<2x1xf32> to vector<2x1x1xf32>
    %cst_27 = arith.constant dense<0.000000e+00> : vector<2x32xf32>
    %65 = vector.multi_reduction <add>, %19, %cst_27 [2] : vector<2x32x256xf32> to vector<2x32xf32>
    %66 = vector.shape_cast %65 : vector<2x32xf32> to vector<2x32x1xf32>
    %cst_28 = arith.constant 3.906250e-03 : f32
    %67 = vector.broadcast %cst_28 : f32 to vector<2x32x1xf32>
    %68 = arith.mulf %66, %67 : vector<2x32x1xf32>
    %cst_29 = arith.constant dense<0.000000e+00> : vector<2x32xf32>
    %69 = vector.multi_reduction <add>, %1, %cst_29 [2] : vector<2x32x256xf32> to vector<2x32xf32>
    %70 = vector.shape_cast %69 : vector<2x32xf32> to vector<2x32x1xf32>
    %cst_30 = arith.constant 3.906250e-03 : f32
    %71 = vector.broadcast %cst_30 : f32 to vector<2x32x1xf32>
    %72 = arith.mulf %70, %71 : vector<2x32x1xf32>
    %73 = vector.broadcast %72 : vector<2x32x1xf32> to vector<2x32x256xf32>
    %74 = arith.subf %1, %73 : vector<2x32x256xf32>
    %75 = arith.mulf %74, %74 : vector<2x32x256xf32>
    %cst_31 = arith.constant dense<0.000000e+00> : vector<2x32xf32>
    %76 = vector.multi_reduction <add>, %75, %cst_31 [2] : vector<2x32x256xf32> to vector<2x32xf32>
    %77 = vector.shape_cast %76 : vector<2x32xf32> to vector<2x32x1xf32>
    %cst_32 = arith.constant 0.00392156886 : f32
    %78 = vector.broadcast %cst_32 : f32 to vector<2x32x1xf32>
    %79 = arith.mulf %77, %78 : vector<2x32x1xf32>
    %80 = math.sqrt %79 : vector<2x32x1xf32>
    %cst_33 = arith.constant 9.99999997E-7 : f32
    %81 = vector.broadcast %cst_33 : f32 to vector<2x32x1xf32>
    %82 = arith.addf %80, %81 : vector<2x32x1xf32>
    %cst_34 = arith.constant 1.000000e+00 : f32
    %83 = vector.broadcast %cst_34 : f32 to vector<2x32x1xf32>
    %84 = arith.divf %83, %82 : vector<2x32x1xf32>
    %85 = vector.broadcast %84 : vector<2x32x1xf32> to vector<2x32x256xf32>
    %86 = arith.mulf %74, %85 : vector<2x32x256xf32>
    %87 = arith.mulf %84, %84 : vector<2x32x1xf32>
    %88 = arith.mulf %79, %87 : vector<2x32x1xf32>
    %cst_35 = arith.constant 9.99999997E-7 : f32
    %89 = vector.broadcast %cst_35 : f32 to vector<2x32x1xf32>
    %90 = arith.maximumf %88, %89 : vector<2x32x1xf32>
    %91 = math.absf %86 : vector<2x32x256xf32>
    %cst_36 = arith.constant dense<0.000000e+00> : vector<2x32xf32>
    %92 = vector.multi_reduction <add>, %91, %cst_36 [2] : vector<2x32x256xf32> to vector<2x32xf32>
    %93 = vector.shape_cast %92 : vector<2x32xf32> to vector<2x32x1xf32>
    %cst_37 = arith.constant 3.906250e-03 : f32
    %94 = vector.broadcast %cst_37 : f32 to vector<2x32x1xf32>
    %95 = arith.mulf %93, %94 : vector<2x32x1xf32>
    %cst_38 = arith.constant dense<0.000000e+00> : vector<2x256xf32>
    %96 = vector.multi_reduction <add>, %91, %cst_38 [1] : vector<2x32x256xf32> to vector<2x256xf32>
    %97 = vector.shape_cast %96 : vector<2x256xf32> to vector<2x1x256xf32>
    %cst_39 = arith.constant 3.125000e-02 : f32
    %98 = vector.broadcast %cst_39 : f32 to vector<2x1x256xf32>
    %99 = arith.mulf %97, %98 : vector<2x1x256xf32>
    %cst_40 = arith.constant dense<0.000000e+00> : vector<2x256xf32>
    %100 = vector.multi_reduction <add>, %86, %cst_40 [1] : vector<2x32x256xf32> to vector<2x256xf32>
    %101 = vector.shape_cast %100 : vector<2x256xf32> to vector<2x1x256xf32>
    %102 = arith.mulf %86, %86 : vector<2x32x256xf32>
    %cst_41 = arith.constant dense<0.000000e+00> : vector<2x256xf32>
    %103 = vector.multi_reduction <add>, %102, %cst_41 [1] : vector<2x32x256xf32> to vector<2x256xf32>
    %104 = vector.shape_cast %103 : vector<2x256xf32> to vector<2x1x256xf32>
    %cst_42 = arith.constant 1.000000e+00 : f32
    %105 = vector.broadcast %cst_42 : f32 to vector<2x32x1xf32>
    %106 = arith.addf %105, %90 : vector<2x32x1xf32>
    %107 = math.log %106 : vector<2x32x1xf32>
    %108 = arith.mulf %107, %95 : vector<2x32x1xf32>
    %cst_43 = arith.constant dense<0.000000e+00> : vector<2x1xf32>
    %109 = vector.multi_reduction <add>, %108, %cst_43 [1] : vector<2x32x1xf32> to vector<2x1xf32>
    %110 = vector.shape_cast %109 : vector<2x1xf32> to vector<2x1x1xf32>
    %cst_44 = arith.constant 3.125000e-02 : f32
    %111 = vector.broadcast %cst_44 : f32 to vector<2x1x1xf32>
    %112 = arith.mulf %110, %111 : vector<2x1x1xf32>
    %113 = arith.mulf %101, %101 : vector<2x1x256xf32>
    %cst_45 = arith.constant 3.125000e-02 : f32
    %114 = vector.broadcast %cst_45 : f32 to vector<2x1x256xf32>
    %115 = arith.mulf %113, %114 : vector<2x1x256xf32>
    %116 = arith.subf %104, %115 : vector<2x1x256xf32>
    %cst_46 = arith.constant 0.0322580636 : f32
    %117 = vector.broadcast %cst_46 : f32 to vector<2x1x256xf32>
    %118 = arith.mulf %116, %117 : vector<2x1x256xf32>
    %cst_47 = arith.constant 9.99999997E-7 : f32
    %119 = vector.broadcast %cst_47 : f32 to vector<2x1x256xf32>
    %120 = arith.maximumf %118, %119 : vector<2x1x256xf32>
    %cst_48 = arith.constant 1.000000e+00 : f32
    %121 = vector.broadcast %cst_48 : f32 to vector<2x1x256xf32>
    %122 = arith.addf %121, %120 : vector<2x1x256xf32>
    %123 = math.log %122 : vector<2x1x256xf32>
    %124 = arith.mulf %123, %99 : vector<2x1x256xf32>
    %cst_49 = arith.constant dense<0.000000e+00> : vector<2x1xf32>
    %125 = vector.multi_reduction <add>, %124, %cst_49 [2] : vector<2x1x256xf32> to vector<2x1xf32>
    %126 = vector.shape_cast %125 : vector<2x1xf32> to vector<2x1x1xf32>
    %cst_50 = arith.constant 3.906250e-03 : f32
    %127 = vector.broadcast %cst_50 : f32 to vector<2x1x1xf32>
    %128 = arith.mulf %126, %127 : vector<2x1x1xf32>
    %129 = arith.mulf %112, %128 : vector<2x1x1xf32>
    %cst_51 = arith.constant dense<0.000000e+00> : vector<2x1xf32>
    %130 = vector.multi_reduction <add>, %101, %cst_51 [2] : vector<2x1x256xf32> to vector<2x1xf32>
    %131 = vector.shape_cast %130 : vector<2x1xf32> to vector<2x1x1xf32>
    %cst_52 = arith.constant dense<0.000000e+00> : vector<2x32xf32>
    %132 = vector.multi_reduction <add>, %86, %cst_52 [2] : vector<2x32x256xf32> to vector<2x32xf32>
    %133 = vector.shape_cast %132 : vector<2x32xf32> to vector<2x32x1xf32>
    %cst_53 = arith.constant 3.906250e-03 : f32
    %134 = vector.broadcast %cst_53 : f32 to vector<2x32x1xf32>
    %135 = arith.mulf %133, %134 : vector<2x32x1xf32>
    %136 = arith.mulf %19, %86 : vector<2x32x256xf32>
    %cst_54 = arith.constant dense<0.000000e+00> : vector<2x256xf32>
    %137 = vector.multi_reduction <add>, %136, %cst_54 [1] : vector<2x32x256xf32> to vector<2x256xf32>
    %138 = vector.shape_cast %137 : vector<2x256xf32> to vector<2x1x256xf32>
    %cst_55 = arith.constant dense<0.000000e+00> : vector<2x1xf32>
    %139 = vector.multi_reduction <add>, %138, %cst_55 [2] : vector<2x1x256xf32> to vector<2x1xf32>
    %140 = vector.shape_cast %139 : vector<2x1xf32> to vector<2x1x1xf32>
    %141 = arith.addf %64, %131 : vector<2x1x1xf32>
    %142 = arith.subf %141, %140 : vector<2x1x1xf32>
    %143 = arith.divf %140, %142 : vector<2x1x1xf32>
    %cst_56 = arith.constant 1.000000e+00 : f32
    %144 = vector.broadcast %cst_56 : f32 to vector<2x1x1xf32>
    %145 = arith.subf %144, %143 : vector<2x1x1xf32>
    %146 = math.sqrt %37 : vector<2x1x256xf32>
    %147 = math.sqrt %104 : vector<2x1x256xf32>
    %cst_57 = arith.constant 9.99999996E-13 : f32
    %148 = vector.broadcast %cst_57 : f32 to vector<2x1x256xf32>
    %149 = arith.maximumf %146, %148 : vector<2x1x256xf32>
    %cst_58 = arith.constant 1.000000e+00 : f32
    %150 = vector.broadcast %cst_58 : f32 to vector<2x1x256xf32>
    %151 = arith.divf %150, %149 : vector<2x1x256xf32>
    %cst_59 = arith.constant 9.99999996E-13 : f32
    %152 = vector.broadcast %cst_59 : f32 to vector<2x1x256xf32>
    %153 = arith.maximumf %147, %152 : vector<2x1x256xf32>
    %cst_60 = arith.constant 1.000000e+00 : f32
    %154 = vector.broadcast %cst_60 : f32 to vector<2x1x256xf32>
    %155 = arith.divf %154, %153 : vector<2x1x256xf32>
    %156 = arith.mulf %151, %155 : vector<2x1x256xf32>
    %157 = arith.mulf %138, %156 : vector<2x1x256xf32>
    %158 = arith.mulf %146, %151 : vector<2x1x256xf32>
    %159 = arith.mulf %147, %155 : vector<2x1x256xf32>
    %160 = arith.mulf %158, %159 : vector<2x1x256xf32>
    %cst_61 = arith.constant 9.99999993E-9 : f32
    %161 = vector.broadcast %cst_61 : f32 to vector<2x1x256xf32>
    %162 = arith.maximumf %160, %161 : vector<2x1x256xf32>
    %163 = arith.divf %157, %162 : vector<2x1x256xf32>
    %cst_62 = arith.constant dense<0.000000e+00> : vector<2x1xf32>
    %164 = vector.multi_reduction <add>, %163, %cst_62 [2] : vector<2x1x256xf32> to vector<2x1xf32>
    %165 = vector.shape_cast %164 : vector<2x1xf32> to vector<2x1x1xf32>
    %cst_63 = arith.constant 3.906250e-03 : f32
    %166 = vector.broadcast %cst_63 : f32 to vector<2x1x1xf32>
    %167 = arith.mulf %165, %166 : vector<2x1x1xf32>
    %cst_64 = arith.constant 0.000000e+00 : f32
    %168 = vector.broadcast %cst_64 : f32 to vector<2x32x8xf32>
    %c0_65 = arith.constant 0 : index
    %c0_66 = arith.constant 0 : index
    %c0_67 = arith.constant 0 : index
    %169 = vector.load %arg3[%c0_65, %c0_66, %c0_67] : memref<2x32x8xf32, #tpu.memory_space<vmem>>, vector<2x32x8xf32>
    tpu.vector_store %arg3[%c0_65, %c0_66, %c0_67], %168 {strides = array<i32>} : memref<2x32x8xf32, #tpu.memory_space<vmem>>, vector<2x32x8xf32>,
    %c0_68 = arith.constant 0 : index
    %c0_69 = arith.constant 0 : index
    %c0_70 = arith.constant 0 : index
    %170 = vector.load %arg3[%c0_68, %c0_69, %c0_70] : memref<2x32x8xf32, #tpu.memory_space<vmem>>, vector<2x32x1xf32>
    tpu.vector_store %arg3[%c0_68, %c0_69, %c0_70], %68 {strides = array<i32>} : memref<2x32x8xf32, #tpu.memory_space<vmem>>, vector<2x32x1xf32>,
    %c0_71 = arith.constant 0 : index
    %c0_72 = arith.constant 0 : index
    %c1 = arith.constant 1 : index
    %171 = vector.load %arg3[%c0_71, %c0_72, %c1] : memref<2x32x8xf32, #tpu.memory_space<vmem>>, vector<2x32x1xf32>
    tpu.vector_store %arg3[%c0_71, %c0_72, %c1], %135 {strides = array<i32>} : memref<2x32x8xf32, #tpu.memory_space<vmem>>, vector<2x32x1xf32>,
    %c0_73 = arith.constant 0 : index
    %c0_74 = arith.constant 0 : index
    %c2 = arith.constant 2 : index
    %172 = vector.load %arg3[%c0_73, %c0_74, %c2] : memref<2x32x8xf32, #tpu.memory_space<vmem>>, vector<2x1x1xf32>
    tpu.vector_store %arg3[%c0_73, %c0_74, %c2], %62 {strides = array<i32>} : memref<2x32x8xf32, #tpu.memory_space<vmem>>, vector<2x1x1xf32>,
    %c0_75 = arith.constant 0 : index
    %c0_76 = arith.constant 0 : index
    %c3 = arith.constant 3 : index
    %173 = vector.load %arg3[%c0_75, %c0_76, %c3] : memref<2x32x8xf32, #tpu.memory_space<vmem>>, vector<2x1x1xf32>
    tpu.vector_store %arg3[%c0_75, %c0_76, %c3], %129 {strides = array<i32>} : memref<2x32x8xf32, #tpu.memory_space<vmem>>, vector<2x1x1xf32>,
    %c0_77 = arith.constant 0 : index
    %c0_78 = arith.constant 0 : index
    %c4 = arith.constant 4 : index
    %174 = vector.load %arg3[%c0_77, %c0_78, %c4] : memref<2x32x8xf32, #tpu.memory_space<vmem>>, vector<2x1x1xf32>
    tpu.vector_store %arg3[%c0_77, %c0_78, %c4], %145 {strides = array<i32>} : memref<2x32x8xf32, #tpu.memory_space<vmem>>, vector<2x1x1xf32>,
    %c0_79 = arith.constant 0 : index
    %c0_80 = arith.constant 0 : index
    %c5 = arith.constant 5 : index
    %175 = vector.load %arg3[%c0_79, %c0_80, %c5] : memref<2x32x8xf32, #tpu.memory_space<vmem>>, vector<2x1x1xf32>
    tpu.vector_store %arg3[%c0_79, %c0_80, %c5], %167 {strides = array<i32>} : memref<2x32x8xf32, #tpu.memory_space<vmem>>, vector<2x1x1xf32>,
    return
  }
  func.func @transform_0(%arg0: i32) -> (i32, i32, i32) {
    %c0_i32 = arith.constant 0 : i32
    %c0_i32_0 = arith.constant 0 : i32
    %c0_i32_1 = arith.constant 0 : i32
    return %arg0, %c0_i32, %c0_i32_0 : i32, i32, i32
  }
  func.func @transform_1(%arg0: i32) -> (i32, i32, i32) {
    %c0_i32 = arith.constant 0 : i32
    %c0_i32_0 = arith.constant 0 : i32
    %c0_i32_1 = arith.constant 0 : i32
    return %arg0, %c0_i32, %c0_i32_0 : i32, i32, i32
  }
  func.func @transform_2(%arg0: i32) -> (i32, i32, i32) {
    %c0_i32 = arith.constant 0 : i32
    %c0_i32_0 = arith.constant 0 : i32
    %c0_i32_1 = arith.constant 0 : i32
    return %arg0, %c0_i32, %c0_i32_0 : i32, i32, i32
  }
}

</mosaic_0001>

<bundles_post_ra>
// kernel: _forward_impl.2
= control target key start
LH: loop header
LB: loop body
LE: loop exit
PB: predicated region body
PF: predicated region fallthrough
CT: control target
= control target key end

     0   :  { %s2866_s0 = inlined_call_operand.vmem [shape: f32[2,32,256], index: 0, kind: input, shape index: {}]   ;;  %s2867_s1 = inlined_call_operand.vmem [shape: f32[2,32,256], index: 1, kind: input, shape index: {}]   ;;  %s2868_s2 = inlined_call_operand.vmem [shape: f32[2,32,8], index: 2, kind: output, shape index: {}]  }
   0x1   :  { %v1506_v0 = vld [vmem:[%s2866_s0] sm:$0xff]  ;;  %v1511_v1 = vld [vmem:[%s2866_s0 + $0x8] sm:$0xff]  ;;  %v1528_v5 = vld [vmem:[%s2866_s0 + $0x10] sm:$0xff] }
   0x2   :  { %v1516_v2 = vld [vmem:[%s2866_s0 + $0x40] sm:$0xff]  ;;  %v43_v3 = vadd.f32 %v1511_v1, %v1506_v0  ;;  %v1523_v4 = vld [vmem:[%s2866_s0 + $0x48] sm:$0xff]  ;;  %v1533_v6 = vld [vmem:[%s2866_s0 + $0x18] sm:$0xff] }
   0x3   :  { %v55_v7 = vadd.f32 %v1523_v4, %v1516_v2  ;;  %v1540_v8 = vld [vmem:[%s2866_s0 + $0x50] sm:$0xff]  ;;  %v1545_v9 = vld [vmem:[%s2866_s0 + $0x58] sm:$0xff]  ;;  %v46_v10 = vadd.f32 %v1533_v6, %v1528_v5  ;;  %v1554_v12 = vld [vmem:[%s2867_s1] sm:$0xff] }
   0x4   :  { %44 = vadd.xlane.f32.xlu0 %v43_v3  ;;  %v58_v11 = vadd.f32 %v1545_v9, %v1540_v8  ;;  %v1559_v13 = vld [vmem:[%s2867_s1 + $0x8] sm:$0xff]  ;;  %v1564_v14 = vld [vmem:[%s2867_s1 + $0x10] sm:$0xff]  ;;  %v1569_v15 = vld [vmem:[%s2867_s1 + $0x18] sm:$0xff] }
   0x5   :  { %56 = vadd.xlane.f32.xlu1 %v55_v7  ;;  %v571_v16 = vadd.f32 %v1559_v13, %v1554_v12  ;;  %v574_v17 = vadd.f32 %v1569_v15, %v1564_v14  ;;  %v1578_v18 = vld [vmem:[%s2867_s1 + $0x40] sm:$0xff]  ;;  %v1583_v19 = vld [vmem:[%s2867_s1 + $0x48] sm:$0xff]  ;;  %v1588_v20 = vld [vmem:[%s2867_s1 + $0x50] sm:$0xff] }
   0x6   :  { %v1593_v21 = vld [vmem:[%s2867_s1 + $0x58] sm:$0xff]  ;;  %v583_v22 = vadd.f32 %v1583_v19, %v1578_v18  ;;  %v1602_v24 = vld [vmem:[%s2866_s0 + $0x20] sm:$0xff]  ;;  %v1607_v25 = vld [vmem:[%s2866_s0 + $0x28] sm:$0xff] }
   0x7   :  { %v586_v23 = vadd.f32 %v1593_v21, %v1588_v20  ;;  %v1612_v26 = vld [vmem:[%s2866_s0 + $0x60] sm:$0xff]  ;;  %v1617_v27 = vld [vmem:[%s2866_s0 + $0x68] sm:$0xff]  ;;  %v49_v28 = vadd.f32 %v1607_v25, %v1602_v24  ;;  %v1650_v36 = vld [vmem:[%s2866_s0 + $0x30] sm:$0xff] }
   0x8   :  { %47 = vadd.xlane.f32.xlu0 %v46_v10  ;;  %v61_v29 = vadd.f32 %v1617_v27, %v1612_v26  ;;  %v1626_v30 = vld [vmem:[%s2867_s1 + $0x20] sm:$0xff]  ;;  %v1631_v31 = vld [vmem:[%s2867_s1 + $0x28] sm:$0xff]  ;;  %v1655_v37 = vld [vmem:[%s2866_s0 + $0x38] sm:$0xff] }
   0x9   :  { %59 = vadd.xlane.f32.xlu1 %v58_v11  ;;  %v1636_v32 = vld [vmem:[%s2867_s1 + $0x60] sm:$0xff]  ;;  %v1641_v33 = vld [vmem:[%s2867_s1 + $0x68] sm:$0xff]  ;;  %v577_v34 = vadd.f32 %v1631_v31, %v1626_v30  ;;  %v1660_v38 = vld [vmem:[%s2866_s0 + $0x70] sm:$0xff]  ;;  %v52_v40 = vadd.f32 %v1655_v37, %v1650_v36 }
   0xa   :  { %v589_v35 = vadd.f32 %v1641_v33, %v1636_v32  ;;  %v1665_v39 = vld [vmem:[%s2866_s0 + $0x78] sm:$0xff]  ;;  %v1674_v42 = vld [vmem:[%s2867_s1 + $0x30] sm:$0xff] }
   0xb   :  { %v64_v41 = vadd.f32 %v1665_v39, %v1660_v38  ;;  %v1679_v43 = vld [vmem:[%s2867_s1 + $0x38] sm:$0xff]  ;;  %v1684_v44 = vld [vmem:[%s2867_s1 + $0x70] sm:$0xff] }
   0xc   :  { %572 = vadd.xlane.f32.xlu0 %v571_v16  ;;  %v1689_v45 = vld [vmem:[%s2867_s1 + $0x78] sm:$0xff]  ;;  %v580_v46 = vadd.f32 %v1679_v43, %v1674_v42 }
   0xd   :  { %575 = vadd.xlane.f32.xlu1 %v574_v17  ;;  %v592_v47 = vadd.f32 %v1689_v45, %v1684_v44 }
  0x10   :  { %584 = vadd.xlane.f32.xlu0 %v583_v22 }
  0x11   :  { %587 = vadd.xlane.f32.xlu1 %v586_v23 }
  0x14   :  { %50 = vadd.xlane.f32.xlu0 %v49_v28 }
  0x15   :  { %62 = vadd.xlane.f32.xlu1 %v61_v29 }
  0x18   :  { %578 = vadd.xlane.f32.xlu0 %v577_v34 }
  0x19   :  { %590 = vadd.xlane.f32.xlu1 %v589_v35 }
  0x1c   :  { %53 = vadd.xlane.f32.xlu0 %v52_v40 }
  0x1d   :  { %65 = vadd.xlane.f32.xlu1 %v64_v41 }
  0x20   :  { %581 = vadd.xlane.f32.xlu0 %v580_v46 }
  0x21   :  { %593 = vadd.xlane.f32.xlu1 %v592_v47 }
  0x8d   :  { %v45_v48 = vpop.xlane.xlu0 %44 }
  0x8e   :  { %v67_v49 = vmul.f32 0.00390625, %v45_v48  ;;  %v57_v50 = vpop.xlane.xlu1 %56 }
  0x8f   :  { %v71_v51 = vmul.f32 0.00390625, %v57_v50 }
  0x90   :  { %v1696_v52 = vsub.f32 %v1506_v0, %v67_v49  ;;  %v1699_v53 = vsub.f32 %v1511_v1, %v67_v49 }
  0x91   :  { %v1702_v54 = vsub.f32 %v1516_v2, %v71_v51  ;;  %v1705_v55 = vsub.f32 %v1523_v4, %v71_v51  ;;  %v48_v56 = vpop.xlane.xlu0 %47 }
  0x92   :  { %v68_v57 = vmul.f32 0.00390625, %v48_v56  ;;  %v60_v58 = vpop.xlane.xlu1 %59  ;;  %v91_v59 = vmul.f32 %v1696_v52, %v1696_v52  ;;  %v92_v60 = vmul.f32 %v1699_v53, %v1699_v53 }
  0x93   :  { %v72_v61 = vmul.f32 0.00390625, %v60_v58  ;;  %v99_v62 = vmul.f32 %v1702_v54, %v1702_v54  ;;  %v100_v63 = vmul.f32 %v1705_v55, %v1705_v55 }
  0x94   :  { %v1716_v0 = vsub.f32 %v1528_v5, %v68_v57  ;;  %v1719_v1 = vsub.f32 %v1533_v6, %v68_v57  ;;  %v107_v2 = vadd.f32 %v92_v60, %v91_v59 }
  0x95   :  { %v1722_v3 = vsub.f32 %v1540_v8, %v72_v61  ;;  %v1725_v4 = vsub.f32 %v1545_v9, %v72_v61  ;;  %v573_v7 = vpop.xlane.xlu0 %572  ;;  %v119_v16 = vadd.f32 %v100_v63, %v99_v62 }
  0x96   :  { %v595_v10 = vmul.f32 0.00390625, %v573_v7  ;;  %108 = vadd.xlane.f32.xlu0 %v107_v2  ;;  %v576_v11 = vpop.xlane.xlu1 %575  ;;  %v93_v17 = vmul.f32 %v1716_v0, %v1716_v0  ;;  %v94_v5 = vmul.f32 %v1719_v1, %v1719_v1 }
  0x97   :  { %v596_v6 = vmul.f32 0.00390625, %v576_v11  ;;  %v101_v22 = vmul.f32 %v1722_v3, %v1722_v3  ;;  %v102_v8 = vmul.f32 %v1725_v4, %v1725_v4 }
  0x98   :  { %v1736_v9 = vsub.f32 %v1554_v12, %v595_v10  ;;  %v1739_v23 = vsub.f32 %v1559_v13, %v595_v10  ;;  %v110_v28 = vadd.f32 %v94_v5, %v93_v17 }
  0x99   :  { %v1742_v29 = vsub.f32 %v1564_v14, %v596_v6  ;;  %v1745_v34 = vsub.f32 %v1569_v15, %v596_v6  ;;  %v585_v35 = vpop.xlane.xlu0 %584  ;;  %v122_v46 = vadd.f32 %v102_v8, %v101_v22 }
  0x9a   :  { %v599_v40 = vmul.f32 0.00390625, %v585_v35  ;;  %120 = vadd.xlane.f32.xlu0 %v119_v16  ;;  %111 = vadd.xlane.f32.xlu1 %v110_v28  ;;  %v588_v41 = vpop.xlane.xlu1 %587  ;;  %v619_v12 = vmul.f32 %v1736_v9, %v1736_v9  ;;  %v620_v13 = vmul.f32 %v1739_v23, %v1739_v23 }
  0x9b   :  { %v600_v47 = vmul.f32 0.00390625, %v588_v41  ;;  %v621_v14 = vmul.f32 %v1742_v29, %v1742_v29  ;;  %v622_v15 = vmul.f32 %v1745_v34, %v1745_v34 }
  0x9c   :  { %v1756_v48 = vsub.f32 %v1578_v18, %v599_v40  ;;  %v1759_v49 = vsub.f32 %v1583_v19, %v599_v40  ;;  %v635_v50 = vadd.f32 %v620_v13, %v619_v12 }
  0x9d   :  { %v1762_v51 = vsub.f32 %v1588_v20, %v600_v47  ;;  %v1765_v56 = vsub.f32 %v1593_v21, %v600_v47  ;;  %v51_v57 = vpop.xlane.xlu0 %50  ;;  %v638_v60 = vadd.f32 %v622_v15, %v621_v14 }
  0x9e   :  { %v69_v58 = vmul.f32 0.00390625, %v51_v57  ;;  %123 = vadd.xlane.f32.xlu1 %v122_v46  ;;  %636 = vadd.xlane.f32.xlu0 %v635_v50  ;;  %v63_v59 = vpop.xlane.xlu1 %62  ;;  %v627_v18 = vmul.f32 %v1756_v48, %v1756_v48  ;;  %v628_v19 = vmul.f32 %v1759_v49, %v1759_v49 }
  0x9f   :  { %v73_v61 = vmul.f32 0.00390625, %v63_v59  ;;  %v629_v20 = vmul.f32 %v1762_v51, %v1762_v51  ;;  %v630_v21 = vmul.f32 %v1765_v56, %v1765_v56 }
  0xa0   :  { %v1776_v62 = vsub.f32 %v1602_v24, %v69_v58  ;;  %v1779_v63 = vsub.f32 %v1607_v25, %v69_v58  ;;  %v647_v2 = vadd.f32 %v628_v19, %v627_v18 }
  0xa1   :  { %v1782_v7 = vsub.f32 %v1612_v26, %v73_v61  ;;  %v1785_v10 = vsub.f32 %v1617_v27, %v73_v61  ;;  %v579_v11 = vpop.xlane.xlu0 %578  ;;  %v650_v5 = vadd.f32 %v630_v21, %v629_v20 }
  0xa2   :  { %v597_v16 = vmul.f32 0.00390625, %v579_v11  ;;  %639 = vadd.xlane.f32.xlu1 %v638_v60  ;;  %648 = vadd.xlane.f32.xlu0 %v647_v2  ;;  %v591_v17 = vpop.xlane.xlu1 %590  ;;  %v95_v24 = vmul.f32 %v1776_v62, %v1776_v62  ;;  %v96_v25 = vmul.f32 %v1779_v63, %v1779_v63 }
  0xa3   :  { %v601_v6 = vmul.f32 0.00390625, %v591_v17  ;;  %v103_v26 = vmul.f32 %v1782_v7, %v1782_v7  ;;  %v104_v27 = vmul.f32 %v1785_v10, %v1785_v10 }
  0xa4   :  { %v1796_v22 = vsub.f32 %v1626_v30, %v597_v16  ;;  %v1799_v8 = vsub.f32 %v1631_v31, %v597_v16  ;;  %v113_v28 = vadd.f32 %v96_v25, %v95_v24 }
  0xa5   :  { %v1802_v35 = vsub.f32 %v1636_v32, %v601_v6  ;;  %v1805_v40 = vsub.f32 %v1641_v33, %v601_v6  ;;  %v54_v41 = vpop.xlane.xlu0 %53  ;;  %v125_v13 = vadd.f32 %v104_v27, %v103_v26 }
  0xa6   :  { %v70_v46 = vmul.f32 0.00390625, %v54_v41  ;;  %651 = vadd.xlane.f32.xlu1 %v650_v5  ;;  %114 = vadd.xlane.f32.xlu0 %v113_v28  ;;  %v66_v12 = vpop.xlane.xlu1 %65  ;;  %v623_v30 = vmul.f32 %v1796_v22, %v1796_v22  ;;  %v624_v31 = vmul.f32 %v1799_v8, %v1799_v8 }
  0xa7   :  { %v74_v47 = vmul.f32 0.00390625, %v66_v12  ;;  %v631_v32 = vmul.f32 %v1802_v35, %v1802_v35  ;;  %v632_v33 = vmul.f32 %v1805_v40, %v1805_v40 }
  0xa8   :  { %v1816_v14 = vsub.f32 %v1650_v36, %v70_v46  ;;  %v1819_v15 = vsub.f32 %v1655_v37, %v70_v46  ;;  %v641_v50 = vadd.f32 %v624_v31, %v623_v30 }
  0xa9   :  { %v1822_v57 = vsub.f32 %v1660_v38, %v74_v47  ;;  %v1825_v58 = vsub.f32 %v1665_v39, %v74_v47  ;;  %v582_v59 = vpop.xlane.xlu0 %581  ;;  %v653_v19 = vadd.f32 %v632_v33, %v631_v32 }
  0xaa   :  { %v598_v60 = vmul.f32 0.00390625, %v582_v59  ;;  %126 = vadd.xlane.f32.xlu1 %v125_v13  ;;  %642 = vadd.xlane.f32.xlu0 %v641_v50  ;;  %v594_v18 = vpop.xlane.xlu1 %593  ;;  %v97_v36 = vmul.f32 %v1816_v14, %v1816_v14  ;;  %v98_v37 = vmul.f32 %v1819_v15, %v1819_v15 }
  0xab   :  { %v602_v61 = vmul.f32 0.00390625, %v594_v18  ;;  %v105_v38 = vmul.f32 %v1822_v57, %v1822_v57  ;;  %v106_v39 = vmul.f32 %v1825_v58, %v1825_v58 }
  0xac   :  { %v1836_v20 = vsub.f32 %v1674_v42, %v598_v60  ;;  %v1839_v21 = vsub.f32 %v1679_v43, %v598_v60  ;;  %v116_v2 = vadd.f32 %v98_v37, %v97_v36 }
  0xad   :  { %v1842_v11 = vsub.f32 %v1684_v44, %v602_v61  ;;  %v1845_v16 = vsub.f32 %v1689_v45, %v602_v61  ;;  %v128_v17 = vadd.f32 %v106_v39, %v105_v38 }
  0xae   :  { %2958 = vst [vmem:[#allocation2_spill] sm:$0xff] %v1839_v21  ;;  %654 = vadd.xlane.f32.xlu1 %v653_v19  ;;  %117 = vadd.xlane.f32.xlu0 %v116_v2  ;;  %v625_v5 = vmul.f32 %v1836_v20, %v1836_v20  ;;  %v626_v42 = vmul.f32 %v1839_v21, %v1839_v21 }
  0xaf   :  { %v633_v43 = vmul.f32 %v1842_v11, %v1842_v11  ;;  %v634_v24 = vmul.f32 %v1845_v16, %v1845_v16 }
  0xb0   :  { %v644_v44 = vadd.f32 %v626_v42, %v625_v5 }
  0xb1   :  { %v656_v45 = vadd.f32 %v634_v24, %v633_v43 }
  0xb2   :  { %129 = vadd.xlane.f32.xlu1 %v128_v17  ;;  %645 = vadd.xlane.f32.xlu0 %v644_v44 }
  0xb6   :  { %657 = vadd.xlane.f32.xlu1 %v656_v45 }
 0x11f   :  { %v109_v25 = vpop.xlane.xlu0 %108 }
 0x120   :  { %v1855_v6 = vmul.f32 0.003921569, %v109_v25 }
 0x122   :  { %2959 = vst [vmem:[#allocation3_spill] sm:$0xff] %v1855_v6  ;;  %1331 = vrsqrt.f32 %v1855_v6  ;;  %vm141_vm0 = vcmp.eq.f32.partialorder %v1855_v6, inf  ;;  %v144_v37 = vand.u32 2147483648, %v1855_v6  ;;  %vm143_vm1 = vcmp.eq.f32.partialorder %v1855_v6, 0.0 }
 0x123   :  { %v112_v26 = vpop.xlane.xlu1 %111  ;;  %v121_v27 = vpop.xlane.xlu0 %120 }
 0x124   :  { %v1858_v28 = vmul.f32 0.003921569, %v112_v26  ;;  %v1860_v41 = vmul.f32 0.003921569, %v121_v27 }
 0x126   :  { %2960 = vst [vmem:[#allocation4_spill] sm:$0xff] %v1858_v28  ;;  %2961 = vst [vmem:[#allocation5_spill] sm:$0xff] %v1860_v41  ;;  %1333 = vrsqrt.f32 %v1858_v28  ;;  %vm148_vm2 = vcmp.eq.f32.partialorder %v1858_v28, inf  ;;  %vm150_vm3 = vcmp.eq.f32.partialorder %v1858_v28, 0.0  ;;  %v151_v24 = vand.u32 2147483648, %v1858_v28 }
 0x127   :  { %1335 = vrsqrt.f32 %v1860_v41  ;;  %v124_v46 = vpop.xlane.xlu1 %123  ;;  %v637_v12 = vpop.xlane.xlu0 %636  ;;  %vm169_vm4 = vcmp.eq.f32.partialorder %v1860_v41, inf  ;;  %vm171_vm5 = vcmp.eq.f32.partialorder %v1860_v41, 0.0  ;;  %v172_v27 = vand.u32 2147483648, %v1860_v41 }
 0x128   :  { %v1864_v13 = vmul.f32 0.003921569, %v124_v46  ;;  %v1866_v30 = vmul.f32 0.003921569, %v637_v12 }
 0x12a   :  { %2962 = vst [vmem:[#allocation6_spill] sm:$0xff] %v1864_v13  ;;  %2963 = vst [vmem:[#allocation7_spill] sm:$0xff] %v1866_v30  ;;  %1337 = vrsqrt.f32 %v1864_v13  ;;  %vm176_vm6 = vcmp.eq.f32.partialorder %v1864_v13, inf  ;;  %vm178_vm7 = vcmp.eq.f32.partialorder %v1864_v13, 0.0  ;;  %vm669_vm8 = vcmp.eq.f32.partialorder %v1866_v30, inf }
 0x12b   :  { %1339 = vrsqrt.f32 %v1866_v30  ;;  %v640_v31 = vpop.xlane.xlu1 %639  ;;  %v649_v47 = vpop.xlane.xlu0 %648  ;;  %vm671_vm9 = vcmp.eq.f32.partialorder %v1866_v30, 0.0 }
 0x12c   :  { %v1870_v32 = vmul.f32 0.003921569, %v640_v31  ;;  %v1872_v33 = vmul.f32 0.003921569, %v649_v47 }
 0x12e   :  { %2964 = vst [vmem:[#allocation8_spill] sm:$0xff] %v1870_v32  ;;  %2965 = vst [vmem:[#allocation9_spill] sm:$0xff] %v1872_v33  ;;  %1341 = vrsqrt.f32 %v1870_v32  ;;  %vm676_vm10 = vcmp.eq.f32.partialorder %v1870_v32, inf  ;;  %vm678_vm11 = vcmp.eq.f32.partialorder %v1870_v32, 0.0  ;;  %vm697_vm12 = vcmp.eq.f32.partialorder %v1872_v33, inf }
 0x12f   :  { %v1332_v50 = vpop.eup %1331  ;;  %1343 = vrsqrt.f32 %v1872_v33  ;;  %v652_v59 = vpop.xlane.xlu1 %651  ;;  %vm699_vm13 = vcmp.eq.f32.partialorder %v1872_v33, 0.0 }
 0x130   :  { %v115_v60 = vpop.xlane.xlu0 %114  ;;  %v140_v18 = vmul.f32 %v1332_v50, %v1855_v6  ;;  %v1877_v19 = vmul.f32 0.003921569, %v652_v59 }
 0x131   :  { %v1879_v36 = vmul.f32 0.003921569, %v115_v60 }
 0x132   :  { %2966 = vst [vmem:[#allocation10_spill] sm:$0xff] %v1877_v19  ;;  %v142_v61 = vsel %vm141_vm0, %v1855_v6, %v140_v18  ;;  %1345 = vrsqrt.f32 %v1877_v19  ;;  %v179_v18 = vand.u32 2147483648, %v1864_v13  ;;  %vm704_vm14 = vcmp.eq.f32.partialorder %v1877_v19, inf }
 0x133   :  { %2967 = vst [vmem:[#allocation11_spill] sm:$0xff] %v1879_v36  ;;  %v1334_v38 = vpop.eup %1333  ;;  %v145_v39 = vsel %vm143_vm1, %v144_v37, %v142_v61  ;;  %1347 = vrsqrt.f32 %v1879_v36  ;;  %v127_v2 = vpop.xlane.xlu1 %126  ;;  %vm706_vm15 = vcmp.eq.f32.partialorder %v1877_v19, 0.0  ;;  %vm155_vm0 = vcmp.eq.f32.partialorder %v1879_v36, inf }
 0x134   :  { %v643_v17 = vpop.xlane.xlu0 %642  ;;  %v1336_v5 = vpop.eup %1335  ;;  %v195_v42 = vadd.f32 1e-06, %v145_v39  ;;  %v147_v43 = vmul.f32 %v1334_v38, %v1858_v28  ;;  %v1894_v45 = vmul.f32 0.003921569, %v127_v2  ;;  %v672_v2 = vand.u32 2147483648, %v1866_v30 }
 0x135   :  { %v168_v44 = vmul.f32 %v1336_v5, %v1860_v41  ;;  %v1896_v25 = vmul.f32 0.003921569, %v643_v17  ;;  %vm157_vm1 = vcmp.eq.f32.partialorder %v1879_v36, 0.0 }
 0x136   :  { %2968 = vst [vmem:[#allocation12_spill] sm:$0xff] %v1894_v45  ;;  %1349 = vrcp.f32 %v195_v42  ;;  %v149_v26 = vsel %vm148_vm2, %v1858_v28, %v147_v43  ;;  %vm183_vm2 = vcmp.eq.f32.partialorder %v1894_v45, inf }
 0x137   :  { %2969 = vst [vmem:[#allocation13_spill] sm:$0xff] %v1896_v25  ;;  %v1338_v46 = vpop.eup %1337  ;;  %v152_v12 = vsel %vm150_vm3, %v151_v24, %v149_v26  ;;  %v170_v31 = vsel %vm169_vm4, %v1860_v41, %v168_v44  ;;  %1351 = vrsqrt.f32 %v1894_v45  ;;  %v655_v47 = vpop.xlane.xlu1 %654  ;;  %v679_v24 = vand.u32 2147483648, %v1870_v32 }
 0x138   :  { %v1340_v50 = vpop.eup %1339  ;;  %v173_v59 = vsel %vm171_vm5, %v172_v27, %v170_v31  ;;  %v175_v60 = vmul.f32 %v1338_v46, %v1864_v13  ;;  %1353 = vrsqrt.f32 %v1896_v25  ;;  %v196_v38 = vadd.f32 1e-06, %v152_v12  ;;  %v118_v17 = vpop.xlane.xlu0 %117 }
 0x139   :  { %v199_v37 = vadd.f32 1e-06, %v173_v59  ;;  %v668_v61 = vmul.f32 %v1340_v50, %v1866_v30  ;;  %v1923_v46 = vmul.f32 0.003921569, %v655_v47  ;;  %v1927_v50 = vmul.f32 0.003921569, %v118_v17 }
 0x13a   :  { %v177_v39 = vsel %vm176_vm6, %v1864_v13, %v175_v60  ;;  %v707_v47 = vand.u32 2147483648, %v1877_v19  ;;  %vm185_vm3 = vcmp.eq.f32.partialorder %v1894_v45, 0.0  ;;  %vm683_vm4 = vcmp.eq.f32.partialorder %v1896_v25, inf }
 0x13b   :  { %v1342_v5 = vpop.eup %1341  ;;  %v180_v42 = vsel %vm178_vm7, %v179_v18, %v177_v39  ;;  %v670_v43 = vsel %vm669_vm8, %v1866_v30, %v668_v61  ;;  %1355 = vrcp.f32 %v199_v37  ;;  %2970 = vst [vmem:[#allocation14_spill] sm:$0xff] %v1923_v46  ;;  %2971 = vst [vmem:[#allocation15_spill] sm:$0xff] %v1927_v50  ;;  %v130_v59 = vpop.xlane.xlu1 %129  ;;  %v700_v18 = vand.u32 2147483648, %v1872_v33 }
 0x13c   :  { %v1344_v44 = vpop.eup %1343  ;;  %v673_v26 = vsel %vm671_vm9, %v672_v2, %v670_v43  ;;  %v675_v27 = vmul.f32 %v1342_v5, %v1870_v32  ;;  %1357 = vrcp.f32 %v196_v38  ;;  %v200_v60 = vadd.f32 1e-06, %v180_v42 }
 0x13d   :  { %v723_v12 = vadd.f32 1e-06, %v673_v26  ;;  %v696_v31 = vmul.f32 %v1344_v44, %v1872_v33  ;;  %v1939_v38 = vmul.f32 0.003921569, %v130_v59  ;;  %v158_v44 = vand.u32 2147483648, %v1879_v36  ;;  %v646_v26 = vpop.xlane.xlu0 %645 }
 0x13e   :  { %v677_v2 = vsel %vm676_vm10, %v1870_v32, %v675_v27  ;;  %vm685_vm5 = vcmp.eq.f32.partialorder %v1896_v25, 0.0  ;;  %vm711_vm6 = vcmp.eq.f32.partialorder %v1923_v46, inf  ;;  %vm162_vm7 = vcmp.eq.f32.partialorder %v1927_v50, inf }
 0x13f   :  { %v1346_v37 = vpop.eup %1345  ;;  %1359 = vrcp.f32 %v723_v12  ;;  %v698_v61 = vsel %vm697_vm12, %v1872_v33, %v696_v31  ;;  %2972 = vst [vmem:[#allocation16_spill] sm:$0xff] %v1939_v38  ;;  %v680_v12 = vsel %vm678_vm11, %v679_v24, %v677_v2  ;;  %v658_v59 = vpop.xlane.xlu1 %657  ;;  %v1958_v24 = vmul.f32 0.003921569, %v646_v26 }
 0x140   :  { %v1348_v39 = vpop.eup %1347  ;;  %v701_v17 = vsel %vm699_vm13, %v700_v18, %v698_v61  ;;  %1361 = vrsqrt.f32 %v1923_v46  ;;  %v703_v43 = vmul.f32 %v1346_v37, %v1877_v19  ;;  %v186_v37 = vand.u32 2147483648, %v1894_v45 }
 0x141   :  { %v727_v5 = vadd.f32 1e-06, %v701_v17  ;;  %v154_v42 = vmul.f32 %v1348_v39, %v1879_v36  ;;  %1363 = vrsqrt.f32 %v1927_v50  ;;  %2974 = vst [vmem:[#allocation18_spill] sm:$0xff] %v1958_v24  ;;  %v724_v17 = vadd.f32 1e-06, %v680_v12 }
 0x142   :  { %1365 = vrcp.f32 %v200_v60  ;;  %vm164_vm8 = vcmp.eq.f32.partialorder %v1927_v50, 0.0  ;;  %vm713_vm9 = vcmp.eq.f32.partialorder %v1923_v46, 0.0  ;;  %vm190_vm10 = vcmp.eq.f32.partialorder %v1939_v38, inf }
 0x143   :  { %v1947_v27 = vpop.eup %1349  ;;  %1367 = vrcp.f32 %v727_v5  ;;  %v156_v31 = vsel %vm155_vm0, %v1879_v36, %v154_v42  ;;  %v705_v5 = vsel %vm704_vm14, %v1877_v19, %v703_v43  ;;  %v1963_v42 = vmul.f32 0.003921569, %v658_v59 }
 0x144   :  { %2973 = vst [vmem:[#allocation17_spill] sm:$0xff] %v1947_v27  ;;  %v1352_v18 = vpop.eup %1351  ;;  %v159_v60 = vsel %vm157_vm1, %v158_v44, %v156_v31  ;;  %1369 = vrsqrt.f32 %v1939_v38  ;;  %v1967_v44 = vmul.f32 %v1947_v27, %v1696_v52  ;;  %v1975_v12 = vmul.f32 %v1947_v27, %v1699_v53 }
 0x145   :  { %v197_v61 = vadd.f32 1e-06, %v159_v60  ;;  %v182_v39 = vmul.f32 %v1352_v18, %v1894_v45  ;;  %v1354_v2 = vpop.eup %1353  ;;  %2975 = vst [vmem:[#allocation19_spill] sm:$0xff] %v1963_v42  ;;  %v686_v59 = vand.u32 2147483648, %v1896_v25  ;;  %v708_v18 = vsel %vm706_vm15, %v707_v47, %v705_v5 }
 0x146   :  { %v682_v26 = vmul.f32 %v1354_v2, %v1896_v25  ;;  %2976 = vst [vmem:[#allocation20_spill] sm:$0xff] %v1975_v12  ;;  %v539_v47 = vadd.f32 %v1975_v12, %v1967_v44  ;;  %vm192_vm11 = vcmp.eq.f32.partialorder %v1939_v38, 0.0  ;;  %vm690_vm12 = vcmp.eq.f32.partialorder %v1958_v24, inf }
 0x147   :  { %1371 = vrcp.f32 %v197_v61  ;;  %v184_v31 = vsel %vm183_vm2, %v1894_v45, %v182_v39  ;;  %vm692_vm13 = vcmp.eq.f32.partialorder %v1958_v24, 0.0  ;;  %vm718_vm14 = vcmp.eq.f32.partialorder %v1963_v42, inf }
 0x148   :  { %v187_v43 = vsel %vm185_vm3, %v186_v37, %v184_v31  ;;  %1373 = vrsqrt.f32 %v1958_v24  ;;  %v1982_v52 = vpop.eup %1355  ;;  %v684_v53 = vsel %vm683_vm4, %v1896_v25, %v682_v26  ;;  %v728_v31 = vadd.f32 1e-06, %v708_v18  ;;  %540 = vadd.xlane.f32.xlu0 %v539_v47 }
 0x149   :  { %2977 = vst [vmem:[#allocation21_spill] sm:$0xff] %v1982_v52  ;;  %v201_v60 = vadd.f32 1e-06, %v187_v43  ;;  %1375 = vrsqrt.f32 %v1963_v42  ;;  %v687_v37 = vsel %vm685_vm5, %v686_v59, %v684_v53  ;;  %v1993_v39 = vpop.eup %1357  ;;  %v2003_v26 = vmul.f32 %v1982_v52, %v1702_v54 }
 0x14a   :  { %1377 = vrcp.f32 %v724_v17  ;;  %2978 = vst [vmem:[#allocation22_spill] sm:$0xff] %v1993_v39  ;;  %v725_v2 = vadd.f32 1e-06, %v687_v37  ;;  %v165_v17 = vand.u32 2147483648, %v1927_v50  ;;  %v2007_v43 = vmul.f32 %v1982_v52, %v1705_v55 }
 0x14b   :  { %1379 = vrcp.f32 %v201_v60  ;;  %v193_v55 = vand.u32 2147483648, %v1939_v38  ;;  %v2025_v37 = vmul.f32 %v1993_v39, %v1716_v0  ;;  %v693_v0 = vand.u32 2147483648, %v1958_v24 }
 0x14c   :  { %v1998_v5 = vpop.eup %1359  ;;  %1381 = vrcp.f32 %v725_v2  ;;  %v551_v53 = vadd.f32 %v2007_v43, %v2003_v26  ;;  %v2035_v2 = vmul.f32 %v1993_v39, %v1719_v1  ;;  %vm720_vm15 = vcmp.eq.f32.partialorder %v1963_v42, 0.0 }
 0x14d   :  { %2979 = vst [vmem:[#allocation23_spill] sm:$0xff] %v1998_v5  ;;  %v1362_v59 = vpop.eup %1361  ;;  %v2014_v18 = vmul.f32 %v1998_v5, %v1736_v9  ;;  %v2018_v54 = vmul.f32 %v1998_v5, %v1739_v23  ;;  %2982 = vst [vmem:[#allocation26_spill] sm:$0xff] %v2025_v37  ;;  %1383 = vrcp.f32 %v728_v31  ;;  %v2991_v32 = vand.u32 2147483648, %v1923_v46 }
 0x14e   :  { %v1364_v60 = vpop.eup %1363  ;;  %v710_v9 = vmul.f32 %v1362_v59, %v1923_v46  ;;  %2984 = vst [vmem:[#allocation28_spill] sm:$0xff] %v2035_v2  ;;  %552 = vadd.xlane.f32.xlu1 %v551_v53 }
 0x14f   :  { %2980 = vst [vmem:[#allocation24_spill] sm:$0xff] %v2014_v18  ;;  %2981 = vst [vmem:[#allocation25_spill] sm:$0xff] %v2018_v54  ;;  %v2027_v47 = vpop.eup %1365  ;;  %v161_v61 = vmul.f32 %v1364_v60, %v1927_v50  ;;  %v1067_v23 = vadd.f32 %v2018_v54, %v2014_v18 }
 0x150   :  { %2983 = vst [vmem:[#allocation27_spill] sm:$0xff] %v2027_v47  ;;  %v2037_v25 = vpop.eup %1367 }
 0x151   :  { %2985 = vst [vmem:[#allocation29_spill] sm:$0xff] %v2037_v25  ;;  %v1370_v59 = vpop.eup %1369  ;;  %v163_v60 = vsel %vm162_vm7, %v1927_v50, %v161_v61  ;;  %1068 = vadd.xlane.f32.xlu0 %v1067_v23  ;;  %v2048_v1 = vmul.f32 %v2037_v25, %v1756_v48  ;;  %v2052_v31 = vmul.f32 %v2037_v25, %v1759_v49  ;;  %v721_v61 = vand.u32 2147483648, %v1963_v42 }
 0x152   :  { %v166_v33 = vsel %vm164_vm8, %v165_v17, %v163_v60  ;;  %v189_v53 = vmul.f32 %v1370_v59, %v1939_v38  ;;  %v712_v23 = vsel %vm711_vm6, %v1923_v46, %v710_v9  ;;  %v542_v48 = vadd.f32 %v2035_v2, %v2025_v37 }
 0x153   :  { %2986 = vst [vmem:[#allocation30_spill] sm:$0xff] %v2048_v1  ;;  %2987 = vst [vmem:[#allocation31_spill] sm:$0xff] %v2052_v31  ;;  %v198_v36 = vadd.f32 1e-06, %v166_v33  ;;  %v1079_v49 = vadd.f32 %v2052_v31, %v2048_v1  ;;  %v384_v59 = vmul.f32 %v1975_v12, %v1975_v12  ;;  %v383_v60 = vmul.f32 %v1967_v44, %v1967_v44 }
 0x154   :  { %v2066_v19 = vpop.eup %1371  ;;  %v191_v17 = vsel %vm190_vm10, %v1939_v38, %v189_v53  ;;  %v2077_v33 = vmul.f32 %v2027_v47, %v1722_v3  ;;  %v715_v3 = vsel %vm713_vm9, %v2991_v32, %v712_v23  ;;  %v385_v23 = vmul.f32 %v2025_v37, %v2025_v37 }
 0x155   :  { %2988 = vst [vmem:[#allocation32_spill] sm:$0xff] %v2066_v19  ;;  %v1374_v9 = vpop.eup %1373  ;;  %1385 = vrcp.f32 %v198_v36  ;;  %v194_v50 = vsel %vm192_vm11, %v193_v55, %v191_v17  ;;  %543 = vadd.xlane.f32.xlu0 %v542_v48  ;;  %1080 = vadd.xlane.f32.xlu1 %v1079_v49  ;;  %v2083_v53 = vmul.f32 %v2066_v19, %v1776_v62  ;;  %v729_v17 = vadd.f32 1e-06, %v715_v3 }
 0x156   :  { %v2087_v30 = vmul.f32 %v2066_v19, %v1779_v63  ;;  %v1376_v25 = vpop.eup %1375  ;;  %v202_v36 = vadd.f32 1e-06, %v194_v50  ;;  %v689_v38 = vmul.f32 %v1374_v9, %v1958_v24  ;;  %v2096_v55 = vmul.f32 %v2027_v47, %v1725_v4 }
 0x157   :  { %2989 = vst [vmem:[#allocation33_spill] sm:$0xff] %v2083_v53  ;;  %v2098_v48 = vpop.eup %1377  ;;  %v717_v62 = vmul.f32 %v1376_v25, %v1963_v42  ;;  %v392_v63 = vmul.f32 %v2007_v43, %v2007_v43  ;;  %v391_v49 = vmul.f32 %v2003_v26, %v2003_v26  ;;  %v386_v25 = vmul.f32 %v2035_v2, %v2035_v2 }
 0x158   :  { %2990 = vst [vmem:[#allocation34_spill] sm:$0xff] %v2087_v30  ;;  %2992 = vst [vmem:[#allocation35_spill] sm:$0xff] %v2096_v55  ;;  %v545_v32 = vadd.f32 %v2087_v30, %v2083_v53  ;;  %v2107_v50 = vpop.eup %1379  ;;  %1387 = vrcp.f32 %v202_v36  ;;  %v691_v4 = vsel %vm690_vm12, %v1958_v24, %v689_v38  ;;  %v393_v36 = vmul.f32 %v2077_v33, %v2077_v33 }
 0x159   :  { %2993 = vst [vmem:[#allocation36_spill] sm:$0xff] %v2098_v48  ;;  %2994 = vst [vmem:[#allocation37_spill] sm:$0xff] %v2107_v50  ;;  %v694_v9 = vsel %vm692_vm13, %v693_v0, %v691_v4  ;;  %v719_v46 = vsel %vm718_vm14, %v1963_v42, %v717_v62  ;;  %v388_v19 = vmul.f32 %v2087_v30, %v2087_v30  ;;  %v2131_v4 = vpop.eup %1381  ;;  %1389 = vrcp.f32 %v729_v17 }
 0x15a   :  { %546 = vadd.xlane.f32.xlu1 %v545_v32  ;;  %v722_v38 = vsel %vm720_vm15, %v721_v61, %v719_v46  ;;  %v387_v3 = vmul.f32 %v2083_v53, %v2083_v53  ;;  %v394_v0 = vmul.f32 %v2096_v55, %v2096_v55  ;;  %2995 = vst [vmem:[#allocation38_spill] sm:$0xff] %v2131_v4  ;;  %v726_v24 = vadd.f32 1e-06, %v694_v9  ;;  %v2151_v5 = vpop.eup %1383 }
 0x15b   :  { %v2135_v62 = vmul.f32 %v2018_v54, %v2018_v54  ;;  %v554_v32 = vadd.f32 %v2096_v55, %v2077_v33  ;;  %v2141_v46 = vmul.f32 %v2107_v50, %v1782_v7  ;;  %v2145_v61 = vmul.f32 %v2014_v18, %v2014_v18  ;;  %2996 = vst [vmem:[#allocation39_spill] sm:$0xff] %v2151_v5 }
 0x15c   :  { %v399_v42 = vadd.f32 %v385_v23, %v383_v60  ;;  %v408_v45 = vadd.f32 %v386_v25, %v384_v59  ;;  %v2149_v9 = vmul.f32 %v2107_v50, %v1785_v10  ;;  %v730_v41 = vadd.f32 1e-06, %v722_v38 }
 0x15d   :  { %v2155_v6 = vmul.f32 %v2052_v31, %v2052_v31  ;;  %v417_v7 = vadd.f32 %v393_v36, %v391_v49  ;;  %v426_v52 = vadd.f32 %v394_v0, %v392_v63  ;;  %v2159_v59 = vmul.f32 %v2131_v4, %v1796_v22 }
 0x15e   :  { %555 = vadd.xlane.f32.xlu1 %v554_v32  ;;  %v409_v13 = vadd.f32 %v408_v45, %v388_v19  ;;  %v400_v28 = vadd.f32 %v399_v42, %v387_v3  ;;  %1391 = vrcp.f32 %v726_v24  ;;  %v395_v10 = vmul.f32 %v2141_v46, %v2141_v46 }
 0x15f   :  { %2997 = vst [vmem:[#allocation40_spill] sm:$0xff] %v2159_v59  ;;  %v2165_v60 = vmul.f32 %v2131_v4, %v1799_v8  ;;  %v2894_v23 = vand.u32 2147483647, %v2025_v37  ;;  %v396_v49 = vmul.f32 %v2149_v9, %v2149_v9  ;;  %v2172_v19 = vmul.f32 %v2098_v48, %v1742_v29 }
 0x160   :  { %v2893_v22 = vand.u32 2147483647, %v2035_v2  ;;  %v2889_v45 = vand.u32 2147483647, %v1967_v44  ;;  %1393 = vrcp.f32 %v730_v41  ;;  %v2178_v24 = vmul.f32 %v2098_v48, %v1745_v34 }
 0x161   :  { %2998 = vst [vmem:[#allocation41_spill] sm:$0xff] %v2172_v19  ;;  %v2890_v8 = vand.u32 2147483647, %v1975_v12  ;;  %v2892_v42 = vand.u32 2147483647, %v2077_v33  ;;  %v557_v25 = vadd.f32 %v2149_v9, %v2141_v46  ;;  %v418_v38 = vadd.f32 %v417_v7, %v395_v10 }
 0x162   :  { %2999 = vst [vmem:[#allocation42_spill] sm:$0xff] %v2178_v24  ;;  %v2182_v63 = vpop.eup %1385  ;;  %v2190_v29 = vadd.f32 %v2894_v23, %v2889_v45  ;;  %v270_v41 = vand.u32 2147483647, %v2096_v55  ;;  %v2891_v34 = vand.u32 2147483647, %v2003_v26  ;;  %v427_v0 = vadd.f32 %v426_v52, %v396_v49 }
 0x163   :  { %3000 = vst [vmem:[#allocation43_spill] sm:$0xff] %v2182_v63  ;;  %v2196_v17 = vmul.f32 %v2182_v63, %v1816_v14  ;;  %v2200_v36 = vmul.f32 %v2182_v63, %v1819_v15  ;;  %v2206_v3 = vadd.f32 %v2893_v22, %v2890_v8  ;;  %v913_v32 = vmul.f32 %v2172_v19, %v2172_v19 }
 0x164   :  { %v2897_v45 = vand.u32 2147483647, %v2007_v43  ;;  %v2215_v14 = vadd.f32 %v2892_v42, %v2891_v34  ;;  %v790_v22 = vand.u32 2147483647, %v2178_v24  ;;  %v914_v49 = vmul.f32 %v2178_v24, %v2178_v24 }
 0x165   :  { %3001 = vst [vmem:[#allocation44_spill] sm:$0xff] %v2196_v17  ;;  %3002 = vst [vmem:[#allocation45_spill] sm:$0xff] %v2200_v36  ;;  %v2217_v15 = vpop.eup %1387  ;;  %v390_v7 = vmul.f32 %v2200_v36, %v2200_v36  ;;  %v548_v10 = vadd.f32 %v2200_v36, %v2196_v17  ;;  %v389_v52 = vmul.f32 %v2196_v17, %v2196_v17  ;;  %v787_v63 = vand.u32 2147483647, %v2014_v18 }
 0x166   :  { %3003 = vst [vmem:[#allocation46_spill] sm:$0xff] %v2217_v15  ;;  %v2228_v8 = vmul.f32 %v2217_v15, %v1822_v57  ;;  %v2232_v34 = vmul.f32 %v2217_v15, %v1825_v58  ;;  %v2236_v42 = vadd.f32 %v270_v41, %v2897_v45  ;;  %v788_v15 = vand.u32 2147483647, %v2018_v54 }
 0x167   :  { %v410_v23 = vadd.f32 %v409_v13, %v390_v7  ;;  %549 = vadd.xlane.f32.xlu0 %v548_v10  ;;  %v401_v4 = vadd.f32 %v400_v28, %v389_v52  ;;  %v3004_v28 = vand.u32 2147483647, %v2172_v19  ;;  %v2255_v10 = vmul.f32 %v2151_v5, %v1762_v51  ;;  %v2257_v52 = vpop.eup %1389 }
 0x168   :  { %v397_v57 = vmul.f32 %v2228_v8, %v2228_v8  ;;  %v398_v58 = vmul.f32 %v2232_v34, %v2232_v34  ;;  %v560_v45 = vadd.f32 %v2232_v34, %v2228_v8  ;;  %3007 = vst [vmem:[#allocation49_spill] sm:$0xff] %v2257_v52  ;;  %v915_v47 = vmul.f32 %v2159_v59, %v2159_v59 }
 0x169   :  { %v411_v48 = vrot.slane %v410_v23, 4  ;;  %v402_v13 = vrot.slane %v401_v4, 4  ;;  %v2251_v7 = vadd.f32 %v3004_v28, %v787_v63  ;;  %3006 = vst [vmem:[#allocation48_spill] sm:$0xff] %v2255_v10  ;;  %v2261_v39 = vadd.f32 %v790_v22, %v788_v15 }
 0x16a   :  { %561 = vadd.xlane.f32.xlu1 %v560_v45  ;;  %v419_v50 = vadd.f32 %v418_v38, %v397_v57  ;;  %v428_v27 = vadd.f32 %v427_v0, %v398_v58  ;;  %v916_v54 = vmul.f32 %v2165_v60, %v2165_v60  ;;  %v1073_v28 = vadd.f32 %v2165_v60, %v2159_v59 }
 0x16b   :  { %3005 = vst [vmem:[#allocation47_spill] sm:$0xff] %v2251_v7  ;;  %3008 = vst [vmem:[#allocation50_spill] sm:$0xff] %v2261_v39  ;;  %558 = vadd.xlane.f32.xlu0 %v557_v25  ;;  %v1070_v51 = vadd.f32 %v2178_v24, %v2172_v19  ;;  %v2271_v45 = vmul.f32 %v2151_v5, %v1765_v56  ;;  %v2273_v38 = vpop.eup %1391  ;;  %v412_v0 = vadd.f32 %v411_v48, %v410_v23  ;;  %vm1287_vm7 = vcmask 64512  }
 0x16c   :  { %3010 = vst [vmem:[#allocation52_spill] sm:$0xff] %v2273_v38  ;;  %v403_v57 = vadd.f32 %v402_v13, %v401_v4  ;;  %v927_v58 = vadd.f32 %v913_v32, %v2145_v61  ;;  %v797_v25 = vand.u32 2147483647, %v2255_v10  ;;  %v420_v18 = vrot.slane %v419_v50, 4 }
 0x16d   :  { %3009 = vst [vmem:[#allocation51_spill] sm:$0xff] %v2271_v45  ;;  %v429_v55 = vrot.slane %v428_v27, 4  ;;  %v936_v39 = vadd.f32 %v914_v49, %v2135_v62  ;;  %v798_v21 = vand.u32 2147483647, %v2271_v45  ;;  %v2279_v7 = vpop.eup %1393  ;;  %v919_v56 = vmul.f32 %v2048_v1, %v2048_v1 }
 0x16e   :  { %3011 = vst [vmem:[#allocation53_spill] sm:$0xff] %v2279_v7  ;;  %1074 = vadd.xlane.f32.xlu1 %v1073_v28  ;;  %v2283_v5 = vadd.f32 %v927_v58, %v915_v47  ;;  %v3012_v48 = vand.u32 2147483647, %v2025_v37  ;;  %v3013_v4 = vand.u32 2147483647, %v2035_v2  ;;  %v413_v58 = vrot.slane %v412_v0, 2 }
 0x16f   :  { %v795_v23 = vand.u32 2147483647, %v2048_v1  ;;  %v2290_v32 = vadd.f32 %v936_v39, %v916_v54  ;;  %1071 = vadd.xlane.f32.xlu0 %v1070_v51  ;;  %v3014_v62 = vand.u32 2147483647, %v1967_v44  ;;  %v3015_v49 = vand.u32 2147483647, %v1975_v12 }
 0x170   :  { %v278_v61 = vadd.f32 %v3013_v4, %v3012_v48  ;;  %v3016_v24 = vand.u32 2147483647, %v2077_v33  ;;  %v796_v47 = vand.u32 2147483647, %v2052_v31  ;;  %v404_v37 = vrot.slane %v403_v57, 2 }
 0x171   :  { %v275_v13 = vadd.f32 %v3015_v49, %v3014_v62  ;;  %v921_v48 = vmul.f32 %v2255_v10, %v2255_v10  ;;  %v853_v4 = vadd.f32 %v797_v25, %v795_v23  ;;  %v2301_v1 = vadd.f32 %v420_v18, %v419_v50 }
 0x172   :  { %v290_v28 = vadd.f32 %v270_v41, %v3016_v24  ;;  %v2303_v39 = vadd.f32 %v429_v55, %v428_v27  ;;  %v922_v54 = vmul.f32 %v2271_v45, %v2271_v45  ;;  %v862_v51 = vadd.f32 %v798_v21, %v796_v47  ;;  %279 = vadd.xlane.f32.xlu1 %v278_v61 }
 0x173   :  { %v3017_v62 = vand.u32 2147483647, %v2003_v26  ;;  %v3018_v24 = vand.u32 2147483647, %v2007_v43  ;;  %v271_v49 = vand.u32 2147483647, %v2141_v46  ;;  %v2314_v31 = vmul.f32 %v2257_v52, %v1802_v35  ;;  %276 = vadd.xlane.f32.xlu0 %v275_v13 }
 0x174   :  { %v2318_v27 = vmul.f32 %v2257_v52, %v1805_v40  ;;  %v3019_v18 = vand.u32 2147483647, %v2172_v19  ;;  %v272_v50 = vand.u32 2147483647, %v2149_v9  ;;  %v263_v61 = vand.u32 2147483647, %v2083_v53 }
 0x175   :  { %v287_v41 = vadd.f32 %v3018_v24, %v3017_v62  ;;  %v264_v62 = vand.u32 2147483647, %v2087_v30  ;;  %v2325_v24 = vadd.f32 %v413_v58, %v412_v0  ;;  %v2327_v45 = vadd.f32 %v404_v37, %v403_v57 }
 0x176   :  { %v806_v55 = vadd.f32 %v790_v22, %v3019_v18  ;;  %v803_v35 = vadd.f32 %v788_v15, %v787_v63  ;;  %v945_v10 = vadd.f32 %v921_v48, %v919_v56  ;;  %v818_v13 = vadd.f32 %v798_v21, %v797_v25  ;;  %291 = vadd.xlane.f32.xlu1 %v290_v28 }
 0x177   :  { %3020 = vst [vmem:[#allocation54_spill] sm:$0xff] %v2325_v24  ;;  %3021 = vst [vmem:[#allocation55_spill] sm:$0xff] %v2327_v45  ;;  %v954_v52 = vadd.f32 %v922_v54, %v2155_v6  ;;  %v815_v22 = vadd.f32 %v796_v47, %v795_v23  ;;  %v799_v18 = vand.u32 2147483647, %v2314_v31  ;;  %v800_v19 = vand.u32 2147483647, %v2318_v27  ;;  %288 = vadd.xlane.f32.xlu0 %v287_v41 }
 0x178   :  { %v273_v0 = vand.u32 2147483647, %v2228_v8  ;;  %v326_v37 = vadd.f32 %v2215_v14, %v271_v49  ;;  %v335_v63 = vadd.f32 %v2236_v42, %v272_v50  ;;  %v308_v15 = vadd.f32 %v2190_v29, %v263_v61  ;;  %v3024_v45 = vld [vmem:[#allocation47_spill] sm:$0xff] }
 0x179   :  { %v317_v57 = vadd.f32 %v2206_v3, %v264_v62  ;;  %v923_v21 = vmul.f32 %v2314_v31, %v2314_v31  ;;  %v274_v6 = vand.u32 2147483647, %v2232_v34  ;;  %v265_v25 = vand.u32 2147483647, %v2196_v17 }
 0x17a   :  { %v266_v56 = vand.u32 2147483647, %v2200_v36  ;;  %v924_v23 = vmul.f32 %v2318_v27, %v2318_v27  ;;  %v327_v28 = vadd.f32 %v326_v37, %v273_v0  ;;  %v2348_v42 = vmul.f32 %v2279_v7, %v1842_v11  ;;  %807 = vadd.xlane.f32.xlu1 %v806_v55 }
 0x17b   :  { %v2352_v29 = vmul.f32 %v2279_v7, %v1845_v16  ;;  %v854_v3 = vadd.f32 %v853_v4, %v799_v18  ;;  %v863_v14 = vadd.f32 %v862_v51, %v800_v19  ;;  %v791_v47 = vand.u32 2147483647, %v2159_v59  ;;  %804 = vadd.xlane.f32.xlu0 %v803_v35 }
 0x17c   :  { %3022 = vst [vmem:[#allocation56_spill] sm:$0xff] %v2348_v42  ;;  %v336_v58 = vadd.f32 %v335_v63, %v274_v6  ;;  %v309_v48 = vadd.f32 %v308_v15, %v265_v25  ;;  %v318_v54 = vadd.f32 %v317_v57, %v266_v56  ;;  %v801_v41 = vand.u32 2147483647, %v2348_v42 }
 0x17d   :  { %3023 = vst [vmem:[#allocation57_spill] sm:$0xff] %v2352_v29  ;;  %v802_v37 = vand.u32 2147483647, %v2352_v29  ;;  %v946_v40 = vadd.f32 %v945_v10, %v923_v21  ;;  %v925_v11 = vmul.f32 %v2348_v42, %v2348_v42  ;;  %v926_v16 = vmul.f32 %v2352_v29, %v2352_v29 }
 0x17e   :  { %v2363_v4 = vmul.f32 %v2273_v38, %v1836_v20  ;;  %v293_v51 = vadd.f32 %v272_v50, %v271_v49  ;;  %v955_v55 = vadd.f32 %v954_v52, %v924_v23  ;;  %v328_v35 = vrot.slane %v327_v28, 4  ;;  %819 = vadd.xlane.f32.xlu1 %v818_v13  ;;  %v3026_v23 = vld [vmem:[#allocation2_spill] sm:$0xff] }
 0x17f   :  { %v855_v63 = vadd.f32 %v854_v3, %v801_v41  ;;  %v792_v15 = vand.u32 2147483647, %v2165_v60  ;;  %v337_v57 = vrot.slane %v336_v58, 4  ;;  %v864_v2 = vadd.f32 %v863_v14, %v802_v37  ;;  %816 = vadd.xlane.f32.xlu0 %v815_v22 }
 0x180   :  { %v947_v10 = vadd.f32 %v946_v40, %v925_v11  ;;  %v281_v21 = vadd.f32 %v264_v62, %v263_v61  ;;  %v310_v7 = vrot.slane %v309_v48, 4  ;;  %v319_v24 = vrot.slane %v318_v54, 4  ;;  %v3027_v61 = vld [vmem:[#allocation50_spill] sm:$0xff] }
 0x181   :  { %v956_v59 = vadd.f32 %v955_v55, %v926_v16  ;;  %v836_v29 = vadd.f32 %v3024_v45, %v791_v47  ;;  %v856_v42 = vrot.slane %v855_v63, 4  ;;  %v865_v20 = vrot.slane %v864_v2, 4 }
 0x182   :  { %v793_v49 = vand.u32 2147483647, %v2363_v4  ;;  %v821_v52 = vadd.f32 %v800_v19, %v799_v18  ;;  %v2368_v50 = vadd.f32 %v328_v35, %v327_v28  ;;  %v948_v13 = vrot.slane %v947_v10, 4  ;;  %294 = vadd.xlane.f32.xlu1 %v293_v51 }
 0x183   :  { %v2372_v3 = vmul.f32 %v2273_v38, %v3026_v23  ;;  %v809_v40 = vadd.f32 %v792_v15, %v791_v47  ;;  %v845_v62 = vadd.f32 %v3027_v61, %v792_v15  ;;  %v2375_v22 = vadd.f32 %v337_v57, %v336_v58  ;;  %282 = vadd.xlane.f32.xlu0 %v281_v21 }
 0x184   :  { %3025 = vst [vmem:[#allocation47_spill] sm:$0xff] %v2368_v50  ;;  %v957_v14 = vrot.slane %v956_v59, 4  ;;  %v296_v45 = vadd.f32 %v274_v6, %v273_v0  ;;  %v2377_v11 = vadd.f32 %v310_v7, %v309_v48  ;;  %v2379_v16 = vadd.f32 %v319_v24, %v318_v54 }
 0x185   :  { %3028 = vst [vmem:[#allocation2_spill] sm:$0xff] %v2375_v22  ;;  %v837_v19 = vadd.f32 %v836_v29, %v793_v49  ;;  %v284_v18 = vadd.f32 %v266_v56, %v265_v25  ;;  %v824_v28 = vadd.f32 %v802_v37, %v801_v41  ;;  %v2381_v55 = vadd.f32 %v856_v42, %v855_v63 }
 0x186   :  { %3029 = vst [vmem:[#allocation50_spill] sm:$0xff] %v2377_v11  ;;  %3030 = vst [vmem:[#allocation58_spill] sm:$0xff] %v2379_v16  ;;  %v2383_v35 = vadd.f32 %v865_v20, %v864_v2  ;;  %v2386_v51 = vadd.f32 %v948_v13, %v947_v10  ;;  %v794_v58 = vand.u32 2147483647, %v2372_v3  ;;  %v917_v0 = vmul.f32 %v2363_v4, %v2363_v4  ;;  %v3033_v2 = vld [vmem:[#allocation35_spill] sm:$0xff]  ;;  %v3034_v13 = vld [vmem:[#allocation26_spill] sm:$0xff] }
 0x187   :  { %3031 = vst [vmem:[#allocation59_spill] sm:$0xff] %v2381_v55  ;;  %822 = vadd.xlane.f32.xlu1 %v821_v52  ;;  %v2392_v24 = vadd.f32 %v957_v14, %v956_v59  ;;  %v365_v6 = vadd.f32 %v2077_v33, %v2003_v26  ;;  %v374_v25 = vadd.f32 %v3033_v2, %v2007_v43  ;;  %v838_v29 = vrot.slane %v837_v19, 4 }
 0x188   :  { %3032 = vst [vmem:[#allocation60_spill] sm:$0xff] %v2383_v35  ;;  %810 = vadd.xlane.f32.xlu0 %v809_v40  ;;  %v918_v48 = vmul.f32 %v2372_v3, %v2372_v3  ;;  %v950_v63 = vrot.slane %v2386_v51, 2  ;;  %v812_v15 = vadd.f32 %v794_v58, %v793_v49  ;;  %v2407_v57 = vadd.f32 %v845_v62, %v794_v58 }
 0x189   :  { %v366_v41 = vadd.f32 %v365_v6, %v2141_v46  ;;  %v375_v37 = vadd.f32 %v374_v25, %v2149_v9  ;;  %v2410_v10 = vadd.f32 %v2283_v5, %v917_v0  ;;  %v347_v23 = vadd.f32 %v3034_v13, %v1967_v44  ;;  %v3038_v6 = vld [vmem:[#allocation28_spill] sm:$0xff]  ;;  %v3039_v25 = vld [vmem:[#allocation30_spill] sm:$0xff] }
 0x18a   :  { %v2417_v40 = vadd.f32 %v838_v29, %v837_v19  ;;  %v2420_v49 = vadd.f32 %v2290_v32, %v918_v48  ;;  %v3036_v5 = vrot.slane %v2301_v1, 2  ;;  %v3037_v62 = vrot.slane %v2303_v39, 2  ;;  %v3040_v29 = vld [vmem:[#allocation48_spill] sm:$0xff] }
 0x18b   :  { %297 = vadd.xlane.f32.xlu1 %v296_v45  ;;  %v367_v20 = vadd.f32 %v366_v41, %v2228_v8  ;;  %v376_v52 = vadd.f32 %v375_v37, %v2232_v34  ;;  %v348_v0 = vadd.f32 %v347_v23, %v2083_v53  ;;  %v893_v48 = vadd.f32 %v3040_v29, %v3039_v25  ;;  %v3041_v41 = vld [vmem:[#allocation31_spill] sm:$0xff] }
 0x18c   :  { %285 = vadd.xlane.f32.xlu0 %v284_v18  ;;  %3035 = vst [vmem:[#allocation35_spill] sm:$0xff] %v2417_v40  ;;  %v423_v61 = vadd.f32 %v3036_v5, %v2301_v1  ;;  %v432_v14 = vadd.f32 %v3037_v62, %v2303_v39  ;;  %v356_v18 = vadd.f32 %v3038_v6, %v1975_v12  ;;  %v3042_v1 = vld [vmem:[#allocation51_spill] sm:$0xff]  ;;  %vm1296_vm12 = vcmask 7168  }
 0x18d   :  { %v368_v45 = vrot.slane %v367_v20, 4  ;;  %v377_v58 = vrot.slane %v376_v52, 4  ;;  %v902_v37 = vadd.f32 %v3042_v1, %v3041_v41  ;;  %v349_v62 = vadd.f32 %v348_v0, %v2196_v17  ;;  %v3045_v40 = vld [vmem:[#allocation55_spill] sm:$0xff] }
 0x18e   :  { %v357_v23 = vadd.f32 %v356_v18, %v2087_v30  ;;  %v424_v59 = vrot.slane %v423_v61, 1  ;;  %v433_v54 = vrot.slane %v432_v14, 1  ;;  %v894_v42 = vadd.f32 %v893_v48, %v2314_v31 }
 0x18f   :  { %825 = vadd.xlane.f32.xlu1 %v824_v28  ;;  %v369_v5 = vadd.f32 %v368_v45, %v367_v20  ;;  %v378_v39 = vadd.f32 %v377_v58, %v376_v52  ;;  %v903_v56 = vadd.f32 %v902_v37, %v2318_v27  ;;  %v350_v32 = vrot.slane %v349_v62, 4  ;;  %v3043_v52 = vld [vmem:[#allocation56_spill] sm:$0xff]  ;;  %v3044_v58 = vld [vmem:[#allocation57_spill] sm:$0xff] }
 0x190   :  { %813 = vadd.xlane.f32.xlu0 %v812_v15  ;;  %v358_v19 = vadd.f32 %v357_v23, %v2200_v36  ;;  %v939_v20 = vrot.slane %v2420_v49, 4  ;;  %v895_v45 = vadd.f32 %v894_v42, %v3043_v52  ;;  %v2446_v48 = vadd.f32 %v424_v59, %v423_v61  ;;  %v3049_v36 = vld [vmem:[#allocation42_spill] sm:$0xff] }
 0x191   :  { %v370_v7 = vrot.slane %v369_v5, 2  ;;  %v379_v47 = vrot.slane %v378_v39, 2  ;;  %v904_v0 = vadd.f32 %v903_v56, %v3044_v58  ;;  %v351_v21 = vadd.f32 %v350_v32, %v349_v62  ;;  %v3048_v62 = vld [vmem:[#allocation25_spill] sm:$0xff] }
 0x192   :  { %v359_v38 = vrot.slane %v358_v19, 4  ;;  %v2448_v37 = vadd.f32 %v433_v54, %v432_v14  ;;  %v896_v35 = vrot.slane %v895_v45, 4  ;;  %v406_v22 = vrot.slane %v3045_v40, 1  ;;  %v3046_v54 = vld [vmem:[#allocation24_spill] sm:$0xff]  ;;  %v3047_v14 = vld [vmem:[#allocation41_spill] sm:$0xff] }
 0x193   :  { %v371_v15 = vadd.f32 %v370_v7, %v369_v5  ;;  %v380_v18 = vadd.f32 %v379_v47, %v378_v39  ;;  %v905_v55 = vrot.slane %v904_v0, 4  ;;  %v352_v11 = vrot.slane %v351_v21, 2 }
 0x194   :  { %v360_v28 = vadd.f32 %v359_v38, %v358_v19  ;;  %v897_v50 = vadd.f32 %v896_v35, %v895_v45  ;;  %v951_v56 = vadd.f32 %v950_v63, %v2386_v51  ;;  %v875_v39 = vadd.f32 %v3047_v14, %v3046_v54  ;;  %v3050_v51 = vld [vmem:[#allocation40_spill] sm:$0xff] }
 0x195   :  { %v372_v16 = vrot.slane %v371_v15, 1  ;;  %v381_v23 = vrot.slane %v380_v18, 1  ;;  %v906_v42 = vadd.f32 %v905_v55, %v904_v0  ;;  %v353_v32 = vadd.f32 %v352_v11, %v351_v21 }
 0x196   :  { %v361_v5 = vrot.slane %v360_v28, 2  ;;  %v898_v59 = vrot.slane %v897_v50, 2  ;;  %v884_v17 = vadd.f32 %v3049_v36, %v3048_v62  ;;  %vm1183_vm9 = vcmp.eq.f32.partialorder %v2446_v48, inf }
 0x197   :  { %v373_v7 = vadd.f32 %v372_v16, %v371_v15  ;;  %v382_v47 = vadd.f32 %v381_v23, %v380_v18  ;;  %v907_v61 = vrot.slane %v906_v42, 2  ;;  %v354_v53 = vrot.slane %v353_v32, 1 }
 0x198   :  { %v362_v35 = vadd.f32 %v361_v5, %v360_v28  ;;  %v899_v55 = vadd.f32 %v898_v59, %v897_v50  ;;  %v876_v16 = vadd.f32 %v875_v39, %v3050_v51  ;;  %v885_v0 = vadd.f32 %v884_v17, %v2165_v60 }
 0x199   :  { %v489_v30 = vmul.f32 %v373_v7, %v373_v7  ;;  %v490_v38 = vmul.f32 %v382_v47, %v382_v47  ;;  %v536_v19 = vadd.f32 %v382_v47, %v373_v7  ;;  %v908_v45 = vadd.f32 %v907_v61, %v906_v42 }
 0x19a   :  { %v355_v21 = vadd.f32 %v354_v53, %v353_v32  ;;  %v363_v15 = vrot.slane %v362_v35, 1  ;;  %v900_v18 = vrot.slane %v899_v55, 1  ;;  %v877_v62 = vadd.f32 %v876_v16, %v2363_v4 }
 0x19b   :  { %v493_v63 = vmul.f32 0.03125, %v489_v30  ;;  %v494_v11 = vmul.f32 0.03125, %v490_v38  ;;  %537 = vadd.xlane.f32.xlu1 %v536_v19  ;;  %v909_v23 = vrot.slane %v908_v45, 1  ;;  %v3051_v50 = vrot.slane %v2392_v24, 2 }
 0x19c   :  { %v487_v7 = vmul.f32 %v355_v21, %v355_v21  ;;  %v886_v42 = vadd.f32 %v885_v0, %v2372_v3  ;;  %v364_v30 = vadd.f32 %v363_v15, %v362_v35  ;;  %v901_v47 = vadd.f32 %v900_v18, %v899_v55 }
 0x19d   :  { %v497_v12 = vsub.f32 %v2446_v48, %v493_v63  ;;  %v960_v28 = vadd.f32 %v3051_v50, %v2392_v24  ;;  %v910_v5 = vadd.f32 %v909_v23, %v908_v45  ;;  %v878_v53 = vrot.slane %v877_v62, 4  ;;  %v3054_v45 = vld [vmem:[#allocation54_spill] sm:$0xff] }
 0x19e   :  { %v3052_v17 = vrot.slane %v2407_v57, 4  ;;  %v498_v59 = vsub.f32 %v2448_v37, %v494_v11  ;;  %v491_v61 = vmul.f32 0.03125, %v487_v7  ;;  %v887_v39 = vrot.slane %v886_v42, 4 }
 0x19f   :  { %v3053_v38 = vrot.slane %v2410_v10, 4  ;;  %v940_v24 = vadd.f32 %v939_v20, %v2420_v49  ;;  %v488_v16 = vmul.f32 %v364_v30, %v364_v30  ;;  %v533_v35 = vadd.f32 %v364_v30, %v355_v21 }
 0x1a0   :  { %v2467_v32 = vadd.f32 %v3052_v17, %v2407_v57  ;;  %v2475_v55 = vadd.f32 %v406_v22, %v3045_v40  ;;  %v415_v63 = vrot.slane %v3054_v45, 1  ;;  %v952_v0 = vrot.slane %v951_v56, 1 }
 0x1a1   :  { %v931_v19 = vadd.f32 %v3053_v38, %v2410_v10  ;;  %v1064_v57 = vadd.f32 %v910_v5, %v901_v47  ;;  %v2478_v15 = vmul.f32 0.032258064, %v497_v12  ;;  %534 = vadd.xlane.f32.xlu0 %v533_v35  ;;  %v961_v11 = vrot.slane %v960_v28, 1 }
 0x1a2   :  { %v1017_v18 = vmul.f32 %v901_v47, %v901_v47  ;;  %v879_v23 = vadd.f32 %v878_v53, %v877_v62  ;;  %v2480_v7 = vmul.f32 0.032258064, %v498_v59  ;;  %v495_v10 = vsub.f32 %v2475_v55, %v491_v61 }
 0x1a3   :  { %v1018_v49 = vmul.f32 %v910_v5, %v910_v5  ;;  %1065 = vadd.xlane.f32.xlu1 %v1064_v57  ;;  %v888_v20 = vadd.f32 %v887_v39, %v886_v42  ;;  %v932_v21 = vrot.slane %v931_v19, 2  ;;  %v941_v22 = vrot.slane %v940_v24, 2 }
 0x1a4   :  { %v492_v40 = vmul.f32 0.03125, %v488_v16  ;;  %v880_v50 = vrot.slane %v879_v23, 2  ;;  %v849_v30 = vrot.slane %v2467_v32, 2  ;;  %v2485_v12 = vadd.f32 %v415_v63, %v3054_v45 }
 0x1a5   :  { %v2487_v17 = vadd.f32 %v952_v0, %v951_v56  ;;  %v889_v47 = vrot.slane %v888_v20, 2  ;;  %v505_v62 = vmax.f32 %v2478_v15, 1e-06  ;;  %v2490_v53 = vadd.f32 %v961_v11, %v960_v28 }
 0x1a6   :  { %v1021_v59 = vmul.f32 0.03125, %v1017_v18  ;;  %v881_v5 = vadd.f32 %v880_v50, %v879_v23  ;;  %v506_v42 = vmax.f32 %v2480_v7, 1e-06  ;;  %v2493_v61 = vmul.f32 0.032258064, %v495_v10  ;;  %v3057_v50 = vld [vmem:[#allocation33_spill] sm:$0xff] }
 0x1a7   :  { %v1022_v39 = vmul.f32 0.03125, %v1018_v49  ;;  %v890_v38 = vadd.f32 %v889_v47, %v888_v20  ;;  %v496_v16 = vsub.f32 %v2485_v12, %v492_v40  ;;  %v933_v35 = vadd.f32 %v932_v21, %v931_v19  ;;  %v3055_v20 = vld [vmem:[#allocation20_spill] sm:$0xff]  ;;  %v3056_v21 = vld [vmem:[#allocation25_spill] sm:$0xff]  ;;  %v3058_v47 = vld [vmem:[#allocation34_spill] sm:$0xff] }
 0x1a8   :  { %v942_v45 = vadd.f32 %v941_v22, %v940_v24  ;;  %v1107_v56 = vmul.f32 %v3039_v25, %v2003_v26  ;;  %v882_v63 = vrot.slane %v881_v5, 1  ;;  %v1109_v28 = vmul.f32 %v3040_v29, %v2077_v33 }
 0x1a9   :  { %v891_v0 = vrot.slane %v890_v38, 1  ;;  %v1110_v57 = vmul.f32 %v3042_v1, %v3033_v2  ;;  %v1025_v11 = vsub.f32 %v2487_v17, %v1021_v59  ;;  %v1108_v18 = vmul.f32 %v3041_v41, %v2007_v43 }
 0x1aa   :  { %v1111_v19 = vmul.f32 %v2314_v31, %v2141_v46  ;;  %v1112_v24 = vmul.f32 %v2318_v27, %v2149_v9  ;;  %v883_v26 = vadd.f32 %v882_v63, %v881_v5  ;;  %v1113_v23 = vmul.f32 %v3043_v52, %v2228_v8 }
 0x1ab   :  { %v892_v25 = vadd.f32 %v891_v0, %v890_v38  ;;  %v1133_v33 = vadd.f32 %v1109_v28, %v1107_v56  ;;  %v1114_v2 = vmul.f32 %v3044_v58, %v2232_v34  ;;  %v1142_v10 = vadd.f32 %v1110_v57, %v1108_v18 }
 0x1ac   :  { %v1101_v49 = vmul.f32 %v3047_v14, %v3034_v13  ;;  %v1102_v43 = vmul.f32 %v3049_v36, %v3038_v6  ;;  %v1099_v9 = vmul.f32 %v3046_v54, %v1967_v44  ;;  %v1100_v22 = vmul.f32 %v3056_v21, %v3055_v20  ;;  %v3059_v6 = vld [vmem:[#allocation44_spill] sm:$0xff]  ;;  %v3060_v44 = vld [vmem:[#allocation45_spill] sm:$0xff] }
 0x1ad   :  { %v1061_v46 = vadd.f32 %v892_v25, %v883_v26  ;;  %v1134_v41 = vadd.f32 %v1133_v33, %v1111_v19  ;;  %v1015_v8 = vmul.f32 %v883_v26, %v883_v26  ;;  %v1143_v40 = vadd.f32 %v1142_v10, %v1112_v24 }
 0x1ae   :  { %v1103_v34 = vmul.f32 %v3050_v51, %v3057_v50  ;;  %v1104_v59 = vmul.f32 %v2165_v60, %v3058_v47  ;;  %v934_v13 = vrot.slane %v933_v35, 1  ;;  %v1016_v14 = vmul.f32 %v892_v25, %v892_v25 }
 0x1af   :  { %1062 = vadd.xlane.f32.xlu0 %v1061_v46  ;;  %v1135_v36 = vadd.f32 %v1134_v41, %v1113_v23  ;;  %v1105_v5 = vmul.f32 %v2363_v4, %v3059_v6  ;;  %v1144_v38 = vadd.f32 %v1143_v40, %v1114_v2  ;;  %v1106_v54 = vmul.f32 %v2372_v3, %v3060_v44 }
 0x1b0   :  { %v1115_v56 = vadd.f32 %v1101_v49, %v1099_v9  ;;  %v1124_v63 = vadd.f32 %v1102_v43, %v1100_v22  ;;  %v503_v0 = vmax.f32 %v2493_v61, 1e-06  ;;  %v1026_v51 = vsub.f32 %v2490_v53, %v1022_v39 }
 0x1b1   :  { %v943_v28 = vrot.slane %v942_v45, 1  ;;  %v1136_v57 = vrot.slane %v1135_v36, 4  ;;  %v1019_v60 = vmul.f32 0.03125, %v1015_v8  ;;  %v1145_v18 = vrot.slane %v1144_v38, 4 }
 0x1b2   :  { %v1116_v19 = vadd.f32 %v1115_v56, %v1103_v34  ;;  %v1125_v24 = vadd.f32 %v1124_v63, %v1104_v59  ;;  %v500_v26 = vmul.f32 0.032258064, %v496_v16  ;;  %v1020_v25 = vmul.f32 0.03125, %v1016_v14  ;;  %v3061_v34 = vld [vmem:[#allocation47_spill] sm:$0xff] }
 0x1b3   :  { %v1137_v23 = vadd.f32 %v1136_v57, %v1135_v36  ;;  %v2533_v33 = vadd.f32 %v2318_v27, %v2314_v31  ;;  %v2535_v2 = vadd.f32 %v934_v13, %v933_v35  ;;  %v1146_v10 = vadd.f32 %v1145_v18, %v1144_v38  ;;  %v3063_v13 = vld [vmem:[#allocation2_spill] sm:$0xff] }
 0x1b4   :  { %v1117_v49 = vadd.f32 %v1116_v19, %v1105_v5  ;;  %v1126_v61 = vadd.f32 %v1125_v24, %v1106_v54  ;;  %v1029_v43 = vmul.f32 0.032258064, %v1025_v11  ;;  %v1030_v39 = vmul.f32 0.032258064, %v1026_v51 }
 0x1b5   :  { %v2537_v46 = vadd.f32 %v943_v28, %v942_v45  ;;  %v1138_v41 = vrot.slane %v1137_v23, 2  ;;  %v1023_v9 = vsub.f32 %v2535_v2, %v1019_v60  ;;  %v1147_v20 = vrot.slane %v1146_v10, 2 }
 0x1b6   :  { %v1118_v16 = vrot.slane %v1117_v49, 4  ;;  %v1127_v21 = vrot.slane %v1126_v61, 4  ;;  %v509_v31 = vadd.f32 1.0, %v505_v62  ;;  %v510_v27 = vadd.f32 1.0, %v506_v42 }
 0x1b7   :  { %v1024_v22 = vsub.f32 %v2537_v46, %v1020_v25  ;;  %v1139_v8 = vadd.f32 %v1138_v41, %v1137_v23  ;;  %v504_v35 = vmax.f32 %v500_v26, 1e-06  ;;  %v1148_v11 = vadd.f32 %v1147_v20, %v1146_v10  ;;  %v3065_v26 = vld [vmem:[#allocation50_spill] sm:$0xff] }
 0x1b8   :  { %v1119_v40 = vadd.f32 %v1118_v16, %v1117_v49  ;;  %v1128_v45 = vadd.f32 %v1127_v21, %v1126_v61  ;;  %v3062_v47 = vrot.slane %v3061_v34, 2  ;;  %v3064_v14 = vrot.slane %v3063_v13, 2  ;;  %v3067_v61 = vld [vmem:[#allocation58_spill] sm:$0xff] }
 0x1b9   :  { %v1140_v50 = vrot.slane %v1139_v8, 1  ;;  %1395 = vlog2.f32 %v509_v31  ;;  %v1033_v6 = vmax.f32 %v1029_v43, 1e-06  ;;  %v1149_v15 = vrot.slane %v1148_v11, 1 }
 0x1ba   :  { %v331_v59 = vadd.f32 %v3062_v47, %v3061_v34  ;;  %v340_v36 = vadd.f32 %v3064_v14, %v3063_v13  ;;  %v1120_v62 = vrot.slane %v1119_v40, 2  ;;  %v1129_v5 = vrot.slane %v1128_v45, 2  ;;  %v3073_v34 = vld [vmem:[#allocation35_spill] sm:$0xff] }
 0x1bb   :  { %v1027_v7 = vmul.f32 0.032258064, %v1023_v9  ;;  %v1028_v42 = vmul.f32 0.032258064, %v1024_v22  ;;  %v2551_v38 = vadd.f32 %v1140_v50, %v1139_v8  ;;  %1397 = vlog2.f32 %v510_v27  ;;  %v3069_v9 = vld [vmem:[#allocation59_spill] sm:$0xff]  ;;  %v3071_v22 = vld [vmem:[#allocation60_spill] sm:$0xff] }
 0x1bc   :  { %v1034_v44 = vmax.f32 %v1030_v39, 1e-06  ;;  %v2553_v54 = vadd.f32 %v1149_v15, %v1148_v11  ;;  %v1121_v56 = vadd.f32 %v1120_v62, %v1119_v40  ;;  %v1130_v63 = vadd.f32 %v1129_v5, %v1128_v45 }
 0x1bd   :  { %v332_v51 = vrot.slane %v331_v59, 1  ;;  %v341_v28 = vrot.slane %v340_v36, 1  ;;  %v507_v57 = vadd.f32 1.0, %v503_v0  ;;  %v508_v60 = vadd.f32 1.0, %v504_v35 }
 0x1be   :  { %v1154_v18 = vadd.f32 %v2553_v54, %v2551_v38  ;;  %v1122_v19 = vrot.slane %v1121_v56, 1  ;;  %v1131_v24 = vrot.slane %v1130_v63, 1  ;;  %v3066_v25 = vrot.slane %v3065_v26, 2 }
 0x1bf   :  { %v1031_v10 = vmax.f32 %v1027_v7, 1e-06  ;;  %v1032_v49 = vmax.f32 %v1028_v42, 1e-06  ;;  %v3068_v43 = vrot.slane %v3067_v61, 2  ;;  %1399 = vlog2.f32 %v507_v57 }
 0x1c0   :  { %v313_v23 = vadd.f32 %v3066_v25, %v3065_v26  ;;  %1155 = vadd.xlane.f32.xlu1 %v1154_v18  ;;  %v2563_v41 = vadd.f32 %v1122_v19, %v1121_v56  ;;  %v2565_v0 = vadd.f32 %v1131_v24, %v1130_v63  ;;  %1401 = vlog2.f32 %v508_v60 }
 0x1c1   :  { %v322_v39 = vadd.f32 %v3068_v43, %v3067_v61  ;;  %v3070_v20 = vrot.slane %v3069_v9, 2  ;;  %v1082_v21 = vadd.f32 %v3042_v1, %v3040_v29  ;;  %v3072_v8 = vrot.slane %v3071_v22, 2 }
 0x1c2   :  { %v1037_v27 = vadd.f32 1.0, %v1033_v6  ;;  %v1038_v35 = vadd.f32 1.0, %v1034_v44  ;;  %v1151_v11 = vadd.f32 %v2565_v0, %v2563_v41  ;;  %v333_v40 = vadd.f32 %v332_v51, %v331_v59 }
 0x1c3   :  { %v859_v16 = vadd.f32 %v3070_v20, %v3069_v9  ;;  %v868_v31 = vadd.f32 %v3072_v8, %v3071_v22  ;;  %v342_v45 = vadd.f32 %v341_v28, %v340_v36  ;;  %v314_v50 = vrot.slane %v313_v23, 1 }
 0x1c4   :  { %1403 = vlog2.f32 %v1037_v27  ;;  %v3074_v47 = vrot.slane %v3073_v34, 2  ;;  %v850_v29 = vadd.f32 %v849_v30, %v2467_v32  ;;  %v1035_v1 = vadd.f32 1.0, %v1031_v10  ;;  %1152 = vadd.xlane.f32.xlu0 %v1151_v11  ;;  %1083 = vadd.xlane.f32.xlu1 %v1082_v21 }
 0x1c5   :  { %v323_v14 = vrot.slane %v322_v39, 1  ;;  %v860_v6 = vrot.slane %v859_v16, 1  ;;  %1405 = vlog2.f32 %v1038_v35  ;;  %v1036_v15 = vadd.f32 1.0, %v1032_v49 }
 0x1c6   :  { %v841_v13 = vadd.f32 %v3074_v47, %v3073_v34  ;;  %v1076_v59 = vadd.f32 %v2372_v3, %v2363_v4  ;;  %v869_v36 = vrot.slane %v868_v31, 1  ;;  %1407 = vlog2.f32 %v1035_v1  ;;  %v1396_v62 = vpop.eup %1395 }
 0x1c7   :  { %v1088_v5 = vadd.f32 %v3044_v58, %v3043_v52  ;;  %v345_v7 = vmul.f32 0.03125, %v333_v40  ;;  %v346_v42 = vmul.f32 0.03125, %v342_v45  ;;  %1409 = vlog2.f32 %v1036_v15 }
 0x1c8   :  { %v516_v32 = vmul.f32 0.6931472, %v1396_v62  ;;  %v842_v30 = vrot.slane %v841_v13, 1  ;;  %v851_v44 = vrot.slane %v850_v29, 1  ;;  %1411 = vrsqrt.f32 %v2475_v55  ;;  %v1398_v56 = vpop.eup %1397  ;;  %1077 = vadd.xlane.f32.xlu0 %v1076_v59 }
 0x1c9   :  { %1089 = vadd.xlane.f32.xlu1 %v1088_v5  ;;  %v315_v63 = vadd.f32 %v314_v50, %v313_v23  ;;  %v324_v51 = vadd.f32 %v323_v14, %v322_v39  ;;  %v861_v4 = vadd.f32 %v860_v6, %v859_v16  ;;  %1413 = vrsqrt.f32 %v2485_v12 }
 0x1ca   :  { %v518_v3 = vmul.f32 0.6931472, %v1398_v56  ;;  %v521_v28 = vmul.f32 %v516_v32, %v345_v7  ;;  %v870_v57 = vadd.f32 %v869_v36, %v868_v31  ;;  %1415 = vrsqrt.f32 %v2535_v2 }
 0x1cb   :  { %1417 = vrsqrt.f32 %v2537_v46  ;;  %v843_v58 = vadd.f32 %v842_v30, %v841_v13  ;;  %v852_v60 = vadd.f32 %v851_v44, %v850_v29  ;;  %v343_v19 = vmul.f32 0.03125, %v315_v63 }
 0x1cc   :  { %v522_v52 = vmul.f32 %v518_v3, %v346_v42  ;;  %1419 = vrsqrt.f32 %v2446_v48  ;;  %v1400_v18 = vpop.eup %1399  ;;  %1086 = vadd.xlane.f32.xlu0 %v2533_v33  ;;  %v344_v24 = vmul.f32 0.03125, %v324_v51  ;;  %v873_v10 = vmul.f32 0.03125, %v861_v4 }
 0x1cd   :  { %1421 = vrsqrt.f32 %v2448_v37  ;;  %v1402_v26 = vpop.eup %1401  ;;  %v512_v23 = vmul.f32 0.6931472, %v1400_v18  ;;  %v874_v49 = vmul.f32 0.03125, %v870_v57  ;;  %vm1169_vm0 = vcmp.eq.f32.partialorder %v2475_v55, inf }
 0x1ce   :  { %v526_v25 = vadd.f32 %v522_v52, %v521_v28  ;;  %v514_v61 = vmul.f32 0.6931472, %v1402_v26  ;;  %v1172_v43 = vand.u32 2147483648, %v2475_v55  ;;  %1423 = vrsqrt.f32 %v2487_v17 }
 0x1cf   :  { %v519_v39 = vmul.f32 %v512_v23, %v343_v19  ;;  %v871_v9 = vmul.f32 0.03125, %v843_v58  ;;  %v872_v33 = vmul.f32 0.03125, %v852_v60  ;;  %vm1171_vm1 = vcmp.eq.f32.partialorder %v2475_v55, 0.0 }
 0x1d0   :  { %527 = vadd.xlane.f32.xlu1 %v526_v25  ;;  %vm1176_vm2 = vcmp.eq.f32.partialorder %v2485_v12, inf  ;;  %1425 = vrsqrt.f32 %v2490_v53  ;;  %v520_v16 = vmul.f32 %v514_v61, %v344_v24  ;;  %vm1178_vm3 = vcmp.eq.f32.partialorder %v2485_v12, 0.0 }
 0x1d1   :  { %v1404_v20 = vpop.eup %1403  ;;  %v1179_v21 = vand.u32 2147483648, %v2485_v12  ;;  %vm1197_vm4 = vcmp.eq.f32.partialorder %v2535_v2, inf  ;;  %v1200_v22 = vand.u32 2147483648, %v2535_v2  ;;  %vm1199_vm5 = vcmp.eq.f32.partialorder %v2535_v2, 0.0  ;;  %v541_v51 = vpop.xlane.xlu0 %540 }
 0x1d2   :  { %v1406_v8 = vpop.eup %1405  ;;  %v1044_v31 = vmul.f32 0.6931472, %v1404_v20  ;;  %vm1204_vm6 = vcmp.eq.f32.partialorder %v2537_v46, inf  ;;  %v523_v35 = vadd.f32 %v520_v16, %v519_v39  ;;  %vm1206_vm8 = vcmp.eq.f32.partialorder %v2537_v46, 0.0 }
 0x1d3   :  { %v1408_v27 = vpop.eup %1407  ;;  %v1046_v11 = vmul.f32 0.6931472, %v1406_v8  ;;  %v1207_v40 = vand.u32 2147483648, %v2537_v46  ;;  %v1487_v45 = vmov 0.0   ;;  %vm1185_vm10 = vcmp.eq.f32.partialorder %v2446_v48, 0.0 }
 0x1d4   :  { %1288 = vst.msk [vmem:[%s2868_s2] sm:$0xff] %vm1287_vm7, %v1487_v45  ;;  %1289 = vst.msk [vmem:[%s2868_s2 + $0x8] sm:$0xff] %vm1287_vm7, %v1487_v45  ;;  %v1410_v50 = vpop.eup %1409  ;;  %v1049_v34 = vmul.f32 %v1044_v31, %v873_v10  ;;  %v1040_v47 = vmul.f32 0.6931472, %v1408_v27  ;;  %v1186_v13 = vand.u32 2147483648, %v2446_v48  ;;  %524 = vadd.xlane.f32.xlu0 %v523_v35  ;;  %v1193_v36 = vand.u32 2147483648, %v2448_v37 }
 0x1d5   :  { %1290 = vst.msk [vmem:[%s2868_s2 + $0x10] sm:$0xff] %vm1287_vm7, %v1487_v45  ;;  %1291 = vst.msk [vmem:[%s2868_s2 + $0x18] sm:$0xff] %vm1287_vm7, %v1487_v45  ;;  %v1412_v29 = vpop.eup %1411  ;;  %v1050_v1 = vmul.f32 %v1046_v11, %v874_v49  ;;  %v1042_v14 = vmul.f32 0.6931472, %v1410_v50  ;;  %v1214_v62 = vand.u32 2147483648, %v2487_v17  ;;  %vm1211_vm13 = vcmp.eq.f32.partialorder %v2487_v17, inf }
 0x1d6   :  { %1292 = vst.msk [vmem:[%s2868_s2 + $0x20] sm:$0xff] %vm1287_vm7, %v1487_v45  ;;  %1293 = vst.msk [vmem:[%s2868_s2 + $0x28] sm:$0xff] %vm1287_vm7, %v1487_v45  ;;  %v1414_v6 = vpop.eup %1413  ;;  %v1047_v15 = vmul.f32 %v1040_v47, %v871_v9  ;;  %v1168_v59 = vmul.f32 %v1412_v29, %v2475_v55  ;;  %vm1218_vm14 = vcmp.eq.f32.partialorder %v2490_v53, inf  ;;  %v1221_v30 = vand.u32 2147483648, %v2490_v53 }
 0x1d7   :  { %1294 = vst.msk [vmem:[%s2868_s2 + $0x30] sm:$0xff] %vm1287_vm7, %v1487_v45  ;;  %1295 = vst.msk [vmem:[%s2868_s2 + $0x38] sm:$0xff] %vm1287_vm7, %v1487_v45  ;;  %v1416_v5 = vpop.eup %1415  ;;  %v1054_v7 = vadd.f32 %v1050_v1, %v1049_v34  ;;  %v1048_v42 = vmul.f32 %v1042_v14, %v872_v33  ;;  %v1175_v32 = vmul.f32 %v1414_v6, %v2485_v12  ;;  %vm1213_vm15 = vcmp.eq.f32.partialorder %v2487_v17, 0.0 }
 0x1d8   :  { %v1418_v44 = vpop.eup %1417  ;;  %v1170_v56 = vsel %vm1169_vm0, %v2475_v55, %v1168_v59  ;;  %v1196_v63 = vmul.f32 %v1416_v5, %v2535_v2  ;;  %vm1220_vm7 = vcmp.eq.f32.partialorder %v2490_v53, 0.0  ;;  %vm1305_vm11 = vcmask 15368  }
 0x1d9   :  { %v1420_v4 = vpop.eup %1419  ;;  %1055 = vadd.xlane.f32.xlu1 %v1054_v7  ;;  %v1051_v3 = vadd.f32 %v1048_v42, %v1047_v15  ;;  %v2654_v28 = vsel %vm1171_vm1, %v1172_v43, %v1170_v56  ;;  %v1177_v57 = vsel %vm1176_vm2, %v2485_v12, %v1175_v32  ;;  %v1203_v52 = vmul.f32 %v1418_v44, %v2537_v46  ;;  %v553_v43 = vpop.xlane.xlu1 %552 }
 0x1da   :  { %v1422_v58 = vpop.eup %1421  ;;  %v1180_v60 = vsel %vm1178_vm3, %v1179_v21, %v1177_v57  ;;  %v1198_v18 = vsel %vm1197_vm4, %v2535_v2, %v1196_v63  ;;  %v1223_v19 = vmax.f32 %v2654_v28, 1e-12  ;;  %v1182_v55 = vmul.f32 %v1420_v4, %v2446_v48  ;;  %v1069_v2 = vpop.xlane.xlu0 %1068 }
 0x1db   :  { %1052 = vadd.xlane.f32.xlu0 %v1051_v3  ;;  %v1201_v24 = vsel %vm1199_vm5, %v1200_v22, %v1198_v18  ;;  %v1205_v26 = vsel %vm1204_vm6, %v2537_v46, %v1203_v52  ;;  %v1224_v12 = vmax.f32 %v1180_v60, 1e-12  ;;  %v1189_v25 = vmul.f32 %v1422_v58, %v2448_v37  ;;  %v1424_v23 = vpop.eup %1423 }
 0x1dc   :  { %v1208_v10 = vsel %vm1206_vm8, %v1207_v40, %v1205_v26  ;;  %1427 = vrcp.f32 %v1223_v19  ;;  %v1235_v49 = vmax.f32 %v1201_v24, 1e-12  ;;  %v1184_v61 = vsel %vm1183_vm9, %v2446_v48, %v1182_v55 }
 0x1dd   :  { %v1426_v39 = vpop.eup %1425  ;;  %1429 = vrcp.f32 %v1224_v12  ;;  %v1236_v9 = vmax.f32 %v1208_v10, 1e-12  ;;  %v1187_v33 = vsel %vm1185_vm10, %v1186_v13, %v1184_v61  ;;  %vm3075_vm0 = vcmp.eq.f32.partialorder %v2448_v37, inf }
 0x1de   :  { %v1191_v20 = vsel %vm3075_vm0, %v2448_v37, %v1189_v25  ;;  %1431 = vrcp.f32 %v1235_v49  ;;  %vm3076_vm1 = vcmp.eq.f32.partialorder %v2448_v37, 0.0  ;;  %v1210_v16 = vmul.f32 %v1424_v23, %v2487_v17  ;;  %v1081_v37 = vpop.xlane.xlu1 %1080  ;;  %v544_v40 = vpop.xlane.xlu0 %543 }
 0x1df   :  { %v1194_v46 = vsel %vm3076_vm1, %v1193_v36, %v1191_v20  ;;  %v1217_v21 = vmul.f32 %v1426_v39, %v2490_v53  ;;  %1433 = vrcp.f32 %v1236_v9  ;;  %v1225_v22 = vmax.f32 %v1187_v33, 1e-12 }
 0x1e0   :  { %v1226_v8 = vmax.f32 %v1194_v46, 1e-12  ;;  %v563_v31 = vmul.f32 0.00390625, %v541_v51  ;;  %v1212_v48 = vsel %vm1211_vm13, %v2487_v17, %v1210_v16  ;;  %v567_v35 = vmul.f32 0.00390625, %v553_v43 }
 0x1e1   :  { %v1219_v27 = vsel %vm1218_vm14, %v2490_v53, %v1217_v21  ;;  %v1091_v11 = vmul.f32 0.00390625, %v1069_v2  ;;  %v1215_v45 = vsel %vm1213_vm15, %v1214_v62, %v1212_v48  ;;  %v1095_v34 = vmul.f32 0.00390625, %v1081_v37 }
 0x1e2   :  { %v1222_v50 = vsel %vm1220_vm7, %v1221_v30, %v1219_v27  ;;  %1297 = vst.msk [vmem:[%s2868_s2] sm:$0xff] %vm1296_vm12, %v563_v31  ;;  %1435 = vrcp.f32 %v1225_v22  ;;  %v1237_v47 = vmax.f32 %v1215_v45, 1e-12  ;;  %1301 = vst.msk [vmem:[%s2868_s2 + $0x20] sm:$0xff] %vm1296_vm12, %v567_v35  ;;  %v564_v17 = vmul.f32 0.00390625, %v544_v40 }
 0x1e3   :  { %v1238_v13 = vmax.f32 %v1222_v50, 1e-12  ;;  %1306 = vst.msk [vmem:[%s2868_s2] sm:$0xff] %vm1305_vm11, %v1091_v11  ;;  %1437 = vrcp.f32 %v1226_v8  ;;  %1310 = vst.msk [vmem:[%s2868_s2 + $0x20] sm:$0xff] %vm1305_vm11, %v1095_v34  ;;  %v547_v53 = vpop.xlane.xlu1 %546  ;;  %vm1314_vm2 = vcmask 16400   ;;  %vm1317_vm3 = vcmask 24600  }
 0x1e4   :  { %1439 = vrcp.f32 %v1237_v47  ;;  %1298 = vst.msk [vmem:[%s2868_s2 + $0x8] sm:$0xff] %vm1296_vm12, %v564_v17  ;;  %v565_v29 = vmul.f32 0.00390625, %v547_v53  ;;  %vm1320_vm4 = vcmask 32800   ;;  %vm1323_vm5 = vcmask 41000  }
 0x1e5   :  { %1441 = vrcp.f32 %v1238_v13  ;;  %v3078_v13 = vld [vmem:[#allocation27_spill] sm:$0xff] }
 0x1e6   :  { %1299 = vst.msk [vmem:[%s2868_s2 + $0x10] sm:$0xff] %vm1296_vm12, %v565_v29  ;;  %v240_v17 = vmul.f32 %v3078_v13, %v3078_v13 }
 0x1e7   :  { %v556_v1 = vpop.xlane.xlu1 %555 }
 0x1e8   :  { %v568_v6 = vmul.f32 0.00390625, %v556_v1 }
 0x1e9   :  { %v1428_v14 = vpop.eup %1427 }
 0x1ea   :  { %v1430_v15 = vpop.eup %1429  ;;  %1302 = vst.msk [vmem:[%s2868_s2 + $0x28] sm:$0xff] %vm1296_vm12, %v568_v6  ;;  %v1255_v62 = vmul.f32 %v1428_v14, %v2654_v28 }
 0x1eb   :  { %v1432_v59 = vpop.eup %1431  ;;  %v1256_v7 = vmul.f32 %v1430_v15, %v1180_v60 }
 0x1ec   :  { %v1434_v36 = vpop.eup %1433  ;;  %v1259_v5 = vmul.f32 %v1432_v59, %v1201_v24  ;;  %v1247_v61 = vmul.f32 %v1432_v59, %v1428_v14  ;;  %v3081_v14 = vld [vmem:[#allocation4_spill] sm:$0xff] }
 0x1ed   :  { %v1260_v42 = vmul.f32 %v1434_v36, %v1208_v10  ;;  %v1248_v39 = vmul.f32 %v1434_v36, %v1430_v15  ;;  %v3082_v15 = vld [vmem:[#allocation6_spill] sm:$0xff]  ;;  %v3083_v36 = vld [vmem:[#allocation37_spill] sm:$0xff] }
 0x1ee   :  { %v1263_v32 = vmul.f32 %v1259_v5, %v1255_v62  ;;  %v248_v59 = vmul.f32 %v240_v17, %v3082_v15  ;;  %v241_v62 = vmul.f32 %v3083_v36, %v3083_v36  ;;  %v3084_v5 = vld [vmem:[#allocation3_spill] sm:$0xff] }
 0x1ef   :  { %v1436_v30 = vpop.eup %1435  ;;  %v1264_v44 = vmul.f32 %v1260_v42, %v1256_v7  ;;  %v3085_v42 = vld [vmem:[#allocation36_spill] sm:$0xff] }
 0x1f0   :  { %v1438_v56 = vpop.eup %1437  ;;  %v1267_v63 = vmax.f32 %v1263_v32, 1e-08  ;;  %v1257_v57 = vmul.f32 %v1436_v30, %v1187_v33  ;;  %v550_v58 = vpop.xlane.xlu0 %549  ;;  %v1251_v33 = vmul.f32 %v1247_v61, %v2563_v41  ;;  %v764_v32 = vmul.f32 %v3085_v42, %v3085_v42  ;;  %v3094_v61 = vld [vmem:[#allocation16_spill] sm:$0xff] }
 0x1f1   :  { %v1440_v51 = vpop.eup %1439  ;;  %v1268_v4 = vmax.f32 %v1264_v44, 1e-08  ;;  %v1258_v18 = vmul.f32 %v1438_v56, %v1194_v46  ;;  %v566_v55 = vmul.f32 0.00390625, %v550_v58  ;;  %v1252_v46 = vmul.f32 %v1248_v39, %v2565_v0  ;;  %v3077_v0 = vld [vmem:[#allocation22_spill] sm:$0xff]  ;;  %v3095_v39 = vld [vmem:[#allocation7_spill] sm:$0xff] }
 0x1f2   :  { %v1442_v3 = vpop.eup %1441  ;;  %1443 = vrcp.f32 %v1267_v63  ;;  %v1261_v52 = vmul.f32 %v1440_v51, %v1215_v45  ;;  %v1249_v22 = vmul.f32 %v1440_v51, %v1436_v30  ;;  %v236_v34 = vmul.f32 %v3077_v0, %v3077_v0  ;;  %v3086_v30 = vld [vmem:[#allocation5_spill] sm:$0xff]  ;;  %v3087_v63 = vld [vmem:[#allocation46_spill] sm:$0xff] }
 0x1f3   :  { %1445 = vrcp.f32 %v1268_v4  ;;  %v1262_v19 = vmul.f32 %v1442_v3, %v1222_v50  ;;  %1300 = vst.msk [vmem:[%s2868_s2 + $0x18] sm:$0xff] %vm1296_vm12, %v566_v55  ;;  %v562_v60 = vpop.xlane.xlu1 %561  ;;  %v1250_v31 = vmul.f32 %v1442_v3, %v1438_v56  ;;  %v242_v51 = vmul.f32 %v3087_v63, %v3087_v63  ;;  %v3088_v3 = vld [vmem:[#allocation23_spill] sm:$0xff]  ;;  %v3090_v55 = vld [vmem:[#allocation12_spill] sm:$0xff] }
 0x1f4   :  { %v1265_v28 = vmul.f32 %v1261_v52, %v1257_v57  ;;  %v570_v12 = vmul.f32 0.00390625, %v562_v60  ;;  %v559_v25 = vpop.xlane.xlu0 %558  ;;  %v1253_v27 = vmul.f32 %v1249_v22, %v2551_v38  ;;  %v3079_v38 = vld [vmem:[#allocation17_spill] sm:$0xff]  ;;  %v244_v6 = vmul.f32 %v236_v34, %v3081_v14  ;;  %v3091_v60 = vld [vmem:[#allocation8_spill] sm:$0xff]  ;;  %v3101_v34 = vld [vmem:[#allocation38_spill] sm:$0xff] }
 0x1f5   :  { %v1266_v24 = vmul.f32 %v1262_v19, %v1258_v18  ;;  %v569_v10 = vmul.f32 0.00390625, %v559_v25  ;;  %v1254_v11 = vmul.f32 %v1250_v31, %v2553_v54  ;;  %v235_v53 = vmul.f32 %v3079_v38, %v3079_v38  ;;  %v3080_v54 = vld [vmem:[#allocation21_spill] sm:$0xff]  ;;  %v3089_v18 = vld [vmem:[#allocation39_spill] sm:$0xff] }
 0x1f6   :  { %v1269_v26 = vmax.f32 %v1265_v28, 1e-08  ;;  %1304 = vst.msk [vmem:[%s2868_s2 + $0x38] sm:$0xff] %vm1296_vm12, %v570_v12  ;;  %v239_v1 = vmul.f32 %v3080_v54, %v3080_v54  ;;  %v252_v4 = vmax.f32 %v244_v6, 1e-06  ;;  %v763_v57 = vmul.f32 %v3088_v3, %v3088_v3  ;;  %v3092_v12 = vld [vmem:[#allocation32_spill] sm:$0xff] }
 0x1f7   :  { %v1270_v23 = vmax.f32 %v1266_v24, 1e-08  ;;  %1303 = vst.msk [vmem:[%s2868_s2 + $0x30] sm:$0xff] %vm1296_vm12, %v569_v10  ;;  %v1075_v49 = vpop.xlane.xlu1 %1074  ;;  %v243_v7 = vmul.f32 %v235_v53, %v3084_v5  ;;  %v256_v52 = vmax.f32 %v248_v59, 1e-06  ;;  %v768_v19 = vmul.f32 %v3089_v18, %v3089_v18  ;;  %v3093_v10 = vld [vmem:[#allocation29_spill] sm:$0xff] }
 0x1f8   :  { %1447 = vrcp.f32 %v1269_v26  ;;  %v1093_v43 = vmul.f32 0.00390625, %v1075_v49  ;;  %v1072_v2 = vpop.xlane.xlu0 %1071  ;;  %v247_v44 = vmul.f32 %v239_v1, %v3086_v30  ;;  %v249_v28 = vmul.f32 %v241_v62, %v3090_v55  ;;  %v3102_v53 = vld [vmem:[#allocation15_spill] sm:$0xff]  ;;  %v3103_v1 = vld [vmem:[#allocation53_spill] sm:$0xff]  ;;  %v3104_v62 = vld [vmem:[#allocation14_spill] sm:$0xff] }
 0x1f9   :  { %1449 = vrcp.f32 %v1270_v23  ;;  %v1092_v9 = vmul.f32 0.00390625, %v1072_v2  ;;  %v251_v24 = vmax.f32 %v243_v7, 1e-06  ;;  %v772_v26 = vmul.f32 %v764_v32, %v3091_v60  ;;  %v3105_v7 = vld [vmem:[#allocation52_spill] sm:$0xff] }
 0x1fa   :  { %1308 = vst.msk [vmem:[%s2868_s2 + $0x10] sm:$0xff] %vm1305_vm11, %v1093_v43  ;;  %v237_v25 = vmul.f32 %v3092_v12, %v3092_v12  ;;  %v255_v23 = vmax.f32 %v247_v44, 1e-06  ;;  %v767_v49 = vmul.f32 %v3093_v10, %v3093_v10  ;;  %v250_v43 = vmul.f32 %v242_v51, %v3094_v61  ;;  %v3106_v44 = vld [vmem:[#allocation13_spill] sm:$0xff] }
 0x1fb   :  { %1307 = vst.msk [vmem:[%s2868_s2 + $0x8] sm:$0xff] %vm1305_vm11, %v1092_v9  ;;  %v2752_v41 = vpop.xlane.xlu1 %279  ;;  %v436_v2 = vadd.f32 1.0, %v252_v4  ;;  %v771_v9 = vmul.f32 %v763_v57, %v3095_v39  ;;  %v435_v31 = vadd.f32 1.0, %v251_v24  ;;  %v765_v13 = vmul.f32 %v3101_v34, %v3101_v34  ;;  %v3107_v57 = vld [vmem:[#allocation19_spill] sm:$0xff]  ;;  %v3108_v24 = vld [vmem:[#allocation18_spill] sm:$0xff] }
 0x1fc   :  { %v2756_v47 = vpop.xlane.xlu0 %276  ;;  %v258_v17 = vmax.f32 %v250_v43, 1e-06  ;;  %v770_v14 = vmul.f32 %v3103_v1, %v3103_v1  ;;  %v766_v42 = vmul.f32 %v3105_v7, %v3105_v7 }
 0x1fd   :  { %1451 = vlog2.f32 %v436_v2  ;;  %v779_v38 = vmax.f32 %v771_v9, 1e-06  ;;  %v773_v63 = vmul.f32 %v765_v13, %v3106_v44  ;;  %v299_v34 = vmul.f32 0.00390625, %v2756_v47 }
 0x1fe   :  { %v442_v51 = vadd.f32 1.0, %v258_v17  ;;  %v774_v60 = vmul.f32 %v766_v42, %v3108_v24 }
 0x1ff   :  { %v1444_v20 = vpop.eup %1443  ;;  %v2762_v29 = vpop.xlane.xlu1 %291  ;;  %v963_v4 = vadd.f32 1.0, %v779_v38  ;;  %v781_v12 = vmax.f32 %v773_v63, 1e-06 }
 0x200   :  { %v1446_v16 = vpop.eup %1445  ;;  %v1272_v21 = vmul.f32 %v1444_v20, %v1251_v33  ;;  %v2774_v56 = vpop.xlane.xlu0 %288  ;;  %v3096_v33 = vld [vmem:[#allocation43_spill] sm:$0xff]  ;;  %v782_v61 = vmax.f32 %v774_v60, 1e-06 }
 0x201   :  { %v1274_v8 = vmul.f32 %v1446_v16, %v1252_v46  ;;  %v238_v20 = vmul.f32 %v3096_v33, %v3096_v33  ;;  %v440_v46 = vadd.f32 1.0, %v256_v52  ;;  %v778_v52 = vmul.f32 %v770_v14, %v3107_v57 }
 0x202   :  { %v965_v2 = vadd.f32 1.0, %v781_v12 }
 0x203   :  { %v1279_v48 = vadd.f32 %v1274_v8, %v1272_v21  ;;  %v2780_v58 = vpop.xlane.xlu1 %807  ;;  %v3097_v21 = vld [vmem:[#allocation10_spill] sm:$0xff]  ;;  %v257_v8 = vmax.f32 %v249_v28, 1e-06  ;;  %v246_v54 = vmul.f32 %v238_v20, %v3102_v53  ;;  %1453 = vlog2.f32 %v440_v46 }
 0x204   :  { %v2794_v16 = vpop.xlane.xlu0 %804  ;;  %v776_v22 = vmul.f32 %v768_v19, %v3097_v21  ;;  %v966_v20 = vadd.f32 1.0, %v782_v61 }
 0x205   :  { %v1448_v35 = vpop.eup %1447  ;;  %1280 = vadd.xlane.f32.xlu0 %v1279_v48  ;;  %v780_v48 = vmax.f32 %v772_v26, 1e-06  ;;  %v441_v15 = vadd.f32 1.0, %v257_v8  ;;  %v254_v3 = vmax.f32 %v246_v54, 1e-06  ;;  %v304_v8 = vmul.f32 0.00390625, %v2762_v29 }
 0x206   :  { %v1450_v37 = vpop.eup %1449  ;;  %v1276_v40 = vmul.f32 %v1448_v35, %v1253_v27  ;;  %v3098_v27 = vld [vmem:[#allocation11_spill] sm:$0xff]  ;;  %v784_v6 = vmax.f32 %v776_v22, 1e-06 }
 0x207   :  { %v1278_v45 = vmul.f32 %v1450_v37, %v1254_v11  ;;  %v245_v35 = vmul.f32 %v237_v25, %v3098_v27  ;;  %v3099_v11 = vld [vmem:[#allocation49_spill] sm:$0xff]  ;;  %v964_v59 = vadd.f32 1.0, %v780_v48  ;;  %v438_v25 = vadd.f32 1.0, %v254_v3 }
 0x208   :  { %v769_v37 = vmul.f32 %v3099_v11, %v3099_v11  ;;  %v2811_v30 = vpop.xlane.xlu0 %816  ;;  %v968_v18 = vadd.f32 1.0, %v784_v6 }
 0x209   :  { %v1282_v50 = vadd.f32 %v1278_v45, %v1276_v40  ;;  %v439_v40 = vadd.f32 1.0, %v255_v23  ;;  %v2800_v45 = vpop.xlane.xlu1 %819  ;;  %v253_v36 = vmax.f32 %v245_v35, 1e-06  ;;  %v786_v23 = vmax.f32 %v778_v52, 1e-06 }
 0x20a   :  { %v777_v5 = vmul.f32 %v769_v37, %v3104_v62  ;;  %v1452_v9 = vpop.eup %1451  ;;  %v832_v44 = vmul.f32 0.00390625, %v2800_v45  ;;  %v831_v63 = vmul.f32 0.00390625, %v2811_v30 }
 0x20b   :  { %1283 = vadd.xlane.f32.xlu1 %v1282_v50  ;;  %v3100_v50 = vld [vmem:[#allocation9_spill] sm:$0xff]  ;;  %1455 = vlog2.f32 %v439_v40  ;;  %v437_v55 = vadd.f32 1.0, %v253_v36  ;;  %v970_v39 = vadd.f32 1.0, %v786_v23 }
 0x20c   :  { %v775_v0 = vmul.f32 %v767_v49, %v3100_v50  ;;  %1457 = vlog2.f32 %v435_v31  ;;  %v785_v28 = vmax.f32 %v777_v5, 1e-06  ;;  %v283_v10 = vpop.xlane.xlu0 %282  ;;  %v303_v31 = vmul.f32 0.00390625, %v2774_v56 }
 0x20d   :  { %1459 = vlog2.f32 %v441_v15  ;;  %v295_v19 = vpop.xlane.xlu1 %294  ;;  %v446_v56 = vmul.f32 0.6931472, %v1452_v9 }
 0x20e   :  { %v783_v32 = vmax.f32 %v775_v0, 1e-06  ;;  %1461 = vlog2.f32 %v964_v59  ;;  %v969_v49 = vadd.f32 1.0, %v785_v28  ;;  %v305_v40 = vmul.f32 0.00390625, %v295_v19 }
 0x20f   :  { %1463 = vlog2.f32 %v442_v51  ;;  %v300_v0 = vmul.f32 0.00390625, %v2752_v41  ;;  %v301_v41 = vmul.f32 0.00390625, %v283_v10  ;;  %v827_v19 = vmul.f32 0.00390625, %v2794_v16 }
 0x210   :  { %v967_v26 = vadd.f32 1.0, %v783_v32  ;;  %1465 = vlog2.f32 %v963_v4  ;;  %v1454_v33 = vpop.eup %1453 }
 0x211   :  { %1467 = vlog2.f32 %v968_v18  ;;  %v823_v43 = vpop.xlane.xlu1 %822  ;;  %v811_v46 = vpop.xlane.xlu0 %810  ;;  %v454_v11 = vmul.f32 0.6931472, %v1454_v33  ;;  %v460_v5 = vmul.f32 %v446_v56, %v300_v0  ;;  %v828_v18 = vmul.f32 0.00390625, %v2780_v58 }
 0x212   :  { %1469 = vlog2.f32 %v437_v55  ;;  %v829_v9 = vmul.f32 0.00390625, %v811_v46 }
 0x213   :  { %1471 = vlog2.f32 %v967_v26  ;;  %v464_v17 = vmul.f32 %v454_v11, %v304_v8 }
 0x214   :  { %1473 = vlog2.f32 %v438_v25  ;;  %v833_v25 = vmul.f32 0.00390625, %v823_v43 }
 0x215   :  { %1475 = vlog2.f32 %v969_v49  ;;  %v298_v48 = vpop.xlane.xlu1 %297  ;;  %v286_v29 = vpop.xlane.xlu0 %285 }
 0x216   :  { %1477 = vlog2.f32 %v965_v2  ;;  %v306_v54 = vmul.f32 0.00390625, %v298_v48  ;;  %v302_v57 = vmul.f32 0.00390625, %v286_v29 }
 0x217   :  { %1479 = vlog2.f32 %v970_v39 }
 0x218   :  { %v1456_v21 = vpop.eup %1455  ;;  %1481 = vlog2.f32 %v966_v20 }
 0x219   :  { %v1458_v22 = vpop.eup %1457  ;;  %v452_v37 = vmul.f32 0.6931472, %v1456_v21  ;;  %v826_v36 = vpop.xlane.xlu1 %825 }
 0x21a   :  { %v1460_v27 = vpop.eup %1459  ;;  %v444_v14 = vmul.f32 0.6931472, %v1458_v22  ;;  %v814_v24 = vpop.xlane.xlu0 %813  ;;  %v834_v58 = vmul.f32 0.00390625, %v826_v36 }
 0x21b   :  { %v1462_v35 = vpop.eup %1461  ;;  %v463_v38 = vmul.f32 %v452_v37, %v303_v31  ;;  %v456_v53 = vmul.f32 0.6931472, %v1460_v27  ;;  %v830_v27 = vmul.f32 0.00390625, %v814_v24 }
 0x21c   :  { %v1464_v50 = vpop.eup %1463  ;;  %v459_v7 = vmul.f32 %v444_v14, %v299_v34  ;;  %v974_v42 = vmul.f32 0.6931472, %v1462_v35 }
 0x21d   :  { %v1466_v13 = vpop.eup %1465  ;;  %v465_v15 = vmul.f32 %v456_v53, %v305_v40  ;;  %v458_v59 = vmul.f32 0.6931472, %v1464_v50  ;;  %v476_v47 = vadd.f32 %v464_v17, %v463_v38 }
 0x21e   :  { %v1468_v1 = vpop.eup %1467  ;;  %v972_v26 = vmul.f32 0.6931472, %v1466_v13  ;;  %v467_v10 = vadd.f32 %v460_v5, %v459_v7  ;;  %v988_v16 = vmul.f32 %v974_v42, %v828_v18 }
 0x21f   :  { %v1470_v6 = vpop.eup %1469  ;;  %v466_v51 = vmul.f32 %v458_v59, %v306_v54  ;;  %v982_v4 = vmul.f32 0.6931472, %v1468_v1  ;;  %v477_v28 = vadd.f32 %v476_v47, %v465_v15 }
 0x220   :  { %v1472_v62 = vpop.eup %1471  ;;  %v448_v3 = vmul.f32 0.6931472, %v1470_v6  ;;  %v987_v21 = vmul.f32 %v972_v26, %v827_v19 }
 0x221   :  { %v1474_v32 = vpop.eup %1473  ;;  %v980_v55 = vmul.f32 0.6931472, %v1472_v62  ;;  %v992_v30 = vmul.f32 %v982_v4, %v832_v44  ;;  %v478_v61 = vadd.f32 %v477_v28, %v466_v51 }
 0x222   :  { %v1476_v52 = vpop.eup %1475  ;;  %v461_v12 = vmul.f32 %v448_v3, %v301_v41  ;;  %v450_v23 = vmul.f32 0.6931472, %v1474_v32  ;;  %v995_v13 = vadd.f32 %v988_v16, %v987_v21 }
 0x223   :  { %v1478_v60 = vpop.eup %1477  ;;  %v991_v49 = vmul.f32 %v980_v55, %v831_v63  ;;  %v984_v39 = vmul.f32 0.6931472, %v1476_v52  ;;  %v479_v35 = vrot.slane %v478_v61, 4 }
 0x224   :  { %v1480_v45 = vpop.eup %1479  ;;  %v538_v2 = vpop.xlane.xlu1 %537  ;;  %v462_v33 = vmul.f32 %v450_v23, %v302_v57  ;;  %v976_v22 = vmul.f32 0.6931472, %v1478_v60  ;;  %v468_v8 = vadd.f32 %v467_v10, %v461_v12 }
 0x225   :  { %v1482_v20 = vpop.eup %1481  ;;  %v993_v31 = vmul.f32 %v984_v39, %v833_v25  ;;  %v986_v48 = vmul.f32 0.6931472, %v1480_v45  ;;  %v1004_v43 = vadd.f32 %v992_v30, %v991_v49  ;;  %v480_v38 = vadd.f32 %v479_v35, %v478_v61 }
 0x226   :  { %v989_v37 = vmul.f32 %v976_v22, %v829_v9  ;;  %v469_v40 = vadd.f32 %v468_v8, %v462_v33  ;;  %v978_v0 = vmul.f32 0.6931472, %v1482_v20 }
 0x227   :  { %v994_v50 = vmul.f32 %v986_v48, %v834_v58  ;;  %v1005_v46 = vadd.f32 %v1004_v43, %v993_v31  ;;  %v481_v14 = vrot.slane %v480_v38, 2 }
 0x228   :  { %v990_v17 = vmul.f32 %v978_v0, %v830_v27  ;;  %v996_v53 = vadd.f32 %v995_v13, %v989_v37  ;;  %v470_v54 = vrot.slane %v469_v40, 4 }
 0x229   :  { %v1006_v29 = vadd.f32 %v1005_v46, %v994_v50  ;;  %v482_v32 = vadd.f32 %v481_v14, %v480_v38 }
 0x22a   :  { %v535_v11 = vpop.xlane.xlu0 %534  ;;  %v997_v56 = vadd.f32 %v996_v53, %v990_v17  ;;  %v471_v59 = vadd.f32 %v470_v54, %v469_v40 }
 0x22b   :  { %v1007_v36 = vrot.slane %v1006_v29, 4  ;;  %v483_v52 = vrot.slane %v482_v32, 1 }
 0x22c   :  { %v1066_v34 = vpop.xlane.xlu1 %1065  ;;  %v998_v5 = vrot.slane %v997_v56, 4  ;;  %v472_v47 = vrot.slane %v471_v59, 2 }
 0x22d   :  { %v1158_v6 = vadd.f32 %v1066_v34, %v538_v2  ;;  %v1008_v44 = vadd.f32 %v1007_v36, %v1006_v29  ;;  %v484_v26 = vadd.f32 %v483_v52, %v482_v32 }
 0x22e   :  { %v999_v4 = vadd.f32 %v998_v5, %v997_v56  ;;  %v473_v28 = vadd.f32 %v472_v47, %v471_v59 }
 0x22f   :  { %v1009_v18 = vrot.slane %v1008_v44, 2  ;;  %v486_v30 = vmul.f32 0.03125, %v484_v26 }
 0x230   :  { %v1000_v24 = vrot.slane %v999_v4, 2  ;;  %v474_v25 = vrot.slane %v473_v28, 1 }
 0x231   :  { %v1010_v23 = vadd.f32 %v1009_v18, %v1008_v44 }
 0x232   :  { %v1001_v10 = vadd.f32 %v1000_v24, %v999_v4  ;;  %v475_v61 = vadd.f32 %v474_v25, %v473_v28 }
 0x233   :  { %v1011_v2 = vrot.slane %v1010_v23, 1 }
 0x234   :  { %v1002_v33 = vrot.slane %v1001_v10, 1  ;;  %v485_v16 = vmul.f32 0.03125, %v475_v61 }
 0x235   :  { %v1012_v22 = vadd.f32 %v1011_v2, %v1010_v23 }
 0x236   :  { %v1003_v48 = vadd.f32 %v1002_v33, %v1001_v10 }
 0x237   :  { %v1014_v35 = vmul.f32 0.03125, %v1012_v22 }
 0x238   :  { %v1063_v1 = vpop.xlane.xlu0 %1062  ;;  %v1013_v0 = vmul.f32 0.03125, %v1003_v48 }
 0x239   :  { %v1157_v7 = vadd.f32 %v1063_v1, %v535_v11 }
 0x249   :  { %v1156_v15 = vpop.xlane.xlu1 %1155 }
 0x24a   :  { %v1160_v62 = vsub.f32 %v1158_v6, %v1156_v15 }
 0x24c   :  { %1483 = vrcp.f32 %v1160_v62 }
 0x24d   :  { %v1153_v42 = vpop.xlane.xlu0 %1152  ;;  %v1084_v41 = vpop.xlane.xlu1 %1083 }
 0x24e   :  { %v1159_v63 = vsub.f32 %v1157_v7, %v1153_v42  ;;  %v1096_v51 = vmul.f32 0.00390625, %v1084_v41 }
 0x250   :  { %1311 = vst.msk [vmem:[%s2868_s2 + $0x28] sm:$0xff] %vm1305_vm11, %v1096_v51  ;;  %1485 = vrcp.f32 %v1159_v63 }
 0x251   :  { %v1078_v3 = vpop.xlane.xlu0 %1077 }
 0x252   :  { %v1090_v57 = vpop.xlane.xlu1 %1089  ;;  %v1094_v19 = vmul.f32 0.00390625, %v1078_v3 }
 0x253   :  { %v1098_v55 = vmul.f32 0.00390625, %v1090_v57 }
 0x254   :  { %1309 = vst.msk [vmem:[%s2868_s2 + $0x18] sm:$0xff] %vm1305_vm11, %v1094_v19 }
 0x255   :  { %1313 = vst.msk [vmem:[%s2868_s2 + $0x38] sm:$0xff] %vm1305_vm11, %v1098_v55  ;;  %v1087_v60 = vpop.xlane.xlu0 %1086 }
 0x256   :  { %v1097_v12 = vmul.f32 0.00390625, %v1087_v60 }
 0x258   :  { %1312 = vst.msk [vmem:[%s2868_s2 + $0x30] sm:$0xff] %vm1305_vm11, %v1097_v12 }
 0x259   :  { %v528_v45 = vpop.xlane.xlu1 %527  ;;  %v1484_v9 = vpop.eup %1483 }
 0x25a   :  { %v530_v49 = vmul.f32 0.00390625, %v528_v45  ;;  %v1164_v8 = vmul.f32 %v1484_v9, %v1156_v15 }
 0x25c   :  { %v532_v39 = vmul.f32 %v530_v49, %v486_v30  ;;  %v1166_v37 = vsub.f32 1.0, %v1164_v8 }
 0x25d   :  { %v525_v58 = vpop.xlane.xlu0 %524  ;;  %v1486_v20 = vpop.eup %1485 }
 0x25e   :  { %1316 = vst.msk [vmem:[%s2868_s2 + $0x20] sm:$0x1] %vm1314_vm2, %v532_v39  ;;  %v529_v21 = vmul.f32 0.00390625, %v525_v58  ;;  %v1162_v27 = vmul.f32 %v1486_v20, %v1153_v42 }
 0x260   :  { %v531_v31 = vmul.f32 %v529_v21, %v485_v16  ;;  %v1165_v13 = vsub.f32 1.0, %v1162_v27 }
 0x262   :  { %v1056_v43 = vpop.xlane.xlu1 %1055  ;;  %1315 = vst.msk [vmem:[%s2868_s2] sm:$0x1] %vm1314_vm2, %v531_v31 }
 0x263   :  { %v1058_v11 = vmul.f32 0.00390625, %v1056_v43 }
 0x264   :  { %v1053_v40 = vpop.xlane.xlu0 %1052 }
 0x265   :  { %v1060_v50 = vmul.f32 %v1058_v11, %v1014_v35  ;;  %v1057_v34 = vmul.f32 0.00390625, %v1053_v40 }
 0x267   :  { %1319 = vst.msk [vmem:[%s2868_s2 + $0x20] sm:$0x1] %vm1317_vm3, %v1060_v50  ;;  %v1059_v46 = vmul.f32 %v1057_v34, %v1013_v0 }
 0x268   :  { %1322 = vst.msk [vmem:[%s2868_s2 + $0x20] sm:$0x1] %vm1320_vm4, %v1166_v37 }
 0x269   :  { %1318 = vst.msk [vmem:[%s2868_s2] sm:$0x1] %vm1317_vm3, %v1059_v46 }
 0x26a   :  { %1321 = vst.msk [vmem:[%s2868_s2] sm:$0x1] %vm1320_vm4, %v1165_v13 }
 0x28e   :  { %v1281_v17 = vpop.xlane.xlu0 %1280 }
 0x28f   :  { %v1285_v38 = vmul.f32 0.00390625, %v1281_v17 }
 0x291   :  { %1324 = vst.msk [vmem:[%s2868_s2] sm:$0x1] %vm1323_vm5, %v1285_v38 }
 0x294   :  { %v1284_v53 = vpop.xlane.xlu1 %1283 }
 0x295   :  { %v1286_v54 = vmul.f32 0.00390625, %v1284_v53 }
 0x297   :  { %1325 = vst.msk [vmem:[%s2868_s2 + $0x20] sm:$0x1] %vm1323_vm5, %v1286_v54 }

// kernel: _forward_impl.3
= control target key start
LH: loop header
LB: loop body
LE: loop exit
PB: predicated region body
PF: predicated region fallthrough
CT: control target
= control target key end

     0   :  { %vm139_vm0 = vcmask 523264   ;;  %s8384_s0 = inlined_call_operand.vmem [shape: bf16[2,128,64], index: 0, kind: input, shape index: {}]   ;;  %s8385_s1 = inlined_call_operand.vmem [shape: bf16[2,128,64], index: 1, kind: input, shape index: {}]   ;;  %s8386_s2 = inlined_call_operand.vmem [shape: f32[2,128,8], index: 2, kind: output, shape index: {}]  }
   0x1   :  { %v3943_v0 = vld [vmem:[%s8384_s0] sm:$0xff]   ;;  %v3948_v1 = vld [vmem:[%s8384_s0 + $0x8] sm:$0xff]   ;;  %v3957_v6 = vld [vmem:[%s8384_s0 + $0x10] sm:$0xff]  }
   0x2   :  { %v3351_v2 = vunpack.c.l.bf16 %v3943_v0  ;;  %v3355_v3 = vunpack.c.l.bf16 %v3948_v1  ;;  %v3352_v4 = vunpack.c.h.bf16 %v3943_v0  ;;  %v3356_v5 = vunpack.c.h.bf16 %v3948_v1  ;;  %v3976_v13 = vld [vmem:[%s8384_s0 + $0x18] sm:$0xff]   ;;  %v3989_v18 = vld [vmem:[%s8384_s0 + $0x20] sm:$0xff]   ;;  %v4002_v23 = vld [vmem:[%s8384_s0 + $0x28] sm:$0xff]  }
   0x3   :  { %v3359_v11 = vunpack.c.l.bf16 %v3957_v6  ;;  %v3360_v12 = vunpack.c.h.bf16 %v3957_v6  ;;  %v3363_v16 = vunpack.c.l.bf16 %v3976_v13  ;;  %v3364_v17 = vunpack.c.h.bf16 %v3976_v13  ;;  %v4015_v28 = vld [vmem:[%s8384_s0 + $0x30] sm:$0xff]   ;;  %v4028_v33 = vld [vmem:[%s8384_s0 + $0x38] sm:$0xff]   ;;  %v4041_v38 = vld [vmem:[%s8384_s0 + $0x40] sm:$0xff]  }
   0x4   :  { %v140_v7 = vsel %vm139_vm0, %v3351_v2, 0.0  ;;  %v146_v8 = vsel %vm139_vm0, %v3355_v3, 0.0  ;;  %v143_v9 = vsel %vm139_vm0, %v3352_v4, 0.0  ;;  %v149_v10 = vsel %vm139_vm0, %v3356_v5, 0.0  ;;  %v4054_v43 = vld [vmem:[%s8384_s0 + $0x48] sm:$0xff]   ;;  %v4067_v48 = vld [vmem:[%s8384_s0 + $0x50] sm:$0xff]  }
   0x5   :  { %141 = vadd.xlane.f32.xlu0 %v140_v7  ;;  %147 = vadd.xlane.f32.xlu1 %v146_v8  ;;  %v152_v14 = vsel %vm139_vm0, %v3359_v11, 0.0  ;;  %v155_v15 = vsel %vm139_vm0, %v3360_v12, 0.0  ;;  %v158_v19 = vsel %vm139_vm0, %v3363_v16, 0.0  ;;  %v161_v20 = vsel %vm139_vm0, %v3364_v17, 0.0  ;;  %v4080_v53 = vld [vmem:[%s8384_s0 + $0x58] sm:$0xff]   ;;  %v4093_v58 = vld [vmem:[%s8384_s0 + $0x60] sm:$0xff]  }
   0x6   :  { %v3367_v21 = vunpack.c.l.bf16 %v3989_v18  ;;  %v3368_v22 = vunpack.c.h.bf16 %v3989_v18  ;;  %v3371_v26 = vunpack.c.l.bf16 %v4002_v23  ;;  %v3372_v27 = vunpack.c.h.bf16 %v4002_v23  ;;  %v4106_v63 = vld [vmem:[%s8384_s0 + $0x68] sm:$0xff]  }
   0x7   :  { %v3375_v31 = vunpack.c.l.bf16 %v4015_v28  ;;  %v3376_v32 = vunpack.c.h.bf16 %v4015_v28  ;;  %v3379_v36 = vunpack.c.l.bf16 %v4028_v33  ;;  %v3380_v37 = vunpack.c.h.bf16 %v4028_v33 }
   0x8   :  { %v164_v24 = vsel %vm139_vm0, %v3367_v21, 0.0  ;;  %v167_v25 = vsel %vm139_vm0, %v3368_v22, 0.0  ;;  %v170_v29 = vsel %vm139_vm0, %v3371_v26, 0.0  ;;  %v173_v30 = vsel %vm139_vm0, %v3372_v27, 0.0 }
   0x9   :  { %144 = vadd.xlane.f32.xlu0 %v143_v9  ;;  %150 = vadd.xlane.f32.xlu1 %v149_v10  ;;  %v176_v34 = vsel %vm139_vm0, %v3375_v31, 0.0  ;;  %v179_v35 = vsel %vm139_vm0, %v3376_v32, 0.0  ;;  %v182_v39 = vsel %vm139_vm0, %v3379_v36, 0.0  ;;  %v185_v40 = vsel %vm139_vm0, %v3380_v37, 0.0 }
   0xa   :  { %v3383_v41 = vunpack.c.l.bf16 %v4041_v38  ;;  %v3384_v42 = vunpack.c.h.bf16 %v4041_v38  ;;  %v3387_v46 = vunpack.c.l.bf16 %v4054_v43  ;;  %v3388_v47 = vunpack.c.h.bf16 %v4054_v43 }
   0xb   :  { %v3391_v51 = vunpack.c.l.bf16 %v4067_v48  ;;  %v3392_v52 = vunpack.c.h.bf16 %v4067_v48  ;;  %v3395_v56 = vunpack.c.l.bf16 %v4080_v53  ;;  %v3396_v57 = vunpack.c.h.bf16 %v4080_v53 }
   0xc   :  { %v188_v44 = vsel %vm139_vm0, %v3383_v41, 0.0  ;;  %v191_v45 = vsel %vm139_vm0, %v3384_v42, 0.0  ;;  %v194_v49 = vsel %vm139_vm0, %v3387_v46, 0.0  ;;  %v197_v50 = vsel %vm139_vm0, %v3388_v47, 0.0 }
   0xd   :  { %153 = vadd.xlane.f32.xlu0 %v152_v14  ;;  %156 = vadd.xlane.f32.xlu1 %v155_v15  ;;  %v200_v54 = vsel %vm139_vm0, %v3391_v51, 0.0  ;;  %v203_v55 = vsel %vm139_vm0, %v3392_v52, 0.0  ;;  %v206_v59 = vsel %vm139_vm0, %v3395_v56, 0.0  ;;  %v209_v60 = vsel %vm139_vm0, %v3396_v57, 0.0  ;;  %v4119_v14 = vld [vmem:[%s8384_s0 + $0x70] sm:$0xff]  }
   0xe   :  { %v3399_v61 = vunpack.c.l.bf16 %v4093_v58  ;;  %v3400_v62 = vunpack.c.h.bf16 %v4093_v58  ;;  %v3403_v9 = vunpack.c.l.bf16 %v4106_v63  ;;  %v3404_v10 = vunpack.c.h.bf16 %v4106_v63 }
  0x10   :  { %v212_v7 = vsel %vm139_vm0, %v3399_v61, 0.0  ;;  %v215_v8 = vsel %vm139_vm0, %v3400_v62, 0.0  ;;  %v218_v15 = vsel %vm139_vm0, %v3403_v9, 0.0 }
  0x11   :  { %159 = vadd.xlane.f32.xlu0 %v158_v19  ;;  %162 = vadd.xlane.f32.xlu1 %v161_v20  ;;  %v221_v19 = vsel %vm139_vm0, %v3404_v10, 0.0  ;;  %v3407_v20 = vunpack.c.l.bf16 %v4119_v14 }
  0x15   :  { %165 = vadd.xlane.f32.xlu0 %v164_v24  ;;  %168 = vadd.xlane.f32.xlu1 %v167_v25  ;;  %v8400_v24 = vunpack.c.h.bf16 %v4119_v14  ;;  %v4132_v25 = vld [vmem:[%s8384_s0 + $0x78] sm:$0xff]  }
  0x19   :  { %171 = vadd.xlane.f32.xlu0 %v170_v29  ;;  %174 = vadd.xlane.f32.xlu1 %v173_v30  ;;  %v224_v29 = vsel %vm139_vm0, %v3407_v20, 0.0  ;;  %v227_v30 = vsel %vm139_vm0, %v8400_v24, 0.0 }
  0x1d   :  { %177 = vadd.xlane.f32.xlu0 %v176_v34  ;;  %180 = vadd.xlane.f32.xlu1 %v179_v35  ;;  %v8399_v34 = vunpack.c.l.bf16 %v4132_v25  ;;  %v8397_v35 = vunpack.c.h.bf16 %v4132_v25 }
  0x21   :  { %183 = vadd.xlane.f32.xlu0 %v182_v39  ;;  %186 = vadd.xlane.f32.xlu1 %v185_v40  ;;  %v4145_v39 = vld [vmem:[%s8385_s1] sm:$0xff]   ;;  %v230_v40 = vsel %vm139_vm0, %v8399_v34, 0.0 }
  0x25   :  { %189 = vadd.xlane.f32.xlu0 %v188_v44  ;;  %192 = vadd.xlane.f32.xlu1 %v191_v45  ;;  %v233_v44 = vsel %vm139_vm0, %v8397_v35, 0.0  ;;  %v8395_v45 = vunpack.c.h.bf16 %v4145_v39 }
  0x29   :  { %195 = vadd.xlane.f32.xlu0 %v194_v49  ;;  %198 = vadd.xlane.f32.xlu1 %v197_v50  ;;  %v8391_v49 = vunpack.c.l.bf16 %v4145_v39  ;;  %v4158_v50 = vld [vmem:[%s8385_s1 + $0x40] sm:$0xff]  }
  0x2d   :  { %201 = vadd.xlane.f32.xlu0 %v200_v54  ;;  %204 = vadd.xlane.f32.xlu1 %v203_v55  ;;  %v1597_v54 = vsel %vm139_vm0, %v8395_v45, 0.0  ;;  %v1594_v55 = vsel %vm139_vm0, %v8391_v49, 0.0 }
  0x31   :  { %207 = vadd.xlane.f32.xlu0 %v206_v59  ;;  %210 = vadd.xlane.f32.xlu1 %v209_v60  ;;  %v8390_v59 = vunpack.c.h.bf16 %v4158_v50  ;;  %v8387_v60 = vunpack.c.l.bf16 %v4158_v50 }
  0x35   :  { %213 = vadd.xlane.f32.xlu0 %v212_v7  ;;  %216 = vadd.xlane.f32.xlu1 %v215_v8  ;;  %v4171_v7 = vld [vmem:[%s8385_s1 + $0x48] sm:$0xff]  }
  0x36   :  { %v4176_v8 = vld [vmem:[%s8385_s1 + $0x8] sm:$0xff]  }
  0x39   :  { %219 = vadd.xlane.f32.xlu0 %v218_v15  ;;  %222 = vadd.xlane.f32.xlu1 %v221_v19  ;;  %v1645_v15 = vsel %vm139_vm0, %v8390_v59, 0.0  ;;  %v1642_v19 = vsel %vm139_vm0, %v8387_v60, 0.0  ;;  %v4197_v60 = vld [vmem:[%s8385_s1 + $0x50] sm:$0xff]  }
  0x3d   :  { %225 = vadd.xlane.f32.xlu0 %v224_v29  ;;  %228 = vadd.xlane.f32.xlu1 %v227_v30  ;;  %v8389_v29 = vunpack.c.l.bf16 %v4171_v7  ;;  %v8388_v30 = vunpack.c.l.bf16 %v4176_v8 }
  0x41   :  { %231 = vadd.xlane.f32.xlu0 %v230_v40  ;;  %234 = vadd.xlane.f32.xlu1 %v233_v44  ;;  %v1648_v40 = vsel %vm139_vm0, %v8389_v29, 0.0  ;;  %v1600_v44 = vsel %vm139_vm0, %v8388_v30, 0.0  ;;  %v8394_v29 = vunpack.c.l.bf16 %v4197_v60 }
  0x43   :  { %v1654_v49 = vsel %vm139_vm0, %v8394_v29, 0.0 }
  0x45   :  { %1598 = vadd.xlane.f32.xlu0 %v1597_v54  ;;  %1595 = vadd.xlane.f32.xlu1 %v1594_v55  ;;  %v8392_v54 = vunpack.c.h.bf16 %v4171_v7  ;;  %v8393_v55 = vunpack.c.h.bf16 %v4176_v8 }
  0x47   :  { %v1603_v30 = vsel %vm139_vm0, %v8393_v55, 0.0 }
  0x49   :  { %1646 = vadd.xlane.f32.xlu0 %v1645_v15  ;;  %1643 = vadd.xlane.f32.xlu1 %v1642_v19  ;;  %v4202_v15 = vld [vmem:[%s8385_s1 + $0x10] sm:$0xff]   ;;  %v1651_v19 = vsel %vm139_vm0, %v8392_v54, 0.0 }
  0x4a   :  { %v8396_v59 = vunpack.c.l.bf16 %v4202_v15  ;;  %v8401_v54 = vunpack.c.h.bf16 %v4202_v15 }
  0x4d   :  { %1649 = vadd.xlane.f32.xlu0 %v1648_v40  ;;  %1601 = vadd.xlane.f32.xlu1 %v1600_v44  ;;  %v1606_v40 = vsel %vm139_vm0, %v8396_v59, 0.0  ;;  %v8398_v44 = vunpack.c.h.bf16 %v4197_v60 }
  0x4f   :  { %v1657_v55 = vsel %vm139_vm0, %v8398_v44, 0.0 }
  0x51   :  { %1652 = vadd.xlane.f32.xlu0 %v1651_v19  ;;  %1604 = vadd.xlane.f32.xlu1 %v1603_v30  ;;  %v1609_v30 = vsel %vm139_vm0, %v8401_v54, 0.0 }
  0x55   :  { %1655 = vadd.xlane.f32.xlu0 %v1654_v49  ;;  %1607 = vadd.xlane.f32.xlu1 %v1606_v40 }
  0x59   :  { %1658 = vadd.xlane.f32.xlu0 %v1657_v55  ;;  %1610 = vadd.xlane.f32.xlu1 %v1609_v30 }
  0x8e   :  { %v142_v19 = vpop.xlane.xlu0 %141  ;;  %v148_v29 = vpop.xlane.xlu1 %147 }
  0x8f   :  { %v236_v45 = vmul.f32 0.015625, %v142_v19  ;;  %v238_v59 = vmul.f32 0.015625, %v148_v29 }
  0x91   :  { %v4228_v35 = vsub.f32 %v3351_v2, %v236_v45  ;;  %v4232_v49 = vsub.f32 %v3355_v3, %v238_v59 }
  0x92   :  { %v145_v40 = vpop.xlane.xlu0 %144  ;;  %v151_v44 = vpop.xlane.xlu1 %150 }
  0x93   :  { %v237_v34 = vmul.f32 0.015625, %v145_v40  ;;  %v239_v24 = vmul.f32 0.015625, %v151_v44  ;;  %v300_v55 = vmul.f32 %v4228_v35, %v4228_v35  ;;  %v302_v30 = vmul.f32 %v4232_v49, %v4232_v49 }
  0x95   :  { %v4240_v29 = vsub.f32 %v3352_v4, %v237_v34  ;;  %v4244_v2 = vsub.f32 %v3356_v5, %v239_v24  ;;  %v332_v3 = vsel %vm139_vm0, %v300_v55, 0.0  ;;  %v338_v44 = vsel %vm139_vm0, %v302_v30, 0.0 }
  0x96   :  { %333 = vadd.xlane.f32.xlu0 %v332_v3  ;;  %v154_v45 = vpop.xlane.xlu0 %153  ;;  %v157_v59 = vpop.xlane.xlu1 %156 }
  0x97   :  { %v240_v19 = vmul.f32 0.015625, %v154_v45  ;;  %v241_v40 = vmul.f32 0.015625, %v157_v59  ;;  %v301_v54 = vmul.f32 %v4240_v29, %v4240_v29  ;;  %v303_v0 = vmul.f32 %v4244_v2, %v4244_v2 }
  0x99   :  { %v4254_v1 = vsub.f32 %v3359_v11, %v240_v19  ;;  %v4258_v4 = vsub.f32 %v3360_v12, %v241_v40  ;;  %v335_v5 = vsel %vm139_vm0, %v301_v54, 0.0  ;;  %v341_v55 = vsel %vm139_vm0, %v303_v0, 0.0 }
  0x9a   :  { %339 = vadd.xlane.f32.xlu0 %v338_v44  ;;  %336 = vadd.xlane.f32.xlu1 %v335_v5  ;;  %v160_v24 = vpop.xlane.xlu0 %159  ;;  %v163_v34 = vpop.xlane.xlu1 %162 }
  0x9b   :  { %v242_v30 = vmul.f32 0.015625, %v160_v24  ;;  %v243_v3 = vmul.f32 0.015625, %v163_v34  ;;  %v304_v45 = vmul.f32 %v4254_v1, %v4254_v1  ;;  %v305_v11 = vmul.f32 %v4258_v4, %v4258_v4 }
  0x9d   :  { %v4268_v6 = vsub.f32 %v3363_v16, %v242_v30  ;;  %v4272_v12 = vsub.f32 %v3364_v17, %v243_v3  ;;  %v344_v54 = vsel %vm139_vm0, %v304_v45, 0.0  ;;  %v347_v19 = vsel %vm139_vm0, %v305_v11, 0.0 }
  0x9e   :  { %342 = vadd.xlane.f32.xlu1 %v341_v55  ;;  %345 = vadd.xlane.f32.xlu0 %v344_v54  ;;  %v166_v59 = vpop.xlane.xlu0 %165  ;;  %v169_v44 = vpop.xlane.xlu1 %168 }
  0x9f   :  { %v244_v40 = vmul.f32 0.015625, %v166_v59  ;;  %v245_v0 = vmul.f32 0.015625, %v169_v44  ;;  %v306_v5 = vmul.f32 %v4268_v6, %v4268_v6  ;;  %v307_v16 = vmul.f32 %v4272_v12, %v4272_v12 }
  0xa1   :  { %v4282_v13 = vsub.f32 %v3367_v21, %v244_v40  ;;  %v4286_v17 = vsub.f32 %v3368_v22, %v245_v0  ;;  %v350_v24 = vsel %vm139_vm0, %v306_v5, 0.0  ;;  %v353_v30 = vsel %vm139_vm0, %v307_v16, 0.0 }
  0xa2   :  { %348 = vadd.xlane.f32.xlu1 %v347_v19  ;;  %351 = vadd.xlane.f32.xlu0 %v350_v24  ;;  %v172_v34 = vpop.xlane.xlu0 %171  ;;  %v175_v55 = vpop.xlane.xlu1 %174 }
  0xa3   :  { %v246_v3 = vmul.f32 0.015625, %v172_v34  ;;  %v247_v45 = vmul.f32 0.015625, %v175_v55  ;;  %v308_v11 = vmul.f32 %v4282_v13, %v4282_v13  ;;  %v309_v21 = vmul.f32 %v4286_v17, %v4286_v17 }
  0xa5   :  { %v4296_v18 = vsub.f32 %v3371_v26, %v246_v3  ;;  %v4300_v22 = vsub.f32 %v3372_v27, %v247_v45  ;;  %v356_v54 = vsel %vm139_vm0, %v308_v11, 0.0  ;;  %v359_v19 = vsel %vm139_vm0, %v309_v21, 0.0 }
  0xa6   :  { %354 = vadd.xlane.f32.xlu1 %v353_v30  ;;  %357 = vadd.xlane.f32.xlu0 %v356_v54  ;;  %v178_v59 = vpop.xlane.xlu0 %177  ;;  %v181_v44 = vpop.xlane.xlu1 %180 }
  0xa7   :  { %8678 = vst [vmem:[#allocation2_spill] sm:$0xff] %v4296_v18  ;;  %8679 = vst [vmem:[#allocation3_spill] sm:$0xff] %v4300_v22  ;;  %v248_v40 = vmul.f32 0.015625, %v178_v59  ;;  %v249_v0 = vmul.f32 0.015625, %v181_v44  ;;  %v310_v5 = vmul.f32 %v4296_v18, %v4296_v18  ;;  %v311_v26 = vmul.f32 %v4300_v22, %v4300_v22 }
  0xa9   :  { %v4310_v23 = vsub.f32 %v3375_v31, %v248_v40  ;;  %v4314_v27 = vsub.f32 %v3376_v32, %v249_v0  ;;  %v362_v16 = vsel %vm139_vm0, %v310_v5, 0.0  ;;  %v365_v55 = vsel %vm139_vm0, %v311_v26, 0.0 }
  0xaa   :  { %360 = vadd.xlane.f32.xlu1 %v359_v19  ;;  %363 = vadd.xlane.f32.xlu0 %v362_v16  ;;  %v184_v24 = vpop.xlane.xlu0 %183  ;;  %v187_v34 = vpop.xlane.xlu1 %186 }
  0xab   :  { %8680 = vst [vmem:[#allocation4_spill] sm:$0xff] %v4310_v23  ;;  %8681 = vst [vmem:[#allocation5_spill] sm:$0xff] %v4314_v27  ;;  %v250_v30 = vmul.f32 0.015625, %v184_v24  ;;  %v251_v3 = vmul.f32 0.015625, %v187_v34  ;;  %v312_v45 = vmul.f32 %v4310_v23, %v4310_v23  ;;  %v313_v31 = vmul.f32 %v4314_v27, %v4314_v27 }
  0xad   :  { %v4324_v28 = vsub.f32 %v3379_v36, %v250_v30  ;;  %v4328_v32 = vsub.f32 %v3380_v37, %v251_v3  ;;  %v368_v11 = vsel %vm139_vm0, %v312_v45, 0.0  ;;  %v371_v59 = vsel %vm139_vm0, %v313_v31, 0.0 }
  0xae   :  { %366 = vadd.xlane.f32.xlu1 %v365_v55  ;;  %369 = vadd.xlane.f32.xlu0 %v368_v11  ;;  %v190_v21 = vpop.xlane.xlu0 %189  ;;  %v193_v54 = vpop.xlane.xlu1 %192 }
  0xaf   :  { %8682 = vst [vmem:[#allocation6_spill] sm:$0xff] %v4324_v28  ;;  %8683 = vst [vmem:[#allocation7_spill] sm:$0xff] %v4328_v32  ;;  %v252_v44 = vmul.f32 0.015625, %v190_v21  ;;  %v253_v19 = vmul.f32 0.015625, %v193_v54  ;;  %v314_v40 = vmul.f32 %v4324_v28, %v4324_v28  ;;  %v315_v36 = vmul.f32 %v4328_v32, %v4328_v32 }
  0xb1   :  { %v4338_v33 = vsub.f32 %v3383_v41, %v252_v44  ;;  %v4342_v37 = vsub.f32 %v3384_v42, %v253_v19  ;;  %v374_v0 = vsel %vm139_vm0, %v314_v40, 0.0  ;;  %v377_v16 = vsel %vm139_vm0, %v315_v36, 0.0 }
  0xb2   :  { %372 = vadd.xlane.f32.xlu1 %v371_v59  ;;  %375 = vadd.xlane.f32.xlu0 %v374_v0  ;;  %v196_v5 = vpop.xlane.xlu0 %195  ;;  %v199_v26 = vpop.xlane.xlu1 %198 }
  0xb3   :  { %8684 = vst [vmem:[#allocation8_spill] sm:$0xff] %v4338_v33  ;;  %8685 = vst [vmem:[#allocation9_spill] sm:$0xff] %v4342_v37  ;;  %v254_v24 = vmul.f32 0.015625, %v196_v5  ;;  %v255_v34 = vmul.f32 0.015625, %v199_v26  ;;  %v316_v55 = vmul.f32 %v4338_v33, %v4338_v33  ;;  %v317_v41 = vmul.f32 %v4342_v37, %v4342_v37 }
  0xb5   :  { %v4352_v38 = vsub.f32 %v3387_v46, %v254_v24  ;;  %v4356_v42 = vsub.f32 %v3388_v47, %v255_v34  ;;  %v380_v30 = vsel %vm139_vm0, %v316_v55, 0.0  ;;  %v383_v31 = vsel %vm139_vm0, %v317_v41, 0.0 }
  0xb6   :  { %378 = vadd.xlane.f32.xlu1 %v377_v16  ;;  %381 = vadd.xlane.f32.xlu0 %v380_v30  ;;  %v202_v3 = vpop.xlane.xlu0 %201  ;;  %v205_v45 = vpop.xlane.xlu1 %204 }
  0xb7   :  { %8686 = vst [vmem:[#allocation10_spill] sm:$0xff] %v4352_v38  ;;  %8687 = vst [vmem:[#allocation11_spill] sm:$0xff] %v4356_v42  ;;  %v256_v11 = vmul.f32 0.015625, %v202_v3  ;;  %v257_v21 = vmul.f32 0.015625, %v205_v45  ;;  %v318_v54 = vmul.f32 %v4352_v38, %v4352_v38  ;;  %v319_v46 = vmul.f32 %v4356_v42, %v4356_v42 }
  0xb9   :  { %v4366_v43 = vsub.f32 %v3391_v51, %v256_v11  ;;  %v4370_v47 = vsub.f32 %v3392_v52, %v257_v21  ;;  %v386_v59 = vsel %vm139_vm0, %v318_v54, 0.0  ;;  %v389_v40 = vsel %vm139_vm0, %v319_v46, 0.0 }
  0xba   :  { %384 = vadd.xlane.f32.xlu1 %v383_v31  ;;  %387 = vadd.xlane.f32.xlu0 %v386_v59  ;;  %v208_v44 = vpop.xlane.xlu0 %207  ;;  %v211_v19 = vpop.xlane.xlu1 %210 }
  0xbb   :  { %8688 = vst [vmem:[#allocation12_spill] sm:$0xff] %v4366_v43  ;;  %8689 = vst [vmem:[#allocation13_spill] sm:$0xff] %v4370_v47  ;;  %v258_v36 = vmul.f32 0.015625, %v208_v44  ;;  %v259_v0 = vmul.f32 0.015625, %v211_v19  ;;  %v320_v5 = vmul.f32 %v4366_v43, %v4366_v43  ;;  %v321_v51 = vmul.f32 %v4370_v47, %v4370_v47 }
  0xbd   :  { %v4380_v48 = vsub.f32 %v3395_v56, %v258_v36  ;;  %v4384_v52 = vsub.f32 %v3396_v57, %v259_v0  ;;  %v392_v26 = vsel %vm139_vm0, %v320_v5, 0.0  ;;  %v395_v34 = vsel %vm139_vm0, %v321_v51, 0.0 }
  0xbe   :  { %390 = vadd.xlane.f32.xlu1 %v389_v40  ;;  %393 = vadd.xlane.f32.xlu0 %v392_v26  ;;  %v214_v16 = vpop.xlane.xlu0 %213  ;;  %v217_v24 = vpop.xlane.xlu1 %216 }
  0xbf   :  { %8690 = vst [vmem:[#allocation14_spill] sm:$0xff] %v4380_v48  ;;  %8691 = vst [vmem:[#allocation15_spill] sm:$0xff] %v4384_v52  ;;  %v260_v55 = vmul.f32 0.015625, %v214_v16  ;;  %v261_v41 = vmul.f32 0.015625, %v217_v24  ;;  %v322_v30 = vmul.f32 %v4380_v48, %v4380_v48  ;;  %v323_v56 = vmul.f32 %v4384_v52, %v4384_v52 }
  0xc1   :  { %v4394_v53 = vsub.f32 %v3399_v61, %v260_v55  ;;  %v4398_v57 = vsub.f32 %v3400_v62, %v261_v41  ;;  %v398_v3 = vsel %vm139_vm0, %v322_v30, 0.0  ;;  %v401_v11 = vsel %vm139_vm0, %v323_v56, 0.0 }
  0xc2   :  { %396 = vadd.xlane.f32.xlu1 %v395_v34  ;;  %399 = vadd.xlane.f32.xlu0 %v398_v3  ;;  %v220_v45 = vpop.xlane.xlu0 %219  ;;  %v223_v31 = vpop.xlane.xlu1 %222  ;;  %v8699_v56 = vunpack.c.l.bf16 %v4132_v25 }
  0xc3   :  { %8692 = vst [vmem:[#allocation16_spill] sm:$0xff] %v4394_v53  ;;  %8693 = vst [vmem:[#allocation17_spill] sm:$0xff] %v4398_v57  ;;  %v262_v21 = vmul.f32 0.015625, %v220_v45  ;;  %v263_v54 = vmul.f32 0.015625, %v223_v31  ;;  %v324_v46 = vmul.f32 %v4394_v53, %v4394_v53  ;;  %v325_v61 = vmul.f32 %v4398_v57, %v4398_v57 }
  0xc4   :  { %v8701_v45 = vunpack.c.h.bf16 %v4132_v25  ;;  %v4457_v25 = vld [vmem:[%s8385_s1 + $0x18] sm:$0xff]  }
  0xc5   :  { %v4408_v58 = vsub.f32 %v3403_v9, %v262_v21  ;;  %v4412_v62 = vsub.f32 %v3404_v10, %v263_v54  ;;  %v404_v59 = vsel %vm139_vm0, %v324_v46, 0.0  ;;  %v407_v40 = vsel %vm139_vm0, %v325_v61, 0.0 }
  0xc6   :  { %402 = vadd.xlane.f32.xlu1 %v401_v11  ;;  %405 = vadd.xlane.f32.xlu0 %v404_v59  ;;  %v226_v44 = vpop.xlane.xlu0 %225  ;;  %v229_v19 = vpop.xlane.xlu1 %228  ;;  %v8697_v10 = vunpack.c.h.bf16 %v4119_v14  ;;  %v4437_v14 = vld [vmem:[%s8385_s1 + $0x58] sm:$0xff]  }
  0xc7   :  { %8694 = vst [vmem:[#allocation18_spill] sm:$0xff] %v4408_v58  ;;  %8695 = vst [vmem:[#allocation19_spill] sm:$0xff] %v4412_v62  ;;  %v264_v36 = vmul.f32 0.015625, %v226_v44  ;;  %v265_v0 = vmul.f32 0.015625, %v229_v19  ;;  %v326_v5 = vmul.f32 %v4408_v58, %v4408_v58  ;;  %v327_v9 = vmul.f32 %v4412_v62, %v4412_v62 }
  0xc8   :  { %v8416_v61 = vunpack.c.l.bf16 %v4437_v14  ;;  %v8749_v27 = vunpack.c.l.bf16 %v4437_v14 }
  0xc9   :  { %v4422_v63 = vsub.f32 %v3407_v20, %v264_v36  ;;  %v4426_v51 = vsub.f32 %v8697_v10, %v265_v0  ;;  %v410_v26 = vsel %vm139_vm0, %v326_v5, 0.0  ;;  %v413_v34 = vsel %vm139_vm0, %v327_v9, 0.0  ;;  %v4469_v0 = vld [vmem:[%s8385_s1 + $0x60] sm:$0xff]  }
  0xca   :  { %408 = vadd.xlane.f32.xlu1 %v407_v40  ;;  %411 = vadd.xlane.f32.xlu0 %v410_v26  ;;  %v232_v16 = vpop.xlane.xlu0 %231  ;;  %v235_v24 = vpop.xlane.xlu1 %234  ;;  %v1660_v19 = vsel %vm139_vm0, %v8416_v61, 0.0  ;;  %v8414_v40 = vunpack.c.l.bf16 %v4457_v25  ;;  %v8412_v36 = vunpack.c.h.bf16 %v4437_v14  ;;  %v8411_v10 = vunpack.c.h.bf16 %v4457_v25 }
  0xcb   :  { %8696 = vst [vmem:[#allocation20_spill] sm:$0xff] %v4422_v63  ;;  %8698 = vst [vmem:[#allocation21_spill] sm:$0xff] %v4426_v51  ;;  %v266_v55 = vmul.f32 0.015625, %v232_v16  ;;  %v267_v41 = vmul.f32 0.015625, %v235_v24  ;;  %v328_v30 = vmul.f32 %v4422_v63, %v4422_v63  ;;  %v329_v20 = vmul.f32 %v4426_v51, %v4426_v51  ;;  %v4482_v16 = vld [vmem:[%s8385_s1 + $0x20] sm:$0xff]  }
  0xcc   :  { %v1612_v5 = vsel %vm139_vm0, %v8414_v40, 0.0  ;;  %v1663_v9 = vsel %vm139_vm0, %v8412_v36, 0.0  ;;  %v8410_v26 = vunpack.c.l.bf16 %v4469_v0  ;;  %v1615_v24 = vsel %vm139_vm0, %v8411_v10, 0.0  ;;  %v4560_v36 = vld [vmem:[%s8385_s1 + $0x38] sm:$0xff]  }
  0xcd   :  { %v4441_v3 = vsub.f32 %v8699_v56, %v266_v55  ;;  %v4445_v31 = vsub.f32 %v8701_v45, %v267_v41  ;;  %v416_v11 = vsel %vm139_vm0, %v328_v30, 0.0  ;;  %v419_v21 = vsel %vm139_vm0, %v329_v20, 0.0  ;;  %v4495_v30 = vld [vmem:[%s8385_s1 + $0x68] sm:$0xff]  }
  0xce   :  { %414 = vadd.xlane.f32.xlu1 %v413_v34  ;;  %417 = vadd.xlane.f32.xlu0 %v416_v11  ;;  %v1666_v34 = vsel %vm139_vm0, %v8410_v26, 0.0  ;;  %v8407_v55 = vunpack.c.l.bf16 %v4482_v16  ;;  %v8406_v41 = vunpack.c.h.bf16 %v4469_v0  ;;  %v8405_v45 = vunpack.c.h.bf16 %v4482_v16 }
  0xcf   :  { %8700 = vst [vmem:[#allocation22_spill] sm:$0xff] %v4441_v3  ;;  %8702 = vst [vmem:[#allocation23_spill] sm:$0xff] %v4445_v31  ;;  %v330_v54 = vmul.f32 %v4441_v3, %v4441_v3  ;;  %v331_v46 = vmul.f32 %v4445_v31, %v4445_v31  ;;  %v8402_v11 = vunpack.c.l.bf16 %v4495_v30 }
  0xd0   :  { %v1618_v20 = vsel %vm139_vm0, %v8407_v55, 0.0  ;;  %v1669_v56 = vsel %vm139_vm0, %v8406_v41, 0.0  ;;  %v4547_v41 = vld [vmem:[%s8385_s1 + $0x78] sm:$0xff]  }
  0xd1   :  { %v422_v59 = vsel %vm139_vm0, %v330_v54, 0.0  ;;  %v425_v44 = vsel %vm139_vm0, %v331_v46, 0.0  ;;  %v1599_v54 = vpop.xlane.xlu0 %1598  ;;  %v1621_v46 = vsel %vm139_vm0, %v8405_v45, 0.0  ;;  %v8421_v26 = vunpack.c.l.bf16 %v4547_v41 }
  0xd2   :  { %420 = vadd.xlane.f32.xlu1 %v419_v21  ;;  %423 = vadd.xlane.f32.xlu0 %v422_v59  ;;  %v4508_v21 = vld [vmem:[%s8385_s1 + $0x28] sm:$0xff]   ;;  %v1672_v59 = vsel %vm139_vm0, %v8402_v11, 0.0  ;;  %v4534_v11 = vld [vmem:[%s8385_s1 + $0x30] sm:$0xff]   ;;  %v1691_v10 = vmul.f32 0.015625, %v1599_v54  ;;  %v8703_v54 = vunpack.c.h.bf16 %v4145_v39  ;;  %v8422_v31 = vunpack.c.h.bf16 %v4547_v41 }
  0xd4   :  { %v4571_v61 = vsub.f32 %v8703_v54, %v1691_v10  ;;  %v1687_v10 = vsel %vm139_vm0, %v8422_v31, 0.0 }
  0xd6   :  { %426 = vadd.xlane.f32.xlu1 %v425_v44  ;;  %1661 = vadd.xlane.f32.xlu0 %v1660_v19  ;;  %v8404_v44 = vunpack.c.l.bf16 %v4508_v21  ;;  %v8403_v19 = vunpack.c.h.bf16 %v4495_v30  ;;  %8704 = vst [vmem:[#allocation24_spill] sm:$0xff] %v4571_v61 }
  0xda   :  { %1613 = vadd.xlane.f32.xlu1 %v1612_v5  ;;  %1664 = vadd.xlane.f32.xlu0 %v1663_v9  ;;  %v4521_v5 = vld [vmem:[%s8385_s1 + $0x70] sm:$0xff]   ;;  %v1596_v9 = vpop.xlane.xlu1 %1595 }
  0xdb   :  { %v8415_v45 = vunpack.c.h.bf16 %v4521_v5 }
  0xde   :  { %1616 = vadd.xlane.f32.xlu1 %v1615_v24  ;;  %1667 = vadd.xlane.f32.xlu0 %v1666_v34  ;;  %v1624_v24 = vsel %vm139_vm0, %v8404_v44, 0.0  ;;  %v1675_v34 = vsel %vm139_vm0, %v8403_v19, 0.0  ;;  %v8413_v44 = vunpack.c.l.bf16 %v4534_v11  ;;  %v1644_v55 = vpop.xlane.xlu1 %1643 }
  0xdf   :  { %v1706_v51 = vmul.f32 0.015625, %v1644_v55 }
  0xe2   :  { %1619 = vadd.xlane.f32.xlu1 %v1618_v20  ;;  %1670 = vadd.xlane.f32.xlu0 %v1669_v56  ;;  %v8408_v20 = vunpack.c.h.bf16 %v4508_v21  ;;  %v8409_v56 = vunpack.c.l.bf16 %v4521_v5  ;;  %v1602_v40 = vpop.xlane.xlu1 %1601 }
  0xe3   :  { %v1692_v31 = vmul.f32 0.015625, %v1602_v40 }
  0xe4   :  { %v1678_v19 = vsel %vm139_vm0, %v8409_v56, 0.0  ;;  %v1681_v56 = vsel %vm139_vm0, %v8415_v45, 0.0  ;;  %v1684_v45 = vsel %vm139_vm0, %v8421_v26, 0.0  ;;  %v8425_v26 = vunpack.c.h.bf16 %v4560_v36 }
  0xe6   :  { %1622 = vadd.xlane.f32.xlu1 %v1621_v46  ;;  %1673 = vadd.xlane.f32.xlu0 %v1672_v59  ;;  %v1647_v46 = vpop.xlane.xlu0 %1646  ;;  %v1627_v59 = vsel %vm139_vm0, %v8408_v20, 0.0  ;;  %v1630_v20 = vsel %vm139_vm0, %v8413_v44, 0.0  ;;  %v8423_v44 = vunpack.c.l.bf16 %v4560_v36 }
  0xe8   :  { %v1636_v3 = vsel %vm139_vm0, %v8423_v44, 0.0 }
  0xea   :  { %1625 = vadd.xlane.f32.xlu1 %v1624_v24  ;;  %1676 = vadd.xlane.f32.xlu0 %v1675_v34  ;;  %v8418_v24 = vunpack.c.h.bf16 %v4534_v11  ;;  %v1650_v34 = vpop.xlane.xlu0 %1649 }
  0xee   :  { %1628 = vadd.xlane.f32.xlu1 %v1627_v59  ;;  %1679 = vadd.xlane.f32.xlu0 %v1678_v19  ;;  %v1633_v19 = vsel %vm139_vm0, %v8418_v24, 0.0  ;;  %v1690_v59 = vmul.f32 0.015625, %v1596_v9  ;;  %v8705_v24 = vunpack.c.l.bf16 %v4145_v39  ;;  %v1755_v39 = vmul.f32 %v4571_v61, %v4571_v61 }
  0xf0   :  { %v4576_v9 = vsub.f32 %v8705_v24, %v1690_v59  ;;  %v1605_v24 = vpop.xlane.xlu1 %1604  ;;  %v1639_v59 = vsel %vm139_vm0, %v8425_v26, 0.0  ;;  %v1789_v44 = vsel %vm139_vm0, %v1755_v39, 0.0 }
  0xf2   :  { %1631 = vadd.xlane.f32.xlu1 %v1630_v20  ;;  %1682 = vadd.xlane.f32.xlu0 %v1681_v56  ;;  %v1707_v20 = vmul.f32 0.015625, %v1647_v46  ;;  %v1653_v56 = vpop.xlane.xlu0 %1652  ;;  %8706 = vst [vmem:[#allocation25_spill] sm:$0xff] %v4576_v9  ;;  %v8707_v46 = vunpack.c.h.bf16 %v4158_v50 }
  0xf4   :  { %v4587_v54 = vsub.f32 %v8707_v46, %v1707_v20  ;;  %v1754_v20 = vmul.f32 %v4576_v9, %v4576_v9  ;;  %v1608_v26 = vpop.xlane.xlu1 %1607 }
  0xf6   :  { %1634 = vadd.xlane.f32.xlu1 %v1633_v19  ;;  %1685 = vadd.xlane.f32.xlu0 %v1684_v45  ;;  %8708 = vst [vmem:[#allocation26_spill] sm:$0xff] %v4587_v54  ;;  %v1708_v45 = vmul.f32 0.015625, %v1650_v34  ;;  %v8709_v19 = vunpack.c.l.bf16 %v4158_v50  ;;  %v1656_v46 = vpop.xlane.xlu0 %1655  ;;  %v8711_v34 = vunpack.c.l.bf16 %v4171_v7  ;;  %v1771_v50 = vmul.f32 %v4587_v54, %v4587_v54 }
  0xf7   :  { %v1786_v40 = vsel %vm139_vm0, %v1754_v20, 0.0 }
  0xf8   :  { %v4593_v55 = vsub.f32 %v8709_v19, %v1706_v51  ;;  %v4603_v61 = vsub.f32 %v8711_v34, %v1708_v45  ;;  %v1709_v51 = vmul.f32 0.015625, %v1653_v56  ;;  %v1693_v19 = vmul.f32 0.015625, %v1605_v24 }
  0xf9   :  { %v1837_v45 = vsel %vm139_vm0, %v1771_v50, 0.0  ;;  %v8715_v34 = vunpack.c.h.bf16 %v4171_v7  ;;  %v1710_v56 = vmul.f32 0.015625, %v1656_v46 }
  0xfa   :  { %1637 = vadd.xlane.f32.xlu1 %v1636_v3  ;;  %1688 = vadd.xlane.f32.xlu0 %v1687_v10  ;;  %8710 = vst [vmem:[#allocation27_spill] sm:$0xff] %v4593_v55  ;;  %8712 = vst [vmem:[#allocation28_spill] sm:$0xff] %v4603_v61  ;;  %v8713_v3 = vunpack.c.l.bf16 %v4176_v8  ;;  %v1770_v39 = vmul.f32 %v4593_v55, %v4593_v55 }
  0xfb   :  { %v4617_v9 = vsub.f32 %v8715_v34, %v1709_v51  ;;  %v8719_v51 = vunpack.c.l.bf16 %v4197_v60 }
  0xfc   :  { %v4609_v10 = vsub.f32 %v8713_v3, %v1692_v31  ;;  %v8717_v31 = vunpack.c.h.bf16 %v4176_v8  ;;  %v1834_v20 = vsel %vm139_vm0, %v1770_v39, 0.0  ;;  %v1694_v3 = vmul.f32 0.015625, %v1608_v26 }
  0xfd   :  { %8716 = vst [vmem:[#allocation30_spill] sm:$0xff] %v4617_v9  ;;  %v4631_v34 = vsub.f32 %v8719_v51, %v1710_v56  ;;  %v1773_v46 = vmul.f32 %v4617_v9, %v4617_v9  ;;  %v8721_v8 = vunpack.c.l.bf16 %v4202_v15  ;;  %v8723_v56 = vunpack.c.h.bf16 %v4197_v60 }
  0xfe   :  { %1640 = vadd.xlane.f32.xlu1 %v1639_v59  ;;  %1790 = vadd.xlane.f32.xlu0 %v1789_v44  ;;  %8714 = vst [vmem:[#allocation29_spill] sm:$0xff] %v4609_v10  ;;  %v1772_v44 = vmul.f32 %v4603_v61, %v4603_v61  ;;  %v1659_v59 = vpop.xlane.xlu0 %1658  ;;  %v4623_v24 = vsub.f32 %v8717_v31, %v1693_v19 }
  0xff   :  { %v1756_v50 = vmul.f32 %v4609_v10, %v4609_v10  ;;  %8720 = vst [vmem:[#allocation32_spill] sm:$0xff] %v4631_v34  ;;  %v4637_v19 = vsub.f32 %v8721_v8, %v1694_v3  ;;  %v8725_v3 = vunpack.c.h.bf16 %v4202_v15 }
 0x100   :  { %8718 = vst [vmem:[#allocation31_spill] sm:$0xff] %v4623_v24  ;;  %v1840_v7 = vsel %vm139_vm0, %v1772_v44, 0.0  ;;  %v1757_v39 = vmul.f32 %v4623_v24, %v4623_v24  ;;  %v1843_v44 = vsel %vm139_vm0, %v1773_v46, 0.0 }
 0x101   :  { %8722 = vst [vmem:[#allocation33_spill] sm:$0xff] %v4637_v19  ;;  %v1792_v26 = vsel %vm139_vm0, %v1756_v50, 0.0  ;;  %v1758_v46 = vmul.f32 %v4637_v19, %v4637_v19 }
 0x102   :  { %1787 = vadd.xlane.f32.xlu1 %v1786_v40  ;;  %1838 = vadd.xlane.f32.xlu0 %v1837_v45  ;;  %v1711_v40 = vmul.f32 0.015625, %v1659_v59  ;;  %v1611_v45 = vpop.xlane.xlu1 %1610  ;;  %v1774_v59 = vmul.f32 %v4631_v34, %v4631_v34 }
 0x103   :  { %v1695_v51 = vmul.f32 0.015625, %v1611_v45 }
 0x104   :  { %v4645_v31 = vsub.f32 %v8723_v56, %v1711_v40  ;;  %v1798_v40 = vsel %vm139_vm0, %v1758_v46, 0.0 }
 0x105   :  { %v4652_v50 = vsub.f32 %v8725_v3, %v1695_v51 }
 0x106   :  { %1835 = vadd.xlane.f32.xlu1 %v1834_v20  ;;  %1841 = vadd.xlane.f32.xlu0 %v1840_v7  ;;  %8724 = vst [vmem:[#allocation34_spill] sm:$0xff] %v4645_v31  ;;  %v1795_v20 = vsel %vm139_vm0, %v1757_v39, 0.0  ;;  %v1846_v7 = vsel %vm139_vm0, %v1774_v59, 0.0  ;;  %v1775_v60 = vmul.f32 %v4645_v31, %v4645_v31 }
 0x107   :  { %8726 = vst [vmem:[#allocation35_spill] sm:$0xff] %v4652_v50  ;;  %v1759_v8 = vmul.f32 %v4652_v50, %v4652_v50 }
 0x108   :  { %v1849_v45 = vsel %vm139_vm0, %v1775_v60, 0.0 }
 0x109   :  { %v1801_v15 = vsel %vm139_vm0, %v1759_v8, 0.0 }
 0x10a   :  { %1793 = vadd.xlane.f32.xlu1 %v1792_v26  ;;  %1844 = vadd.xlane.f32.xlu0 %v1843_v44 }
 0x10e   :  { %1796 = vadd.xlane.f32.xlu1 %v1795_v20  ;;  %1847 = vadd.xlane.f32.xlu0 %v1846_v7 }
 0x112   :  { %1799 = vadd.xlane.f32.xlu1 %v1798_v40  ;;  %1850 = vadd.xlane.f32.xlu0 %v1849_v45 }
 0x116   :  { %1802 = vadd.xlane.f32.xlu1 %v1801_v15 }
 0x11f   :  { %v334_v26 = vpop.xlane.xlu0 %333 }
 0x120   :  { %v4666_v51 = vmul.f32 0.015873017, %v334_v26 }
 0x122   :  { %8728 = vst [vmem:[#allocation37_spill] sm:$0xff] %v4666_v51  ;;  %vm462_vm2 = vcmp.eq.f32.partialorder %v4666_v51, inf  ;;  %vm464_vm4 = vcmp.eq.f32.partialorder %v4666_v51, 0.0 }
 0x123   :  { %v337_v39 = vpop.xlane.xlu1 %336  ;;  %v340_v44 = vpop.xlane.xlu0 %339 }
 0x124   :  { %v4664_v56 = vmul.f32 0.015873017, %v337_v39  ;;  %v4672_v46 = vmul.f32 0.015873017, %v340_v44 }
 0x126   :  { %8727 = vst [vmem:[#allocation36_spill] sm:$0xff] %v4664_v56  ;;  %3508 = vrsqrt.f32 %v4664_v56  ;;  %8729 = vst [vmem:[#allocation38_spill] sm:$0xff] %v4672_v46  ;;  %vm469_vm1 = vcmp.eq.f32.partialorder %v4664_v56, inf  ;;  %v472_v55 = vand.u32 2147483648, %v4664_v56  ;;  %vm471_vm3 = vcmp.eq.f32.partialorder %v4664_v56, 0.0 }
 0x127   :  { %v343_v59 = vpop.xlane.xlu1 %342  ;;  %v346_v20 = vpop.xlane.xlu0 %345  ;;  %3510 = vrsqrt.f32 %v4666_v51  ;;  %vm476_vm5 = vcmp.eq.f32.partialorder %v4672_v46, inf  ;;  %vm478_vm6 = vcmp.eq.f32.partialorder %v4672_v46, 0.0 }
 0x128   :  { %3512 = vrsqrt.f32 %v4672_v46  ;;  %v4679_v45 = vmul.f32 0.015873017, %v343_v59  ;;  %v4730_v52 = vmul.f32 0.015873017, %v346_v20 }
 0x12a   :  { %8730 = vst [vmem:[#allocation39_spill] sm:$0xff] %v4679_v45  ;;  %3514 = vrsqrt.f32 %v4679_v45  ;;  %vm483_vm7 = vcmp.eq.f32.partialorder %v4679_v45, inf  ;;  %vm485_vm8 = vcmp.eq.f32.partialorder %v4679_v45, 0.0  ;;  %8731 = vst [vmem:[#allocation40_spill] sm:$0xff] %v4730_v52  ;;  %vm490_vm9 = vcmp.eq.f32.partialorder %v4730_v52, inf }
 0x12b   :  { %v349_v3 = vpop.xlane.xlu1 %348  ;;  %v4670_v7 = vpop.xlane.xlu0 %351  ;;  %vm492_vm10 = vcmp.eq.f32.partialorder %v4730_v52, 0.0  ;;  %v493_v33 = vand.u32 2147483648, %v4730_v52 }
 0x12f   :  { %v4674_v60 = vpop.xlane.xlu1 %354  ;;  %v4676_v40 = vpop.xlane.xlu0 %357 }
 0x133   :  { %v4681_v8 = vpop.xlane.xlu1 %360  ;;  %v4683_v15 = vpop.xlane.xlu0 %363 }
 0x134   :  { %v3509_v26 = vpop.eup %3508 }
 0x135   :  { %v3511_v39 = vpop.eup %3510  ;;  %v468_v34 = vmul.f32 %v3509_v26, %v4664_v56  ;;  %v465_v26 = vand.u32 2147483648, %v4666_v51 }
 0x136   :  { %v461_v9 = vmul.f32 %v3511_v39, %v4666_v51  ;;  %v3513_v10 = vpop.eup %3512 }
 0x137   :  { %v4686_v31 = vpop.xlane.xlu1 %366  ;;  %v4688_v44 = vpop.xlane.xlu0 %369  ;;  %v470_v54 = vsel %vm469_vm1, %v4664_v56, %v468_v34  ;;  %v475_v62 = vmul.f32 %v3513_v10, %v4672_v46 }
 0x138   :  { %v463_v50 = vsel %vm462_vm2, %v4666_v51, %v461_v9  ;;  %v473_v24 = vsel %vm471_vm3, %v472_v55, %v470_v54  ;;  %v3515_v9 = vpop.eup %3514 }
 0x139   :  { %v466_v63 = vsel %vm464_vm4, %v465_v26, %v463_v50  ;;  %v685_v34 = vadd.f32 1e-06, %v473_v24  ;;  %v477_v53 = vsel %vm476_vm5, %v4672_v46, %v475_v62  ;;  %v482_v54 = vmul.f32 %v3515_v9, %v4679_v45 }
 0x13a   :  { %v684_v56 = vadd.f32 1e-06, %v466_v63  ;;  %v479_v24 = vand.u32 2147483648, %v4672_v46  ;;  %v486_v62 = vand.u32 2147483648, %v4679_v45 }
 0x13b   :  { %v4693_v59 = vpop.xlane.xlu1 %372  ;;  %v4695_v61 = vpop.xlane.xlu0 %375  ;;  %3516 = vrcp.f32 %v685_v34  ;;  %v484_v63 = vsel %vm483_vm7, %v4679_v45, %v482_v54  ;;  %v4739_v54 = vmul.f32 0.015873017, %v349_v3  ;;  %v4759_v3 = vmul.f32 0.015873017, %v4676_v40 }
 0x13c   :  { %3518 = vrcp.f32 %v684_v56  ;;  %v480_v10 = vsel %vm478_vm6, %v479_v24, %v477_v53  ;;  %v487_v9 = vsel %vm485_vm8, %v486_v62, %v484_v63  ;;  %v4751_v63 = vmul.f32 0.015873017, %v4674_v60 }
 0x13d   :  { %v686_v34 = vadd.f32 1e-06, %v480_v10  ;;  %v687_v53 = vadd.f32 1e-06, %v487_v9  ;;  %8733 = vst [vmem:[#allocation42_spill] sm:$0xff] %v4739_v54  ;;  %8739 = vst [vmem:[#allocation48_spill] sm:$0xff] %v4759_v3 }
 0x13e   :  { %v4746_v10 = vmul.f32 0.015873017, %v4670_v7  ;;  %8738 = vst [vmem:[#allocation47_spill] sm:$0xff] %v4751_v63  ;;  %v4784_v45 = vmul.f32 0.015873017, %v4683_v15  ;;  %vm497_vm11 = vcmp.eq.f32.partialorder %v4739_v54, inf }
 0x13f   :  { %v4703_v19 = vpop.xlane.xlu1 %378  ;;  %v4705_v39 = vpop.xlane.xlu0 %381  ;;  %3520 = vrcp.f32 %v686_v34  ;;  %vm511_vm13 = vcmp.eq.f32.partialorder %v4751_v63, inf  ;;  %vm499_vm14 = vcmp.eq.f32.partialorder %v4739_v54, 0.0  ;;  %vm518_vm15 = vcmp.eq.f32.partialorder %v4759_v3, inf }
 0x140   :  { %3522 = vrsqrt.f32 %v4730_v52  ;;  %8736 = vst [vmem:[#allocation45_spill] sm:$0xff] %v4746_v10  ;;  %8745 = vst [vmem:[#allocation54_spill] sm:$0xff] %v4784_v45  ;;  %vm504_vm12 = vcmp.eq.f32.partialorder %v4746_v10, inf  ;;  %vm506_vm2 = vcmp.eq.f32.partialorder %v4746_v10, 0.0  ;;  %vm513_vm3 = vcmp.eq.f32.partialorder %v4751_v63, 0.0 }
 0x141   :  { %3524 = vrcp.f32 %v687_v53  ;;  %vm520_vm4 = vcmp.eq.f32.partialorder %v4759_v3, 0.0  ;;  %vm532_vm6 = vcmp.eq.f32.partialorder %v4784_v45, inf  ;;  %vm534_vm7 = vcmp.eq.f32.partialorder %v4784_v45, 0.0 }
 0x142   :  { %3526 = vrsqrt.f32 %v4739_v54 }
 0x143   :  { %v4709_v58 = vpop.xlane.xlu1 %384  ;;  %v4711_v57 = vpop.xlane.xlu0 %387  ;;  %3528 = vrsqrt.f32 %v4746_v10 }
 0x144   :  { %3530 = vrsqrt.f32 %v4751_v63 }
 0x145   :  { %3532 = vrsqrt.f32 %v4759_v3 }
 0x147   :  { %v4716_v55 = vpop.xlane.xlu1 %390  ;;  %v4718_v51 = vpop.xlane.xlu0 %393 }
 0x148   :  { %v4736_v24 = vpop.eup %3516 }
 0x149   :  { %8732 = vst [vmem:[#allocation41_spill] sm:$0xff] %v4736_v24  ;;  %v4748_v20 = vpop.eup %3518  ;;  %v4755_v62 = vmul.f32 %v4736_v24, %v4240_v29  ;;  %v4772_v29 = vmul.f32 0.015873017, %v4681_v8 }
 0x14a   :  { %8737 = vst [vmem:[#allocation46_spill] sm:$0xff] %v4748_v20  ;;  %v4768_v7 = vmul.f32 %v4748_v20, %v4228_v35 }
 0x14b   :  { %v4724_v50 = vpop.xlane.xlu1 %396  ;;  %v4726_v26 = vpop.xlane.xlu0 %399  ;;  %8742 = vst [vmem:[#allocation51_spill] sm:$0xff] %v4772_v29  ;;  %v4776_v60 = vsel %vm139_vm0, %v4755_v62, 0.0  ;;  %3534 = vrsqrt.f32 %v4772_v29  ;;  %vm525_vm1 = vcmp.eq.f32.partialorder %v4772_v29, inf  ;;  %vm527_vm5 = vcmp.eq.f32.partialorder %v4772_v29, 0.0 }
 0x14c   :  { %v4788_v35 = vsel %vm139_vm0, %v4768_v7, 0.0  ;;  %v4792_v24 = vpop.eup %3520  ;;  %3536 = vrsqrt.f32 %v4784_v45 }
 0x14d   :  { %v1114_v8 = vadd.f32 %v4776_v60, %v4788_v35  ;;  %8746 = vst [vmem:[#allocation55_spill] sm:$0xff] %v4792_v24  ;;  %v3523_v42 = vpop.eup %3522  ;;  %v4800_v15 = vmul.f32 %v4792_v24, %v4232_v49 }
 0x14e   :  { %v4802_v37 = vpop.eup %3524  ;;  %v489_v28 = vmul.f32 %v3523_v42, %v4730_v52 }
 0x14f   :  { %v4732_v56 = vpop.xlane.xlu1 %402  ;;  %v4734_v46 = vpop.xlane.xlu0 %405  ;;  %8748 = vst [vmem:[#allocation57_spill] sm:$0xff] %v4802_v37  ;;  %v4817_v22 = vsel %vm139_vm0, %v4800_v15, 0.0 }
 0x153   :  { %v4741_v48 = vpop.xlane.xlu1 %408  ;;  %v4743_v47 = vpop.xlane.xlu0 %411 }
 0x154   :  { %8734 = vst [vmem:[#allocation43_spill] sm:$0xff] %v4741_v48  ;;  %8735 = vst [vmem:[#allocation44_spill] sm:$0xff] %v4743_v47 }
 0x157   :  { %v4761_v34 = vpop.xlane.xlu1 %414  ;;  %v4763_v9 = vpop.xlane.xlu0 %417 }
 0x158   :  { %8740 = vst [vmem:[#allocation49_spill] sm:$0xff] %v4761_v34  ;;  %8741 = vst [vmem:[#allocation50_spill] sm:$0xff] %v4763_v9  ;;  %v4831_v34 = vmul.f32 %v4802_v37, %v4244_v2  ;;  %v491_v2 = vsel %vm490_vm9, %v4730_v52, %v489_v28  ;;  %v4850_v37 = vmul.f32 0.015873017, %v4688_v44 }
 0x15a   :  { %8752 = vst [vmem:[#allocation60_spill] sm:$0xff] %v4831_v34  ;;  %8757 = vst [vmem:[#allocation63_spill] sm:$0xff] %v4850_v37  ;;  %vm546_vm9 = vcmp.eq.f32.partialorder %v4850_v37, inf }
 0x15b   :  { %v4779_v40 = vpop.xlane.xlu1 %420  ;;  %v4781_v53 = vpop.xlane.xlu0 %423 }
 0x15c   :  { %8743 = vst [vmem:[#allocation52_spill] sm:$0xff] %v4779_v40  ;;  %8744 = vst [vmem:[#allocation53_spill] sm:$0xff] %v4781_v53 }
 0x15f   :  { %v4795_v20 = vpop.xlane.xlu1 %426  ;;  %v1662_v43 = vpop.xlane.xlu0 %1661 }
 0x160   :  { %8747 = vst [vmem:[#allocation56_spill] sm:$0xff] %v4795_v20  ;;  %v1712_v38 = vmul.f32 0.015625, %v1662_v43  ;;  %v3527_v20 = vpop.eup %3526  ;;  %v1116_v43 = vadd.f32 %v4817_v22, %v1114_v8  ;;  %v8753_v8 = vunpack.c.l.bf16 %v4457_v25 }
 0x161   :  { %v3529_v40 = vpop.eup %3528 }
 0x162   :  { %v4813_v49 = vsub.f32 %v8749_v27, %v1712_v38  ;;  %v4825_v38 = vmul.f32 0.015873017, %v4686_v31  ;;  %v3531_v47 = vpop.eup %3530  ;;  %v8755_v27 = vunpack.c.h.bf16 %v4437_v14  ;;  %v503_v28 = vmul.f32 %v3529_v40, %v4746_v10 }
 0x163   :  { %v1614_v24 = vpop.xlane.xlu1 %1613  ;;  %v1665_v23 = vpop.xlane.xlu0 %1664  ;;  %v510_v44 = vmul.f32 %v3531_v47, %v4751_v63  ;;  %v494_v47 = vsel %vm492_vm10, %v493_v33, %v491_v2 }
 0x164   :  { %8750 = vst [vmem:[#allocation58_spill] sm:$0xff] %v4813_v49  ;;  %v1696_v32 = vmul.f32 0.015625, %v1614_v24  ;;  %v1713_v53 = vmul.f32 0.015625, %v1665_v23  ;;  %8751 = vst [vmem:[#allocation59_spill] sm:$0xff] %v4825_v38  ;;  %v1776_v9 = vmul.f32 %v4813_v49, %v4813_v49  ;;  %v496_v49 = vmul.f32 %v3527_v20, %v4739_v54  ;;  %v3533_v48 = vpop.eup %3532 }
 0x165   :  { %3538 = vrsqrt.f32 %v4825_v38  ;;  %v3535_v40 = vpop.eup %3534  ;;  %vm539_vm8 = vcmp.eq.f32.partialorder %v4825_v38, inf }
 0x166   :  { %v4839_v31 = vsub.f32 %v8753_v8, %v1696_v32  ;;  %v4843_v42 = vsub.f32 %v8755_v27, %v1713_v53  ;;  %v1852_v24 = vsel %vm139_vm0, %v1776_v9, 0.0  ;;  %v4857_v53 = vsel %vm139_vm0, %v4831_v34, 0.0 }
 0x167   :  { %v1617_v23 = vpop.xlane.xlu1 %1616  ;;  %v1668_v18 = vpop.xlane.xlu0 %1667  ;;  %1853 = vadd.xlane.f32.xlu0 %v1852_v24  ;;  %v8760_v27 = vunpack.c.l.bf16 %v4469_v0  ;;  %3540 = vrsqrt.f32 %v4850_v37 }
 0x168   :  { %8754 = vst [vmem:[#allocation61_spill] sm:$0xff] %v4839_v31  ;;  %8756 = vst [vmem:[#allocation62_spill] sm:$0xff] %v4843_v42  ;;  %v1697_v32 = vmul.f32 0.015625, %v1617_v23  ;;  %v1714_v8 = vmul.f32 0.015625, %v1668_v18  ;;  %v1760_v14 = vmul.f32 %v4839_v31, %v4839_v31  ;;  %v1777_v20 = vmul.f32 %v4843_v42, %v4843_v42 }
 0x169   :  { %v8758_v18 = vunpack.c.h.bf16 %v4457_v25  ;;  %v517_v31 = vmul.f32 %v3533_v48, %v4759_v3 }
 0x16a   :  { %v4871_v23 = vsub.f32 %v8760_v27, %v1714_v8  ;;  %v1804_v24 = vsel %vm139_vm0, %v1760_v14, 0.0  ;;  %v1855_v25 = vsel %vm139_vm0, %v1777_v20, 0.0  ;;  %v498_v8 = vsel %vm497_vm11, %v4739_v54, %v496_v49  ;;  %v3537_v14 = vpop.eup %3536 }
 0x16b   :  { %v4867_v9 = vsub.f32 %v8758_v18, %v1697_v32  ;;  %1805 = vadd.xlane.f32.xlu1 %v1804_v24  ;;  %v1620_v42 = vpop.xlane.xlu1 %1619  ;;  %v1671_v32 = vpop.xlane.xlu0 %1670  ;;  %v4880_v18 = vadd.f32 %v4857_v53, %v1116_v43  ;;  %1856 = vadd.xlane.f32.xlu0 %v1855_v25  ;;  %v505_v20 = vsel %vm504_vm12, %v4746_v10, %v503_v28  ;;  %v688_v27 = vadd.f32 1e-06, %v494_v47 }
 0x16c   :  { %8761 = vst [vmem:[#allocation65_spill] sm:$0xff] %v4871_v23  ;;  %v1698_v33 = vmul.f32 0.015625, %v1620_v42  ;;  %v1715_v2 = vmul.f32 0.015625, %v1671_v32  ;;  %v512_v43 = vsel %vm511_vm13, %v4751_v63, %v510_v44  ;;  %v1778_v49 = vmul.f32 %v4871_v23, %v4871_v23 }
 0x16d   :  { %8759 = vst [vmem:[#allocation64_spill] sm:$0xff] %v4867_v9  ;;  %v1761_v48 = vmul.f32 %v4867_v9, %v4867_v9  ;;  %v524_v42 = vmul.f32 %v3535_v40, %v4772_v29  ;;  %v8762_v24 = vunpack.c.l.bf16 %v4482_v16  ;;  %v8764_v32 = vunpack.c.h.bf16 %v4469_v0 }
 0x16e   :  { %v519_v44 = vsel %vm518_vm15, %v4759_v3, %v517_v31  ;;  %v1858_v23 = vsel %vm139_vm0, %v1778_v49, 0.0  ;;  %3542 = vrcp.f32 %v688_v27  ;;  %v8766_v40 = vand.u32 2147483648, %v4739_v54 }
 0x16f   :  { %v4900_v25 = vsub.f32 %v8762_v24, %v1698_v33  ;;  %v4904_v52 = vsub.f32 %v8764_v32, %v1715_v2  ;;  %v1807_v28 = vsel %vm139_vm0, %v1761_v48, 0.0  ;;  %v1623_v47 = vpop.xlane.xlu1 %1622  ;;  %v1674_v9 = vpop.xlane.xlu0 %1673  ;;  %v4917_v0 = vmul.f32 %v3537_v14, %v4784_v45  ;;  %1859 = vadd.xlane.f32.xlu0 %v1858_v23 }
 0x170   :  { %1808 = vadd.xlane.f32.xlu1 %v1807_v28  ;;  %v501_v33 = vsel %vm499_vm14, %v8766_v40, %v498_v8  ;;  %v1699_v2 = vmul.f32 0.015625, %v1623_v47  ;;  %v1716_v48 = vmul.f32 0.015625, %v1674_v9  ;;  %v908_v24 = vand.u32 2147483647, %v4768_v7 }
 0x171   :  { %8763 = vst [vmem:[#allocation66_spill] sm:$0xff] %v4900_v25  ;;  %8765 = vst [vmem:[#allocation67_spill] sm:$0xff] %v4904_v52  ;;  %v1762_v31 = vmul.f32 %v4900_v25, %v4900_v25  ;;  %v1779_v49 = vmul.f32 %v4904_v52, %v4904_v52  ;;  %v689_v27 = vadd.f32 1e-06, %v501_v33  ;;  %v909_v32 = vand.u32 2147483647, %v4755_v62 }
 0x172   :  { %v526_v8 = vsel %vm525_vm1, %v4772_v29, %v524_v42  ;;  %v8767_v23 = vunpack.c.h.bf16 %v4482_v16  ;;  %v8769_v14 = vunpack.c.l.bf16 %v4495_v30  ;;  %v4940_v42 = vsel %vm139_vm0, %v908_v24, 0.0 }
 0x173   :  { %v1810_v47 = vsel %vm139_vm0, %v1762_v31, 0.0  ;;  %v1626_v40 = vpop.xlane.xlu1 %1625  ;;  %v1861_v33 = vsel %vm139_vm0, %v1779_v49, 0.0  ;;  %v1677_v52 = vpop.xlane.xlu0 %1676  ;;  %3544 = vrcp.f32 %v689_v27  ;;  %v4943_v54 = vsel %vm139_vm0, %v909_v32, 0.0 }
 0x174   :  { %v4931_v9 = vsub.f32 %v8767_v23, %v1699_v2  ;;  %v4935_v28 = vsub.f32 %v8769_v14, %v1716_v48  ;;  %1811 = vadd.xlane.f32.xlu1 %v1810_v47  ;;  %v1700_v16 = vmul.f32 0.015625, %v1626_v40  ;;  %1862 = vadd.xlane.f32.xlu0 %v1861_v33  ;;  %v1717_v2 = vmul.f32 0.015625, %v1677_v52  ;;  %v4958_v14 = vpop.eup %3538 }
 0x175   :  { %v1068_v49 = vadd.f32 %v4943_v54, %v4940_v42  ;;  %v910_v27 = vand.u32 2147483647, %v4800_v15  ;;  %v911_v24 = vand.u32 2147483647, %v4831_v34  ;;  %v8771_v32 = vand.u32 2147483648, %v4746_v10 }
 0x176   :  { %8768 = vst [vmem:[#allocation68_spill] sm:$0xff] %v4931_v9  ;;  %8770 = vst [vmem:[#allocation69_spill] sm:$0xff] %v4935_v28  ;;  %v1763_v48 = vmul.f32 %v4931_v9, %v4931_v9  ;;  %v1780_v31 = vmul.f32 %v4935_v28, %v4935_v28  ;;  %v8772_v52 = vunpack.c.l.bf16 %v4508_v21  ;;  %v8774_v40 = vunpack.c.h.bf16 %v4495_v30 }
 0x177   :  { %v508_v23 = vsel %vm506_vm2, %v8771_v32, %v505_v20  ;;  %v1629_v25 = vpop.xlane.xlu1 %1628  ;;  %v1680_v34 = vpop.xlane.xlu0 %1679  ;;  %v4971_v10 = vsel %vm139_vm0, %v910_v27, 0.0  ;;  %v4974_v20 = vsel %vm139_vm0, %v911_v24, 0.0  ;;  %vm541_vm1 = vcmp.eq.f32.partialorder %v4825_v38, 0.0 }
 0x178   :  { %v4962_v47 = vsub.f32 %v8772_v52, %v1700_v16  ;;  %v4966_v33 = vsub.f32 %v8774_v40, %v1717_v2  ;;  %v1813_v28 = vsel %vm139_vm0, %v1763_v48, 0.0  ;;  %v1864_v9 = vsel %vm139_vm0, %v1780_v31, 0.0  ;;  %v4980_v2 = vpop.eup %3540 }
 0x179   :  { %1814 = vadd.xlane.f32.xlu1 %v1813_v28  ;;  %v690_v32 = vadd.f32 1e-06, %v508_v23  ;;  %v8776_v16 = vand.u32 2147483648, %v4751_v63  ;;  %v1701_v48 = vmul.f32 0.015625, %v1629_v25  ;;  %1865 = vadd.xlane.f32.xlu0 %v1864_v9  ;;  %v1718_v28 = vmul.f32 0.015625, %v1680_v34 }
 0x17a   :  { %8773 = vst [vmem:[#allocation70_spill] sm:$0xff] %v4962_v47  ;;  %8775 = vst [vmem:[#allocation71_spill] sm:$0xff] %v4966_v33  ;;  %v1764_v31 = vmul.f32 %v4962_v47, %v4962_v47  ;;  %v1781_v27 = vmul.f32 %v4966_v33, %v4966_v33  ;;  %v1069_v24 = vadd.f32 %v1068_v49, %v4971_v10  ;;  %v8777_v52 = vand.u32 2147483648, %v4759_v3 }
 0x17b   :  { %v515_v30 = vsel %vm513_vm3, %v8776_v16, %v512_v43  ;;  %3546 = vrcp.f32 %v690_v32  ;;  %v8778_v40 = vunpack.c.h.bf16 %v4508_v21  ;;  %v8780_v34 = vunpack.c.l.bf16 %v4521_v5  ;;  %v1632_v49 = vpop.xlane.xlu1 %1631  ;;  %v1683_v32 = vpop.xlane.xlu0 %1682 }
 0x17c   :  { %v691_v23 = vadd.f32 1e-06, %v515_v30  ;;  %v522_v43 = vsel %vm520_vm4, %v8777_v52, %v519_v44  ;;  %v1816_v16 = vsel %vm139_vm0, %v1764_v31, 0.0  ;;  %v1867_v33 = vsel %vm139_vm0, %v1781_v27, 0.0 }
 0x17d   :  { %v4994_v25 = vsub.f32 %v8778_v40, %v1701_v48  ;;  %v4998_v9 = vsub.f32 %v8780_v34, %v1718_v28  ;;  %1817 = vadd.xlane.f32.xlu1 %v1816_v16  ;;  %v1070_v30 = vadd.f32 %v1069_v24, %v4974_v20  ;;  %v692_v3 = vadd.f32 1e-06, %v522_v43  ;;  %v5007_v48 = vpop.eup %3542  ;;  %1868 = vadd.xlane.f32.xlu0 %v1867_v33 }
 0x17e   :  { %3548 = vrcp.f32 %v691_v23  ;;  %v8782_v44 = vand.u32 2147483648, %v4772_v29  ;;  %8783 = vst [vmem:[#allocation74_spill] sm:$0xff] %v5007_v48  ;;  %v1702_v28 = vmul.f32 0.015625, %v1632_v49  ;;  %v1719_v52 = vmul.f32 0.015625, %v1683_v32 }
 0x17f   :  { %8779 = vst [vmem:[#allocation72_spill] sm:$0xff] %v4994_v25  ;;  %8781 = vst [vmem:[#allocation73_spill] sm:$0xff] %v4998_v9  ;;  %v1765_v31 = vmul.f32 %v4994_v25, %v4994_v25  ;;  %v1782_v27 = vmul.f32 %v4998_v9, %v4998_v9  ;;  %v533_v24 = vsel %vm532_vm6, %v4784_v45, %v4917_v0  ;;  %v5018_v23 = vmul.f32 0.015873017, %v4693_v59  ;;  %v1635_v49 = vpop.xlane.xlu1 %1634 }
 0x180   :  { %v529_v21 = vsel %vm527_vm5, %v8782_v44, %v526_v8  ;;  %v5021_v8 = vmul.f32 0.015873017, %v4695_v61  ;;  %v5025_v33 = vmul.f32 %v5007_v48, %v4254_v1  ;;  %v8786_v43 = vunpack.c.l.bf16 %v4534_v11  ;;  %v1686_v61 = vpop.xlane.xlu0 %1685 }
 0x181   :  { %8784 = vst [vmem:[#allocation75_spill] sm:$0xff] %v5018_v23  ;;  %v8788_v34 = vunpack.c.h.bf16 %v4521_v5  ;;  %v1819_v0 = vsel %vm139_vm0, %v1765_v31, 0.0  ;;  %v1870_v59 = vsel %vm139_vm0, %v1782_v27, 0.0  ;;  %3550 = vrcp.f32 %v692_v3 }
 0x182   :  { %8785 = vst [vmem:[#allocation76_spill] sm:$0xff] %v5021_v8  ;;  %v5029_v40 = vsub.f32 %v8786_v43, %v1702_v28  ;;  %1820 = vadd.xlane.f32.xlu1 %v1819_v0  ;;  %v5039_v32 = vsel %vm139_vm0, %v5025_v33, 0.0  ;;  %v912_v1 = vand.u32 2147483647, %v5025_v33  ;;  %v693_v44 = vadd.f32 1e-06, %v529_v21  ;;  %v5042_v28 = vpop.eup %3544  ;;  %1871 = vadd.xlane.f32.xlu0 %v1870_v59 }
 0x183   :  { %v5033_v16 = vsub.f32 %v8788_v34, %v1719_v52  ;;  %8790 = vst [vmem:[#allocation79_spill] sm:$0xff] %v5042_v28  ;;  %v1703_v5 = vmul.f32 0.015625, %v1635_v49  ;;  %v1720_v52 = vmul.f32 0.015625, %v1686_v61  ;;  %v1120_v43 = vadd.f32 %v5039_v32, %v4880_v18  ;;  %v1638_v9 = vpop.xlane.xlu1 %1637 }
 0x184   :  { %8787 = vst [vmem:[#allocation77_spill] sm:$0xff] %v5029_v40  ;;  %v1766_v31 = vmul.f32 %v5029_v40, %v5029_v40  ;;  %v5052_v34 = vmul.f32 %v5042_v28, %v4258_v4  ;;  %v5055_v3 = vsel %vm139_vm0, %v912_v1, 0.0  ;;  %v8792_v21 = vand.u32 2147483648, %v4784_v45 }
 0x185   :  { %8789 = vst [vmem:[#allocation78_spill] sm:$0xff] %v5033_v16  ;;  %v1783_v27 = vmul.f32 %v5033_v16, %v5033_v16  ;;  %v8793_v59 = vunpack.c.h.bf16 %v4534_v11  ;;  %v8795_v61 = vunpack.c.l.bf16 %v4547_v41  ;;  %3552 = vrsqrt.f32 %v5018_v23 }
 0x186   :  { %8791 = vst [vmem:[#allocation80_spill] sm:$0xff] %v5052_v34  ;;  %v536_v0 = vsel %vm534_vm7, %v8792_v21, %v533_v24  ;;  %v1822_v18 = vsel %vm139_vm0, %v1766_v31, 0.0  ;;  %v5073_v1 = vmul.f32 0.015873017, %v4703_v19  ;;  %v1689_v24 = vpop.xlane.xlu0 %1688  ;;  %v5077_v11 = vsel %vm139_vm0, %v5052_v34, 0.0 }
 0x187   :  { %v5063_v49 = vsub.f32 %v8793_v59, %v1703_v5  ;;  %v5067_v16 = vsub.f32 %v8795_v61, %v1720_v52  ;;  %v1873_v4 = vsel %vm139_vm0, %v1783_v27, 0.0  ;;  %1823 = vadd.xlane.f32.xlu1 %v1822_v18  ;;  %v1071_v5 = vadd.f32 %v1070_v30, %v5055_v3 }
 0x188   :  { %8797 = vst [vmem:[#allocation83_spill] sm:$0xff] %v5073_v1  ;;  %v1704_v52 = vmul.f32 0.015625, %v1638_v9  ;;  %1874 = vadd.xlane.f32.xlu0 %v1873_v4  ;;  %v1721_v21 = vmul.f32 0.015625, %v1689_v24  ;;  %v5085_v19 = vadd.f32 %v5077_v11, %v1120_v43  ;;  %v913_v59 = vand.u32 2147483647, %v5052_v34  ;;  %v5088_v18 = vpop.eup %3546  ;;  %v1641_v43 = vpop.xlane.xlu1 %1640 }
 0x189   :  { %8794 = vst [vmem:[#allocation81_spill] sm:$0xff] %v5063_v49  ;;  %8796 = vst [vmem:[#allocation82_spill] sm:$0xff] %v5067_v16  ;;  %v1767_v31 = vmul.f32 %v5063_v49, %v5063_v49  ;;  %v1784_v27 = vmul.f32 %v5067_v16, %v5067_v16  ;;  %3554 = vrcp.f32 %v693_v44  ;;  %v694_v61 = vadd.f32 1e-06, %v536_v0 }
 0x18a   :  { %8798 = vst [vmem:[#allocation84_spill] sm:$0xff] %v5088_v18  ;;  %v8799_v30 = vunpack.c.l.bf16 %v4560_v36  ;;  %v8801_v4 = vunpack.c.h.bf16 %v4547_v41  ;;  %3556 = vrsqrt.f32 %v5021_v8  ;;  %v5102_v44 = vsel %vm139_vm0, %v913_v59, 0.0 }
 0x18b   :  { %v1825_v49 = vsel %vm139_vm0, %v1767_v31, 0.0  ;;  %v1876_v16 = vsel %vm139_vm0, %v1784_v27, 0.0  ;;  %v5106_v0 = vmul.f32 %v5088_v18, %v4268_v6  ;;  %v5111_v41 = vmul.f32 0.015873017, %v4705_v39 }
 0x18c   :  { %v5092_v9 = vsub.f32 %v8799_v30, %v1704_v52  ;;  %v5096_v24 = vsub.f32 %v8801_v4, %v1721_v21  ;;  %1826 = vadd.xlane.f32.xlu1 %v1825_v49  ;;  %v5108_v52 = vpop.eup %3548  ;;  %v1705_v21 = vmul.f32 0.015625, %v1641_v43  ;;  %1877 = vadd.xlane.f32.xlu0 %v1876_v16  ;;  %3558 = vrsqrt.f32 %v5073_v1 }
 0x18d   :  { %8803 = vst [vmem:[#allocation87_spill] sm:$0xff] %v5106_v0  ;;  %8804 = vst [vmem:[#allocation88_spill] sm:$0xff] %v5108_v52  ;;  %v1072_v27 = vadd.f32 %v1071_v5, %v5102_v44  ;;  %v914_v6 = vand.u32 2147483647, %v5106_v0  ;;  %v5122_v59 = vmul.f32 %v5108_v52, %v4272_v12  ;;  %v5125_v39 = vmul.f32 0.015873017, %v4709_v58 }
 0x18e   :  { %8800 = vst [vmem:[#allocation85_spill] sm:$0xff] %v5092_v9  ;;  %8802 = vst [vmem:[#allocation86_spill] sm:$0xff] %v5096_v24  ;;  %v1768_v31 = vmul.f32 %v5092_v9, %v5092_v9  ;;  %v1785_v49 = vmul.f32 %v5096_v24, %v5096_v24  ;;  %v8808_v16 = vunpack.c.h.bf16 %v4560_v36  ;;  %3560 = vrcp.f32 %v694_v61  ;;  %v5139_v12 = vpop.eup %3550 }
 0x18f   :  { %8805 = vst [vmem:[#allocation89_spill] sm:$0xff] %v5111_v41  ;;  %8806 = vst [vmem:[#allocation90_spill] sm:$0xff] %v5122_v59  ;;  %v5132_v4 = vmul.f32 0.015873017, %v4711_v57  ;;  %v5137_v24 = vsel %vm139_vm0, %v914_v6, 0.0  ;;  %3562 = vrsqrt.f32 %v5111_v41  ;;  %vm553_vm10 = vcmp.eq.f32.partialorder %v5018_v23, inf }
 0x190   :  { %8807 = vst [vmem:[#allocation91_spill] sm:$0xff] %v5125_v39  ;;  %v5129_v30 = vsub.f32 %v8808_v16, %v1705_v21  ;;  %v1828_v43 = vsel %vm139_vm0, %v1768_v31, 0.0  ;;  %v1879_v5 = vsel %vm139_vm0, %v1785_v49, 0.0  ;;  %8811 = vst [vmem:[#allocation94_spill] sm:$0xff] %v5139_v12  ;;  %v1073_v36 = vadd.f32 %v1072_v27, %v5137_v24 }
 0x191   :  { %8810 = vst [vmem:[#allocation93_spill] sm:$0xff] %v5132_v4  ;;  %1829 = vadd.xlane.f32.xlu1 %v1828_v43  ;;  %1880 = vadd.xlane.f32.xlu0 %v1879_v5  ;;  %v5146_v57 = vmul.f32 0.015873017, %v4716_v55  ;;  %v915_v61 = vand.u32 2147483647, %v5122_v59  ;;  %3564 = vrsqrt.f32 %v5125_v39  ;;  %v5156_v31 = vmul.f32 %v5139_v12, %v4282_v13 }
 0x192   :  { %8809 = vst [vmem:[#allocation92_spill] sm:$0xff] %v5129_v30  ;;  %v1769_v58 = vmul.f32 %v5129_v30, %v5129_v30  ;;  %3566 = vrsqrt.f32 %v5132_v4  ;;  %v5152_v21 = vmul.f32 0.015873017, %v4718_v51  ;;  %v3553_v49 = vpop.eup %3552  ;;  %v5170_v13 = vmul.f32 0.015873017, %v4724_v50 }
 0x193   :  { %8812 = vst [vmem:[#allocation95_spill] sm:$0xff] %v5146_v57  ;;  %8814 = vst [vmem:[#allocation97_spill] sm:$0xff] %v5156_v31  ;;  %3568 = vrsqrt.f32 %v5146_v57  ;;  %v5162_v55 = vsel %vm139_vm0, %v915_v61, 0.0  ;;  %v916_v16 = vand.u32 2147483647, %v5156_v31  ;;  %vm560_vm11 = vcmp.eq.f32.partialorder %v5021_v8, inf }
 0x194   :  { %8813 = vst [vmem:[#allocation96_spill] sm:$0xff] %v5152_v21  ;;  %v1831_v6 = vsel %vm139_vm0, %v1769_v58, 0.0  ;;  %3570 = vrsqrt.f32 %v5152_v21  ;;  %8816 = vst [vmem:[#allocation99_spill] sm:$0xff] %v5170_v13  ;;  %v1074_v5 = vadd.f32 %v1073_v36, %v5162_v55  ;;  %v5182_v61 = vmul.f32 0.015873017, %v4726_v26 }
 0x195   :  { %1498 = vadd.xlane.f32.xlu0 %v4788_v35  ;;  %1832 = vadd.xlane.f32.xlu1 %v1831_v6  ;;  %v538_v43 = vmul.f32 %v4958_v14, %v4825_v38  ;;  %vm567_vm12 = vcmp.eq.f32.partialorder %v5073_v1, inf  ;;  %v545_v26 = vmul.f32 %v4980_v2, %v4850_v37  ;;  %vm574_vm13 = vcmp.eq.f32.partialorder %v5111_v41, inf }
 0x196   :  { %v5164_v27 = vpop.eup %3554  ;;  %8817 = vst [vmem:[#allocation100_spill] sm:$0xff] %v5182_v61  ;;  %3572 = vrsqrt.f32 %v5170_v13  ;;  %v5201_v14 = vsel %vm139_vm0, %v916_v16, 0.0  ;;  %vm581_vm14 = vcmp.eq.f32.partialorder %v5125_v39, inf  ;;  %vm588_vm15 = vcmp.eq.f32.partialorder %v5132_v4, inf }
 0x197   :  { %8815 = vst [vmem:[#allocation98_spill] sm:$0xff] %v5164_v27  ;;  %v3557_v35 = vpop.eup %3556  ;;  %v5191_v36 = vmul.f32 %v5164_v27, %v4286_v17  ;;  %v5206_v17 = vmul.f32 0.015873017, %v4732_v56  ;;  %v1075_v2 = vadd.f32 %v1074_v5, %v5201_v14  ;;  %3574 = vrsqrt.f32 %v5182_v61  ;;  %v8824_v5 = vld [vmem:[#allocation2_spill] sm:$0xff] }
 0x198   :  { %v559_v30 = vmul.f32 %v3557_v35, %v5021_v8  ;;  %v5221_v56 = vsel %vm539_vm8, %v4825_v38, %v538_v43  ;;  %vm548_vm2 = vcmp.eq.f32.partialorder %v4850_v37, 0.0  ;;  %vm555_vm3 = vcmp.eq.f32.partialorder %v5018_v23, 0.0 }
 0x199   :  { %1502 = vadd.xlane.f32.xlu0 %v4817_v22  ;;  %1500 = vadd.xlane.f32.xlu1 %v4776_v60  ;;  %v3559_v6 = vpop.eup %3558  ;;  %8818 = vst [vmem:[#allocation101_spill] sm:$0xff] %v5191_v36  ;;  %v552_v22 = vmul.f32 %v3553_v49, %v5018_v23  ;;  %8820 = vst [vmem:[#allocation103_spill] sm:$0xff] %v5206_v17  ;;  %v5215_v49 = vmul.f32 0.015873017, %v4734_v46  ;;  %v917_v35 = vand.u32 2147483647, %v5191_v36  ;;  %3576 = vrsqrt.f32 %v5206_v17 }
 0x19a   :  { %v566_v43 = vmul.f32 %v3559_v6, %v5073_v1  ;;  %vm595_vm4 = vcmp.eq.f32.partialorder %v5146_v57, inf  ;;  %v561_v6 = vsel %vm560_vm11, %v5021_v8, %v559_v30  ;;  %vm562_vm5 = vcmp.eq.f32.partialorder %v5021_v8, 0.0 }
 0x19b   :  { %v5193_v58 = vpop.eup %3560  ;;  %8821 = vst [vmem:[#allocation104_spill] sm:$0xff] %v5215_v49  ;;  %vm569_vm6 = vcmp.eq.f32.partialorder %v5073_v1, 0.0  ;;  %3578 = vrsqrt.f32 %v5215_v49  ;;  %v1186_v50 = vmul.f32 %v4768_v7, %v4768_v7  ;;  %v5266_v30 = vsel %vm139_vm0, %v917_v35, 0.0 }
 0x19c   :  { %8819 = vst [vmem:[#allocation102_spill] sm:$0xff] %v5193_v58  ;;  %v3563_v51 = vpop.eup %3562  ;;  %v5230_v60 = vmul.f32 %v5193_v58, %v8824_v5  ;;  %v554_v5 = vsel %vm553_vm10, %v5018_v23, %v552_v22  ;;  %vm576_vm7 = vcmp.eq.f32.partialorder %v5111_v41, 0.0  ;;  %vm583_vm8 = vcmp.eq.f32.partialorder %v5125_v39, 0.0 }
 0x19d   :  { %1506 = vadd.xlane.f32.xlu0 %v5039_v32  ;;  %1504 = vadd.xlane.f32.xlu1 %v4857_v53  ;;  %v8822_v32 = vld [vmem:[#allocation43_spill] sm:$0xff]  ;;  %v547_v53 = vsel %vm546_vm9, %v4850_v37, %v545_v26  ;;  %v573_v40 = vmul.f32 %v3563_v51, %v5111_v41  ;;  %v8826_v26 = vld [vmem:[#allocation44_spill] sm:$0xff]  ;;  %v8828_v51 = vld [vmem:[#allocation49_spill] sm:$0xff]  ;;  %vm602_vm9 = vcmp.eq.f32.partialorder %v5152_v21, inf  ;;  %vm590_vm10 = vcmp.eq.f32.partialorder %v5132_v4, 0.0 }
 0x19e   :  { %v5225_v16 = vmul.f32 0.015873017, %v8822_v32  ;;  %8825 = vst [vmem:[#allocation2_spill] sm:$0xff] %v5230_v60  ;;  %v3565_v46 = vpop.eup %3564  ;;  %v5248_v45 = vmul.f32 0.015873017, %v8826_v26  ;;  %vm597_vm11 = vcmp.eq.f32.partialorder %v5146_v57, 0.0 }
 0x19f   :  { %v3567_v9 = vpop.eup %3566  ;;  %v5258_v22 = vmul.f32 0.015873017, %v8828_v51  ;;  %v918_v32 = vand.u32 2147483647, %v5230_v60  ;;  %v568_v51 = vsel %vm567_vm12, %v5073_v1, %v566_v43  ;;  %v575_v29 = vsel %vm574_vm13, %v5111_v41, %v573_v40  ;;  %v8830_v43 = vld [vmem:[#allocation50_spill] sm:$0xff] }
 0x1a0   :  { %8823 = vst [vmem:[#allocation43_spill] sm:$0xff] %v5225_v16  ;;  %8827 = vst [vmem:[#allocation44_spill] sm:$0xff] %v5248_v45  ;;  %v3569_v26 = vpop.eup %3568  ;;  %3580 = vrsqrt.f32 %v5225_v16  ;;  %v5284_v27 = vmul.f32 0.015873017, %v8830_v43  ;;  %v1076_v40 = vadd.f32 %v1075_v2, %v5266_v30  ;;  %vm609_vm12 = vcmp.eq.f32.partialorder %v5170_v13, inf }
 0x1a1   :  { %941 = vadd.xlane.f32.xlu0 %v4940_v42  ;;  %8829 = vst [vmem:[#allocation49_spill] sm:$0xff] %v5258_v22  ;;  %1508 = vadd.xlane.f32.xlu1 %v5077_v11  ;;  %v580_v42 = vmul.f32 %v3565_v46, %v5125_v39  ;;  %v587_v11 = vmul.f32 %v3567_v9, %v5132_v4  ;;  %v3571_v35 = vpop.eup %3570  ;;  %3582 = vrsqrt.f32 %v5248_v45  ;;  %v5305_v25 = vsel %vm139_vm0, %v918_v32, 0.0 }
 0x1a2   :  { %8831 = vst [vmem:[#allocation50_spill] sm:$0xff] %v5284_v27  ;;  %v594_v9 = vmul.f32 %v3569_v26, %v5146_v57  ;;  %3584 = vrsqrt.f32 %v5258_v22  ;;  %v5302_v26 = vsel %vm139_vm0, %v1186_v50, 0.0  ;;  %v601_v2 = vmul.f32 %v3571_v35, %v5152_v21 }
 0x1a3   :  { %v582_v58 = vsel %vm581_vm14, %v5125_v39, %v580_v42  ;;  %vm604_vm13 = vcmp.eq.f32.partialorder %v5152_v21, 0.0  ;;  %v5314_v46 = vadd.f32 %v1076_v40, %v5305_v25  ;;  %vm616_vm14 = vcmp.eq.f32.partialorder %v5182_v61, inf }
 0x1a4   :  { %3586 = vrsqrt.f32 %v5284_v27  ;;  %v1187_v50 = vmul.f32 %v4755_v62, %v4755_v62  ;;  %v8834_v32 = vand.u32 2147483648, %v4825_v38  ;;  %v8835_v35 = vand.u32 2147483648, %v4850_v37 }
 0x1a5   :  { %947 = vadd.xlane.f32.xlu0 %v4971_v10  ;;  %944 = vadd.xlane.f32.xlu1 %v4943_v54  ;;  %v8832_v10 = vld [vmem:[#allocation52_spill] sm:$0xff]  ;;  %v589_v54 = vsel %vm588_vm15, %v5132_v4, %v587_v11  ;;  %v596_v42 = vsel %vm595_vm4, %v5146_v57, %v594_v9  ;;  %vm611_vm15 = vcmp.eq.f32.partialorder %v5170_v13, 0.0  ;;  %v8836_v63 = vand.u32 2147483648, %v5018_v23 }
 0x1a6   :  { %v5299_v43 = vmul.f32 0.015873017, %v8832_v10  ;;  %v3573_v10 = vpop.eup %3572  ;;  %v543_v11 = vsel %vm541_vm1, %v8834_v32, %v5221_v56  ;;  %v550_v40 = vsel %vm548_vm2, %v8835_v35, %v547_v53  ;;  %v8837_v53 = vand.u32 2147483648, %v5021_v8 }
 0x1a7   :  { %v696_v12 = vadd.f32 1e-06, %v550_v40  ;;  %v557_v56 = vsel %vm555_vm3, %v8836_v63, %v554_v5  ;;  %v3575_v32 = vpop.eup %3574  ;;  %v8838_v35 = vand.u32 2147483648, %v5073_v1  ;;  %vm618_vm1 = vcmp.eq.f32.partialorder %v5182_v61, 0.0 }
 0x1a8   :  { %8833 = vst [vmem:[#allocation52_spill] sm:$0xff] %v5299_v43  ;;  %3588 = vrsqrt.f32 %v5299_v43  ;;  %v697_v37 = vadd.f32 1e-06, %v557_v56  ;;  %v564_v9 = vsel %vm562_vm5, %v8837_v53, %v561_v6  ;;  %vm623_vm2 = vcmp.eq.f32.partialorder %v5206_v17, inf }
 0x1a9   :  { %953 = vadd.xlane.f32.xlu0 %v5055_v3  ;;  %950 = vadd.xlane.f32.xlu1 %v4974_v20  ;;  %v695_v3 = vadd.f32 1e-06, %v543_v11  ;;  %v571_v20 = vsel %vm569_vm6, %v8838_v35, %v568_v51  ;;  %v608_v11 = vmul.f32 %v3573_v10, %v5170_v13  ;;  %v698_v63 = vadd.f32 1e-06, %v564_v9  ;;  %v8865_v9 = vld [vmem:[#allocation6_spill] sm:$0xff] }
 0x1aa   :  { %v699_v5 = vadd.f32 1e-06, %v571_v20  ;;  %v603_v40 = vsel %vm602_vm9, %v5152_v21, %v601_v2  ;;  %v8839_v6 = vand.u32 2147483648, %v5111_v41  ;;  %v8840_v10 = vand.u32 2147483648, %v5125_v39 }
 0x1ab   :  { %3590 = vrcp.f32 %v695_v3  ;;  %v3577_v3 = vpop.eup %3576  ;;  %v615_v53 = vmul.f32 %v3575_v32, %v5182_v61  ;;  %vm630_vm3 = vcmp.eq.f32.partialorder %v5215_v49, inf  ;;  %vm637_vm4 = vcmp.eq.f32.partialorder %v5225_v16, inf }
 0x1ac   :  { %3592 = vrcp.f32 %v696_v12  ;;  %v578_v51 = vsel %vm576_vm7, %v8839_v6, %v575_v29  ;;  %v585_v56 = vsel %vm583_vm8, %v8840_v10, %v582_v58  ;;  %v3579_v2 = vpop.eup %3578  ;;  %vm625_vm5 = vcmp.eq.f32.partialorder %v5206_v17, 0.0  ;;  %v8844_v10 = vld [vmem:[#allocation53_spill] sm:$0xff] }
 0x1ad   :  { %959 = vadd.xlane.f32.xlu0 %v5137_v24  ;;  %956 = vadd.xlane.f32.xlu1 %v5102_v44  ;;  %3594 = vrcp.f32 %v697_v37  ;;  %v700_v24 = vadd.f32 1e-06, %v578_v51  ;;  %v701_v12 = vadd.f32 1e-06, %v585_v56  ;;  %v647_v29 = vand.u32 2147483648, %v5248_v45  ;;  %v3581_v35 = vpop.eup %3580 }
 0x1ae   :  { %3596 = vrcp.f32 %v698_v63  ;;  %v8841_v58 = vand.u32 2147483648, %v5132_v4  ;;  %v610_v37 = vsel %vm609_vm12, %v5170_v13, %v608_v11  ;;  %vm644_vm6 = vcmp.eq.f32.partialorder %v5248_v45, inf  ;;  %v3583_v51 = vpop.eup %3582 }
 0x1af   :  { %3598 = vrcp.f32 %v699_v5  ;;  %v8842_v20 = vand.u32 2147483648, %v5146_v57  ;;  %v622_v63 = vmul.f32 %v3577_v3, %v5206_v17  ;;  %vm632_vm7 = vcmp.eq.f32.partialorder %v5215_v49, 0.0 }
 0x1b0   :  { %v592_v32 = vsel %vm590_vm10, %v8841_v58, %v589_v54  ;;  %vm651_vm8 = vcmp.eq.f32.partialorder %v5258_v22, inf  ;;  %3600 = vrcp.f32 %v700_v24  ;;  %v8843_v11 = vand.u32 2147483648, %v5152_v21 }
 0x1b1   :  { %v702_v44 = vadd.f32 1e-06, %v592_v32  ;;  %v599_v6 = vsel %vm597_vm11, %v8842_v20, %v596_v42  ;;  %965 = vadd.xlane.f32.xlu0 %v5201_v14  ;;  %v617_v42 = vsel %vm616_vm14, %v5182_v61, %v615_v53  ;;  %vm639_vm9 = vcmp.eq.f32.partialorder %v5225_v16, 0.0  ;;  %962 = vadd.xlane.f32.xlu1 %v5162_v55  ;;  %v3585_v14 = vpop.eup %3584  ;;  %v8847_v20 = vld [vmem:[#allocation56_spill] sm:$0xff] }
 0x1b2   :  { %v606_v5 = vsel %vm604_vm13, %v8843_v11, %v603_v40  ;;  %v5396_v56 = vmul.f32 0.015873017, %v8844_v10  ;;  %v1219_v3 = vsel %vm139_vm0, %v1187_v50, 0.0  ;;  %3602 = vrcp.f32 %v701_v12  ;;  %v3587_v10 = vpop.eup %3586 }
 0x1b3   :  { %v629_v24 = vmul.f32 %v3579_v2, %v5215_v49  ;;  %v636_v40 = vmul.f32 %v3581_v35, %v5225_v16  ;;  %vm646_vm10 = vcmp.eq.f32.partialorder %v5248_v45, 0.0  ;;  %v703_v58 = vadd.f32 1e-06, %v599_v6 }
 0x1b4   :  { %8845 = vst [vmem:[#allocation53_spill] sm:$0xff] %v5396_v56  ;;  %v8846_v53 = vand.u32 2147483648, %v5170_v13  ;;  %vm653_vm11 = vcmp.eq.f32.partialorder %v5258_v22, 0.0  ;;  %v5409_v50 = vmul.f32 0.015873017, %v8847_v20  ;;  %v1188_v55 = vmul.f32 %v4800_v15, %v4800_v15 }
 0x1b5   :  { %3604 = vrcp.f32 %v702_v44  ;;  %v704_v12 = vadd.f32 1e-06, %v606_v5  ;;  %v624_v2 = vsel %vm623_vm2, %v5206_v17, %v622_v63  ;;  %v643_v35 = vmul.f32 %v3583_v51, %v5248_v45  ;;  %971 = vadd.xlane.f32.xlu0 %v5305_v25  ;;  %968 = vadd.xlane.f32.xlu1 %v5266_v30 }
 0x1b6   :  { %v613_v32 = vsel %vm611_vm15, %v8846_v53, %v610_v37  ;;  %8848 = vst [vmem:[#allocation56_spill] sm:$0xff] %v5409_v50  ;;  %vm658_vm12 = vcmp.eq.f32.partialorder %v5284_v27, inf  ;;  %v1220_v37 = vadd.f32 %v1219_v3, %v5302_v26  ;;  %v8849_v6 = vand.u32 2147483648, %v5182_v61 }
 0x1b7   :  { %v650_v44 = vmul.f32 %v3585_v14, %v5258_v22  ;;  %3606 = vrsqrt.f32 %v5396_v56  ;;  %v705_v63 = vadd.f32 1e-06, %v613_v32  ;;  %v631_v26 = vsel %vm630_vm3, %v5215_v49, %v629_v24 }
 0x1b8   :  { %v620_v11 = vsel %vm618_vm1, %v8849_v6, %v617_v42  ;;  %v638_v25 = vsel %vm637_vm4, %v5225_v16, %v636_v40  ;;  %3608 = vrcp.f32 %v703_v58  ;;  %v3589_v42 = vpop.eup %3588  ;;  %v1221_v3 = vsel %vm139_vm0, %v1188_v55, 0.0 }
 0x1b9   :  { %3610 = vrcp.f32 %v704_v12  ;;  %v706_v14 = vadd.f32 1e-06, %v620_v11  ;;  %v8850_v53 = vand.u32 2147483648, %v5206_v17  ;;  %v5440_v32 = vpop.eup %3590  ;;  %v645_v24 = vsel %vm644_vm6, %v5248_v45, %v643_v35  ;;  %v8853_v12 = vld [vmem:[#allocation3_spill] sm:$0xff] }
 0x1ba   :  { %8851 = vst [vmem:[#allocation105_spill] sm:$0xff] %v5440_v32  ;;  %v657_v40 = vmul.f32 %v3587_v10, %v5284_v27  ;;  %vm660_vm13 = vcmp.eq.f32.partialorder %v5284_v27, 0.0  ;;  %3612 = vrsqrt.f32 %v5409_v50  ;;  %v5448_v58 = vadd.f32 %v1221_v3, %v1220_v37  ;;  %v5450_v20 = vpop.eup %3592  ;;  %v8857_v37 = vld [vmem:[#allocation60_spill] sm:$0xff] }
 0x1bb   :  { %v627_v30 = vsel %vm625_vm5, %v8850_v53, %v624_v2  ;;  %8852 = vst [vmem:[#allocation106_spill] sm:$0xff] %v5450_v20  ;;  %v652_v55 = vsel %vm651_vm8, %v5258_v22, %v650_v44  ;;  %v5457_v2 = vmul.f32 %v5440_v32, %v8853_v12  ;;  %3614 = vrcp.f32 %v705_v63  ;;  %v5463_v11 = vpop.eup %3594  ;;  %v8858_v3 = vld [vmem:[#allocation4_spill] sm:$0xff] }
 0x1bc   :  { %v8855_v35 = vand.u32 2147483648, %v5215_v49  ;;  %8856 = vst [vmem:[#allocation107_spill] sm:$0xff] %v5463_v11  ;;  %v1189_v10 = vmul.f32 %v8857_v37, %v8857_v37  ;;  %v5469_v53 = vmul.f32 %v5450_v20, %v8858_v3  ;;  %v707_v44 = vadd.f32 1e-06, %v627_v30  ;;  %v5475_v12 = vpop.eup %3596  ;;  %v8871_v49 = vld [vmem:[#allocation7_spill] sm:$0xff]  ;;  %v8908_v20 = vld [vmem:[#allocation18_spill] sm:$0xff] }
 0x1bd   :  { %8854 = vst [vmem:[#allocation3_spill] sm:$0xff] %v5457_v2  ;;  %v8860_v51 = vand.u32 2147483648, %v5225_v16  ;;  %8861 = vst [vmem:[#allocation4_spill] sm:$0xff] %v5475_v12  ;;  %v919_v5 = vand.u32 2147483647, %v5457_v2  ;;  %3616 = vrcp.f32 %v706_v14  ;;  %v648_v3 = vsel %vm646_vm10, %v647_v29, %v645_v24  ;;  %v5486_v30 = vpop.eup %3598 }
 0x1be   :  { %v634_v6 = vsel %vm632_vm7, %v8855_v35, %v631_v26  ;;  %8859 = vst [vmem:[#allocation60_spill] sm:$0xff] %v5469_v53  ;;  %v8862_v26 = vld [vmem:[#allocation5_spill] sm:$0xff]  ;;  %8864 = vst [vmem:[#allocation108_spill] sm:$0xff] %v5486_v30  ;;  %v920_v54 = vand.u32 2147483647, %v5469_v53  ;;  %v8867_v16 = vand.u32 2147483648, %v5258_v22  ;;  %v5497_v14 = vpop.eup %3600  ;;  %v659_v29 = vsel %vm658_vm12, %v5284_v27, %v657_v40 }
 0x1bf   :  { %v641_v63 = vsel %vm639_vm9, %v8860_v51, %v638_v25  ;;  %v5480_v35 = vmul.f32 %v5463_v11, %v8862_v26  ;;  %v5491_v25 = vmul.f32 %v5475_v12, %v8865_v9  ;;  %v708_v51 = vadd.f32 1e-06, %v634_v6  ;;  %8868 = vst [vmem:[#allocation109_spill] sm:$0xff] %v5497_v14  ;;  %v5504_v8 = vpop.eup %3602 }
 0x1c0   :  { %v655_v26 = vsel %vm653_vm11, %v8867_v16, %v652_v55  ;;  %v973_v24 = vsel %vm139_vm0, %v919_v5, 0.0  ;;  %v709_v1 = vadd.f32 1e-06, %v641_v63  ;;  %8869 = vst [vmem:[#allocation110_spill] sm:$0xff] %v5504_v8  ;;  %v1223_v9 = vsel %vm139_vm0, %v1189_v10, 0.0 }
 0x1c1   :  { %8863 = vst [vmem:[#allocation5_spill] sm:$0xff] %v5480_v35  ;;  %8866 = vst [vmem:[#allocation6_spill] sm:$0xff] %v5491_v25  ;;  %v921_v45 = vand.u32 2147483647, %v5480_v35  ;;  %974 = vadd.xlane.f32.xlu1 %v973_v24  ;;  %v1078_v6 = vadd.f32 %v5314_v46, %v973_v24  ;;  %v976_v16 = vsel %vm139_vm0, %v920_v54, 0.0  ;;  %vm665_vm14 = vcmp.eq.f32.partialorder %v5299_v43, inf }
 0x1c2   :  { %v710_v55 = vadd.f32 1e-06, %v648_v3  ;;  %977 = vadd.xlane.f32.xlu0 %v976_v16  ;;  %v922_v5 = vand.u32 2147483647, %v5491_v25  ;;  %3618 = vrcp.f32 %v707_v44  ;;  %v711_v22 = vadd.f32 1e-06, %v655_v26  ;;  %v5512_v63 = vpop.eup %3604 }
 0x1c3   :  { %v979_v40 = vsel %vm139_vm0, %v921_v45, 0.0  ;;  %8870 = vst [vmem:[#allocation111_spill] sm:$0xff] %v5512_v63  ;;  %v1079_v12 = vadd.f32 %v1078_v6, %v976_v16  ;;  %v5516_v10 = vmul.f32 %v5486_v30, %v8871_v49  ;;  %v8873_v46 = vld [vmem:[#allocation8_spill] sm:$0xff]  ;;  %3620 = vrcp.f32 %v708_v51  ;;  %v8875_v24 = vld [vmem:[#allocation9_spill] sm:$0xff] }
 0x1c4   :  { %v5520_v54 = vmul.f32 %v5497_v14, %v8873_v46  ;;  %v664_v3 = vmul.f32 %v3589_v42, %v5299_v43  ;;  %v5525_v45 = vmul.f32 %v5504_v8, %v8875_v24  ;;  %3622 = vrcp.f32 %v709_v1  ;;  %v3607_v6 = vpop.eup %3606  ;;  %v8902_v14 = vld [vmem:[#allocation16_spill] sm:$0xff] }
 0x1c5   :  { %8872 = vst [vmem:[#allocation7_spill] sm:$0xff] %v5516_v10  ;;  %v8877_v44 = vand.u32 2147483648, %v5284_v27  ;;  %v1190_v49 = vmul.f32 %v5025_v33, %v5025_v33  ;;  %980 = vadd.xlane.f32.xlu1 %v979_v40  ;;  %v1080_v16 = vadd.f32 %v1079_v12, %v979_v40  ;;  %v982_v51 = vsel %vm139_vm0, %v922_v5, 0.0  ;;  %v5535_v46 = vpop.eup %3608 }
 0x1c6   :  { %8874 = vst [vmem:[#allocation8_spill] sm:$0xff] %v5520_v54  ;;  %8876 = vst [vmem:[#allocation9_spill] sm:$0xff] %v5525_v45  ;;  %v923_v42 = vand.u32 2147483647, %v5516_v10  ;;  %vm672_vm15 = vcmp.eq.f32.partialorder %v5396_v56, inf  ;;  %983 = vadd.xlane.f32.xlu0 %v982_v51  ;;  %3624 = vrcp.f32 %v710_v55  ;;  %v5544_v27 = vpop.eup %3610  ;;  %vm679_vm1 = vcmp.eq.f32.partialorder %v5409_v50, inf }
 0x1c7   :  { %v662_v26 = vsel %vm660_vm13, %v8877_v44, %v659_v29  ;;  %8878 = vst [vmem:[#allocation112_spill] sm:$0xff] %v5535_v46  ;;  %v924_v1 = vand.u32 2147483647, %v5520_v54  ;;  %v925_v24 = vand.u32 2147483647, %v5525_v45  ;;  %v8879_v29 = vld [vmem:[#allocation10_spill] sm:$0xff]  ;;  %v1081_v12 = vadd.f32 %v1080_v16, %v982_v51  ;;  %v3613_v30 = vpop.eup %3612 }
 0x1c8   :  { %v5542_v44 = vmul.f32 %v5512_v63, %v8879_v29  ;;  %8881 = vst [vmem:[#allocation113_spill] sm:$0xff] %v5544_v27  ;;  %v985_v40 = vsel %vm139_vm0, %v923_v42, 0.0  ;;  %3626 = vrcp.f32 %v711_v22  ;;  %v712_v5 = vadd.f32 1e-06, %v662_v26  ;;  %v5551_v21 = vpop.eup %3614  ;;  %v8883_v42 = vld [vmem:[#allocation11_spill] sm:$0xff] }
 0x1c9   :  { %v1224_v17 = vadd.f32 %v1223_v9, %v5448_v58  ;;  %v988_v61 = vsel %vm139_vm0, %v924_v1, 0.0  ;;  %v991_v13 = vsel %vm139_vm0, %v925_v24, 0.0  ;;  %8882 = vst [vmem:[#allocation114_spill] sm:$0xff] %v5551_v21  ;;  %vm667_vm2 = vcmp.eq.f32.partialorder %v5299_v43, 0.0  ;;  %986 = vadd.xlane.f32.xlu1 %v985_v40  ;;  %v1791_v58 = vpop.xlane.xlu0 %1790  ;;  %v8885_v24 = vld [vmem:[#allocation12_spill] sm:$0xff] }
 0x1ca   :  { %8880 = vst [vmem:[#allocation10_spill] sm:$0xff] %v5542_v44  ;;  %v1191_v16 = vmul.f32 %v5052_v34, %v5052_v34  ;;  %v5557_v22 = vadd.f32 %v1081_v12, %v985_v40  ;;  %v1089_v26 = vadd.f32 %v991_v13, %v988_v61  ;;  %v671_v51 = vmul.f32 %v3607_v6, %v5396_v56  ;;  %v5569_v55 = vpop.eup %3616  ;;  %v1788_v40 = vpop.xlane.xlu1 %1787 }
 0x1cb   :  { %989 = vadd.xlane.f32.xlu0 %v988_v61  ;;  %v926_v9 = vand.u32 2147483647, %v5542_v44  ;;  %v5563_v1 = vmul.f32 %v5535_v46, %v8883_v42  ;;  %v5567_v29 = vmul.f32 %v5544_v27, %v8885_v24  ;;  %8887 = vst [vmem:[#allocation115_spill] sm:$0xff] %v5569_v55  ;;  %v666_v12 = vsel %vm665_vm14, %v5299_v43, %v664_v3  ;;  %v8888_v27 = vld [vmem:[#allocation13_spill] sm:$0xff] }
 0x1cc   :  { %v678_v6 = vmul.f32 %v3613_v30, %v5409_v50  ;;  %v1225_v61 = vsel %vm139_vm0, %v1190_v49, 0.0  ;;  %3628 = vrcp.f32 %v712_v5  ;;  %vm674_vm3 = vcmp.eq.f32.partialorder %v5396_v56, 0.0 }
 0x1cd   :  { %8884 = vst [vmem:[#allocation11_spill] sm:$0xff] %v5563_v1  ;;  %8886 = vst [vmem:[#allocation12_spill] sm:$0xff] %v5567_v29  ;;  %v1226_v42 = vadd.f32 %v1225_v61, %v1224_v17  ;;  %v994_v57 = vsel %vm139_vm0, %v926_v9, 0.0  ;;  %v927_v24 = vand.u32 2147483647, %v5563_v1  ;;  %v5581_v23 = vmul.f32 %v5551_v21, %v8888_v27  ;;  %992 = vadd.xlane.f32.xlu1 %v991_v13  ;;  %v8892_v27 = vld [vmem:[#allocation14_spill] sm:$0xff] }
 0x1ce   :  { %vm681_vm4 = vcmp.eq.f32.partialorder %v5409_v50, 0.0  ;;  %v5584_v3 = vmul.f32 0.015873017, %v1791_v58  ;;  %v1227_v30 = vsel %vm139_vm0, %v1191_v16, 0.0  ;;  %v1203_v49 = vmul.f32 %v5525_v45, %v5525_v45 }
 0x1cf   :  { %8889 = vst [vmem:[#allocation13_spill] sm:$0xff] %v5581_v23  ;;  %v1090_v5 = vadd.f32 %v1089_v26, %v994_v57  ;;  %v5589_v17 = vmul.f32 0.015873017, %v1788_v40  ;;  %995 = vadd.xlane.f32.xlu0 %v994_v57  ;;  %v997_v9 = vsel %vm139_vm0, %v927_v24, 0.0  ;;  %v928_v61 = vand.u32 2147483647, %v5567_v29  ;;  %v5597_v58 = vpop.eup %3618 }
 0x1d0   :  { %8890 = vst [vmem:[#allocation116_spill] sm:$0xff] %v5584_v3  ;;  %v5595_v21 = vmul.f32 %v5569_v55, %v8892_v27  ;;  %8894 = vst [vmem:[#allocation118_spill] sm:$0xff] %v5597_v58  ;;  %v673_v16 = vsel %vm672_vm15, %v5396_v56, %v671_v51  ;;  %v680_v13 = vsel %vm679_vm1, %v5409_v50, %v678_v6  ;;  %v5607_v40 = vpop.eup %3620  ;;  %v929_v46 = vand.u32 2147483647, %v5581_v23 }
 0x1d1   :  { %8891 = vst [vmem:[#allocation117_spill] sm:$0xff] %v5589_v17  ;;  %v1202_v57 = vmul.f32 %v5520_v54, %v5520_v54  ;;  %v1091_v26 = vadd.f32 %v1090_v5, %v997_v9  ;;  %8895 = vst [vmem:[#allocation119_spill] sm:$0xff] %v5607_v40  ;;  %v1228_v24 = vadd.f32 %v1227_v30, %v1226_v42  ;;  %v1000_v55 = vsel %vm139_vm0, %v928_v61, 0.0  ;;  %v5613_v4 = vpop.eup %3622 }
 0x1d2   :  { %8893 = vst [vmem:[#allocation14_spill] sm:$0xff] %v5595_v21  ;;  %v1192_v27 = vmul.f32 %v5106_v0, %v5106_v0  ;;  %8896 = vst [vmem:[#allocation120_spill] sm:$0xff] %v5613_v4  ;;  %3630 = vrsqrt.f32 %v5584_v3  ;;  %v1193_v51 = vmul.f32 %v5122_v59, %v5122_v59  ;;  %v1256_v6 = vsel %vm139_vm0, %v1203_v49, 0.0  ;;  %998 = vadd.xlane.f32.xlu1 %v997_v9 }
 0x1d3   :  { %v1092_v5 = vadd.f32 %v1091_v26, %v1000_v55  ;;  %3632 = vrsqrt.f32 %v5589_v17  ;;  %1001 = vadd.xlane.f32.xlu0 %v1000_v55  ;;  %v1003_v42 = vsel %vm139_vm0, %v929_v46, 0.0  ;;  %v930_v30 = vand.u32 2147483647, %v5595_v21  ;;  %v5626_v41 = vpop.eup %3624  ;;  %v8899_v26 = vld [vmem:[#allocation15_spill] sm:$0xff] }
 0x1d4   :  { %v8897_v61 = vand.u32 2147483648, %v5299_v43  ;;  %8898 = vst [vmem:[#allocation121_spill] sm:$0xff] %v5626_v41  ;;  %v1255_v63 = vsel %vm139_vm0, %v1202_v57, 0.0  ;;  %v1204_v49 = vmul.f32 %v5542_v44, %v5542_v44  ;;  %v5633_v55 = vmul.f32 %v5597_v58, %v8899_v26 }
 0x1d5   :  { %v1093_v9 = vadd.f32 %v1092_v5, %v1003_v42  ;;  %v5635_v46 = vpop.eup %3626  ;;  %v1257_v8 = vadd.f32 %v1256_v6, %v1255_v63  ;;  %v1006_v11 = vsel %vm139_vm0, %v930_v30, 0.0  ;;  %v1205_v5 = vmul.f32 %v5563_v1, %v5563_v1  ;;  %v5653_v6 = vpop.xlane.xlu1 %1835 }
 0x1d6   :  { %v669_v39 = vsel %vm667_vm2, %v8897_v61, %v666_v12  ;;  %8900 = vst [vmem:[#allocation15_spill] sm:$0xff] %v5633_v55  ;;  %8901 = vst [vmem:[#allocation122_spill] sm:$0xff] %v5635_v46  ;;  %v5640_v12 = vmul.f32 %v5607_v40, %v8902_v14  ;;  %v8904_v61 = vld [vmem:[#allocation17_spill] sm:$0xff]  ;;  %1004 = vadd.xlane.f32.xlu1 %v1003_v42  ;;  %v931_v26 = vand.u32 2147483647, %v5633_v55  ;;  %v8906_v58 = vand.u32 2147483648, %v5396_v56 }
 0x1d7   :  { %v5644_v57 = vmul.f32 %v5613_v4, %v8904_v61  ;;  %v1094_v43 = vadd.f32 %v1093_v9, %v1006_v11  ;;  %1007 = vadd.xlane.f32.xlu0 %v1006_v11  ;;  %v713_v61 = vadd.f32 1e-06, %v669_v39  ;;  %v8907_v4 = vand.u32 2147483648, %v5409_v50 }
 0x1d8   :  { %8903 = vst [vmem:[#allocation16_spill] sm:$0xff] %v5640_v12  ;;  %v676_v63 = vsel %vm674_vm3, %v8906_v58, %v673_v16  ;;  %v932_v14 = vand.u32 2147483647, %v5640_v12  ;;  %v1258_v9 = vsel %vm139_vm0, %v1204_v49, 0.0  ;;  %v1009_v40 = vsel %vm139_vm0, %v931_v26, 0.0  ;;  %v8910_v16 = vld [vmem:[#allocation19_spill] sm:$0xff] }
 0x1d9   :  { %8905 = vst [vmem:[#allocation17_spill] sm:$0xff] %v5644_v57  ;;  %v933_v30 = vand.u32 2147483647, %v5644_v57  ;;  %v683_v42 = vsel %vm681_vm4, %v8907_v4, %v680_v13  ;;  %v5665_v58 = vmul.f32 %v5626_v41, %v8908_v20  ;;  %v5669_v11 = vmul.f32 %v5635_v46, %v8910_v16  ;;  %v5671_v56 = vpop.eup %3628 }
 0x1da   :  { %8912 = vst [vmem:[#allocation123_spill] sm:$0xff] %v5671_v56  ;;  %v1259_v38 = vadd.f32 %v1258_v9, %v1257_v8  ;;  %v1095_v32 = vadd.f32 %v1094_v43, %v1009_v40  ;;  %v714_v50 = vadd.f32 1e-06, %v676_v63  ;;  %v1260_v4 = vsel %vm139_vm0, %v1205_v5, 0.0  ;;  %1010 = vadd.xlane.f32.xlu1 %v1009_v40  ;;  %v8913_v43 = vld [vmem:[#allocation20_spill] sm:$0xff]  ;;  %v5686_v40 = vpop.xlane.xlu0 %1838  ;;  %v1794_v63 = vpop.xlane.xlu1 %1793 }
 0x1db   :  { %8909 = vst [vmem:[#allocation18_spill] sm:$0xff] %v5665_v58  ;;  %8911 = vst [vmem:[#allocation19_spill] sm:$0xff] %v5669_v11  ;;  %v1012_v13 = vsel %vm139_vm0, %v932_v14, 0.0  ;;  %v1015_v49 = vsel %vm139_vm0, %v933_v30, 0.0  ;;  %v934_v20 = vand.u32 2147483647, %v5665_v58  ;;  %v5683_v5 = vmul.f32 %v5671_v56, %v8913_v43 }
 0x1dc   :  { %v1229_v26 = vsel %vm139_vm0, %v1192_v27, 0.0  ;;  %v1096_v16 = vadd.f32 %v1095_v32, %v1012_v13  ;;  %1013 = vadd.xlane.f32.xlu0 %v1012_v13  ;;  %v935_v46 = vand.u32 2147483647, %v5669_v11  ;;  %v715_v41 = vadd.f32 1e-06, %v683_v42 }
 0x1dd   :  { %v1230_v39 = vadd.f32 %v1229_v26, %v1228_v24  ;;  %v1231_v8 = vsel %vm139_vm0, %v1193_v51, 0.0  ;;  %8914 = vst [vmem:[#allocation20_spill] sm:$0xff] %v5683_v5  ;;  %3634 = vrcp.f32 %v713_v61  ;;  %vm1916_vm5 = vcmp.eq.f32.partialorder %v5589_v17, inf }
 0x1de   :  { %v1261_v14 = vadd.f32 %v1260_v4, %v1259_v38  ;;  %v1206_v32 = vmul.f32 %v5567_v29, %v5567_v29  ;;  %v1097_v27 = vadd.f32 %v1096_v16, %v1015_v49  ;;  %v5692_v24 = vsel %vm139_vm0, %v5106_v0, 0.0  ;;  %1016 = vadd.xlane.f32.xlu1 %v1015_v49 }
 0x1df   :  { %v1018_v51 = vsel %vm139_vm0, %v934_v20, 0.0  ;;  %v1021_v30 = vsel %vm139_vm0, %v935_v46, 0.0  ;;  %v936_v61 = vand.u32 2147483647, %v5683_v5  ;;  %3636 = vrcp.f32 %v714_v50  ;;  %v3631_v42 = vpop.eup %3630 }
 0x1e0   :  { %v1098_v9 = vadd.f32 %v1097_v27, %v1018_v51  ;;  %1019 = vadd.xlane.f32.xlu0 %v1018_v51  ;;  %3638 = vrcp.f32 %v715_v41  ;;  %v1124_v38 = vadd.f32 %v5692_v24, %v5085_v19  ;;  %v5701_v4 = vsel %vm139_vm0, %v5122_v59, 0.0  ;;  %v3633_v13 = vpop.eup %3632  ;;  %v5726_v51 = vpop.xlane.xlu0 %1841 }
 0x1e1   :  { %vm1923_vm6 = vcmp.eq.f32.partialorder %v5584_v3, inf  ;;  %v5705_v46 = vmul.f32 0.015873017, %v1794_v63  ;;  %v1194_v50 = vmul.f32 %v5156_v31, %v5156_v31  ;;  %v1207_v41 = vmul.f32 %v5581_v23, %v5581_v23 }
 0x1e2   :  { %v1232_v20 = vadd.f32 %v1231_v8, %v1230_v39  ;;  %v1195_v19 = vmul.f32 %v5191_v36, %v5191_v36  ;;  %v1099_v26 = vadd.f32 %v1098_v9, %v1021_v30  ;;  %v1126_v16 = vadd.f32 %v5701_v4, %v1124_v38  ;;  %1022 = vadd.xlane.f32.xlu1 %v1021_v30  ;;  %v1797_v9 = vpop.xlane.xlu1 %1796 }
 0x1e3   :  { %8915 = vst [vmem:[#allocation124_spill] sm:$0xff] %v5705_v46  ;;  %vm1918_vm7 = vcmp.eq.f32.partialorder %v5589_v17, 0.0  ;;  %v1262_v43 = vsel %vm139_vm0, %v1206_v32, 0.0  ;;  %v1024_v63 = vsel %vm139_vm0, %v936_v61, 0.0  ;;  %v5719_v27 = vsel %vm139_vm0, %v5156_v31, 0.0 }
 0x1e4   :  { %v5723_v39 = vsel %vm139_vm0, %v5191_v36, 0.0  ;;  %v1915_v8 = vmul.f32 %v3633_v13, %v5589_v17  ;;  %v1263_v38 = vadd.f32 %v1262_v43, %v1261_v14  ;;  %v5728_v49 = vadd.f32 %v1099_v26, %v1024_v63  ;;  %1025 = vadd.xlane.f32.xlu0 %v1024_v63 }
 0x1e5   :  { %v1128_v32 = vadd.f32 %v5719_v27, %v1126_v16  ;;  %vm1925_vm8 = vcmp.eq.f32.partialorder %v5584_v3, 0.0  ;;  %v1264_v30 = vsel %vm139_vm0, %v1207_v41, 0.0  ;;  %v1208_v61 = vmul.f32 %v5595_v21, %v5595_v21 }
 0x1e6   :  { %v5737_v56 = vsel %vm139_vm0, %v5520_v54, 0.0  ;;  %v5741_v13 = vsel %vm139_vm0, %v5525_v45, 0.0  ;;  %3640 = vrsqrt.f32 %v5705_v46  ;;  %v1233_v14 = vsel %vm139_vm0, %v1194_v50, 0.0  ;;  %v1800_v34 = vpop.xlane.xlu1 %1799 }
 0x1e7   :  { %v1130_v26 = vadd.f32 %v5723_v39, %v1128_v32  ;;  %v1151_v41 = vadd.f32 %v5741_v13, %v5737_v56  ;;  %v1922_v16 = vmul.f32 %v3631_v42, %v5584_v3  ;;  %v5749_v43 = vmul.f32 0.015873017, %v1797_v9 }
 0x1e8   :  { %v5753_v63 = vsel %vm139_vm0, %v5542_v44, 0.0  ;;  %v5757_v36 = vsel %vm139_vm0, %v5563_v1, 0.0  ;;  %v1234_v52 = vadd.f32 %v1233_v14, %v1232_v20  ;;  %v1265_v18 = vadd.f32 %v1264_v30, %v1263_v38  ;;  %v5772_v20 = vpop.xlane.xlu0 %1844 }
 0x1e9   :  { %8916 = vst [vmem:[#allocation125_spill] sm:$0xff] %v5749_v43  ;;  %v5761_v50 = vsel %vm139_vm0, %v5230_v60, 0.0  ;;  %v1153_v32 = vadd.f32 %v5753_v63, %v1151_v41  ;;  %v1917_v42 = vsel %vm1916_vm5, %v5589_v17, %v1915_v8  ;;  %v1235_v9 = vsel %vm139_vm0, %v1195_v19, 0.0  ;;  %8918 = vst [vmem:[#allocation127_spill] sm:$0xff] %v5772_v20  ;;  %v8919_v8 = vld [vmem:[#allocation21_spill] sm:$0xff] }
 0x1ea   :  { %v1266_v28 = vsel %vm139_vm0, %v1208_v61, 0.0  ;;  %v1132_v48 = vadd.f32 %v5761_v50, %v1130_v26  ;;  %v5770_v1 = vpop.eup %3634  ;;  %v1209_v38 = vmul.f32 %v5633_v55, %v5633_v55  ;;  %v5778_v30 = vsel %vm139_vm0, %v5457_v2, 0.0 }
 0x1eb   :  { %8917 = vst [vmem:[#allocation126_spill] sm:$0xff] %v5770_v1  ;;  %v1155_v14 = vadd.f32 %v5757_v36, %v1153_v32  ;;  %v5783_v19 = vsel %vm139_vm0, %v5567_v29, 0.0  ;;  %v5787_v61 = vmul.f32 %v5770_v1, %v8919_v8  ;;  %v5791_v26 = vsel %vm139_vm0, %v5581_v23, 0.0  ;;  %v8925_v1 = vld [vmem:[#allocation23_spill] sm:$0xff] }
 0x1ec   :  { %vm3234_vm9 = vcmask 64512   ;;  %v5793_v41 = vpop.eup %3636  ;;  %v1924_v44 = vsel %vm1923_vm6, %v5584_v3, %v1922_v16  ;;  %v5798_v32 = vadd.f32 %v1235_v9, %v1234_v52  ;;  %v1267_v45 = vadd.f32 %v1266_v28, %v1265_v18  ;;  %v8923_v16 = vld [vmem:[#allocation22_spill] sm:$0xff] }
 0x1ed   :  { %8920 = vst [vmem:[#allocation21_spill] sm:$0xff] %v5787_v61  ;;  %8921 = vst [vmem:[#allocation128_spill] sm:$0xff] %v5793_v41  ;;  %v1157_v29 = vadd.f32 %v5783_v19, %v1155_v14  ;;  %v3924_v54 = vmov 0.0   ;;  %v5929_v28 = vpop.eup %3638  ;;  %v1210_v18 = vmul.f32 %v5640_v12, %v5640_v12  ;;  %v937_v52 = vand.u32 2147483647, %v5787_v61 }
 0x1ee   :  { %3235 = vst.msk [vmem:[%s8386_s2] sm:$0xff] %vm3234_vm9, %v3924_v54  ;;  %3236 = vst.msk [vmem:[%s8386_s2 + $0x8] sm:$0xff] %vm3234_vm9, %v3924_v54  ;;  %v5936_v9 = vmul.f32 %v5793_v41, %v8923_v16  ;;  %v1134_v14 = vadd.f32 %v5778_v30, %v1132_v48  ;;  %v1268_v8 = vsel %vm139_vm0, %v1209_v38, 0.0  ;;  %v5942_v23 = vmul.f32 %v5929_v28, %v8925_v1  ;;  %v5959_v1 = vpop.xlane.xlu0 %1847 }
 0x1ef   :  { %3237 = vst.msk [vmem:[%s8386_s2 + $0x10] sm:$0xff] %vm3234_vm9, %v3924_v54  ;;  %3238 = vst.msk [vmem:[%s8386_s2 + $0x18] sm:$0xff] %vm3234_vm9, %v3924_v54  ;;  %v8927_v47 = vand.u32 2147483648, %v5589_v17  ;;  %v1027_v59 = vsel %vm139_vm0, %v937_v52, 0.0  ;;  %v5953_v48 = vsel %vm139_vm0, %v5469_v53, 0.0  ;;  %v5957_v38 = vsel %vm139_vm0, %v5595_v21, 0.0 }
 0x1f0   :  { %3239 = vst.msk [vmem:[%s8386_s2 + $0x20] sm:$0xff] %vm3234_vm9, %v3924_v54  ;;  %3240 = vst.msk [vmem:[%s8386_s2 + $0x28] sm:$0xff] %vm3234_vm9, %v3924_v54  ;;  %v938_v16 = vand.u32 2147483647, %v5936_v9  ;;  %1028 = vadd.xlane.f32.xlu1 %v1027_v59  ;;  %v939_v17 = vand.u32 2147483647, %v5942_v23  ;;  %v1136_v41 = vadd.f32 %v5953_v48, %v1134_v14  ;;  %v1211_v14 = vmul.f32 %v5644_v57, %v5644_v57 }
 0x1f1   :  { %3241 = vst.msk [vmem:[%s8386_s2 + $0x30] sm:$0xff] %vm3234_vm9, %v3924_v54  ;;  %3242 = vst.msk [vmem:[%s8386_s2 + $0x38] sm:$0xff] %vm3234_vm9, %v3924_v54  ;;  %v1920_v31 = vsel %vm1918_vm7, %v8927_v47, %v1917_v42  ;;  %v5965_v47 = vsel %vm139_vm0, %v5633_v55, 0.0  ;;  %v8929_v42 = vand.u32 2147483648, %v5584_v3  ;;  %v5977_v55 = vsel %vm139_vm0, %v5480_v35, 0.0 }
 0x1f2   :  { %3243 = vst.msk [vmem:[%s8386_s2 + $0x40] sm:$0xff] %vm3234_vm9, %v3924_v54  ;;  %3244 = vst.msk [vmem:[%s8386_s2 + $0x48] sm:$0xff] %vm3234_vm9, %v3924_v54  ;;  %v2138_v0 = vadd.f32 1e-06, %v1920_v31  ;;  %v1272_v3 = vsel %vm139_vm0, %v1211_v14, 0.0  ;;  %v1212_v14 = vmul.f32 %v5665_v58, %v5665_v58  ;;  %vm1930_vm10 = vcmp.eq.f32.partialorder %v5705_v46, inf }
 0x1f3   :  { %3245 = vst.msk [vmem:[%s8386_s2 + $0x50] sm:$0xff] %vm3234_vm9, %v3924_v54  ;;  %3246 = vst.msk [vmem:[%s8386_s2 + $0x58] sm:$0xff] %vm3234_vm9, %v3924_v54  ;;  %v1927_v52 = vsel %vm1925_vm8, %v8929_v42, %v1924_v44  ;;  %v3641_v20 = vpop.eup %3640  ;;  %v1196_v44 = vmul.f32 %v5230_v60, %v5230_v60  ;;  %v6000_v42 = vmul.f32 0.015873017, %v1800_v34  ;;  %v1139_v34 = vsel %vm139_vm0, %v5491_v25, 0.0 }
 0x1f4   :  { %3247 = vst.msk [vmem:[%s8386_s2 + $0x60] sm:$0xff] %vm3234_vm9, %v3924_v54  ;;  %3248 = vst.msk [vmem:[%s8386_s2 + $0x68] sm:$0xff] %vm3234_vm9, %v3924_v54  ;;  %v2139_v31 = vadd.f32 1e-06, %v1927_v52  ;;  %3642 = vrcp.f32 %v2138_v0  ;;  %v6002_v52 = vpop.xlane.xlu0 %1850  ;;  %v6014_v0 = vsel %vm139_vm0, %v5669_v11, 0.0  ;;  %vm1932_vm11 = vcmp.eq.f32.partialorder %v5705_v46, 0.0 }
 0x1f5   :  { %3249 = vst.msk [vmem:[%s8386_s2 + $0x70] sm:$0xff] %vm3234_vm9, %v3924_v54  ;;  %3250 = vst.msk [vmem:[%s8386_s2 + $0x78] sm:$0xff] %vm3234_vm9, %v3924_v54  ;;  %3644 = vrsqrt.f32 %v5749_v43  ;;  %vm1937_vm12 = vcmp.eq.f32.partialorder %v5749_v43, inf  ;;  %vm1939_vm13 = vcmp.eq.f32.partialorder %v5749_v43, 0.0  ;;  %vm1944_vm14 = vcmp.eq.f32.partialorder %v6000_v42, inf }
 0x1f6   :  { %3251 = vst.msk [vmem:[%s8386_s2 + $0x80] sm:$0xff] %vm3234_vm9, %v3924_v54  ;;  %3252 = vst.msk [vmem:[%s8386_s2 + $0x88] sm:$0xff] %vm3234_vm9, %v3924_v54  ;;  %3646 = vrcp.f32 %v2139_v31  ;;  %v1141_v31 = vsel %vm139_vm0, %v5516_v10, 0.0  ;;  %vm1946_vm15 = vcmp.eq.f32.partialorder %v6000_v42, 0.0  ;;  %vm3267_vm3 = vcmask 7168  }
 0x1f7   :  { %3253 = vst.msk [vmem:[%s8386_s2 + $0x90] sm:$0xff] %vm3234_vm9, %v3924_v54  ;;  %3254 = vst.msk [vmem:[%s8386_s2 + $0x98] sm:$0xff] %vm3234_vm9, %v3924_v54  ;;  %3648 = vrsqrt.f32 %v6000_v42 }
 0x1f8   :  { %3255 = vst.msk [vmem:[%s8386_s2 + $0xa0] sm:$0xff] %vm3234_vm9, %v3924_v54  ;;  %3256 = vst.msk [vmem:[%s8386_s2 + $0xa8] sm:$0xff] %vm3234_vm9, %v3924_v54 }
 0x1f9   :  { %3257 = vst.msk [vmem:[%s8386_s2 + $0xb0] sm:$0xff] %vm3234_vm9, %v3924_v54  ;;  %3258 = vst.msk [vmem:[%s8386_s2 + $0xb8] sm:$0xff] %vm3234_vm9, %v3924_v54 }
 0x1fa   :  { %3259 = vst.msk [vmem:[%s8386_s2 + $0xc0] sm:$0xff] %vm3234_vm9, %v3924_v54  ;;  %3260 = vst.msk [vmem:[%s8386_s2 + $0xc8] sm:$0xff] %vm3234_vm9, %v3924_v54 }
 0x1fb   :  { %3261 = vst.msk [vmem:[%s8386_s2 + $0xd0] sm:$0xff] %vm3234_vm9, %v3924_v54  ;;  %3262 = vst.msk [vmem:[%s8386_s2 + $0xd8] sm:$0xff] %vm3234_vm9, %v3924_v54 }
 0x1fc   :  { %3263 = vst.msk [vmem:[%s8386_s2 + $0xe0] sm:$0xff] %vm3234_vm9, %v3924_v54  ;;  %3264 = vst.msk [vmem:[%s8386_s2 + $0xe8] sm:$0xff] %vm3234_vm9, %v3924_v54 }
 0x1fd   :  { %3265 = vst.msk [vmem:[%s8386_s2 + $0xf0] sm:$0xff] %vm3234_vm9, %v3924_v54  ;;  %3266 = vst.msk [vmem:[%s8386_s2 + $0xf8] sm:$0xff] %vm3234_vm9, %v3924_v54  ;;  %v1159_v54 = vadd.f32 %v5791_v26, %v1157_v29  ;;  %v1101_v29 = vadd.f32 %v5728_v49, %v1027_v59  ;;  %v1033_v49 = vsel %vm139_vm0, %v939_v17, 0.0 }
 0x1fe   :  { %8922 = vst [vmem:[#allocation129_spill] sm:$0xff] %v5929_v28  ;;  %8924 = vst [vmem:[#allocation22_spill] sm:$0xff] %v5936_v9  ;;  %v1030_v28 = vsel %vm139_vm0, %v938_v16, 0.0  ;;  %1034 = vadd.xlane.f32.xlu1 %v1033_v49  ;;  %v1270_v16 = vsel %vm139_vm0, %v1210_v18, 0.0 }
 0x1ff   :  { %8926 = vst [vmem:[#allocation23_spill] sm:$0xff] %v5942_v23  ;;  %8928 = vst [vmem:[#allocation130_spill] sm:$0xff] %v5959_v1  ;;  %v1161_v21 = vadd.f32 %v5957_v38, %v1159_v54  ;;  %v1269_v1 = vadd.f32 %v1268_v8, %v1267_v45  ;;  %v1102_v59 = vadd.f32 %v1101_v29, %v1030_v28  ;;  %1031 = vadd.xlane.f32.xlu0 %v1030_v28 }
 0x200   :  { %v1197_v45 = vmul.f32 %v5457_v2, %v5457_v2  ;;  %v5990_v28 = vsel %vm139_vm0, %v5644_v57, 0.0  ;;  %v5994_v8 = vsel %vm139_vm0, %v5640_v12, 0.0  ;;  %v1138_v29 = vadd.f32 %v5977_v55, %v1136_v41  ;;  %8930 = vst [vmem:[#allocation131_spill] sm:$0xff] %v6000_v42 }
 0x201   :  { %v1163_v54 = vadd.f32 %v5965_v47, %v1161_v21  ;;  %v5986_v17 = vadd.f32 %v1102_v59, %v1033_v49  ;;  %v1271_v59 = vadd.f32 %v1270_v16, %v1269_v1  ;;  %v1237_v49 = vsel %vm139_vm0, %v1196_v44, 0.0  ;;  %v1803_v1 = vpop.xlane.xlu1 %1802  ;;  %v6028_v16 = vpop.xlane.xlu0 %1853 }
 0x202   :  { %v1238_v41 = vadd.f32 %v1237_v49, %v5798_v32  ;;  %1512 = vadd.xlane.f32.xlu1 %v5701_v4  ;;  %v1239_v44 = vsel %vm139_vm0, %v1197_v45, 0.0  ;;  %v1140_v32 = vadd.f32 %v1139_v34, %v1138_v29  ;;  %v1213_v45 = vmul.f32 %v5669_v11, %v5669_v11 }
 0x203   :  { %v1165_v21 = vadd.f32 %v5994_v8, %v1163_v54  ;;  %1510 = vadd.xlane.f32.xlu0 %v5692_v24  ;;  %v6018_v24 = vsel %vm139_vm0, %v5665_v58, 0.0  ;;  %v1273_v54 = vadd.f32 %v1272_v3, %v1271_v59  ;;  %v1199_v3 = vmul.f32 %v5480_v35, %v5480_v35 }
 0x204   :  { %v1240_v49 = vadd.f32 %v1239_v44, %v1238_v41  ;;  %v1142_v59 = vadd.f32 %v1141_v31, %v1140_v32  ;;  %v6046_v11 = vsel %vm139_vm0, %v5683_v5, 0.0  ;;  %v6048_v41 = vmul.f32 0.015873017, %v1803_v1 }
 0x205   :  { %v1167_v18 = vadd.f32 %v5990_v28, %v1165_v21  ;;  %v1198_v21 = vmul.f32 %v5469_v53, %v5469_v53  ;;  %v6042_v53 = vpop.xlane.xlu0 %1856  ;;  %v1276_v44 = vsel %vm139_vm0, %v1213_v45, 0.0  ;;  %v1929_v32 = vmul.f32 %v3641_v20, %v5705_v46 }
 0x206   :  { %1516 = vadd.xlane.f32.xlu1 %v5723_v39  ;;  %8931 = vst [vmem:[#allocation132_spill] sm:$0xff] %v6048_v41  ;;  %v1243_v1 = vsel %vm139_vm0, %v1199_v3, 0.0  ;;  %v1200_v20 = vmul.f32 %v5491_v25, %v5491_v25  ;;  %3650 = vrsqrt.f32 %v6048_v41  ;;  %v1215_v3 = vmul.f32 %v5787_v61, %v5787_v61 }
 0x207   :  { %v1169_v4 = vadd.f32 %v6018_v24, %v1167_v18  ;;  %1514 = vadd.xlane.f32.xlu0 %v5719_v27  ;;  %v1274_v27 = vsel %vm139_vm0, %v1212_v14, 0.0  ;;  %v6039_v18 = vpop.xlane.xlu1 %1805  ;;  %v1241_v39 = vsel %vm139_vm0, %v1198_v21, 0.0  ;;  %v1143_v21 = vrot.slane %v1142_v59, 4 }
 0x208   :  { %v1275_v2 = vadd.f32 %v1274_v27, %v1273_v54  ;;  %v1214_v54 = vmul.f32 %v5683_v5, %v5683_v5  ;;  %v1245_v60 = vsel %vm139_vm0, %v1200_v20, 0.0  ;;  %vm1951_vm1 = vcmp.eq.f32.partialorder %v6048_v41, inf }
 0x209   :  { %v1171_v29 = vadd.f32 %v6014_v0, %v1169_v4  ;;  %v1242_v4 = vadd.f32 %v1241_v39, %v1240_v49  ;;  %v6070_v49 = vpop.xlane.xlu0 %1859  ;;  %v1933_v39 = vand.u32 2147483648, %v5705_v46  ;;  %v1144_v58 = vadd.f32 %v1143_v21, %v1142_v59 }
 0x20a   :  { %1520 = vadd.xlane.f32.xlu1 %v5778_v30  ;;  %v1277_v30 = vadd.f32 %v1276_v44, %v1275_v2  ;;  %v1931_v2 = vsel %vm1930_vm10, %v5705_v46, %v1929_v32  ;;  %v1201_v44 = vmul.f32 %v5516_v10, %v5516_v10  ;;  %v1278_v25 = vsel %vm139_vm0, %v1214_v54, 0.0  ;;  %v8935_v54 = vld [vmem:[#allocation24_spill] sm:$0xff] }
 0x20b   :  { %1518 = vadd.xlane.f32.xlu0 %v5761_v50  ;;  %v1173_v14 = vadd.f32 %v6046_v11, %v1171_v29  ;;  %v6057_v50 = vsel %vm139_vm0, %v5787_v61, 0.0  ;;  %v6063_v45 = vpop.xlane.xlu1 %1808  ;;  %v6065_v29 = vpop.eup %3642  ;;  %v1934_v20 = vsel %vm1932_vm11, %v1933_v39, %v1931_v2  ;;  %vm1953_vm2 = vcmp.eq.f32.partialorder %v6048_v41, 0.0 }
 0x20c   :  { %8932 = vst [vmem:[#allocation133_spill] sm:$0xff] %v6065_v29  ;;  %v3645_v27 = vpop.eup %3644  ;;  %v1279_v32 = vadd.f32 %v1278_v25, %v1277_v30  ;;  %v6112_v30 = vsel %vm139_vm0, %v5942_v23, 0.0  ;;  %v2140_v2 = vadd.f32 1e-06, %v1934_v20 }
 0x20d   :  { %v1175_v5 = vadd.f32 %v6057_v50, %v1173_v14  ;;  %v6077_v35 = vpop.eup %3646  ;;  %v8934_v14 = vld [vmem:[#allocation25_spill] sm:$0xff]  ;;  %v6094_v12 = vpop.xlane.xlu0 %1862  ;;  %v1936_v25 = vmul.f32 %v3645_v27, %v5749_v43 }
 0x20e   :  { %8933 = vst [vmem:[#allocation134_spill] sm:$0xff] %v6077_v35  ;;  %1524 = vadd.xlane.f32.xlu1 %v5977_v55  ;;  %v6091_v57 = vmul.f32 %v6065_v29, %v8934_v14  ;;  %v6098_v55 = vsel %vm139_vm0, %v5936_v9, 0.0  ;;  %v6104_v21 = vmul.f32 %v6077_v35, %v8935_v54  ;;  %v1145_v14 = vrot.slane %v1144_v58, 2 }
 0x20f   :  { %1522 = vadd.xlane.f32.xlu0 %v5953_v48  ;;  %v1244_v48 = vadd.f32 %v1243_v1, %v1242_v4  ;;  %v6087_v61 = vpop.xlane.xlu1 %1811  ;;  %v3649_v4 = vpop.eup %3648  ;;  %v1280_v1 = vsel %vm139_vm0, %v1215_v3, 0.0  ;;  %v1177_v59 = vadd.f32 %v6098_v55, %v1175_v5  ;;  %v1247_v3 = vsel %vm139_vm0, %v1201_v44, 0.0 }
 0x210   :  { %v1216_v5 = vmul.f32 %v5936_v9, %v5936_v9  ;;  %v2640_v39 = vmul.f32 %v6091_v57, %v6091_v57  ;;  %v2641_v46 = vmul.f32 %v6104_v21, %v6104_v21  ;;  %v1940_v35 = vand.u32 2147483648, %v5749_v43 }
 0x211   :  { %v6124_v27 = vpop.xlane.xlu0 %1865  ;;  %v1179_v44 = vadd.f32 %v6112_v30, %v1177_v59  ;;  %v1146_v20 = vadd.f32 %v1145_v14, %v1144_v58  ;;  %3652 = vrcp.f32 %v2140_v2  ;;  %v2363_v14 = vand.u32 2147483647, %v6104_v21 }
 0x212   :  { %1528 = vadd.xlane.f32.xlu1 %v1141_v31  ;;  %v1281_v31 = vadd.f32 %v1280_v1, %v1279_v32  ;;  %v1947_v32 = vand.u32 2147483648, %v6000_v42  ;;  %v1282_v1 = vsel %vm139_vm0, %v1216_v5, 0.0  ;;  %v2672_v29 = vsel %vm139_vm0, %v2640_v39, 0.0 }
 0x213   :  { %1526 = vadd.xlane.f32.xlu0 %v1139_v34  ;;  %v1246_v34 = vadd.f32 %v1245_v60, %v1244_v48  ;;  %v6117_v54 = vpop.xlane.xlu1 %1814  ;;  %v1943_v60 = vmul.f32 %v3649_v4, %v6000_v42  ;;  %v1217_v48 = vmul.f32 %v5942_v23, %v5942_v23  ;;  %v1938_v4 = vsel %vm1937_vm12, %v5749_v43, %v1936_v25  ;;  %v3651_v58 = vpop.eup %3650 }
 0x214   :  { %v1283_v9 = vadd.f32 %v1282_v1, %v1281_v31  ;;  %v1180_v25 = vrot.slane %v1179_v44, 4  ;;  %v1941_v2 = vsel %vm1939_vm13, %v1940_v35, %v1938_v4 }
 0x215   :  { %v1945_v23 = vsel %vm1944_vm14, %v6000_v42, %v1943_v60  ;;  %v6145_v10 = vpop.xlane.xlu0 %1868  ;;  %v1147_v60 = vrot.slane %v1146_v20, 1 }
 0x216   :  { %1532 = vadd.xlane.f32.xlu1 %v5741_v13  ;;  %v2362_v13 = vand.u32 2147483647, %v6091_v57 }
 0x217   :  { %1530 = vadd.xlane.f32.xlu0 %v5737_v56  ;;  %v1248_v56 = vadd.f32 %v1247_v3, %v1246_v34  ;;  %v6140_v59 = vpop.xlane.xlu1 %1817  ;;  %v1284_v34 = vsel %vm139_vm0, %v1217_v48, 0.0  ;;  %v2673_v3 = vsel %vm139_vm0, %v2641_v46, 0.0  ;;  %v1948_v48 = vsel %vm1946_vm15, %v1947_v32, %v1945_v23 }
 0x218   :  { %v6152_v39 = vadd.f32 %v2673_v3, %v2672_v29  ;;  %v1285_v1 = vadd.f32 %v1284_v34, %v1283_v9  ;;  %v1950_v29 = vmul.f32 %v3651_v58, %v6048_v41  ;;  %v6172_v23 = vsel %vm139_vm0, %v2363_v14, 0.0 }
 0x219   :  { %v1249_v5 = vrot.slane %v1248_v56, 4  ;;  %v6161_v46 = vpop.xlane.xlu0 %1871  ;;  %v2142_v9 = vadd.f32 1e-06, %v1948_v48  ;;  %v1148_v32 = vadd.f32 %v1147_v60, %v1146_v20  ;;  %v3049_v34 = vmul.f32 %v6104_v21, %v4755_v62 }
 0x21a   :  { %1536 = vadd.xlane.f32.xlu1 %v5757_v36  ;;  %v6164_v36 = vsel %vm139_vm0, %v2362_v13, 0.0  ;;  %v1952_v20 = vsel %vm1951_vm1, %v6048_v41, %v1950_v29  ;;  %v6197_v48 = vmul.f32 0.015873017, %v6039_v18  ;;  %v1083_v18 = vrot.slane %v5557_v22, 4 }
 0x21b   :  { %1534 = vadd.xlane.f32.xlu0 %v5753_v63  ;;  %v1181_v63 = vadd.f32 %v1180_v25, %v1179_v44  ;;  %v6154_v31 = vpop.xlane.xlu1 %1820  ;;  %v3048_v25 = vmul.f32 %v6091_v57, %v4768_v7  ;;  %v1250_v35 = vadd.f32 %v1249_v5, %v1248_v56  ;;  %v6180_v3 = vadd.f32 %v6172_v23, %v6164_v36 }
 0x21c   :  { %v1954_v7 = vand.u32 2147483648, %v6048_v41  ;;  %v1286_v56 = vrot.slane %v1285_v1, 4  ;;  %v1492_v14 = vsel %vm139_vm0, %v1148_v32, 0.0  ;;  %8936 = vst [vmem:[#allocation25_spill] sm:$0xff] %v6197_v48  ;;  %v8950_v41 = vld [vmem:[#allocation33_spill] sm:$0xff]  ;;  %vm1958_vm4 = vcmp.eq.f32.partialorder %v6197_v48, inf }
 0x21d   :  { %v1182_v44 = vrot.slane %v1181_v63, 2  ;;  %v3080_v62 = vsel %vm139_vm0, %v3048_v25, 0.0  ;;  %v1251_v5 = vrot.slane %v1250_v35, 2  ;;  %vm1960_vm7 = vcmp.eq.f32.partialorder %v6197_v48, 0.0 }
 0x21e   :  { %1540 = vadd.xlane.f32.xlu1 %v5791_v26  ;;  %v6184_v26 = vpop.xlane.xlu0 %1874  ;;  %v6205_v25 = vpop.eup %3652 }
 0x21f   :  { %1538 = vadd.xlane.f32.xlu0 %v5783_v19  ;;  %v2141_v19 = vadd.f32 1e-06, %v1941_v2  ;;  %v1183_v4 = vadd.f32 %v1182_v44, %v1181_v63  ;;  %v6174_v13 = vpop.xlane.xlu1 %1823  ;;  %v1287_v2 = vadd.f32 %v1286_v56, %v1285_v1  ;;  %8937 = vst [vmem:[#allocation24_spill] sm:$0xff] %v6205_v25  ;;  %v6212_v1 = vmul.f32 0.015873017, %v5686_v40 }
 0x220   :  { %v6216_v56 = vmul.f32 0.015873017, %v5653_v6  ;;  %v6228_v40 = vmul.f32 0.015873017, %v6087_v61  ;;  %v6234_v6 = vmul.f32 0.015873017, %v5726_v51 }
 0x221   :  { %v1184_v58 = vrot.slane %v1183_v4, 1  ;;  %3654 = vrcp.f32 %v2141_v19  ;;  %v6208_v19 = vmul.f32 0.015873017, %v6063_v45  ;;  %8939 = vst [vmem:[#allocation136_spill] sm:$0xff] %v6212_v1  ;;  %v1104_v51 = vrot.slane %v5986_v17, 4 }
 0x222   :  { %1544 = vadd.xlane.f32.xlu1 %v5965_v47  ;;  %3656 = vrcp.f32 %v2142_v9  ;;  %v6199_v29 = vpop.xlane.xlu0 %1877  ;;  %v1955_v47 = vsel %vm1953_vm2, %v1954_v7, %v1952_v20  ;;  %v1252_v9 = vadd.f32 %v1251_v5, %v1250_v35  ;;  %8940 = vst [vmem:[#allocation137_spill] sm:$0xff] %v6216_v56  ;;  %v8941_v7 = vld [vmem:[#allocation29_spill] sm:$0xff]  ;;  %8943 = vst [vmem:[#allocation138_spill] sm:$0xff] %v6234_v6  ;;  %vm1972_vm6 = vcmp.eq.f32.partialorder %v6228_v40, inf }
 0x223   :  { %1542 = vadd.xlane.f32.xlu0 %v5957_v38  ;;  %v1185_v60 = vadd.f32 %v1184_v58, %v1183_v4  ;;  %v6193_v63 = vpop.xlane.xlu1 %1826  ;;  %v3081_v38 = vsel %vm139_vm0, %v3049_v34, 0.0  ;;  %8938 = vst [vmem:[#allocation135_spill] sm:$0xff] %v6208_v19  ;;  %v2143_v34 = vadd.f32 1e-06, %v1955_v47  ;;  %v1288_v58 = vrot.slane %v1287_v2, 2  ;;  %8942 = vst [vmem:[#allocation29_spill] sm:$0xff] %v6228_v40 }
 0x224   :  { %v6201_v44 = vadd.f32 %v3081_v38, %v3080_v62  ;;  %3658 = vrsqrt.f32 %v6197_v48  ;;  %v6224_v20 = vmul.f32 %v6205_v25, %v8941_v7  ;;  %v1253_v62 = vrot.slane %v1252_v9, 1 }
 0x225   :  { %v1495_v4 = vsel %vm139_vm0, %v1185_v60, 0.0  ;;  %3660 = vrsqrt.f32 %v6208_v19  ;;  %v1464_v5 = vmul.f32 %v1148_v32, %v1148_v32  ;;  %v1289_v61 = vadd.f32 %v1288_v58, %v1287_v2 }
 0x226   :  { %1496 = vadd.xlane.f32.xlu1 %v1495_v4  ;;  %v6230_v35 = vpop.xlane.xlu0 %1880  ;;  %3662 = vrsqrt.f32 %v6212_v1  ;;  %v2364_v38 = vand.u32 2147483647, %v6224_v20  ;;  %v6252_v47 = vadd.f32 %v1253_v62, %v1252_v9  ;;  %v6267_v9 = vadd.f32 %v1104_v51, %v5986_v17 }
 0x227   :  { %1493 = vadd.xlane.f32.xlu0 %v1492_v14  ;;  %v6220_v45 = vpop.xlane.xlu1 %1829  ;;  %v6239_v14 = vmul.f32 0.015873017, %v6117_v54  ;;  %3664 = vrcp.f32 %v2143_v34  ;;  %v1466_v2 = vmul.f32 0.0078125, %v1464_v5  ;;  %v6258_v34 = vmul.f32 0.015873017, %v6140_v59  ;;  %v8949_v5 = vld [vmem:[#allocation31_spill] sm:$0xff] }
 0x228   :  { %3666 = vrsqrt.f32 %v6216_v56  ;;  %8946 = vst [vmem:[#allocation141_spill] sm:$0xff] %v6252_v47  ;;  %v3050_v7 = vmul.f32 %v6224_v20, %v4800_v15  ;;  %vm1965_vm5 = vcmp.eq.f32.partialorder %v6208_v19, inf  ;;  %vm2035_vm8 = vcmp.eq.f32.partialorder %v6212_v1, inf }
 0x229   :  { %8944 = vst [vmem:[#allocation139_spill] sm:$0xff] %v6239_v14  ;;  %3668 = vrsqrt.f32 %v6228_v40  ;;  %8948 = vst [vmem:[#allocation143_spill] sm:$0xff] %v6258_v34  ;;  %v1468_v17 = vsub.f32 %v6252_v47, %v1466_v2  ;;  %vm1979_vm9 = vcmp.eq.f32.partialorder %v6239_v14, inf  ;;  %vm1967_vm10 = vcmp.eq.f32.partialorder %v6208_v19, 0.0 }
 0x22a   :  { %1548 = vadd.xlane.f32.xlu1 %v5990_v28  ;;  %3670 = vrsqrt.f32 %v6234_v6  ;;  %v1465_v28 = vmul.f32 %v1185_v60, %v1185_v60  ;;  %v6262_v60 = vsel %vm139_vm0, %v2364_v38, 0.0  ;;  %vm1974_vm11 = vcmp.eq.f32.partialorder %v6228_v40, 0.0 }
 0x22b   :  { %1546 = vadd.xlane.f32.xlu0 %v5994_v8  ;;  %v1084_v8 = vadd.f32 %v1083_v18, %v5557_v22  ;;  %v6246_v22 = vpop.xlane.xlu1 %1832  ;;  %3672 = vrsqrt.f32 %v6239_v14  ;;  %v1290_v18 = vrot.slane %v1289_v61, 1  ;;  %v2523_v58 = vadd.f32 %v6180_v3, %v6262_v60 }
 0x22c   :  { %v1467_v59 = vmul.f32 0.0078125, %v1465_v28  ;;  %v3083_v3 = vsel %vm139_vm0, %v3050_v7, 0.0  ;;  %3674 = vrsqrt.f32 %v6258_v34  ;;  %v1470_v7 = vmul.f32 0.007874016, %v1468_v17 }
 0x22d   :  { %v1085_v32 = vrot.slane %v1084_v8, 2  ;;  %vm1981_vm12 = vcmp.eq.f32.partialorder %v6239_v14, 0.0  ;;  %vm1986_vm13 = vcmp.eq.f32.partialorder %v6258_v34, inf  ;;  %vm2028_vm14 = vcmp.eq.f32.partialorder %v6216_v56, inf }
 0x22e   :  { %1552 = vadd.xlane.f32.xlu1 %v6014_v0  ;;  %v6250_v54 = vpop.eup %3654  ;;  %v2642_v0 = vmul.f32 %v6224_v20, %v6224_v20  ;;  %v1472_v25 = vmax.f32 %v1470_v7, 1e-06  ;;  %vm2030_vm15 = vcmp.eq.f32.partialorder %v6216_v56, 0.0  ;;  %vm1988_vm1 = vcmp.eq.f32.partialorder %v6258_v34, 0.0 }
 0x22f   :  { %1550 = vadd.xlane.f32.xlu0 %v6018_v24  ;;  %8945 = vst [vmem:[#allocation140_spill] sm:$0xff] %v6250_v54  ;;  %v1499_v24 = vpop.xlane.xlu0 %1498  ;;  %v6255_v4 = vpop.eup %3656  ;;  %v6277_v38 = vmul.f32 %v6250_v54, %v8949_v5  ;;  %v6286_v42 = vadd.f32 %v1085_v32, %v1084_v8  ;;  %vm2037_vm2 = vcmp.eq.f32.partialorder %v6212_v1, 0.0 }
 0x230   :  { %8947 = vst [vmem:[#allocation142_spill] sm:$0xff] %v6255_v4  ;;  %v1562_v62 = vmul.f32 0.015625, %v1499_v24  ;;  %v6284_v15 = vmul.f32 %v6255_v4, %v8950_v41  ;;  %v1501_v28 = vpop.xlane.xlu1 %1500  ;;  %v3084_v24 = vadd.f32 %v3083_v3, %v6201_v44 }
 0x231   :  { %v2643_v44 = vmul.f32 %v6277_v38, %v6277_v38  ;;  %v3051_v2 = vmul.f32 %v6277_v38, %v8857_v37 }
 0x232   :  { %1556 = vadd.xlane.f32.xlu1 %v6057_v50  ;;  %v6288_v50 = vadd.f32 %v1290_v18, %v1289_v61  ;;  %3268 = vst.msk [vmem:[%s8386_s2] sm:$0xff] %vm3267_vm3, %v1562_v62  ;;  %v2365_v61 = vand.u32 2147483647, %v6277_v38  ;;  %v2366_v62 = vand.u32 2147483647, %v6284_v15 }
 0x233   :  { %1554 = vadd.xlane.f32.xlu0 %v6046_v11  ;;  %v2675_v11 = vsel %vm139_vm0, %v2642_v0, 0.0  ;;  %v1503_v5 = vpop.xlane.xlu0 %1502  ;;  %v2677_v37 = vsel %vm139_vm0, %v2643_v44, 0.0  ;;  %v2644_v44 = vmul.f32 %v6284_v15, %v6284_v15 }
 0x234   :  { %v2676_v51 = vadd.f32 %v2675_v11, %v6152_v39  ;;  %8951 = vst [vmem:[#allocation31_spill] sm:$0xff] %v6288_v50  ;;  %v3659_v39 = vpop.eup %3658  ;;  %v2403_v11 = vsel %vm139_vm0, %v2365_v61, 0.0  ;;  %v2406_v4 = vsel %vm139_vm0, %v2366_v62, 0.0 }
 0x235   :  { %v3661_v32 = vpop.eup %3660  ;;  %v2524_v41 = vadd.f32 %v2523_v58, %v2403_v11  ;;  %v3052_v58 = vmul.f32 %v6284_v15, %v5025_v33  ;;  %v2679_v33 = vsel %vm139_vm0, %v2644_v44, 0.0 }
 0x236   :  { %1560 = vadd.xlane.f32.xlu1 %v6112_v30  ;;  %v6308_v18 = vpop.eup %3662  ;;  %v1957_v30 = vmul.f32 %v3659_v39, %v6197_v48  ;;  %v1964_v17 = vmul.f32 %v3661_v32, %v6208_v19  ;;  %v2678_v61 = vadd.f32 %v2677_v37, %v2676_v51  ;;  %v1505_v39 = vpop.xlane.xlu1 %1504  ;;  %v1563_v32 = vmul.f32 0.015625, %v1501_v28 }
 0x237   :  { %1558 = vadd.xlane.f32.xlu0 %v6098_v55  ;;  %v1469_v55 = vsub.f32 %v6288_v50, %v1467_v59  ;;  %v6313_v3 = vpop.eup %3664  ;;  %v3085_v59 = vsel %vm139_vm0, %v3051_v2, 0.0  ;;  %v1564_v51 = vmul.f32 0.015625, %v1503_v5 }
 0x238   :  { %8952 = vst [vmem:[#allocation33_spill] sm:$0xff] %v6313_v3  ;;  %v6320_v0 = vpop.eup %3666  ;;  %v3086_v8 = vadd.f32 %v3085_v59, %v3084_v24  ;;  %v8953_v24 = vld [vmem:[#allocation35_spill] sm:$0xff]  ;;  %v2680_v7 = vadd.f32 %v2679_v33, %v2678_v61  ;;  %3269 = vst.msk [vmem:[%s8386_s2 + $0x8] sm:$0xff] %vm3267_vm3, %v1563_v32  ;;  %v1966_v59 = vsel %vm1965_vm5, %v6208_v19, %v1964_v17  ;;  %v8954_v61 = vld [vmem:[#allocation80_spill] sm:$0xff]  ;;  %vm2044_vm5 = vcmp.eq.f32.partialorder %v6234_v6, 0.0 }
 0x239   :  { %v3669_v43 = vpop.eup %3668  ;;  %v1471_v54 = vmul.f32 0.007874016, %v1469_v55  ;;  %v6334_v62 = vmul.f32 %v6313_v3, %v8953_v24  ;;  %v3087_v55 = vsel %vm139_vm0, %v3052_v58, 0.0  ;;  %3270 = vst.msk [vmem:[%s8386_s2 + $0x10] sm:$0xff] %vm3267_vm3, %v1564_v51  ;;  %v1474_v51 = vadd.f32 1.0, %v1472_v25 }
 0x23a   :  { %2398 = vadd.xlane.f32.xlu1 %v6172_v23  ;;  %v6330_v2 = vpop.eup %3670  ;;  %v1959_v23 = vsel %vm1958_vm4, %v6197_v48, %v1957_v30  ;;  %v1971_v28 = vmul.f32 %v3669_v43, %v6228_v40  ;;  %v3088_v5 = vadd.f32 %v3087_v55, %v3086_v8  ;;  %v1507_v30 = vpop.xlane.xlu0 %1506  ;;  %v1565_v24 = vmul.f32 0.015625, %v1505_v39 }
 0x23b   :  { %2395 = vadd.xlane.f32.xlu0 %v6164_v36  ;;  %v2525_v36 = vadd.f32 %v2524_v41, %v2406_v4  ;;  %v3673_v37 = vpop.eup %3672  ;;  %v1975_v41 = vand.u32 2147483648, %v6228_v40  ;;  %v1473_v43 = vmax.f32 %v1471_v54, 1e-06  ;;  %v2645_v8 = vmul.f32 %v6334_v62, %v6334_v62  ;;  %v1509_v33 = vpop.xlane.xlu1 %1508 }
 0x23c   :  { %v3053_v44 = vmul.f32 %v6334_v62, %v8954_v61  ;;  %v1978_v58 = vmul.f32 %v3673_v37, %v6239_v14  ;;  %v3675_v3 = vpop.eup %3674  ;;  %v1973_v61 = vsel %vm1972_vm6, %v6228_v40, %v1971_v28  ;;  %3676 = vlog2.f32 %v1474_v51  ;;  %3271 = vst.msk [vmem:[%s8386_s2 + $0x18] sm:$0xff] %vm3267_vm3, %v1565_v24 }
 0x23d   :  { %v2681_v55 = vsel %vm139_vm0, %v2645_v8, 0.0  ;;  %v1475_v25 = vadd.f32 1.0, %v1473_v43  ;;  %v1982_v43 = vand.u32 2147483648, %v6239_v14  ;;  %v8959_v51 = vrot.slane %v6267_v9, 2 }
 0x23e   :  { %2404 = vadd.xlane.f32.xlu1 %v2403_v11  ;;  %v3089_v17 = vsel %vm139_vm0, %v3053_v44, 0.0  ;;  %v1566_v11 = vmul.f32 0.015625, %v1507_v30  ;;  %v6369_v47 = vadd.f32 %v2681_v55, %v2680_v7  ;;  %v1980_v28 = vsel %vm1979_vm9, %v6239_v14, %v1978_v58  ;;  %v8978_v14 = vld [vmem:[#allocation97_spill] sm:$0xff] }
 0x23f   :  { %2401 = vadd.xlane.f32.xlu0 %v6262_v60  ;;  %v2367_v60 = vand.u32 2147483647, %v6334_v62  ;;  %v6371_v37 = vadd.f32 %v3089_v17, %v3088_v5  ;;  %v1985_v5 = vmul.f32 %v3675_v3, %v6258_v34  ;;  %3678 = vlog2.f32 %v1475_v25 }
 0x240   :  { %3272 = vst.msk [vmem:[%s8386_s2 + $0x20] sm:$0xff] %vm3267_vm3, %v1566_v11  ;;  %v2027_v58 = vmul.f32 %v6320_v0, %v6216_v56  ;;  %v1107_v24 = vadd.f32 %v8959_v51, %v6267_v9  ;;  %v2034_v17 = vmul.f32 %v6308_v18, %v6212_v1  ;;  %v6418_v9 = vmul.f32 0.015873017, %v6002_v52 }
 0x241   :  { %v2409_v32 = vsel %vm139_vm0, %v2367_v60, 0.0  ;;  %v8956_v60 = vand.u32 2147483648, %v6208_v19  ;;  %v1987_v0 = vsel %vm1986_vm13, %v6258_v34, %v1985_v5  ;;  %v1989_v11 = vand.u32 2147483648, %v6258_v34 }
 0x242   :  { %v6364_v54 = vadd.f32 %v2525_v36, %v2409_v32  ;;  %2410 = vadd.xlane.f32.xlu1 %v2409_v32  ;;  %v1567_v36 = vmul.f32 0.015625, %v1509_v33  ;;  %v8957_v32 = vld [vmem:[#allocation127_spill] sm:$0xff]  ;;  %v8960_v33 = vld [vmem:[#allocation130_spill] sm:$0xff]  ;;  %v1108_v25 = vrot.slane %v1107_v24, 1  ;;  %vm2042_vm4 = vcmp.eq.f32.partialorder %v6234_v6, inf }
 0x243   :  { %2407 = vadd.xlane.f32.xlu0 %v2406_v4  ;;  %v8955_v4 = vand.u32 2147483648, %v6197_v48  ;;  %v1969_v30 = vsel %vm1967_vm10, %v8956_v60, %v1966_v59  ;;  %v6401_v3 = vmul.f32 0.015873017, %v8957_v32  ;;  %v1983_v59 = vsel %vm1981_vm12, %v1982_v43, %v1980_v28  ;;  %8962 = vst [vmem:[#allocation127_spill] sm:$0xff] %v6418_v9  ;;  %v6438_v32 = vpop.xlane.xlu1 %944 }
 0x244   :  { %3273 = vst.msk [vmem:[%s8386_s2 + $0x28] sm:$0xff] %vm3267_vm3, %v1567_v36  ;;  %v2145_v8 = vadd.f32 1e-06, %v1969_v30  ;;  %v6411_v55 = vmul.f32 0.015873017, %v8960_v33  ;;  %v1990_v18 = vsel %vm1988_vm1, %v1989_v11, %v1987_v0  ;;  %v2038_v28 = vand.u32 2147483648, %v6212_v1 }
 0x245   :  { %v1962_v39 = vsel %vm1960_vm7, %v8955_v4, %v1959_v23  ;;  %v1976_v23 = vsel %vm1974_vm11, %v1975_v41, %v1973_v61  ;;  %8958 = vst [vmem:[#allocation35_spill] sm:$0xff] %v6401_v3  ;;  %v1087_v41 = vrot.slane %v6286_v42, 1  ;;  %v2031_v61 = vand.u32 2147483648, %v6216_v56 }
 0x246   :  { %v2144_v7 = vadd.f32 1e-06, %v1962_v39  ;;  %v2146_v44 = vadd.f32 1e-06, %v1976_v23  ;;  %8961 = vst [vmem:[#allocation80_spill] sm:$0xff] %v6411_v55  ;;  %v2029_v39 = vsel %vm2028_vm14, %v6216_v56, %v2027_v58  ;;  %v1109_v60 = vadd.f32 %v1108_v25, %v1107_v24  ;;  %v6436_v58 = vpop.xlane.xlu0 %941  ;;  %v8964_v25 = vld [vmem:[#allocation61_spill] sm:$0xff] }
 0x247   :  { %v2147_v4 = vadd.f32 1e-06, %v1983_v59  ;;  %v1088_v36 = vadd.f32 %v1087_v41, %v6286_v42  ;;  %v2148_v52 = vadd.f32 1e-06, %v1990_v18  ;;  %v2032_v42 = vsel %vm2030_vm15, %v2031_v61, %v2029_v39 }
 0x248   :  { %3680 = vrcp.f32 %v2144_v7  ;;  %v2036_v7 = vsel %vm2035_vm8, %v6212_v1, %v2034_v17  ;;  %v2154_v51 = vadd.f32 1e-06, %v2032_v42  ;;  %v1111_v59 = vmul.f32 0.0078125, %v1109_v60  ;;  %v8969_v60 = vld [vmem:[#allocation87_spill] sm:$0xff] }
 0x249   :  { %3682 = vrcp.f32 %v2145_v8  ;;  %v3677_v5 = vpop.eup %3676  ;;  %v1110_v30 = vmul.f32 0.0078125, %v1088_v36  ;;  %v2039_v43 = vsel %vm2037_vm2, %v2038_v28, %v2036_v7  ;;  %v2041_v17 = vmul.f32 %v6330_v2, %v6234_v6 }
 0x24a   :  { %3684 = vrcp.f32 %v2146_v44  ;;  %v1477_v23 = vmul.f32 0.6931472, %v3677_v5  ;;  %v2155_v0 = vadd.f32 1e-06, %v2039_v43  ;;  %v6456_v18 = vmul.f32 0.015873017, %v6028_v16 }
 0x24b   :  { %3686 = vrsqrt.f32 %v6401_v3  ;;  %v6459_v28 = vmul.f32 0.015873017, %v6042_v53  ;;  %vm2049_vm6 = vcmp.eq.f32.partialorder %v6401_v3, inf  ;;  %vm2056_vm7 = vcmp.eq.f32.partialorder %v6411_v55, inf }
 0x24c   :  { %3688 = vrsqrt.f32 %v6411_v55  ;;  %v3679_v8 = vpop.eup %3678  ;;  %v1480_v44 = vmul.f32 %v1477_v23, %v1110_v30  ;;  %8966 = vst [vmem:[#allocation144_spill] sm:$0xff] %v6456_v18  ;;  %v8970_v30 = vld [vmem:[#allocation64_spill] sm:$0xff]  ;;  %v8971_v23 = vld [vmem:[#allocation66_spill] sm:$0xff]  ;;  %vm2063_vm8 = vcmp.eq.f32.partialorder %v6418_v9, inf  ;;  %vm2051_vm9 = vcmp.eq.f32.partialorder %v6401_v3, 0.0 }
 0x24d   :  { %3690 = vrsqrt.f32 %v6418_v9  ;;  %v1479_v33 = vmul.f32 0.6931472, %v3679_v8  ;;  %8967 = vst [vmem:[#allocation145_spill] sm:$0xff] %v6459_v28  ;;  %v2043_v8 = vsel %vm2042_vm4, %v6234_v6, %v2041_v17  ;;  %vm2058_vm10 = vcmp.eq.f32.partialorder %v6411_v55, 0.0 }
 0x24e   :  { %3692 = vrcp.f32 %v2147_v4  ;;  %v1482_v61 = vsel %vm139_vm0, %v1480_v44, 0.0  ;;  %vm2070_vm11 = vcmp.eq.f32.partialorder %v6456_v18, inf  ;;  %vm2065_vm12 = vcmp.eq.f32.partialorder %v6418_v9, 0.0 }
 0x24f   :  { %3694 = vrcp.f32 %v2148_v52  ;;  %1483 = vadd.xlane.f32.xlu0 %v1482_v61  ;;  %v1481_v2 = vmul.f32 %v1479_v33, %v1111_v59  ;;  %v6486_v33 = vpop.xlane.xlu0 %947  ;;  %v6488_v61 = vpop.xlane.xlu1 %950  ;;  %vm2077_vm13 = vcmp.eq.f32.partialorder %v6459_v28, inf  ;;  %v6613_v19 = vmul.f32 0.015873017, %v6161_v46 }
 0x250   :  { %3696 = vrcp.f32 %v2154_v51  ;;  %v6620_v48 = vmul.f32 0.015873017, %v6174_v13  ;;  %vm2072_vm1 = vcmp.eq.f32.partialorder %v6456_v18, 0.0 }
 0x251   :  { %v1485_v16 = vsel %vm139_vm0, %v1481_v2, 0.0  ;;  %3698 = vrcp.f32 %v2155_v0  ;;  %8996 = vst [vmem:[#allocation155_spill] sm:$0xff] %v6613_v19 }
 0x252   :  { %1486 = vadd.xlane.f32.xlu1 %v1485_v16  ;;  %3700 = vrsqrt.f32 %v6456_v18  ;;  %8998 = vst [vmem:[#allocation157_spill] sm:$0xff] %v6620_v48 }
 0x253   :  { %3702 = vrsqrt.f32 %v6459_v28 }
 0x255   :  { %v6440_v41 = vpop.eup %3680 }
 0x256   :  { %8963 = vst [vmem:[#allocation130_spill] sm:$0xff] %v6440_v41  ;;  %v6449_v4 = vmul.f32 %v6440_v41, %v8964_v25  ;;  %v6451_v39 = vpop.eup %3682 }
 0x257   :  { %8965 = vst [vmem:[#allocation61_spill] sm:$0xff] %v6451_v39  ;;  %v6461_v52 = vpop.eup %3684  ;;  %v6472_v53 = vmul.f32 %v6451_v39, %v8970_v30  ;;  %v9000_v39 = vld [vmem:[#allocation8_spill] sm:$0xff] }
 0x258   :  { %8968 = vst [vmem:[#allocation146_spill] sm:$0xff] %v6461_v52  ;;  %v2368_v7 = vand.u32 2147483647, %v6449_v4  ;;  %v2646_v5 = vmul.f32 %v6449_v4, %v6449_v4  ;;  %v3054_v42 = vmul.f32 %v6449_v4, %v8969_v60  ;;  %v6476_v43 = vmul.f32 %v6461_v52, %v8971_v23  ;;  %v3687_v0 = vpop.eup %3686 }
 0x259   :  { %v2369_v60 = vand.u32 2147483647, %v6472_v53  ;;  %v3689_v16 = vpop.eup %3688  ;;  %v2048_v36 = vmul.f32 %v3687_v0, %v6401_v3 }
 0x25a   :  { %v2412_v44 = vsel %vm139_vm0, %v2368_v7, 0.0  ;;  %v2683_v51 = vsel %vm139_vm0, %v2646_v5, 0.0  ;;  %v3091_v59 = vsel %vm139_vm0, %v3054_v42, 0.0  ;;  %v6496_v7 = vmul.f32 0.015873017, %v6070_v49  ;;  %v8973_v42 = vld [vmem:[#allocation90_spill] sm:$0xff] }
 0x25b   :  { %v2527_v25 = vadd.f32 %v6364_v54, %v2412_v44  ;;  %v2684_v17 = vadd.f32 %v2683_v51, %v6369_v47  ;;  %v3092_v2 = vadd.f32 %v3091_v59, %v6371_v37  ;;  %2413 = vadd.xlane.f32.xlu0 %v2412_v44  ;;  %v2647_v5 = vmul.f32 %v6472_v53, %v6472_v53  ;;  %v3691_v54 = vpop.eup %3690 }
 0x25c   :  { %8972 = vst [vmem:[#allocation87_spill] sm:$0xff] %v6496_v7  ;;  %v3055_v30 = vmul.f32 %v6472_v53, %v8973_v42  ;;  %v6504_v47 = vmul.f32 0.015873017, %v6094_v12  ;;  %v2415_v37 = vsel %vm139_vm0, %v2369_v60, 0.0  ;;  %v2370_v23 = vand.u32 2147483647, %v6476_v43  ;;  %v6508_v44 = vpop.eup %3692 }
 0x25d   :  { %8975 = vst [vmem:[#allocation66_spill] sm:$0xff] %v6508_v44  ;;  %v6511_v49 = vmul.f32 0.015873017, %v6124_v27  ;;  %v2685_v51 = vsel %vm139_vm0, %v2647_v5, 0.0  ;;  %2416 = vadd.xlane.f32.xlu1 %v2415_v37  ;;  %v2528_v42 = vadd.f32 %v2527_v25, %v2415_v37  ;;  %v6517_v60 = vpop.eup %3694  ;;  %3704 = vrsqrt.f32 %v6496_v7  ;;  %v6526_v25 = vpop.xlane.xlu1 %956 }
 0x25e   :  { %8974 = vst [vmem:[#allocation64_spill] sm:$0xff] %v6504_v47  ;;  %v3093_v59 = vsel %vm139_vm0, %v3055_v30, 0.0  ;;  %v2686_v11 = vadd.f32 %v2685_v51, %v2684_v17  ;;  %v2418_v24 = vsel %vm139_vm0, %v2370_v23, 0.0  ;;  %8977 = vst [vmem:[#allocation147_spill] sm:$0xff] %v6517_v60  ;;  %v2648_v27 = vmul.f32 %v6476_v43, %v6476_v43  ;;  %v6524_v30 = vpop.xlane.xlu0 %953 }
 0x25f   :  { %8976 = vst [vmem:[#allocation90_spill] sm:$0xff] %v6511_v49  ;;  %v3094_v12 = vadd.f32 %v3093_v59, %v3092_v2  ;;  %v2529_v34 = vadd.f32 %v2528_v42, %v2418_v24  ;;  %v3056_v5 = vmul.f32 %v6476_v43, %v8978_v14  ;;  %2419 = vadd.xlane.f32.xlu0 %v2418_v24  ;;  %3706 = vrsqrt.f32 %v6504_v47  ;;  %v8979_v2 = vld [vmem:[#allocation68_spill] sm:$0xff]  ;;  %v8983_v42 = vld [vmem:[#allocation70_spill] sm:$0xff] }
 0x260   :  { %v2055_v0 = vmul.f32 %v3689_v16, %v6411_v55  ;;  %v2062_v17 = vmul.f32 %v3691_v54, %v6418_v9  ;;  %v6533_v37 = vmul.f32 %v6508_v44, %v8979_v2  ;;  %3708 = vrsqrt.f32 %v6511_v49 }
 0x261   :  { %v2687_v23 = vsel %vm139_vm0, %v2648_v27, 0.0  ;;  %v3095_v14 = vsel %vm139_vm0, %v3056_v5, 0.0  ;;  %v8981_v24 = vand.u32 2147483648, %v6234_v6  ;;  %v6547_v2 = vmul.f32 %v6517_v60, %v8983_v42 }
 0x262   :  { %8980 = vst [vmem:[#allocation97_spill] sm:$0xff] %v6533_v37  ;;  %v2688_v16 = vadd.f32 %v2687_v23, %v2686_v11  ;;  %v6542_v59 = vadd.f32 %v3095_v14, %v3094_v12  ;;  %v2371_v54 = vand.u32 2147483647, %v6533_v37  ;;  %v6552_v27 = vsel %vm2049_vm6, %v6401_v3, %v2048_v36  ;;  %v6582_v60 = vpop.xlane.xlu0 %959 }
 0x263   :  { %v2046_v51 = vsel %vm2044_vm5, %v8981_v24, %v2043_v8  ;;  %8984 = vst [vmem:[#allocation70_spill] sm:$0xff] %v6547_v2  ;;  %v6556_v44 = vmul.f32 0.015873017, %v6145_v10  ;;  %v2649_v11 = vmul.f32 %v6533_v37, %v6533_v37  ;;  %v6560_v8 = vpop.eup %3696  ;;  %v6565_v12 = vsel %vm2056_vm7, %v6411_v55, %v2055_v0 }
 0x264   :  { %8982 = vst [vmem:[#allocation68_spill] sm:$0xff] %v6542_v59  ;;  %8986 = vst [vmem:[#allocation149_spill] sm:$0xff] %v6560_v8  ;;  %v6570_v36 = vsel %vm2063_vm8, %v6418_v9, %v2062_v17  ;;  %v2421_v23 = vsel %vm139_vm0, %v2371_v54, 0.0  ;;  %v2156_v14 = vadd.f32 1e-06, %v2046_v51  ;;  %v6573_v10 = vpop.eup %3698  ;;  %v6579_v42 = vsel %vm139_vm0, %v6091_v57, 0.0  ;;  %v6584_v17 = vpop.xlane.xlu1 %962 }
 0x265   :  { %8985 = vst [vmem:[#allocation148_spill] sm:$0xff] %v6556_v44  ;;  %8987 = vst [vmem:[#allocation150_spill] sm:$0xff] %v6573_v10  ;;  %v2689_v0 = vsel %vm139_vm0, %v2649_v11, 0.0  ;;  %2422 = vadd.xlane.f32.xlu1 %v2421_v23  ;;  %v2530_v5 = vadd.f32 %v2529_v34, %v2421_v23  ;;  %v2372_v57 = vand.u32 2147483647, %v6547_v2  ;;  %3710 = vrsqrt.f32 %v6556_v44  ;;  %v8991_v23 = vld [vmem:[#allocation27_spill] sm:$0xff]  ;;  %v3701_v52 = vpop.eup %3700 }
 0x266   :  { %8988 = vst [vmem:[#allocation151_spill] sm:$0xff] %v6579_v42  ;;  %8989 = vst [vmem:[#allocation152_spill] sm:$0xff] %v6584_v17  ;;  %v2690_v24 = vadd.f32 %v2689_v0, %v2688_v16  ;;  %v6594_v34 = vsel %vm139_vm0, %v6104_v21, 0.0  ;;  %v2650_v11 = vmul.f32 %v6547_v2, %v6547_v2  ;;  %v6600_v40 = vmul.f32 %v6560_v8, %v8991_v23  ;;  %v8994_v0 = vld [vmem:[#allocation26_spill] sm:$0xff]  ;;  %v3703_v21 = vpop.eup %3702  ;;  %v6633_v13 = vpop.xlane.xlu0 %965 }
 0x267   :  { %8990 = vst [vmem:[#allocation153_spill] sm:$0xff] %v6594_v34  ;;  %v6603_v51 = vmul.f32 0.015873017, %v6154_v31  ;;  %v2424_v16 = vsel %vm139_vm0, %v2372_v57, 0.0  ;;  %v6608_v54 = vmul.f32 %v6573_v10, %v8994_v0  ;;  %3712 = vrcp.f32 %v2156_v14  ;;  %9001 = vst [vmem:[#allocation8_spill] sm:$0xff] %v6633_v13 }
 0x268   :  { %8992 = vst [vmem:[#allocation27_spill] sm:$0xff] %v6600_v40  ;;  %v6615_v23 = vadd.f32 %v2530_v5, %v2424_v16  ;;  %v2691_v31 = vsel %vm139_vm0, %v2650_v11, 0.0  ;;  %2425 = vadd.xlane.f32.xlu0 %v2424_v16  ;;  %v2378_v57 = vand.u32 2147483647, %v6600_v40  ;;  %v2656_v14 = vmul.f32 %v6600_v40, %v6600_v40 }
 0x269   :  { %8993 = vst [vmem:[#allocation154_spill] sm:$0xff] %v6603_v51  ;;  %8995 = vst [vmem:[#allocation26_spill] sm:$0xff] %v6608_v54  ;;  %v6622_v0 = vadd.f32 %v2691_v31, %v2690_v24  ;;  %v3064_v41 = vmul.f32 %v6600_v40, %v9000_v39  ;;  %v2069_v46 = vmul.f32 %v3701_v52, %v6456_v18  ;;  %vm2084_vm14 = vcmp.eq.f32.partialorder %v6496_v7, inf  ;;  %v6635_v24 = vpop.xlane.xlu1 %968 }
 0x26a   :  { %8997 = vst [vmem:[#allocation156_spill] sm:$0xff] %v6615_v23  ;;  %v2442_v11 = vsel %vm139_vm0, %v2378_v57, 0.0  ;;  %v2379_v16 = vand.u32 2147483647, %v6608_v54  ;;  %9002 = vst [vmem:[#allocation159_spill] sm:$0xff] %v6635_v24  ;;  %v3705_v31 = vpop.eup %3704  ;;  %v2076_v6 = vmul.f32 %v3703_v21, %v6459_v28  ;;  %vm2091_vm15 = vcmp.eq.f32.partialorder %v6504_v47, inf }
 0x26b   :  { %8999 = vst [vmem:[#allocation158_spill] sm:$0xff] %v6622_v0  ;;  %3714 = vrsqrt.f32 %v6603_v51  ;;  %v2709_v39 = vsel %vm139_vm0, %v2656_v14, 0.0  ;;  %2443 = vadd.xlane.f32.xlu1 %v2442_v11  ;;  %v2657_v52 = vmul.f32 %v6608_v54, %v6608_v54  ;;  %v3117_v5 = vsel %vm139_vm0, %v3064_v41, 0.0  ;;  %v9003_v21 = vld [vmem:[#allocation9_spill] sm:$0xff] }
 0x26c   :  { %v3707_v57 = vpop.eup %3706  ;;  %3716 = vrsqrt.f32 %v6613_v19  ;;  %v2445_v56 = vsel %vm139_vm0, %v2379_v16, 0.0  ;;  %v3065_v1 = vmul.f32 %v6608_v54, %v9003_v21  ;;  %v6651_v14 = vmul.f32 0.015873017, %v6184_v26 }
 0x26d   :  { %v3709_v8 = vpop.eup %3708  ;;  %3718 = vrsqrt.f32 %v6620_v48  ;;  %v6653_v10 = vadd.f32 %v2445_v56, %v2442_v11  ;;  %v2710_v50 = vsel %vm139_vm0, %v2657_v52, 0.0  ;;  %2446 = vadd.xlane.f32.xlu0 %v2445_v56  ;;  %v2071_v41 = vsel %vm2070_vm11, %v6456_v18, %v2069_v46 }
 0x26e   :  { %9004 = vst [vmem:[#allocation9_spill] sm:$0xff] %v6651_v14  ;;  %v6661_v16 = vadd.f32 %v6594_v34, %v6579_v42  ;;  %v2711_v21 = vadd.f32 %v2710_v50, %v2709_v39  ;;  %v3118_v24 = vsel %vm139_vm0, %v3065_v1, 0.0  ;;  %v2083_v59 = vmul.f32 %v3705_v31, %v6496_v7  ;;  %v6678_v31 = vpop.xlane.xlu0 %971 }
 0x26f   :  { %vm2098_vm2 = vcmp.eq.f32.partialorder %v6511_v49, inf  ;;  %v3119_v26 = vadd.f32 %v3118_v24, %v3117_v5  ;;  %v9005_v11 = vand.u32 2147483648, %v6401_v3  ;;  %v2090_v46 = vmul.f32 %v3707_v57, %v6504_v47  ;;  %9007 = vst [vmem:[#allocation160_spill] sm:$0xff] %v6678_v31  ;;  %v6680_v5 = vpop.xlane.xlu1 %974 }
 0x270   :  { %v9006_v50 = vand.u32 2147483648, %v6411_v55  ;;  %9008 = vst [vmem:[#allocation161_spill] sm:$0xff] %v6680_v5  ;;  %v2078_v24 = vsel %vm2077_vm13, %v6459_v28, %v2076_v6  ;;  %3720 = vrsqrt.f32 %v6651_v14  ;;  %vm2105_vm4 = vcmp.eq.f32.partialorder %v6556_v44, inf }
 0x271   :  { %v2053_v56 = vsel %vm2051_vm9, %v9005_v11, %v6552_v27  ;;  %v2097_v27 = vmul.f32 %v3709_v8, %v6511_v49  ;;  %v6690_v11 = vmul.f32 0.015873017, %v6193_v63  ;;  %vm2079_vm5 = vcmp.eq.f32.partialorder %v6459_v28, 0.0 }
 0x272   :  { %v2157_v34 = vadd.f32 1e-06, %v2053_v56  ;;  %v2060_v1 = vsel %vm2058_vm10, %v9006_v50, %v6565_v12  ;;  %v3711_v12 = vpop.eup %3710  ;;  %v2085_v6 = vsel %vm2084_vm14, %v6496_v7, %v2083_v59  ;;  %vm2086_vm6 = vcmp.eq.f32.partialorder %v6496_v7, 0.0 }
 0x273   :  { %v2158_v39 = vadd.f32 1e-06, %v2060_v1  ;;  %9009 = vst [vmem:[#allocation162_spill] sm:$0xff] %v6690_v11  ;;  %v9010_v56 = vand.u32 2147483648, %v6418_v9  ;;  %v9014_v52 = vand.u32 2147483648, %v6456_v18  ;;  %v2104_v59 = vmul.f32 %v3711_v12, %v6556_v44  ;;  %v6730_v1 = vpop.xlane.xlu0 %977  ;;  %v6732_v8 = vpop.xlane.xlu1 %980  ;;  %v9018_v12 = vld [vmem:[#allocation10_spill] sm:$0xff] }
 0x274   :  { %3722 = vrcp.f32 %v2157_v34  ;;  %v6703_v50 = vpop.eup %3712  ;;  %v6708_v34 = vsel %vm2091_vm15, %v6504_v47, %v2090_v46  ;;  %vm1993_vm7 = vcmp.eq.f32.partialorder %v6603_v51, inf  ;;  %9015 = vst [vmem:[#allocation164_spill] sm:$0xff] %v6730_v1  ;;  %9016 = vst [vmem:[#allocation165_spill] sm:$0xff] %v6732_v8  ;;  %vm2112_vm8 = vcmp.eq.f32.partialorder %v6613_v19, inf  ;;  %v9022_v8 = vld [vmem:[#allocation46_spill] sm:$0xff] }
 0x275   :  { %3724 = vrcp.f32 %v2158_v39  ;;  %v2067_v63 = vsel %vm2065_vm12, %v9010_v56, %v6570_v36  ;;  %9011 = vst [vmem:[#allocation163_spill] sm:$0xff] %v6703_v50  ;;  %v6715_v39 = vsel %vm2098_vm2, %v6511_v49, %v2097_v27  ;;  %v9012_v36 = vld [vmem:[#allocation28_spill] sm:$0xff]  ;;  %v2074_v46 = vsel %vm2072_vm1, %v9014_v52, %v2071_v41 }
 0x276   :  { %v2159_v57 = vadd.f32 1e-06, %v2067_v63  ;;  %v6720_v56 = vmul.f32 %v6703_v50, %v9012_v36  ;;  %3726 = vrsqrt.f32 %v6690_v11  ;;  %v2160_v63 = vadd.f32 1e-06, %v2074_v46 }
 0x277   :  { %v6736_v36 = vmul.f32 0.015873017, %v6199_v29  ;;  %vm2000_vm9 = vcmp.eq.f32.partialorder %v6620_v48, inf  ;;  %v6745_v46 = vmul.f32 0.015873017, %v6220_v45  ;;  %v6752_v29 = vsel %vm139_vm0, %v6224_v20, 0.0 }
 0x278   :  { %9013 = vst [vmem:[#allocation28_spill] sm:$0xff] %v6720_v56  ;;  %v2380_v41 = vand.u32 2147483647, %v6720_v56  ;;  %v2658_v52 = vmul.f32 %v6720_v56, %v6720_v56  ;;  %v3066_v18 = vmul.f32 %v6720_v56, %v9018_v12  ;;  %v3715_v9 = vpop.eup %3714  ;;  %v6748_v27 = vmul.f32 0.015873017, %v6230_v35  ;;  %9021 = vst [vmem:[#allocation168_spill] sm:$0xff] %v6752_v29 }
 0x279   :  { %9017 = vst [vmem:[#allocation166_spill] sm:$0xff] %v6736_v36  ;;  %9019 = vst [vmem:[#allocation10_spill] sm:$0xff] %v6745_v46  ;;  %3728 = vrcp.f32 %v2159_v57  ;;  %v3717_v55 = vpop.eup %3716  ;;  %v812_v45 = vmul.f32 %v9022_v8, %v9022_v8  ;;  %v6763_v20 = vsel %vm2105_vm4, %v6556_v44, %v2104_v59  ;;  %v1992_v57 = vmul.f32 %v3715_v9, %v6603_v51  ;;  %v6780_v9 = vpop.xlane.xlu0 %983 }
 0x27a   :  { %9020 = vst [vmem:[#allocation167_spill] sm:$0xff] %v6748_v27  ;;  %v2448_v3 = vsel %vm139_vm0, %v2380_v41, 0.0  ;;  %v2712_v50 = vsel %vm139_vm0, %v2658_v52, 0.0  ;;  %v3120_v12 = vsel %vm139_vm0, %v3066_v18, 0.0  ;;  %3730 = vrcp.f32 %v2160_v63  ;;  %v3719_v42 = vpop.eup %3718  ;;  %9026 = vst [vmem:[#allocation169_spill] sm:$0xff] %v6780_v9 }
 0x27b   :  { %v2713_v1 = vadd.f32 %v2712_v50, %v2711_v21  ;;  %v3121_v35 = vadd.f32 %v3120_v12, %v3119_v26  ;;  %2449 = vadd.xlane.f32.xlu1 %v2448_v3  ;;  %v2544_v5 = vadd.f32 %v6653_v10, %v2448_v3  ;;  %3732 = vrsqrt.f32 %v6736_v36  ;;  %v6782_v50 = vpop.xlane.xlu1 %986 }
 0x27c   :  { %v6768_v18 = vmul.f32 0.015873017, %v6246_v22  ;;  %v2111_v63 = vmul.f32 %v3717_v55, %v6613_v19  ;;  %v9024_v26 = vand.u32 2147483648, %v6459_v28  ;;  %v9025_v10 = vand.u32 2147483648, %v6496_v7  ;;  %9027 = vst [vmem:[#allocation170_spill] sm:$0xff] %v6782_v50  ;;  %v9035_v7 = vld [vmem:[#allocation32_spill] sm:$0xff] }
 0x27d   :  { %v1999_v22 = vmul.f32 %v3719_v42, %v6620_v48  ;;  %3734 = vrsqrt.f32 %v6745_v46  ;;  %v3721_v41 = vpop.eup %3720  ;;  %v6796_v42 = vsel %vm1993_vm7, %v6603_v51, %v1992_v57  ;;  %v9033_v57 = vld [vmem:[#allocation30_spill] sm:$0xff]  ;;  %v9037_v50 = vld [vmem:[#allocation36_spill] sm:$0xff]  ;;  %vm2093_vm10 = vcmp.eq.f32.partialorder %v6504_v47, 0.0 }
 0x27e   :  { %9023 = vst [vmem:[#allocation46_spill] sm:$0xff] %v6768_v18  ;;  %v2081_v3 = vsel %vm2079_vm5, %v9024_v26, %v2078_v24  ;;  %v2088_v8 = vsel %vm2086_vm6, %v9025_v10, %v2085_v6  ;;  %3736 = vrsqrt.f32 %v6748_v27  ;;  %v9028_v24 = vld [vmem:[#allocation37_spill] sm:$0xff]  ;;  %vm2100_vm11 = vcmp.eq.f32.partialorder %v6511_v49, 0.0 }
 0x27f   :  { %v2161_v55 = vadd.f32 1e-06, %v2081_v3  ;;  %v2162_v59 = vadd.f32 1e-06, %v2088_v8  ;;  %v844_v12 = vmul.f32 %v812_v45, %v9028_v24  ;;  %v9029_v26 = vld [vmem:[#allocation41_spill] sm:$0xff]  ;;  %v6801_v8 = vadd.f32 %v6752_v29, %v6661_v16  ;;  %v9032_v24 = vld [vmem:[#allocation55_spill] sm:$0xff] }
 0x280   :  { %v813_v6 = vmul.f32 %v9029_v26, %v9029_v26  ;;  %3738 = vrsqrt.f32 %v6768_v18  ;;  %v6809_v45 = vsel %vm2112_vm8, %v6613_v19, %v2111_v63  ;;  %v814_v26 = vmul.f32 %v9032_v24, %v9032_v24  ;;  %v9043_v29 = vld [vmem:[#allocation57_spill] sm:$0xff] }
 0x281   :  { %v6791_v10 = vpop.eup %3722  ;;  %3740 = vrcp.f32 %v2161_v55  ;;  %v6820_v16 = vsel %vm2000_vm9, %v6620_v48, %v1999_v22  ;;  %v876_v63 = vmax.f32 %v844_v12, 1e-06  ;;  %v6836_v3 = vmul.f32 %v3721_v41, %v6651_v14 }
 0x282   :  { %9030 = vst [vmem:[#allocation37_spill] sm:$0xff] %v6791_v10  ;;  %v6804_v21 = vpop.eup %3724  ;;  %v6815_v52 = vmul.f32 %v6791_v10, %v9033_v57  ;;  %3742 = vrcp.f32 %v2162_v59  ;;  %v845_v24 = vmul.f32 %v813_v6, %v9037_v50  ;;  %v6831_v57 = vpop.xlane.xlu0 %989  ;;  %v9041_v59 = vld [vmem:[#allocation11_spill] sm:$0xff]  ;;  %v9042_v6 = vld [vmem:[#allocation38_spill] sm:$0xff]  ;;  %v815_v31 = vmul.f32 %v9043_v29, %v9043_v29 }
 0x283   :  { %9031 = vst [vmem:[#allocation41_spill] sm:$0xff] %v6804_v21  ;;  %v6825_v28 = vmul.f32 %v6804_v21, %v9035_v7  ;;  %9038 = vst [vmem:[#allocation32_spill] sm:$0xff] %v6831_v57  ;;  %v6833_v10 = vpop.xlane.xlu1 %992  ;;  %v3727_v22 = vpop.eup %3726  ;;  %v6840_v7 = vsel %vm139_vm0, %v6277_v38, 0.0  ;;  %v846_v21 = vmul.f32 %v814_v26, %v9042_v6  ;;  %v1292_v17 = vadd.f32 1.0, %v876_v63  ;;  %v9046_v6 = vld [vmem:[#allocation74_spill] sm:$0xff] }
 0x284   :  { %9034 = vst [vmem:[#allocation55_spill] sm:$0xff] %v6815_v52  ;;  %v2381_v9 = vand.u32 2147483647, %v6815_v52  ;;  %v2659_v55 = vmul.f32 %v6815_v52, %v6815_v52  ;;  %9039 = vst [vmem:[#allocation36_spill] sm:$0xff] %v6833_v10  ;;  %v3067_v50 = vmul.f32 %v6815_v52, %v9041_v59  ;;  %v877_v26 = vmax.f32 %v845_v24, 1e-06 }
 0x285   :  { %9036 = vst [vmem:[#allocation30_spill] sm:$0xff] %v6825_v28  ;;  %9040 = vst [vmem:[#allocation171_spill] sm:$0xff] %v6840_v7  ;;  %v2382_v12 = vand.u32 2147483647, %v6825_v28  ;;  %v816_v29 = vmul.f32 %v9046_v6, %v9046_v6  ;;  %v6870_v24 = vmul.f32 %v3727_v22, %v6690_v11  ;;  %3744 = vlog2.f32 %v1292_v17 }
 0x286   :  { %v2451_v0 = vsel %vm139_vm0, %v2381_v9, 0.0  ;;  %v2714_v10 = vsel %vm139_vm0, %v2659_v55, 0.0  ;;  %v6850_v41 = vpop.eup %3728  ;;  %v3122_v38 = vsel %vm139_vm0, %v3067_v50, 0.0  ;;  %v878_v50 = vmax.f32 %v846_v21, 1e-06  ;;  %v6880_v6 = vpop.xlane.xlu0 %995 }
 0x287   :  { %9044 = vst [vmem:[#allocation11_spill] sm:$0xff] %v6850_v41  ;;  %v2545_v57 = vadd.f32 %v2544_v5, %v2451_v0  ;;  %v2715_v13 = vadd.f32 %v2714_v10, %v2713_v1  ;;  %2452 = vadd.xlane.f32.xlu0 %v2451_v0  ;;  %v2454_v59 = vsel %vm139_vm0, %v2382_v12, 0.0  ;;  %v6854_v52 = vpop.eup %3730  ;;  %v3123_v56 = vadd.f32 %v3122_v38, %v3121_v35  ;;  %v9047_v1 = vld [vmem:[#allocation12_spill] sm:$0xff]  ;;  %v9048_v10 = vld [vmem:[#allocation34_spill] sm:$0xff] }
 0x288   :  { %9045 = vst [vmem:[#allocation38_spill] sm:$0xff] %v6854_v52  ;;  %2455 = vadd.xlane.f32.xlu1 %v2454_v59  ;;  %v2660_v5 = vmul.f32 %v6825_v28, %v6825_v28  ;;  %v3068_v9 = vmul.f32 %v6825_v28, %v9047_v1  ;;  %v6865_v55 = vmul.f32 %v6850_v41, %v9048_v10  ;;  %v6867_v63 = vpop.eup %3732  ;;  %v6874_v35 = vsel %vm139_vm0, %v6284_v15, 0.0  ;;  %v9051_v12 = vld [vmem:[#allocation58_spill] sm:$0xff] }
 0x289   :  { %v2546_v0 = vadd.f32 %v2545_v57, %v2454_v59  ;;  %9050 = vst [vmem:[#allocation74_spill] sm:$0xff] %v6874_v35  ;;  %v6878_v38 = vmul.f32 %v6854_v52, %v9051_v12  ;;  %9052 = vst [vmem:[#allocation12_spill] sm:$0xff] %v6880_v6  ;;  %v6882_v57 = vpop.xlane.xlu1 %998  ;;  %v9054_v59 = vld [vmem:[#allocation39_spill] sm:$0xff]  ;;  %v1293_v15 = vadd.f32 1.0, %v877_v26  ;;  %v9055_v52 = vld [vmem:[#allocation40_spill] sm:$0xff]  ;;  %v1294_v17 = vadd.f32 1.0, %v878_v50 }
 0x28a   :  { %9049 = vst [vmem:[#allocation57_spill] sm:$0xff] %v6865_v55  ;;  %9053 = vst [vmem:[#allocation34_spill] sm:$0xff] %v6882_v57  ;;  %v847_v1 = vmul.f32 %v815_v31, %v9054_v59  ;;  %v2716_v10 = vsel %vm139_vm0, %v2660_v5, 0.0  ;;  %v3124_v22 = vsel %vm139_vm0, %v3068_v9, 0.0  ;;  %v2383_v41 = vand.u32 2147483647, %v6865_v55  ;;  %v6888_v28 = vpop.eup %3734 }
 0x28b   :  { %v2717_v21 = vadd.f32 %v2716_v10, %v2715_v13  ;;  %v3125_v2 = vadd.f32 %v3124_v22, %v3123_v56  ;;  %v6890_v12 = vpop.eup %3736  ;;  %v6894_v57 = vmul.f32 %v816_v29, %v9055_v52  ;;  %v9056_v31 = vld [vmem:[#allocation79_spill] sm:$0xff]  ;;  %v2661_v59 = vmul.f32 %v6865_v55, %v6865_v55  ;;  %v9057_v56 = vld [vmem:[#allocation13_spill] sm:$0xff] }
 0x28c   :  { %v817_v5 = vmul.f32 %v9056_v31, %v9056_v31  ;;  %v2457_v9 = vsel %vm139_vm0, %v2383_v41, 0.0  ;;  %v3069_v26 = vmul.f32 %v6865_v55, %v9057_v56  ;;  %v2384_v10 = vand.u32 2147483647, %v6878_v38  ;;  %v9059_v31 = vld [vmem:[#allocation14_spill] sm:$0xff]  ;;  %v6917_v56 = vpop.xlane.xlu0 %1001 }
 0x28d   :  { %v6901_v6 = vpop.eup %3738  ;;  %v2547_v13 = vadd.f32 %v2546_v0, %v2457_v9  ;;  %2458 = vadd.xlane.f32.xlu0 %v2457_v9  ;;  %v879_v29 = vmax.f32 %v847_v1, 1e-06  ;;  %v2718_v22 = vsel %vm139_vm0, %v2661_v59, 0.0  ;;  %v2662_v41 = vmul.f32 %v6878_v38, %v6878_v38  ;;  %9061 = vst [vmem:[#allocation40_spill] sm:$0xff] %v6917_v56  ;;  %v6919_v55 = vpop.xlane.xlu1 %1004  ;;  %v9063_v1 = vld [vmem:[#allocation42_spill] sm:$0xff] }
 0x28e   :  { %v6906_v52 = vpop.eup %3740  ;;  %v3070_v23 = vmul.f32 %v6878_v38, %v9059_v31  ;;  %3746 = vlog2.f32 %v1293_v15  ;;  %v2719_v0 = vadd.f32 %v2718_v22, %v2717_v21  ;;  %v3126_v50 = vsel %vm139_vm0, %v3069_v26, 0.0  ;;  %9062 = vst [vmem:[#allocation79_spill] sm:$0xff] %v6919_v55  ;;  %v9064_v26 = vld [vmem:[#allocation62_spill] sm:$0xff] }
 0x28f   :  { %9058 = vst [vmem:[#allocation58_spill] sm:$0xff] %v6906_v52  ;;  %v6913_v54 = vpop.eup %3742  ;;  %v2460_v9 = vsel %vm139_vm0, %v2384_v10, 0.0  ;;  %vm2119_vm12 = vcmp.eq.f32.partialorder %v6651_v14, inf  ;;  %v849_v59 = vmul.f32 %v817_v5, %v9063_v1  ;;  %v3127_v40 = vadd.f32 %v3126_v50, %v3125_v2  ;;  %v9067_v1 = vld [vmem:[#allocation65_spill] sm:$0xff] }
 0x290   :  { %9060 = vst [vmem:[#allocation39_spill] sm:$0xff] %v6913_v54  ;;  %v2720_v37 = vsel %vm139_vm0, %v2662_v41, 0.0  ;;  %v3128_v31 = vsel %vm139_vm0, %v3070_v23, 0.0  ;;  %2461 = vadd.xlane.f32.xlu1 %v2460_v9  ;;  %vm2007_vm13 = vcmp.eq.f32.partialorder %v6690_v11, inf  ;;  %v2548_v21 = vadd.f32 %v2547_v13, %v2460_v9  ;;  %v9066_v41 = vld [vmem:[#allocation84_spill] sm:$0xff]  ;;  %v9068_v9 = vld [vmem:[#allocation15_spill] sm:$0xff] }
 0x291   :  { %v2721_v15 = vadd.f32 %v2720_v37, %v2719_v0  ;;  %v6928_v10 = vmul.f32 %v6906_v52, %v9064_v26  ;;  %v9065_v22 = vand.u32 2147483648, %v6504_v47  ;;  %v880_v2 = vmax.f32 %v6894_v57, 1e-06  ;;  %v6962_v47 = vpop.xlane.xlu1 %1010 }
 0x292   :  { %v818_v23 = vmul.f32 %v9066_v41, %v9066_v41  ;;  %v3129_v50 = vadd.f32 %v3128_v31, %v3127_v40  ;;  %v6940_v37 = vmul.f32 %v6913_v54, %v9067_v1  ;;  %vm1995_vm14 = vcmp.eq.f32.partialorder %v6603_v51, 0.0  ;;  %9071 = vst [vmem:[#allocation14_spill] sm:$0xff] %v6962_v47  ;;  %v3745_v54 = vpop.eup %3744  ;;  %v9155_v47 = vld [vmem:[#allocation75_spill] sm:$0xff] }
 0x293   :  { %v2095_v5 = vsel %vm2093_vm10, %v9065_v22, %v6708_v34  ;;  %vm2126_vm15 = vcmp.eq.f32.partialorder %v6736_v36, inf  ;;  %3748 = vlog2.f32 %v1294_v17  ;;  %v1295_v13 = vadd.f32 1.0, %v879_v29 }
 0x294   :  { %v2385_v0 = vand.u32 2147483647, %v6928_v10  ;;  %v2663_v34 = vmul.f32 %v6928_v10, %v6928_v10  ;;  %vm2107_vm1 = vcmp.eq.f32.partialorder %v6556_v44, 0.0  ;;  %v881_v57 = vmax.f32 %v849_v59, 1e-06  ;;  %v6960_v59 = vpop.xlane.xlu0 %1007 }
 0x295   :  { %v3071_v40 = vmul.f32 %v6928_v10, %v9068_v9  ;;  %v2386_v31 = vand.u32 2147483647, %v6940_v37  ;;  %v2163_v26 = vadd.f32 1e-06, %v2095_v5  ;;  %v2664_v17 = vmul.f32 %v6940_v37, %v6940_v37  ;;  %9070 = vst [vmem:[#allocation13_spill] sm:$0xff] %v6960_v59 }
 0x296   :  { %v2463_v22 = vsel %vm139_vm0, %v2385_v0, 0.0  ;;  %v2722_v41 = vsel %vm139_vm0, %v2663_v34, 0.0  ;;  %v9069_v29 = vand.u32 2147483648, %v6511_v49  ;;  %vm2002_vm2 = vcmp.eq.f32.partialorder %v6620_v48, 0.0 }
 0x297   :  { %v2549_v5 = vadd.f32 %v2548_v21, %v2463_v22  ;;  %v2723_v9 = vadd.f32 %v2722_v41, %v2721_v15  ;;  %v3130_v0 = vsel %vm139_vm0, %v3071_v40, 0.0  ;;  %2464 = vadd.xlane.f32.xlu0 %v2463_v22  ;;  %v2466_v34 = vsel %vm139_vm0, %v2386_v31, 0.0  ;;  %v9072_v40 = vld [vmem:[#allocation16_spill] sm:$0xff] }
 0x298   :  { %v2102_v1 = vsel %vm2100_vm11, %v9069_v29, %v6715_v39  ;;  %vm2014_vm4 = vcmp.eq.f32.partialorder %v6745_v46, inf  ;;  %vm2133_vm5 = vcmp.eq.f32.partialorder %v6748_v27, inf  ;;  %3750 = vlog2.f32 %v1295_v13  ;;  %2467 = vadd.xlane.f32.xlu1 %v2466_v34 }
 0x299   :  { %v1296_v49 = vadd.f32 1.0, %v880_v2  ;;  %v3131_v39 = vadd.f32 %v3130_v0, %v3129_v50  ;;  %v2724_v29 = vsel %vm139_vm0, %v2664_v17, 0.0  ;;  %vm2114_vm6 = vcmp.eq.f32.partialorder %v6613_v19, 0.0  ;;  %v9073_v17 = vld [vmem:[#allocation45_spill] sm:$0xff] }
 0x29a   :  { %v2125_v15 = vmul.f32 %v6867_v63, %v6736_v36  ;;  %v6973_v21 = vadd.f32 %v2724_v29, %v2723_v9  ;;  %v3072_v31 = vmul.f32 %v6940_v37, %v9072_v40  ;;  %v6977_v22 = vadd.f32 %v2549_v5, %v2466_v34 }
 0x29b   :  { %v6983_v2 = vsel %vm2119_vm12, %v6651_v14, %v6836_v3  ;;  %vm2021_vm7 = vcmp.eq.f32.partialorder %v6768_v18, inf  ;;  %v2572_v50 = vadd.f32 %v6840_v7, %v6801_v8  ;;  %3752 = vrcp.f32 %v2163_v26  ;;  %v7000_v26 = vpop.xlane.xlu0 %1013 }
 0x29c   :  { %v2164_v63 = vadd.f32 1e-06, %v2102_v1  ;;  %v2008_v13 = vsel %vm2007_vm13, %v6690_v11, %v6870_v24  ;;  %v1297_v41 = vadd.f32 1.0, %v881_v57  ;;  %v850_v5 = vmul.f32 %v818_v23, %v9073_v17  ;;  %9074 = vst [vmem:[#allocation42_spill] sm:$0xff] %v7000_v26  ;;  %v7002_v1 = vpop.xlane.xlu1 %1016  ;;  %v3747_v24 = vpop.eup %3746  ;;  %v9153_v26 = vld [vmem:[#allocation93_spill] sm:$0xff] }
 0x29d   :  { %v3132_v9 = vsel %vm139_vm0, %v3072_v31, 0.0  ;;  %vm2009_vm8 = vcmp.eq.f32.partialorder %v6690_v11, 0.0  ;;  %v2013_v3 = vmul.f32 %v6888_v28, %v6745_v46  ;;  %v2574_v0 = vadd.f32 %v6874_v35, %v2572_v50  ;;  %9075 = vst [vmem:[#allocation62_spill] sm:$0xff] %v7002_v1 }
 0x29e   :  { %3754 = vlog2.f32 %v1296_v49  ;;  %v6998_v8 = vadd.f32 %v3132_v9, %v3131_v39  ;;  %v7007_v23 = vsel %vm2126_vm15, %v6736_v36, %v2125_v15  ;;  %v2132_v57 = vmul.f32 %v6890_v12, %v6748_v27 }
 0x29f   :  { %3756 = vrcp.f32 %v2164_v63  ;;  %v9076_v28 = vand.u32 2147483648, %v6603_v51  ;;  %v7018_v34 = vsel %vm139_vm0, %v6334_v62, 0.0  ;;  %v1037_v39 = vmul.f32 0.015625, %v6438_v32 }
 0x2a0   :  { %9077 = vst [vmem:[#allocation84_spill] sm:$0xff] %v7018_v34  ;;  %v9078_v15 = vand.u32 2147483648, %v6556_v44  ;;  %v2020_v40 = vmul.f32 %v6901_v6, %v6768_v18  ;;  %3758 = vlog2.f32 %v1297_v41  ;;  %v882_v31 = vmax.f32 %v850_v5, 1e-06  ;;  %v3749_v17 = vpop.eup %3748  ;;  %v9080_v5 = vld [vmem:[#allocation88_spill] sm:$0xff]  ;;  %v9107_v44 = vld [vmem:[#allocation51_spill] sm:$0xff] }
 0x2a1   :  { %v1997_v49 = vsel %vm1995_vm14, %v9076_v28, %v6796_v42  ;;  %vm2121_vm9 = vcmp.eq.f32.partialorder %v6651_v14, 0.0  ;;  %v1036_v62 = vmul.f32 0.015625, %v6436_v58  ;;  %v1327_v42 = vmul.f32 0.6931472, %v3747_v24 }
 0x2a2   :  { %v2149_v29 = vadd.f32 1e-06, %v1997_v49  ;;  %v2109_v12 = vsel %vm2107_vm1, %v9078_v15, %v6763_v20  ;;  %v9079_v32 = vand.u32 2147483648, %v6620_v48  ;;  %v7038_v20 = vsel %vm2014_vm4, %v6745_v46, %v2013_v3  ;;  %v7052_v3 = vpop.xlane.xlu0 %1019  ;;  %v7054_v49 = vpop.xlane.xlu1 %1022  ;;  %v9104_v48 = vld [vmem:[#allocation101_spill] sm:$0xff] }
 0x2a3   :  { %v2165_v50 = vadd.f32 1e-06, %v2109_v12  ;;  %v7043_v6 = vsel %vm2133_vm5, %v6748_v27, %v2132_v57  ;;  %v1325_v58 = vmul.f32 0.6931472, %v3745_v54  ;;  %v1389_v41 = vmul.f32 %v1327_v42, %v1037_v39  ;;  %9082 = vst [vmem:[#allocation65_spill] sm:$0xff] %v7052_v3  ;;  %9083 = vst [vmem:[#allocation15_spill] sm:$0xff] %v7054_v49 }
 0x2a4   :  { %3760 = vrcp.f32 %v2149_v29  ;;  %v2004_v63 = vsel %vm2002_vm2, %v9079_v32, %v6820_v16  ;;  %v819_v9 = vmul.f32 %v9080_v5, %v9080_v5  ;;  %v9081_v16 = vand.u32 2147483648, %v6613_v19  ;;  %v9143_v3 = vld [vmem:[#allocation110_spill] sm:$0xff] }
 0x2a5   :  { %3762 = vrcp.f32 %v2165_v50  ;;  %v2150_v24 = vadd.f32 1e-06, %v2004_v63  ;;  %v7059_v54 = vsel %vm2021_vm7, %v6768_v18, %v2020_v40  ;;  %v2576_v57 = vadd.f32 %v7018_v34, %v2574_v0  ;;  %v3751_v42 = vpop.eup %3750 }
 0x2a6   :  { %v2116_v28 = vsel %vm2114_vm6, %v9081_v16, %v6809_v45  ;;  %v1038_v39 = vmul.f32 0.015625, %v6486_v33  ;;  %v1298_v29 = vadd.f32 1.0, %v882_v31  ;;  %v7065_v15 = vsel %vm139_vm0, %v6449_v4, 0.0  ;;  %v9087_v4 = vld [vmem:[#allocation47_spill] sm:$0xff] }
 0x2a7   :  { %9084 = vst [vmem:[#allocation16_spill] sm:$0xff] %v7065_v15  ;;  %v1388_v12 = vmul.f32 %v1325_v58, %v1036_v62  ;;  %v1039_v45 = vmul.f32 0.015625, %v6488_v61  ;;  %v2166_v50 = vadd.f32 1e-06, %v2116_v28  ;;  %v7070_v32 = vsel %vm139_vm0, %v6472_v53, 0.0  ;;  %v9090_v28 = vld [vmem:[#allocation67_spill] sm:$0xff] }
 0x2a8   :  { %9085 = vst [vmem:[#allocation45_spill] sm:$0xff] %v7070_v32  ;;  %v1329_v40 = vmul.f32 0.6931472, %v3749_v17  ;;  %v1040_v63 = vmul.f32 0.015625, %v6524_v30  ;;  %v9086_v0 = vand.u32 2147483648, %v6690_v11  ;;  %v851_v5 = vmul.f32 %v819_v9, %v9087_v4  ;;  %v7078_v61 = vpop.eup %3752  ;;  %v7092_v9 = vpop.xlane.xlu1 %1028 }
 0x2a9   :  { %v1420_v31 = vadd.f32 %v1389_v41, %v1388_v12  ;;  %3764 = vrcp.f32 %v2150_v24  ;;  %9088 = vst [vmem:[#allocation88_spill] sm:$0xff] %v7078_v61  ;;  %v2578_v58 = vadd.f32 %v7065_v15, %v2576_v57  ;;  %v7083_v53 = vsel %vm139_vm0, %v6476_v43, 0.0  ;;  %v7090_v41 = vpop.xlane.xlu0 %1025  ;;  %9092 = vst [vmem:[#allocation172_spill] sm:$0xff] %v7092_v9  ;;  %v9093_v12 = vld [vmem:[#allocation94_spill] sm:$0xff] }
 0x2aa   :  { %v2011_v33 = vsel %vm2009_vm8, %v9086_v0, %v2008_v13  ;;  %9089 = vst [vmem:[#allocation47_spill] sm:$0xff] %v7083_v53  ;;  %v1041_v30 = vmul.f32 0.015625, %v6526_v25  ;;  %3766 = vlog2.f32 %v1298_v29  ;;  %v1390_v17 = vmul.f32 %v1329_v40, %v1038_v39  ;;  %9091 = vst [vmem:[#allocation67_spill] sm:$0xff] %v7090_v41  ;;  %v9098_v9 = vld [vmem:[#allocation102_spill] sm:$0xff]  ;;  %v9125_v41 = vld [vmem:[#allocation73_spill] sm:$0xff] }
 0x2ab   :  { %v2151_v62 = vadd.f32 1e-06, %v2011_v33  ;;  %v1331_v16 = vmul.f32 0.6931472, %v3751_v42  ;;  %v7088_v13 = vmul.f32 %v7078_v61, %v9090_v28  ;;  %3768 = vrcp.f32 %v2166_v50  ;;  %v3755_v24 = vpop.eup %3754  ;;  %v9097_v28 = vld [vmem:[#allocation69_spill] sm:$0xff] }
 0x2ac   :  { %v2580_v57 = vadd.f32 %v7070_v32, %v2578_v58  ;;  %v820_v43 = vmul.f32 %v9093_v12, %v9093_v12  ;;  %v9094_v25 = vand.u32 2147483648, %v6651_v14  ;;  %v7102_v29 = vpop.eup %3756  ;;  %v1421_v50 = vadd.f32 %v1420_v31, %v1390_v17  ;;  %v9096_v58 = vld [vmem:[#allocation98_spill] sm:$0xff]  ;;  %v7133_v19 = vpop.xlane.xlu1 %1034 }
 0x2ad   :  { %3770 = vrcp.f32 %v2151_v62  ;;  %9095 = vst [vmem:[#allocation94_spill] sm:$0xff] %v7102_v29  ;;  %v1391_v42 = vmul.f32 %v1331_v16, %v1039_v45  ;;  %v883_v40 = vmax.f32 %v851_v5, 1e-06  ;;  %v2387_v0 = vand.u32 2147483647, %v7088_v13  ;;  %v9100_v16 = vld [vmem:[#allocation97_spill] sm:$0xff]  ;;  %v7131_v14 = vpop.xlane.xlu0 %1031 }
 0x2ae   :  { %v2123_v39 = vsel %vm2121_vm9, %v9094_v25, %v6983_v2  ;;  %v2582_v33 = vadd.f32 %v7083_v53, %v2580_v57  ;;  %v7107_v4 = vmul.f32 0.015625, %v6582_v60  ;;  %v821_v62 = vmul.f32 %v9096_v58, %v9096_v58  ;;  %v3759_v2 = vpop.eup %3758  ;;  %v9102_v57 = vld [vmem:[#allocation48_spill] sm:$0xff]  ;;  %9105 = vst [vmem:[#allocation97_spill] sm:$0xff] %v7131_v14  ;;  %v9142_v53 = vld [vmem:[#allocation107_spill] sm:$0xff] }
 0x2af   :  { %v7113_v12 = vmul.f32 %v7102_v29, %v9097_v28  ;;  %v1333_v25 = vmul.f32 0.6931472, %v3755_v24  ;;  %v822_v45 = vmul.f32 %v9098_v9, %v9098_v9  ;;  %v2469_v31 = vsel %vm139_vm0, %v2387_v0, 0.0  ;;  %9106 = vst [vmem:[#allocation48_spill] sm:$0xff] %v7133_v19 }
 0x2b0   :  { %v2167_v5 = vadd.f32 1e-06, %v2123_v39  ;;  %v7122_v60 = vsel %vm139_vm0, %v9100_v16, 0.0  ;;  %v852_v58 = vmul.f32 %v820_v43, %v9102_v57  ;;  %v2551_v11 = vadd.f32 %v6977_v22, %v2469_v31  ;;  %2470 = vadd.xlane.f32.xlu0 %v2469_v31  ;;  %v9108_v22 = vld [vmem:[#allocation72_spill] sm:$0xff]  ;;  %v9109_v57 = vld [vmem:[#allocation71_spill] sm:$0xff] }
 0x2b1   :  { %v7118_v17 = vpop.eup %3760  ;;  %9101 = vst [vmem:[#allocation69_spill] sm:$0xff] %v7122_v60  ;;  %v2388_v28 = vand.u32 2147483647, %v7113_v12  ;;  %v3057_v9 = vmul.f32 %v9100_v16, %v9104_v48  ;;  %v1422_v0 = vadd.f32 %v1421_v50, %v1391_v42  ;;  %v1392_v39 = vmul.f32 %v1333_v25, %v1040_v63  ;;  %v9110_v50 = vld [vmem:[#allocation54_spill] sm:$0xff] }
 0x2b2   :  { %9099 = vst [vmem:[#allocation98_spill] sm:$0xff] %v7118_v17  ;;  %v7127_v24 = vpop.eup %3762  ;;  %v1299_v51 = vadd.f32 1.0, %v883_v40  ;;  %v853_v29 = vmul.f32 %v821_v62, %v9107_v44  ;;  %v7139_v31 = vmul.f32 %v7118_v17, %v9108_v22  ;;  %v1335_v48 = vmul.f32 0.6931472, %v3759_v2  ;;  %v9111_v44 = vld [vmem:[#allocation27_spill] sm:$0xff] }
 0x2b3   :  { %9103 = vst [vmem:[#allocation102_spill] sm:$0xff] %v7127_v24  ;;  %v2472_v43 = vsel %vm139_vm0, %v2388_v28, 0.0  ;;  %v7143_v61 = vmul.f32 %v7127_v24, %v9109_v57  ;;  %v854_v63 = vmul.f32 %v822_v45, %v9110_v50  ;;  %3772 = vrcp.f32 %v2167_v5  ;;  %v9113_v57 = vld [vmem:[#allocation105_spill] sm:$0xff]  ;;  %v9115_v5 = vld [vmem:[#allocation26_spill] sm:$0xff] }
 0x2b4   :  { %2473 = vadd.xlane.f32.xlu1 %v2472_v43  ;;  %v7146_v42 = vadd.f32 %v2551_v11, %v2472_v43  ;;  %v7149_v40 = vadd.f32 %v7122_v60, %v2582_v33  ;;  %v7153_v62 = vsel %vm139_vm0, %v9111_v44, 0.0  ;;  %v884_v25 = vmax.f32 %v852_v58, 1e-06  ;;  %v9124_v24 = vld [vmem:[#allocation77_spill] sm:$0xff] }
 0x2b5   :  { %9112 = vst [vmem:[#allocation101_spill] sm:$0xff] %v7153_v62  ;;  %v2373_v16 = vand.u32 2147483647, %v7139_v31  ;;  %v1423_v28 = vadd.f32 %v1422_v0, %v1392_v39  ;;  %v1393_v22 = vmul.f32 %v1335_v48, %v1041_v30  ;;  %v823_v2 = vmul.f32 %v9113_v57, %v9113_v57  ;;  %v9117_v39 = vld [vmem:[#allocation156_spill] sm:$0xff]  ;;  %v7174_v57 = vpop.xlane.xlu0 %1510  ;;  %v9128_v60 = vld [vmem:[#allocation81_spill] sm:$0xff] }
 0x2b6   :  { %v2389_v45 = vand.u32 2147483647, %v7143_v61  ;;  %v7159_v11 = vpop.eup %3764  ;;  %v7163_v33 = vsel %vm139_vm0, %v9115_v5, 0.0  ;;  %3774 = vlog2.f32 %v1299_v51  ;;  %v885_v43 = vmax.f32 %v853_v29, 1e-06  ;;  %v7176_v5 = vpop.xlane.xlu1 %1512 }
 0x2b7   :  { %9114 = vst [vmem:[#allocation51_spill] sm:$0xff] %v7159_v11  ;;  %9116 = vst [vmem:[#allocation72_spill] sm:$0xff] %v7163_v33  ;;  %v2427_v50 = vsel %vm139_vm0, %v2373_v16, 0.0  ;;  %v3767_v58 = vpop.eup %3766  ;;  %v2605_v0 = vadd.f32 %v7163_v33, %v7153_v62  ;;  %v886_v30 = vmax.f32 %v854_v63, 1e-06  ;;  %v7181_v29 = vsel %vm139_vm0, %v3057_v9, 0.0 }
 0x2b8   :  { %v7169_v48 = vadd.f32 %v9117_v39, %v2427_v50  ;;  %2428 = vadd.xlane.f32.xlu0 %v2427_v50  ;;  %v7172_v44 = vsel %vm139_vm0, %v2389_v45, 0.0  ;;  %v7178_v51 = vpop.eup %3768  ;;  %v9119_v16 = vld [vmem:[#allocation70_spill] sm:$0xff]  ;;  %v1300_v50 = vadd.f32 1.0, %v884_v25  ;;  %vm2128_vm10 = vcmp.eq.f32.partialorder %v6736_v36, 0.0  ;;  %v9123_v9 = vld [vmem:[#allocation59_spill] sm:$0xff] }
 0x2b9   :  { %9118 = vst [vmem:[#allocation71_spill] sm:$0xff] %v7178_v51  ;;  %v7185_v19 = vsel %vm139_vm0, %v9119_v16, 0.0  ;;  %v9121_v63 = vld [vmem:[#allocation2_spill] sm:$0xff]  ;;  %2476 = vadd.xlane.f32.xlu1 %v7172_v44  ;;  %vm2016_vm11 = vcmp.eq.f32.partialorder %v6745_v46, 0.0  ;;  %v1424_v14 = vadd.f32 %v1423_v28, %v1393_v22  ;;  %v855_v17 = vmul.f32 %v823_v2, %v9123_v9  ;;  %v9129_v9 = vld [vmem:[#allocation152_spill] sm:$0xff] }
 0x2ba   :  { %9120 = vst [vmem:[#allocation54_spill] sm:$0xff] %v7185_v19  ;;  %v7189_v39 = vmul.f32 %v9119_v16, %v9121_v63  ;;  %v7192_v45 = vpop.eup %3770  ;;  %v7199_v52 = vmul.f32 %v7159_v11, %v9124_v24  ;;  %v7203_v16 = vmul.f32 %v7178_v51, %v9125_v41  ;;  %v1337_v25 = vmul.f32 0.6931472, %v3767_v58  ;;  %v9126_v63 = vld [vmem:[#allocation28_spill] sm:$0xff]  ;;  %v9138_v51 = vld [vmem:[#allocation109_spill] sm:$0xff] }
 0x2bb   :  { %9122 = vst [vmem:[#allocation27_spill] sm:$0xff] %v7192_v45  ;;  %v7207_v49 = vsel %vm139_vm0, %v9126_v63, 0.0  ;;  %v1301_v33 = vadd.f32 1.0, %v885_v43  ;;  %v7211_v32 = vmul.f32 %v7192_v45, %v9128_v60  ;;  %v1302_v22 = vadd.f32 1.0, %v886_v30  ;;  %v9130_v63 = vld [vmem:[#allocation55_spill] sm:$0xff]  ;;  %v7231_v45 = vpop.xlane.xlu0 %1514 }
 0x2bc   :  { %9127 = vst [vmem:[#allocation105_spill] sm:$0xff] %v7207_v49  ;;  %v2607_v28 = vadd.f32 %v7207_v49, %v2605_v0  ;;  %v2374_v24 = vand.u32 2147483647, %v7199_v52  ;;  %v2390_v2 = vand.u32 2147483647, %v7203_v16  ;;  %v1394_v41 = vmul.f32 %v1337_v25, %v7107_v4  ;;  %v7233_v4 = vpop.xlane.xlu1 %1516  ;;  %v9132_v25 = vld [vmem:[#allocation8_spill] sm:$0xff] }
 0x2bd   :  { %v7218_v58 = vmul.f32 0.015625, %v9129_v9  ;;  %3776 = vlog2.f32 %v1300_v50  ;;  %v7222_v43 = vsel %vm139_vm0, %v9130_v63, 0.0  ;;  %v887_v11 = vmax.f32 %v855_v17, 1e-06  ;;  %v9134_v50 = vld [vmem:[#allocation30_spill] sm:$0xff]  ;;  %v9140_v49 = vld [vmem:[#allocation57_spill] sm:$0xff] }
 0x2be   :  { %9131 = vst [vmem:[#allocation26_spill] sm:$0xff] %v7222_v43  ;;  %v7225_v60 = vsel %vm139_vm0, %v2374_v24, 0.0  ;;  %v7228_v0 = vsel %vm139_vm0, %v2390_v2, 0.0  ;;  %v2375_v30 = vand.u32 2147483647, %v7211_v32  ;;  %v7236_v9 = vmul.f32 0.015625, %v9132_v25 }
 0x2bf   :  { %v7240_v63 = vsel %vm139_vm0, %v9134_v50, 0.0  ;;  %3778 = vlog2.f32 %v1301_v33  ;;  %v9136_v17 = vld [vmem:[#allocation106_spill] sm:$0xff]  ;;  %2431 = vadd.xlane.f32.xlu0 %v7225_v60  ;;  %2479 = vadd.xlane.f32.xlu1 %v7228_v0  ;;  %vm2135_vm12 = vcmp.eq.f32.partialorder %v6748_v27, 0.0  ;;  %vm2023_vm13 = vcmp.eq.f32.partialorder %v6768_v18, 0.0 }
 0x2c0   :  { %9133 = vst [vmem:[#allocation156_spill] sm:$0xff] %v7236_v9  ;;  %9135 = vst [vmem:[#allocation70_spill] sm:$0xff] %v7240_v63  ;;  %v824_v24 = vmul.f32 %v9136_v17, %v9136_v17  ;;  %v7248_v2 = vadd.f32 %v1424_v14, %v1394_v41  ;;  %v2609_v25 = vadd.f32 %v7222_v43, %v2607_v28  ;;  %3780 = vlog2.f32 %v1302_v22  ;;  %v7253_v33 = vpop.eup %3772  ;;  %v9144_v14 = vld [vmem:[#allocation111_spill] sm:$0xff]  ;;  %v9145_v43 = vld [vmem:[#allocation78_spill] sm:$0xff] }
 0x2c1   :  { %v828_v50 = vmul.f32 %v9138_v51, %v9138_v51  ;;  %9139 = vst [vmem:[#allocation59_spill] sm:$0xff] %v7253_v33  ;;  %v7257_v17 = vsel %vm139_vm0, %v9140_v49, 0.0  ;;  %v825_v34 = vmul.f32 %v9142_v53, %v9142_v53  ;;  %v829_v15 = vmul.f32 %v9143_v3, %v9143_v3  ;;  %v9147_v53 = vld [vmem:[#allocation63_spill] sm:$0xff] }
 0x2c2   :  { %9137 = vst [vmem:[#allocation2_spill] sm:$0xff] %v7248_v2  ;;  %9141 = vst [vmem:[#allocation77_spill] sm:$0xff] %v7257_v17  ;;  %v830_v41 = vmul.f32 %v9144_v14, %v9144_v14  ;;  %v2611_v28 = vadd.f32 %v7240_v63, %v2609_v25  ;;  %v1303_v22 = vadd.f32 1.0, %v887_v11  ;;  %v7267_v51 = vsel %vm139_vm0, %v2375_v30, 0.0  ;;  %v9151_v14 = vld [vmem:[#allocation89_spill] sm:$0xff]  ;;  %v7296_v63 = vpop.xlane.xlu0 %1518 }
 0x2c3   :  { %v7271_v1 = vmul.f32 %v7253_v33, %v9145_v43  ;;  %v7275_v49 = vsel %vm139_vm0, %v6878_v38, 0.0  ;;  %v856_v7 = vmul.f32 %v824_v24, %v9147_v53  ;;  %2434 = vadd.xlane.f32.xlu0 %v7267_v51  ;;  %v9148_v3 = vand.u32 2147483648, %v6745_v46  ;;  %v3775_v25 = vpop.eup %3774 }
 0x2c4   :  { %9146 = vst [vmem:[#allocation73_spill] sm:$0xff] %v7275_v49  ;;  %v9149_v30 = vand.u32 2147483648, %v6736_v36  ;;  %v2613_v38 = vadd.f32 %v7257_v17, %v2611_v28  ;;  %v7292_v24 = vsel %vm139_vm0, %v6928_v10, 0.0  ;;  %v860_v53 = vmul.f32 %v828_v50, %v9151_v14  ;;  %v9154_v17 = vld [vmem:[#allocation112_spill] sm:$0xff] }
 0x2c5   :  { %v2018_v11 = vsel %vm2016_vm11, %v9148_v3, %v7038_v20  ;;  %9150 = vst [vmem:[#allocation28_spill] sm:$0xff] %v7292_v24  ;;  %v2391_v33 = vand.u32 2147483647, %v7271_v1  ;;  %v7298_v20 = vpop.xlane.xlu1 %1520  ;;  %v9152_v3 = vld [vmem:[#allocation91_spill] sm:$0xff]  ;;  %v862_v36 = vmul.f32 %v830_v41, %v9153_v26  ;;  %3782 = vlog2.f32 %v1303_v22 }
 0x2c6   :  { %v2130_v43 = vsel %vm2128_vm10, %v9149_v30, %v7007_v23  ;;  %v861_v46 = vmul.f32 %v829_v15, %v9152_v3  ;;  %v2152_v23 = vadd.f32 1e-06, %v2018_v11  ;;  %v2615_v28 = vadd.f32 %v7275_v49, %v2613_v38 }
 0x2c7   :  { %v2168_v30 = vadd.f32 1e-06, %v2130_v43  ;;  %v831_v10 = vmul.f32 %v9154_v17, %v9154_v17  ;;  %v7306_v50 = vsel %vm139_vm0, %v2391_v33, 0.0  ;;  %v1339_v14 = vmul.f32 0.6931472, %v3775_v25  ;;  %v9161_v43 = vld [vmem:[#allocation95_spill] sm:$0xff] }
 0x2c8   :  { %v888_v35 = vmax.f32 %v856_v7, 1e-06  ;;  %v7309_v59 = vmul.f32 %v825_v34, %v9155_v47  ;;  %2482 = vadd.xlane.f32.xlu1 %v7306_v50  ;;  %3784 = vrcp.f32 %v2152_v23  ;;  %v2617_v26 = vadd.f32 %v7292_v24, %v2615_v28 }
 0x2c9   :  { %v7315_v15 = vsel %vm139_vm0, %v6940_v37, 0.0  ;;  %v892_v41 = vmax.f32 %v860_v53, 1e-06  ;;  %3786 = vrcp.f32 %v2168_v30  ;;  %v893_v17 = vmax.f32 %v861_v46, 1e-06  ;;  %v7334_v53 = vpop.xlane.xlu0 %1522 }
 0x2ca   :  { %9156 = vst [vmem:[#allocation81_spill] sm:$0xff] %v7309_v59  ;;  %9157 = vst [vmem:[#allocation152_spill] sm:$0xff] %v7315_v15  ;;  %v894_v22 = vmax.f32 %v862_v36, 1e-06  ;;  %v9158_v33 = vand.u32 2147483648, %v6768_v18  ;;  %v9159_v7 = vand.u32 2147483648, %v6748_v27  ;;  %v7327_v11 = vpop.eup %3776  ;;  %v2665_v37 = vmul.f32 %v7088_v13, %v7088_v13 }
 0x2cb   :  { %9160 = vst [vmem:[#allocation55_spill] sm:$0xff] %v7327_v11  ;;  %v863_v46 = vmul.f32 %v831_v10, %v9161_v43  ;;  %v9162_v36 = vld [vmem:[#allocation113_spill] sm:$0xff]  ;;  %v7339_v3 = vmul.f32 %v1339_v14, %v7218_v58  ;;  %v7341_v23 = vadd.f32 1.0, %v888_v35  ;;  %v2666_v10 = vmul.f32 %v7113_v12, %v7113_v12  ;;  %v9168_v14 = vld [vmem:[#allocation36_spill] sm:$0xff] }
 0x2cc   :  { %v2025_v47 = vsel %vm2023_vm13, %v9158_v33, %v7059_v54  ;;  %v2137_v34 = vsel %vm2135_vm12, %v9159_v7, %v7043_v6  ;;  %v832_v25 = vmul.f32 %v9162_v36, %v9162_v36  ;;  %v7336_v54 = vpop.xlane.xlu1 %1524  ;;  %v2619_v6 = vadd.f32 %v7315_v15, %v2617_v26  ;;  %v7344_v28 = vpop.eup %3778  ;;  %v9166_v7 = vld [vmem:[#allocation32_spill] sm:$0xff] }
 0x2cd   :  { %v2153_v38 = vadd.f32 1e-06, %v2025_v47  ;;  %9163 = vst [vmem:[#allocation8_spill] sm:$0xff] %v7339_v3  ;;  %9164 = vst [vmem:[#allocation30_spill] sm:$0xff] %v7341_v23  ;;  %v2169_v30 = vadd.f32 1e-06, %v2137_v34  ;;  %v7351_v43 = vpop.eup %3780  ;;  %v2651_v58 = vmul.f32 %v7139_v31, %v7139_v31  ;;  %v2667_v18 = vmul.f32 %v7143_v61, %v7143_v61 }
 0x2ce   :  { %9165 = vst [vmem:[#allocation106_spill] sm:$0xff] %v7344_v28  ;;  %v1308_v33 = vadd.f32 1.0, %v892_v41  ;;  %v7349_v47 = vmul.f32 0.015625, %v9166_v7  ;;  %9167 = vst [vmem:[#allocation109_spill] sm:$0xff] %v7351_v43  ;;  %v1309_v35 = vadd.f32 1.0, %v893_v17  ;;  %v7356_v36 = vmul.f32 0.015625, %v9168_v14 }
 0x2cf   :  { %3788 = vrcp.f32 %v2153_v38  ;;  %v1310_v26 = vadd.f32 1.0, %v894_v22  ;;  %v2726_v34 = vsel %vm139_vm0, %v2665_v37, 0.0  ;;  %v895_v41 = vmax.f32 %v863_v46, 1e-06  ;;  %v9169_v27 = vld [vmem:[#allocation96_spill] sm:$0xff]  ;;  %v9172_v17 = vld [vmem:[#allocation114_spill] sm:$0xff]  ;;  %v7378_v46 = vpop.xlane.xlu0 %1526 }
 0x2d0   :  { %v7362_v7 = vmul.f32 %v832_v25, %v9169_v27  ;;  %v9170_v38 = vld [vmem:[#allocation12_spill] sm:$0xff]  ;;  %v2652_v49 = vmul.f32 %v7199_v52, %v7199_v52  ;;  %v833_v14 = vmul.f32 %v9172_v17, %v9172_v17  ;;  %3790 = vrcp.f32 %v2169_v30  ;;  %v7380_v25 = vpop.xlane.xlu1 %1528  ;;  %v9174_v30 = vld [vmem:[#allocation34_spill] sm:$0xff] }
 0x2d1   :  { %v7365_v15 = vmul.f32 0.015625, %v9170_v38  ;;  %v7373_v22 = vsel %vm139_vm0, %v7088_v13, 0.0  ;;  %v2728_v37 = vsel %vm139_vm0, %v2666_v10, 0.0  ;;  %3792 = vlog2.f32 %v1308_v33  ;;  %v9193_v23 = vld [vmem:[#allocation92_spill] sm:$0xff] }
 0x2d2   :  { %9173 = vst [vmem:[#allocation107_spill] sm:$0xff] %v7373_v22  ;;  %v2668_v27 = vmul.f32 %v7203_v16, %v7203_v16  ;;  %v2727_v38 = vadd.f32 %v2726_v34, %v6973_v21  ;;  %v2693_v24 = vsel %vm139_vm0, %v2651_v58, 0.0  ;;  %3794 = vlog2.f32 %v1309_v35  ;;  %v7391_v43 = vpop.eup %3782  ;;  %v9177_v34 = vld [vmem:[#allocation99_spill] sm:$0xff] }
 0x2d3   :  { %9171 = vst [vmem:[#allocation57_spill] sm:$0xff] %v7365_v15  ;;  %v7385_v17 = vmul.f32 0.015625, %v9174_v30  ;;  %v2730_v62 = vsel %vm139_vm0, %v2667_v18, 0.0  ;;  %3796 = vlog2.f32 %v1310_v26  ;;  %v7388_v10 = vadd.f32 1.0, %v895_v41  ;;  %9176 = vst [vmem:[#allocation111_spill] sm:$0xff] %v7391_v43  ;;  %v9179_v30 = vld [vmem:[#allocation17_spill] sm:$0xff] }
 0x2d4   :  { %v2621_v55 = vadd.f32 %v7373_v22, %v2619_v6  ;;  %v2729_v56 = vadd.f32 %v2728_v37, %v2727_v38  ;;  %v2695_v21 = vsel %vm139_vm0, %v2652_v49, 0.0  ;;  %v7396_v58 = vmul.f32 %v833_v14, %v9177_v34  ;;  %v9180_v26 = vld [vmem:[#allocation158_spill] sm:$0xff]  ;;  %v9182_v14 = vld [vmem:[#allocation85_spill] sm:$0xff] }
 0x2d5   :  { %9175 = vst [vmem:[#allocation110_spill] sm:$0xff] %v7385_v17  ;;  %v7398_v35 = vpop.eup %3784  ;;  %v7402_v18 = vmul.f32 %v7088_v13, %v9179_v30  ;;  %v2694_v41 = vadd.f32 %v2693_v24, %v9180_v26  ;;  %v2732_v33 = vsel %vm139_vm0, %v2668_v27, 0.0  ;;  %v2653_v43 = vmul.f32 %v7211_v32, %v7211_v32  ;;  %v9185_v34 = vld [vmem:[#allocation82_spill] sm:$0xff]  ;;  %v7432_v26 = vpop.xlane.xlu1 %1532 }
 0x2d6   :  { %9178 = vst [vmem:[#allocation78_spill] sm:$0xff] %v7398_v35  ;;  %v7408_v6 = vpop.eup %3786  ;;  %v2731_v37 = vadd.f32 %v2730_v62, %v2729_v56  ;;  %v2669_v49 = vmul.f32 %v7271_v1, %v7271_v1  ;;  %v7414_v38 = vmul.f32 %v7398_v35, %v9182_v14  ;;  %v7418_v13 = vsel %vm139_vm0, %v7139_v31, 0.0  ;;  %v7430_v62 = vpop.xlane.xlu0 %1530  ;;  %9187 = vst [vmem:[#allocation112_spill] sm:$0xff] %v7432_v26 }
 0x2d7   :  { %9181 = vst [vmem:[#allocation63_spill] sm:$0xff] %v7408_v6  ;;  %9183 = vst [vmem:[#allocation89_spill] sm:$0xff] %v7418_v13  ;;  %v7422_v24 = vsel %vm139_vm0, %v7113_v12, 0.0  ;;  %v2696_v27 = vadd.f32 %v2695_v21, %v2694_v41  ;;  %v7426_v30 = vmul.f32 %v7408_v6, %v9185_v34  ;;  %v2586_v56 = vadd.f32 %v7185_v19, %v7149_v40 }
 0x2d8   :  { %9184 = vst [vmem:[#allocation91_spill] sm:$0xff] %v7422_v24  ;;  %9186 = vst [vmem:[#allocation93_spill] sm:$0xff] %v7430_v62  ;;  %v2733_v14 = vadd.f32 %v2732_v33, %v2731_v37  ;;  %v2376_v35 = vand.u32 2147483647, %v7414_v38  ;;  %v2654_v22 = vmul.f32 %v7414_v38, %v7414_v38  ;;  %v7439_v21 = vsel %vm139_vm0, %v7199_v52, 0.0 }
 0x2d9   :  { %9188 = vst [vmem:[#allocation75_spill] sm:$0xff] %v7439_v21  ;;  %v2697_v41 = vsel %vm139_vm0, %v2653_v43, 0.0  ;;  %v2392_v34 = vand.u32 2147483647, %v7426_v30  ;;  %v2588_v40 = vadd.f32 %v7418_v13, %v2586_v56  ;;  %v7446_v6 = vsel %vm139_vm0, %v7143_v61, 0.0 }
 0x2da   :  { %9189 = vst [vmem:[#allocation95_spill] sm:$0xff] %v7446_v6  ;;  %v2734_v37 = vsel %vm139_vm0, %v2669_v49, 0.0  ;;  %v7452_v19 = vsel %vm139_vm0, %v2376_v35, 0.0  ;;  %v7456_v28 = vsel %vm139_vm0, %v7211_v32, 0.0  ;;  %v2623_v43 = vadd.f32 %v7422_v24, %v2621_v55  ;;  %v7488_v3 = vpop.xlane.xlu0 %1534 }
 0x2db   :  { %9191 = vst [vmem:[#allocation32_spill] sm:$0xff] %v7456_v28  ;;  %2437 = vadd.xlane.f32.xlu0 %v7452_v19  ;;  %v7461_v56 = vsel %vm139_vm0, %v2392_v34, 0.0  ;;  %v2670_v13 = vmul.f32 %v7426_v30, %v7426_v30  ;;  %v2590_v17 = vadd.f32 %v7439_v21, %v2588_v40  ;;  %v7468_v35 = vsel %vm139_vm0, %v7203_v16, 0.0  ;;  %9197 = vst [vmem:[#allocation34_spill] sm:$0xff] %v7488_v3 }
 0x2dc   :  { %v7448_v33 = vpop.eup %3788  ;;  %9192 = vst [vmem:[#allocation36_spill] sm:$0xff] %v7468_v35  ;;  %v2699_v49 = vsel %vm139_vm0, %v2654_v22, 0.0  ;;  %2485 = vadd.xlane.f32.xlu1 %v7461_v56  ;;  %v7478_v34 = vsel %vm139_vm0, %v7414_v38, 0.0  ;;  %v2625_v24 = vadd.f32 %v7446_v6, %v2623_v43  ;;  %v2698_v40 = vadd.f32 %v2697_v41, %v2696_v27  ;;  %v9199_v6 = vld [vmem:[#allocation86_spill] sm:$0xff] }
 0x2dd   :  { %9190 = vst [vmem:[#allocation113_spill] sm:$0xff] %v7448_v33  ;;  %v7474_v55 = vmul.f32 %v7448_v33, %v9193_v23  ;;  %9194 = vst [vmem:[#allocation96_spill] sm:$0xff] %v7478_v34  ;;  %v7481_v9 = vpop.eup %3790  ;;  %v2735_v21 = vadd.f32 %v2734_v37, %v2733_v14  ;;  %v2592_v2 = vadd.f32 %v7456_v28, %v2590_v17  ;;  %v7486_v22 = vsel %vm139_vm0, %v7271_v1, 0.0  ;;  %v7490_v23 = vpop.xlane.xlu1 %1536 }
 0x2de   :  { %9195 = vst [vmem:[#allocation12_spill] sm:$0xff] %v7481_v9  ;;  %9196 = vst [vmem:[#allocation114_spill] sm:$0xff] %v7486_v22  ;;  %v3793_v33 = vpop.eup %3792  ;;  %v7497_v27 = vmul.f32 %v7481_v9, %v9199_v6  ;;  %v2627_v17 = vadd.f32 %v7468_v35, %v2625_v24  ;;  %v2700_v41 = vadd.f32 %v2699_v49, %v2698_v40  ;;  %v2736_v37 = vsel %vm139_vm0, %v2670_v13, 0.0 }
 0x2df   :  { %9198 = vst [vmem:[#allocation99_spill] sm:$0xff] %v7490_v23  ;;  %v2377_v15 = vand.u32 2147483647, %v7474_v55  ;;  %v2655_v43 = vmul.f32 %v7474_v55, %v7474_v55  ;;  %v3795_v14 = vpop.eup %3794  ;;  %v2594_v28 = vadd.f32 %v7478_v34, %v2592_v2  ;;  %v7504_v59 = vsel %vm139_vm0, %v7474_v55, 0.0 }
 0x2e0   :  { %9200 = vst [vmem:[#allocation17_spill] sm:$0xff] %v7504_v59  ;;  %v7506_v11 = vpop.eup %3796  ;;  %v2393_v9 = vand.u32 2147483647, %v7497_v27  ;;  %v7515_v24 = vsel %vm139_vm0, %v7426_v30, 0.0  ;;  %v2671_v2 = vmul.f32 %v7497_v27, %v7497_v27  ;;  %v2629_v40 = vadd.f32 %v7486_v22, %v2627_v17 }
 0x2e1   :  { %v7509_v23 = vsel %vm139_vm0, %v2377_v15, 0.0  ;;  %v2701_v6 = vsel %vm139_vm0, %v2655_v43, 0.0  ;;  %9201 = vst [vmem:[#allocation158_spill] sm:$0xff] %v7515_v24  ;;  %v2596_v49 = vadd.f32 %v7504_v59, %v2594_v28  ;;  %3798 = vlog2.f32 %v7388_v10  ;;  %v7537_v10 = vpop.xlane.xlu0 %1538 }
 0x2e2   :  { %v2702_v13 = vadd.f32 %v2701_v6, %v2700_v41  ;;  %2440 = vadd.xlane.f32.xlu0 %v7509_v23  ;;  %v2737_v15 = vadd.f32 %v2736_v37, %v2735_v21  ;;  %v7524_v43 = vsel %vm139_vm0, %v2393_v9, 0.0  ;;  %v7528_v35 = vsel %vm139_vm0, %v7497_v27, 0.0  ;;  %9202 = vst [vmem:[#allocation85_spill] sm:$0xff] %v7537_v10  ;;  %v7539_v21 = vpop.xlane.xlu1 %1540  ;;  %v9204_v9 = vld [vmem:[#allocation18_spill] sm:$0xff] }
 0x2e3   :  { %v7532_v41 = vsel %vm139_vm0, %v7402_v18, 0.0  ;;  %v2738_v34 = vsel %vm139_vm0, %v2671_v2, 0.0  ;;  %2488 = vadd.xlane.f32.xlu1 %v7524_v43  ;;  %v2631_v28 = vadd.f32 %v7515_v24, %v2629_v40  ;;  %9203 = vst [vmem:[#allocation82_spill] sm:$0xff] %v7539_v21  ;;  %v7543_v17 = vmul.f32 %v7113_v12, %v9204_v9  ;;  %v9206_v24 = vld [vmem:[#allocation3_spill] sm:$0xff] }
 0x2e4   :  { %v2703_v6 = vrot.slane %v2702_v13, 4  ;;  %v9205_v37 = vmax.f32 %v7362_v7, 1e-06  ;;  %v2739_v18 = vadd.f32 %v2738_v34, %v2737_v15  ;;  %v2597_v59 = vrot.slane %v2596_v49, 4  ;;  %v9207_v21 = vld [vmem:[#allocation19_spill] sm:$0xff] }
 0x2e5   :  { %v1357_v3 = vmul.f32 0.6931472, %v3793_v33  ;;  %v2633_v40 = vadd.f32 %v7528_v35, %v2631_v28  ;;  %v3059_v10 = vmul.f32 %v7139_v31, %v9206_v24  ;;  %v7555_v62 = vmul.f32 %v7143_v61, %v9207_v21 }
 0x2e6   :  { %v7547_v22 = vadd.f32 1.0, %v9205_v37  ;;  %v2704_v26 = vadd.f32 %v2703_v6, %v2702_v13  ;;  %v2740_v12 = vrot.slane %v2739_v18, 4  ;;  %v2598_v9 = vadd.f32 %v2597_v59, %v2596_v49  ;;  %v9208_v59 = vld [vmem:[#allocation115_spill] sm:$0xff] }
 0x2e7   :  { %v2553_v7 = vadd.f32 %v7146_v42, %v7172_v44  ;;  %v2533_v33 = vadd.f32 %v7169_v48, %v7225_v60  ;;  %v2634_v15 = vrot.slane %v2633_v40, 4  ;;  %v7562_v13 = vmul.f32 %v1357_v3, %v7349_v47  ;;  %v7572_v44 = vpop.xlane.xlu0 %1542  ;;  %v7574_v48 = vpop.xlane.xlu1 %1544 }
 0x2e8   :  { %v2705_v34 = vrot.slane %v2704_v26, 2  ;;  %v7564_v6 = vmul.f32 0.6931472, %v3795_v14  ;;  %v2741_v31 = vadd.f32 %v2740_v12, %v2739_v18  ;;  %v2599_v24 = vrot.slane %v2598_v9, 2  ;;  %v9209_v14 = vld [vmem:[#allocation60_spill] sm:$0xff] }
 0x2e9   :  { %v2554_v61 = vadd.f32 %v2553_v7, %v7228_v0  ;;  %v2534_v28 = vadd.f32 %v2533_v33, %v7267_v51  ;;  %v7570_v49 = vmul.f32 %v9208_v59, %v9208_v59  ;;  %v2635_v42 = vadd.f32 %v2634_v15, %v2633_v40  ;;  %v9210_v0 = vld [vmem:[#allocation118_spill] sm:$0xff]  ;;  %v9211_v12 = vld [vmem:[#allocation68_spill] sm:$0xff]  ;;  %v9212_v33 = vld [vmem:[#allocation5_spill] sm:$0xff] }
 0x2ea   :  { %v2706_v60 = vadd.f32 %v2705_v34, %v2704_v26  ;;  %v2742_v3 = vrot.slane %v2741_v31, 2  ;;  %v2600_v47 = vadd.f32 %v2599_v24, %v2598_v9  ;;  %v3060_v21 = vmul.f32 %v7199_v52, %v9209_v14  ;;  %v9213_v14 = vld [vmem:[#allocation6_spill] sm:$0xff] }
 0x2eb   :  { %v2555_v37 = vadd.f32 %v2554_v61, %v7306_v50  ;;  %v7581_v51 = vmul.f32 %v9210_v0, %v9210_v0  ;;  %v2636_v18 = vrot.slane %v2635_v42, 2  ;;  %v3098_v40 = vadd.f32 %v7181_v29, %v9211_v12  ;;  %v7598_v2 = vpop.xlane.xlu0 %1493 }
 0x2ec   :  { %v2601_v7 = vrot.slane %v2600_v47, 1  ;;  %v3061_v15 = vmul.f32 %v7211_v32, %v9212_v33  ;;  %v3099_v26 = vsel %vm139_vm0, %v7189_v39, 0.0  ;;  %v3101_v9 = vsel %vm139_vm0, %v3059_v10, 0.0  ;;  %9214 = vst [vmem:[#allocation92_spill] sm:$0xff] %v7598_v2  ;;  %v9374_v2 = vld [vmem:[#allocation167_spill] sm:$0xff] }
 0x2ed   :  { %v2535_v52 = vadd.f32 %v2534_v28, %v7452_v19  ;;  %v2743_v50 = vadd.f32 %v2742_v3, %v2741_v31  ;;  %v2637_v34 = vadd.f32 %v2636_v18, %v2635_v42  ;;  %v3100_v24 = vadd.f32 %v3099_v26, %v3098_v40  ;;  %v7600_v19 = vpop.xlane.xlu1 %1496  ;;  %v9216_v42 = vld [vmem:[#allocation7_spill] sm:$0xff] }
 0x2ee   :  { %v2707_v61 = vrot.slane %v2706_v60, 1  ;;  %v2602_v59 = vadd.f32 %v2601_v7, %v2600_v47  ;;  %v3062_v0 = vmul.f32 %v7414_v38, %v9213_v14  ;;  %v3103_v29 = vsel %vm139_vm0, %v3060_v21, 0.0  ;;  %v7594_v12 = vpop.eup %3798  ;;  %9215 = vst [vmem:[#allocation86_spill] sm:$0xff] %v7600_v19  ;;  %v9217_v7 = vld [vmem:[#allocation20_spill] sm:$0xff]  ;;  %v9346_v19 = vld [vmem:[#allocation87_spill] sm:$0xff] }
 0x2ef   :  { %v2556_v32 = vadd.f32 %v2555_v37, %v7461_v56  ;;  %v2536_v39 = vadd.f32 %v2535_v52, %v7509_v23  ;;  %v2638_v33 = vrot.slane %v2637_v34, 1  ;;  %v3102_v10 = vadd.f32 %v3101_v9, %v3100_v24 }
 0x2f0   :  { %v2918_v31 = vmul.f32 %v2602_v59, %v2602_v59  ;;  %v2946_v28 = vsel %vm139_vm0, %v2602_v59, 0.0  ;;  %v3063_v38 = vmul.f32 %v7474_v55, %v9216_v42  ;;  %v3105_v3 = vsel %vm139_vm0, %v3061_v15, 0.0 }
 0x2f1   :  { %v2744_v47 = vrot.slane %v2743_v50, 1  ;;  %v2557_v21 = vadd.f32 %v2556_v32, %v7524_v43  ;;  %2947 = vadd.xlane.f32.xlu0 %v2946_v28  ;;  %v2639_v56 = vadd.f32 %v2638_v33, %v2637_v34  ;;  %v3104_v23 = vadd.f32 %v3103_v29, %v3102_v10  ;;  %v9218_v34 = vld [vmem:[#allocation21_spill] sm:$0xff]  ;;  %v7624_v29 = vpop.xlane.xlu0 %1546  ;;  %v9219_v33 = vld [vmem:[#allocation22_spill] sm:$0xff]  ;;  %v9220_v28 = vld [vmem:[#allocation100_spill] sm:$0xff] }
 0x2f2   :  { %v7607_v37 = vadd.f32 %v2707_v61, %v2706_v60  ;;  %v2920_v18 = vmul.f32 0.0078125, %v2918_v31  ;;  %v3107_v40 = vsel %vm139_vm0, %v3062_v0, 0.0  ;;  %v3076_v26 = vmul.f32 %v7203_v16, %v9217_v7 }
 0x2f3   :  { %v2919_v9 = vmul.f32 %v2639_v56, %v2639_v56  ;;  %v2949_v52 = vsel %vm139_vm0, %v2639_v56, 0.0  ;;  %v3106_v55 = vadd.f32 %v3105_v3, %v3104_v23  ;;  %v3135_v15 = vadd.f32 %v7532_v41, %v6998_v8  ;;  %v7626_v8 = vpop.xlane.xlu1 %1548  ;;  %v9221_v3 = vld [vmem:[#allocation23_spill] sm:$0xff] }
 0x2f4   :  { %2950 = vadd.xlane.f32.xlu1 %v2949_v52  ;;  %v3109_v43 = vsel %vm139_vm0, %v3063_v38, 0.0  ;;  %v3077_v60 = vmul.f32 %v7271_v1, %v9218_v34  ;;  %v3136_v24 = vsel %vm139_vm0, %v7543_v17, 0.0  ;;  %v3138_v61 = vsel %vm139_vm0, %v7555_v62, 0.0 }
 0x2f5   :  { %v7622_v16 = vadd.f32 %v2744_v47, %v2743_v50  ;;  %v2921_v59 = vmul.f32 0.0078125, %v2919_v9  ;;  %v3108_v14 = vadd.f32 %v3107_v40, %v3106_v55  ;;  %v3137_v0 = vadd.f32 %v3136_v24, %v3135_v15  ;;  %v9222_v40 = vld [vmem:[#allocation103_spill] sm:$0xff]  ;;  %v7650_v34 = vpop.xlane.xlu0 %1550 }
 0x2f6   :  { %v2558_v41 = vrot.slane %v2557_v21, 4  ;;  %v2922_v32 = vsub.f32 %v7607_v37, %v2920_v18  ;;  %v3078_v1 = vmul.f32 %v7426_v30, %v9219_v33  ;;  %v3140_v17 = vsel %vm139_vm0, %v3076_v26, 0.0 }
 0x2f7   :  { %v7633_v10 = vmul.f32 0.6931472, %v7506_v11  ;;  %v2923_v62 = vsub.f32 %v7622_v16, %v2921_v59  ;;  %v3110_v50 = vadd.f32 %v3109_v43, %v3108_v14  ;;  %v3139_v31 = vadd.f32 %v3138_v61, %v3137_v0 }
 0x2f8   :  { %v866_v42 = vmul.f32 %v7570_v49, %v9220_v28  ;;  %v2537_v38 = vrot.slane %v2536_v39, 4  ;;  %v3079_v47 = vmul.f32 %v7497_v27, %v9221_v3  ;;  %v3142_v56 = vsel %vm139_vm0, %v3077_v60, 0.0 }
 0x2f9   :  { %v7643_v30 = vmul.f32 %v7564_v6, %v7356_v36  ;;  %v2925_v23 = vmul.f32 0.007874016, %v2923_v62  ;;  %v3111_v11 = vrot.slane %v3110_v50, 4  ;;  %v3141_v18 = vadd.f32 %v3140_v17, %v3139_v31  ;;  %v7652_v36 = vpop.xlane.xlu1 %1552  ;;  %v1555_v31 = vpop.xlane.xlu0 %1554 }
 0x2fa   :  { %v867_v7 = vmul.f32 %v7581_v51, %v9222_v40  ;;  %v2559_v26 = vadd.f32 %v2558_v41, %v2557_v21  ;;  %v2924_v9 = vmul.f32 0.007874016, %v2922_v32  ;;  %v3144_v49 = vsel %vm139_vm0, %v3078_v1, 0.0  ;;  %v9224_v21 = vld [vmem:[#allocation119_spill] sm:$0xff] }
 0x2fb   :  { %v9223_v52 = vmax.f32 %v7396_v58, 1e-06  ;;  %v2927_v27 = vmax.f32 %v2925_v23, 1e-06  ;;  %v3112_v15 = vadd.f32 %v3111_v11, %v3110_v50  ;;  %v3143_v43 = vadd.f32 %v3142_v56, %v3141_v18 }
 0x2fc   :  { %v898_v6 = vmax.f32 %v866_v42, 1e-06  ;;  %v2538_v60 = vadd.f32 %v2537_v38, %v2536_v39  ;;  %v3146_v24 = vsel %vm139_vm0, %v3079_v47, 0.0  ;;  %v1568_v51 = vmul.f32 0.015625, %v7174_v57  ;;  %v9225_v38 = vld [vmem:[#allocation104_spill] sm:$0xff] }
 0x2fd   :  { %v1313_v55 = vadd.f32 1.0, %v9223_v52  ;;  %v836_v61 = vmul.f32 %v9224_v21, %v9224_v21  ;;  %v3113_v59 = vrot.slane %v3112_v15, 2  ;;  %v3145_v14 = vadd.f32 %v3144_v49, %v3143_v43  ;;  %v1557_v28 = vpop.xlane.xlu1 %1556  ;;  %v9227_v49 = vld [vmem:[#allocation112_spill] sm:$0xff] }
 0x2fe   :  { %v1569_v58 = vmul.f32 0.015625, %v7176_v5  ;;  %v899_v0 = vmax.f32 %v867_v7, 1e-06  ;;  %v2560_v41 = vrot.slane %v2559_v26, 2  ;;  %v2926_v32 = vmax.f32 %v2924_v9, 1e-06 }
 0x2ff   :  { %3274 = vst.msk [vmem:[%s8386_s2 + $0x30] sm:$0xff] %vm3267_vm3, %v1568_v51  ;;  %v1570_v39 = vmul.f32 0.015625, %v7231_v45  ;;  %3800 = vlog2.f32 %v7547_v22  ;;  %v3114_v57 = vadd.f32 %v3113_v59, %v3112_v15  ;;  %v3147_v33 = vadd.f32 %v3146_v24, %v3145_v14  ;;  %v9229_v15 = vld [vmem:[#allocation99_spill] sm:$0xff]  ;;  %v9231_v24 = vld [vmem:[#allocation82_spill] sm:$0xff] }
 0x300   :  { %3275 = vst.msk [vmem:[%s8386_s2 + $0x38] sm:$0xff] %vm3267_vm3, %v1569_v58  ;;  %v2929_v5 = vadd.f32 1.0, %v2927_v27  ;;  %3802 = vlog2.f32 %v1313_v55  ;;  %v7669_v1 = vadd.f32 1.0, %v898_v6  ;;  %v2539_v17 = vrot.slane %v2538_v60, 2  ;;  %v9228_v55 = vld [vmem:[#allocation34_spill] sm:$0xff]  ;;  %v9230_v6 = vld [vmem:[#allocation85_spill] sm:$0xff] }
 0x301   :  { %3276 = vst.msk [vmem:[%s8386_s2 + $0x40] sm:$0xff] %vm3267_vm3, %v1570_v39  ;;  %v1571_v45 = vmul.f32 0.015625, %v7233_v4  ;;  %v3115_v22 = vrot.slane %v3114_v57, 1  ;;  %v3148_v62 = vrot.slane %v3147_v33, 4  ;;  %v1572_v50 = vmul.f32 0.015625, %v7296_v63  ;;  %v1561_v59 = vpop.xlane.xlu1 %1560 }
 0x302   :  { %3804 = vlog2.f32 %v2929_v5  ;;  %v7677_v42 = vadd.f32 1.0, %v899_v0  ;;  %v7680_v3 = vmul.f32 %v836_v61, %v9225_v38  ;;  %v2561_v47 = vadd.f32 %v2560_v41, %v2559_v26  ;;  %v1559_v61 = vpop.xlane.xlu0 %1558  ;;  %v9232_v5 = vld [vmem:[#allocation55_spill] sm:$0xff]  ;;  %v9236_v38 = vld [vmem:[#allocation8_spill] sm:$0xff] }
 0x303   :  { %3277 = vst.msk [vmem:[%s8386_s2 + $0x48] sm:$0xff] %vm3267_vm3, %v1571_v45  ;;  %v2928_v56 = vadd.f32 1.0, %v2926_v32  ;;  %v7686_v4 = vadd.f32 %v3115_v22, %v3114_v57  ;;  %v3149_v23 = vadd.f32 %v3148_v62, %v3147_v33  ;;  %3278 = vst.msk [vmem:[%s8386_s2 + $0x50] sm:$0xff] %vm3267_vm3, %v1572_v50  ;;  %v1573_v63 = vmul.f32 0.015625, %v7298_v20  ;;  %v9234_v22 = vld [vmem:[#allocation4_spill] sm:$0xff]  ;;  %v9235_v50 = vld [vmem:[#allocation57_spill] sm:$0xff] }
 0x304   :  { %v1574_v11 = vmul.f32 0.015625, %v7334_v53  ;;  %v7694_v18 = vadd.f32 %v2539_v17, %v2538_v60  ;;  %v1575_v40 = vmul.f32 0.015625, %v7336_v54  ;;  %v1576_v7 = vmul.f32 0.015625, %v7378_v46  ;;  %v9226_v53 = vld [vmem:[#allocation93_spill] sm:$0xff] }
 0x305   :  { %3806 = vlog2.f32 %v2928_v56  ;;  %v3154_v26 = vsel %vm139_vm0, %v7686_v4, 0.0  ;;  %v3150_v9 = vrot.slane %v3149_v23, 2  ;;  %3279 = vst.msk [vmem:[%s8386_s2 + $0x58] sm:$0xff] %vm3267_vm3, %v1573_v63  ;;  %v1577_v20 = vmul.f32 0.015625, %v7380_v25  ;;  %v9233_v17 = vld [vmem:[#allocation81_spill] sm:$0xff]  ;;  %v9238_v63 = vld [vmem:[#allocation156_spill] sm:$0xff] }
 0x306   :  { %3280 = vst.msk [vmem:[%s8386_s2 + $0x60] sm:$0xff] %vm3267_vm3, %v1574_v11  ;;  %v1578_v54 = vmul.f32 0.015625, %v9226_v53  ;;  %3155 = vadd.xlane.f32.xlu0 %v3154_v26  ;;  %v2562_v46 = vrot.slane %v2561_v47, 1  ;;  %3281 = vst.msk [vmem:[%s8386_s2 + $0x68] sm:$0xff] %vm3267_vm3, %v1575_v40  ;;  %v1579_v52 = vmul.f32 0.015625, %v9227_v49  ;;  %v1580_v27 = vmul.f32 0.015625, %v9228_v55 }
 0x307   :  { %3282 = vst.msk [vmem:[%s8386_s2 + $0x70] sm:$0xff] %vm3267_vm3, %v1576_v7  ;;  %v1581_v25 = vmul.f32 0.015625, %v9229_v15  ;;  %v3151_v43 = vadd.f32 %v3150_v9, %v3149_v23  ;;  %3283 = vst.msk [vmem:[%s8386_s2 + $0x78] sm:$0xff] %vm3267_vm3, %v1577_v20  ;;  %v1582_v60 = vmul.f32 0.015625, %v9230_v6  ;;  %v1583_v51 = vmul.f32 0.015625, %v9231_v24  ;;  %v9239_v40 = vld [vmem:[#allocation30_spill] sm:$0xff] }
 0x308   :  { %3284 = vst.msk [vmem:[%s8386_s2 + $0x80] sm:$0xff] %vm3267_vm3, %v1578_v54  ;;  %v1584_v21 = vmul.f32 0.015625, %v7572_v44  ;;  %3285 = vst.msk [vmem:[%s8386_s2 + $0x88] sm:$0xff] %vm3267_vm3, %v1579_v52  ;;  %v1585_v14 = vmul.f32 0.015625, %v7574_v48  ;;  %v1586_v44 = vmul.f32 0.015625, %v7624_v29  ;;  %v1587_v58 = vmul.f32 0.015625, %v7626_v8 }
 0x309   :  { %3286 = vst.msk [vmem:[%s8386_s2 + $0x90] sm:$0xff] %vm3267_vm3, %v1580_v27  ;;  %3287 = vst.msk [vmem:[%s8386_s2 + $0x98] sm:$0xff] %vm3267_vm3, %v1581_v25  ;;  %v1588_v0 = vmul.f32 0.015625, %v7650_v34  ;;  %v3152_v41 = vrot.slane %v3151_v43, 1  ;;  %v1589_v48 = vmul.f32 0.015625, %v7652_v36  ;;  %v1590_v29 = vmul.f32 0.015625, %v1555_v31 }
 0x30a   :  { %3288 = vst.msk [vmem:[%s8386_s2 + $0xa0] sm:$0xff] %vm3267_vm3, %v1582_v60  ;;  %3289 = vst.msk [vmem:[%s8386_s2 + $0xa8] sm:$0xff] %vm3267_vm3, %v1583_v51  ;;  %v1591_v8 = vmul.f32 0.015625, %v1557_v28  ;;  %v1441_v34 = vadd.f32 %v7643_v30, %v7562_v13  ;;  %v2541_v32 = vrot.slane %v7694_v18, 1  ;;  %v1592_v13 = vmul.f32 0.015625, %v1559_v61  ;;  %v9240_v9 = vld [vmem:[#allocation110_spill] sm:$0xff] }
 0x30b   :  { %3290 = vst.msk [vmem:[%s8386_s2 + $0xb0] sm:$0xff] %vm3267_vm3, %v1584_v21  ;;  %3291 = vst.msk [vmem:[%s8386_s2 + $0xb8] sm:$0xff] %vm3267_vm3, %v1585_v14  ;;  %v1593_v30 = vmul.f32 0.015625, %v1561_v59  ;;  %3808 = vlog2.f32 %v7669_v1  ;;  %v900_v36 = vmax.f32 %v7680_v3, 1e-06  ;;  %v7782_v39 = vadd.f32 %v3152_v41, %v3151_v43  ;;  %v9237_v3 = vld [vmem:[#allocation2_spill] sm:$0xff] }
 0x30c   :  { %3292 = vst.msk [vmem:[%s8386_s2 + $0xc0] sm:$0xff] %vm3267_vm3, %v1586_v44  ;;  %3293 = vst.msk [vmem:[%s8386_s2 + $0xc8] sm:$0xff] %vm3267_vm3, %v1587_v58  ;;  %v2563_v57 = vadd.f32 %v2562_v46, %v2561_v47  ;;  %v3801_v33 = vpop.eup %3800  ;;  %v1341_v1 = vmul.f32 0.6931472, %v9232_v5  ;;  %v889_v45 = vmax.f32 %v9233_v17, 1e-06  ;;  %v826_v62 = vmul.f32 %v9234_v22, %v9234_v22 }
 0x30d   :  { %3294 = vst.msk [vmem:[%s8386_s2 + $0xd0] sm:$0xff] %vm3267_vm3, %v1588_v0  ;;  %3295 = vst.msk [vmem:[%s8386_s2 + $0xd8] sm:$0xff] %vm3267_vm3, %v1589_v48  ;;  %v1406_v31 = vmul.f32 %v7633_v10, %v9235_v50  ;;  %v3803_v28 = vpop.eup %3802  ;;  %v1426_v47 = vadd.f32 %v9237_v3, %v9236_v38  ;;  %v1363_v56 = vmul.f32 0.6931472, %v7594_v12  ;;  %3810 = vlog2.f32 %v7677_v42  ;;  %v9241_v12 = vld [vmem:[#allocation159_spill] sm:$0xff]  ;;  %v9242_v42 = vld [vmem:[#allocation160_spill] sm:$0xff] }
 0x30e   :  { %3296 = vst.msk [vmem:[%s8386_s2 + $0xe0] sm:$0xff] %vm3267_vm3, %v1590_v29  ;;  %3297 = vst.msk [vmem:[%s8386_s2 + $0xe8] sm:$0xff] %vm3267_vm3, %v1591_v8  ;;  %v3157_v10 = vsel %vm139_vm0, %v7782_v39, 0.0  ;;  %v1396_v11 = vmul.f32 %v1341_v1, %v9238_v63  ;;  %3812 = vlog2.f32 %v9239_v40  ;;  %v2542_v26 = vadd.f32 %v2541_v32, %v7694_v18  ;;  %v9243_v27 = vld [vmem:[#allocation76_spill] sm:$0xff]  ;;  %v9244_v6 = vld [vmem:[#allocation106_spill] sm:$0xff] }
 0x30f   :  { %3298 = vst.msk [vmem:[%s8386_s2 + $0xf0] sm:$0xff] %vm3267_vm3, %v1592_v13  ;;  %3299 = vst.msk [vmem:[%s8386_s2 + $0xf8] sm:$0xff] %vm3267_vm3, %v1593_v30  ;;  %v3805_v23 = vpop.eup %3804  ;;  %v1442_v7 = vadd.f32 %v1441_v34, %v1406_v31  ;;  %3158 = vadd.xlane.f32.xlu1 %v3157_v10  ;;  %v1407_v20 = vmul.f32 %v1363_v56, %v9240_v9  ;;  %v1316_v53 = vadd.f32 1.0, %v900_v36  ;;  %v2565_v54 = vmul.f32 0.0078125, %v2563_v57  ;;  %v9245_v24 = vld [vmem:[#allocation40_spill] sm:$0xff]  ;;  %v9247_v59 = vld [vmem:[#allocation79_spill] sm:$0xff] }
 0x310   :  { %v2933_v46 = vmul.f32 0.6931472, %v3805_v23  ;;  %v1045_v49 = vmul.f32 0.015625, %v9241_v12  ;;  %v1046_v52 = vmul.f32 0.015625, %v9242_v42  ;;  %v1305_v55 = vadd.f32 1.0, %v889_v45  ;;  %v9246_v18 = vld [vmem:[#allocation108_spill] sm:$0xff] }
 0x311   :  { %v858_v15 = vmul.f32 %v826_v62, %v9243_v27  ;;  %v1427_v43 = vadd.f32 %v1426_v47, %v1396_v11  ;;  %v1343_v60 = vmul.f32 0.6931472, %v9244_v6  ;;  %v1056_v51 = vmul.f32 0.015625, %v9245_v24  ;;  %v9248_v8 = vld [vmem:[#allocation120_spill] sm:$0xff]  ;;  %v9249_v13 = vld [vmem:[#allocation161_spill] sm:$0xff]  ;;  %v9253_v62 = vld [vmem:[#allocation122_spill] sm:$0xff] }
 0x312   :  { %v3807_v25 = vpop.eup %3806  ;;  %v2935_v21 = vmul.f32 %v2933_v46, %v2565_v54  ;;  %v827_v61 = vmul.f32 %v9246_v18, %v9246_v18  ;;  %v1057_v14 = vmul.f32 0.015625, %v9247_v59  ;;  %v2564_v44 = vmul.f32 0.0078125, %v2542_v26  ;;  %v9250_v5 = vld [vmem:[#allocation121_spill] sm:$0xff]  ;;  %v9251_v17 = vld [vmem:[#allocation164_spill] sm:$0xff]  ;;  %v9255_v10 = vld [vmem:[#allocation123_spill] sm:$0xff] }
 0x313   :  { %v2931_v58 = vmul.f32 0.6931472, %v3807_v25  ;;  %v1443_v0 = vadd.f32 %v1442_v7, %v1407_v20  ;;  %v1365_v41 = vmul.f32 0.6931472, %v3801_v33  ;;  %3814 = vlog2.f32 %v1316_v53  ;;  %v9252_v33 = vld [vmem:[#allocation83_spill] sm:$0xff]  ;;  %v9254_v38 = vld [vmem:[#allocation109_spill] sm:$0xff] }
 0x314   :  { %v2939_v48 = vsel %vm139_vm0, %v2935_v21, 0.0  ;;  %v1397_v29 = vmul.f32 %v1343_v60, %v1045_v49  ;;  %3816 = vlog2.f32 %v1305_v55  ;;  %v837_v34 = vmul.f32 %v9248_v8, %v9248_v8  ;;  %v9256_v40 = vld [vmem:[#allocation43_spill] sm:$0xff]  ;;  %v9257_v26 = vld [vmem:[#allocation101_spill] sm:$0xff]  ;;  %v9261_v49 = vld [vmem:[#allocation44_spill] sm:$0xff]  ;;  %v7850_v55 = vpop.xlane.xlu1 %2398 }
 0x315   :  { %2940 = vadd.xlane.f32.xlu1 %v2939_v48  ;;  %v2934_v32 = vmul.f32 %v2931_v58, %v2564_v44  ;;  %v1047_v30 = vmul.f32 0.015625, %v9249_v13  ;;  %v1408_v36 = vmul.f32 %v1365_v41, %v1056_v51  ;;  %v1367_v57 = vmul.f32 0.6931472, %v3803_v28  ;;  %v9258_v9 = vld [vmem:[#allocation31_spill] sm:$0xff]  ;;  %v9259_v53 = vld [vmem:[#allocation165_spill] sm:$0xff]  ;;  %v9263_v6 = vld [vmem:[#allocation14_spill] sm:$0xff] }
 0x316   :  { %v838_v1 = vmul.f32 %v9250_v5, %v9250_v5  ;;  %v1048_v45 = vmul.f32 0.015625, %v9251_v17  ;;  %v859_v22 = vmul.f32 %v827_v61, %v9252_v33  ;;  %v839_v50 = vmul.f32 %v9253_v62, %v9253_v62  ;;  %v9260_v46 = vld [vmem:[#allocation13_spill] sm:$0xff]  ;;  %v9262_v25 = vld [vmem:[#allocation111_spill] sm:$0xff]  ;;  %v9265_v61 = vld [vmem:[#allocation50_spill] sm:$0xff] }
 0x317   :  { %v2936_v31 = vsel %vm139_vm0, %v2934_v32, 0.0  ;;  %v1345_v3 = vmul.f32 0.6931472, %v9254_v38  ;;  %v1444_v47 = vadd.f32 %v1443_v0, %v1408_v36  ;;  %v1409_v56 = vmul.f32 %v1367_v57, %v1057_v14  ;;  %v9264_v24 = vld [vmem:[#allocation49_spill] sm:$0xff]  ;;  %v9266_v14 = vld [vmem:[#allocation151_spill] sm:$0xff]  ;;  %v9267_v48 = vld [vmem:[#allocation168_spill] sm:$0xff] }
 0x318   :  { %v840_v23 = vmul.f32 %v9255_v10, %v9255_v10  ;;  %2937 = vadd.xlane.f32.xlu0 %v2936_v31  ;;  %v3809_v28 = vpop.eup %3808  ;;  %v1428_v63 = vadd.f32 %v1427_v43, %v1397_v29  ;;  %v890_v11 = vmax.f32 %v858_v15, 1e-06  ;;  %v869_v7 = vmul.f32 %v837_v34, %v9256_v40  ;;  %v9268_v32 = vld [vmem:[#allocation126_spill] sm:$0xff]  ;;  %v9269_v5 = vld [vmem:[#allocation128_spill] sm:$0xff]  ;;  %v9270_v17 = vld [vmem:[#allocation141_spill] sm:$0xff]  ;;  %v7865_v31 = vpop.xlane.xlu1 %2404 }
 0x319   :  { %2984 = vadd.xlane.f32.xlu1 %v9257_v26  ;;  %3818 = vrsqrt.f32 %v9258_v9  ;;  %v1398_v20 = vmul.f32 %v1345_v3, %v1046_v52  ;;  %v7846_v54 = vmul.f32 0.015625, %v9259_v53  ;;  %v1058_v12 = vmul.f32 0.015625, %v9260_v46  ;;  %v9275_v40 = vld [vmem:[#allocation42_spill] sm:$0xff] }
 0x31a   :  { %v870_v42 = vmul.f32 %v838_v1, %v9261_v49  ;;  %v3811_v27 = vpop.eup %3810  ;;  %v1347_v43 = vmul.f32 0.6931472, %v9262_v25  ;;  %v891_v15 = vmax.f32 %v859_v22, 1e-06  ;;  %v1059_v60 = vmul.f32 0.015625, %v9263_v6  ;;  %v9277_v46 = vld [vmem:[#allocation170_spill] sm:$0xff] }
 0x31b   :  { %v871_v51 = vmul.f32 %v839_v50, %v9264_v24  ;;  %v3813_v21 = vpop.eup %3812  ;;  %v1445_v18 = vadd.f32 %v1444_v47, %v1409_v56  ;;  %v1369_v52 = vmul.f32 0.6931472, %v3809_v28  ;;  %v872_v59 = vmul.f32 %v840_v23, %v9265_v61  ;;  %v9271_v50 = vld [vmem:[#allocation153_spill] sm:$0xff]  ;;  %v9274_v28 = vld [vmem:[#allocation74_spill] sm:$0xff] }
 0x31c   :  { %2952 = vadd.xlane.f32.xlu0 %v9266_v14  ;;  %3820 = vrsqrt.f32 %v7622_v16  ;;  %v1429_v44 = vadd.f32 %v1428_v63, %v1398_v20  ;;  %v1399_v58 = vmul.f32 %v1347_v43, %v1047_v30  ;;  %v1306_v0 = vadd.f32 1.0, %v890_v11  ;;  %v9272_v56 = vld [vmem:[#allocation169_spill] sm:$0xff]  ;;  %v7871_v63 = vpop.xlane.xlu0 %2395  ;;  %v9276_v20 = vld [vmem:[#allocation52_spill] sm:$0xff]  ;;  %v9281_v24 = vld [vmem:[#allocation62_spill] sm:$0xff] }
 0x31d   :  { %v901_v41 = vmax.f32 %v869_v7, 1e-06  ;;  %2956 = vadd.xlane.f32.xlu1 %v9267_v48  ;;  %v1410_v29 = vmul.f32 %v1369_v52, %v1058_v12  ;;  %v1371_v8 = vmul.f32 0.6931472, %v3811_v27  ;;  %v902_v34 = vmax.f32 %v870_v42, 1e-06 }
 0x31e   :  { %v841_v13 = vmul.f32 %v9268_v32, %v9268_v32  ;;  %v1349_v36 = vmul.f32 0.6931472, %v3813_v21  ;;  %v903_v57 = vmax.f32 %v871_v51, 1e-06  ;;  %v842_v1 = vmul.f32 %v9269_v5, %v9269_v5  ;;  %v9282_v21 = vld [vmem:[#allocation16_spill] sm:$0xff] }
 0x31f   :  { %3822 = vrsqrt.f32 %v9270_v17  ;;  %v1307_v33 = vadd.f32 1.0, %v891_v15  ;;  %v1446_v22 = vadd.f32 %v1445_v18, %v1410_v29  ;;  %v1411_v30 = vmul.f32 %v1371_v8, %v1059_v60  ;;  %v9280_v15 = vld [vmem:[#allocation171_spill] sm:$0xff] }
 0x320   :  { %v904_v62 = vmax.f32 %v872_v59, 1e-06  ;;  %2954 = vadd.xlane.f32.xlu0 %v9271_v50  ;;  %v3815_v38 = vpop.eup %3814  ;;  %v1430_v3 = vadd.f32 %v1429_v44, %v1399_v58  ;;  %v1400_v47 = vmul.f32 %v1349_v36, %v1048_v45  ;;  %v7868_v10 = vmul.f32 0.015625, %v9272_v56  ;;  %v9279_v45 = vld [vmem:[#allocation53_spill] sm:$0xff]  ;;  %v7891_v44 = vpop.xlane.xlu1 %2410  ;;  %v9286_v36 = vld [vmem:[#allocation47_spill] sm:$0xff] }
 0x321   :  { %v1317_v23 = vadd.f32 1.0, %v901_v41  ;;  %2960 = vadd.xlane.f32.xlu1 %v9274_v28  ;;  %v3817_v11 = vpop.eup %3816  ;;  %3824 = vlog2.f32 %v1306_v0  ;;  %v1060_v7 = vmul.f32 0.015625, %v9275_v40  ;;  %v1318_v26 = vadd.f32 1.0, %v902_v34  ;;  %v9283_v59 = vld [vmem:[#allocation129_spill] sm:$0xff]  ;;  %v7896_v48 = vpop.xlane.xlu0 %2401  ;;  %v9285_v34 = vld [vmem:[#allocation84_spill] sm:$0xff] }
 0x322   :  { %9273 = vst [vmem:[#allocation18_spill] sm:$0xff] %v7868_v10  ;;  %v873_v53 = vmul.f32 %v841_v13, %v9276_v20  ;;  %v7876_v12 = vmul.f32 0.015625, %v9277_v46  ;;  %v1319_v49 = vadd.f32 1.0, %v903_v57  ;;  %v874_v42 = vmul.f32 %v842_v1, %v9279_v45  ;;  %v9284_v58 = vld [vmem:[#allocation65_spill] sm:$0xff]  ;;  %v9288_v1 = vld [vmem:[#allocation134_spill] sm:$0xff] }
 0x323   :  { %3826 = vrsqrt.f32 %v7607_v37  ;;  %v1447_v27 = vadd.f32 %v1446_v22, %v1411_v30  ;;  %v1373_v25 = vmul.f32 0.6931472, %v3815_v38  ;;  %v1320_v43 = vadd.f32 1.0, %v904_v62  ;;  %v9287_v57 = vld [vmem:[#allocation133_spill] sm:$0xff]  ;;  %v9289_v62 = vld [vmem:[#allocation56_spill] sm:$0xff]  ;;  %v9294_v46 = vld [vmem:[#allocation54_spill] sm:$0xff] }
 0x324   :  { %9278 = vst [vmem:[#allocation3_spill] sm:$0xff] %v7876_v12  ;;  %3828 = vlog2.f32 %v1307_v33  ;;  %2958 = vadd.xlane.f32.xlu0 %v9280_v15  ;;  %v7881_v6 = vadd.f32 %v1430_v3, %v1400_v47  ;;  %v7883_v60 = vmul.f32 0.6931472, %v3817_v11  ;;  %v7886_v51 = vmul.f32 0.015625, %v9281_v24  ;;  %v9290_v11 = vld [vmem:[#allocation45_spill] sm:$0xff]  ;;  %v7927_v20 = vpop.xlane.xlu1 %1486 }
 0x325   :  { %3830 = vlog2.f32 %v1317_v23  ;;  %2964 = vadd.xlane.f32.xlu1 %v9282_v21  ;;  %v1412_v52 = vmul.f32 %v1373_v25, %v1060_v7  ;;  %v905_v61 = vmax.f32 %v873_v53, 1e-06  ;;  %v843_v14 = vmul.f32 %v9283_v59, %v9283_v59  ;;  %v9292_v7 = vld [vmem:[#allocation140_spill] sm:$0xff]  ;;  %9293 = vst [vmem:[#allocation19_spill] sm:$0xff] %v7927_v20  ;;  %v7934_v25 = vpop.xlane.xlu0 %2407 }
 0x326   :  { %v3819_v18 = vpop.eup %3818  ;;  %3832 = vlog2.f32 %v1318_v26  ;;  %v7894_v0 = vmul.f32 0.015625, %v9284_v58  ;;  %v906_v41 = vmax.f32 %v874_v42, 1e-06  ;;  %vm3179_vm3 = vcmp.eq.f32.partialorder %v9258_v9, inf  ;;  %v9296_v42 = vld [vmem:[#allocation116_spill] sm:$0xff]  ;;  %v9298_v58 = vld [vmem:[#allocation69_spill] sm:$0xff] }
 0x327   :  { %3834 = vlog2.f32 %v1319_v49  ;;  %v3178_v29 = vmul.f32 %v3819_v18, %v9258_v9  ;;  %v7899_v8 = vadd.f32 %v1447_v27, %v1412_v52  ;;  %v3182_v32 = vand.u32 2147483648, %v9258_v9  ;;  %v9295_v49 = vld [vmem:[#allocation117_spill] sm:$0xff] }
 0x328   :  { %3836 = vlog2.f32 %v1320_v43  ;;  %2962 = vadd.xlane.f32.xlu0 %v9285_v34  ;;  %v2266_v5 = vmul.f32 %v9287_v57, %v9287_v57  ;;  %v2267_v33 = vmul.f32 %v9288_v1, %v9288_v1  ;;  %vm3181_vm14 = vcmp.eq.f32.partialorder %v9258_v9, 0.0  ;;  %v9300_v34 = vld [vmem:[#allocation125_spill] sm:$0xff]  ;;  %v9302_v57 = vld [vmem:[#allocation75_spill] sm:$0xff] }
 0x329   :  { %v3821_v13 = vpop.eup %3820  ;;  %2968 = vadd.xlane.f32.xlu1 %v9286_v36  ;;  %v3180_v22 = vsel %vm3179_vm3, %v9258_v9, %v3178_v29  ;;  %v7911_v30 = vadd.f32 1.0, %v905_v61  ;;  %v875_v50 = vmul.f32 %v843_v14, %v9289_v62  ;;  %v7917_v47 = vadd.f32 1.0, %v906_v41  ;;  %v9291_v9 = vld [vmem:[#allocation24_spill] sm:$0xff]  ;;  %v9297_v61 = vld [vmem:[#allocation150_spill] sm:$0xff] }
 0x32a   :  { %v7914_v38 = vsel %vm3181_vm14, %v3182_v32, %v3180_v22  ;;  %v3192_v3 = vmul.f32 %v3821_v13, %v7622_v16  ;;  %vm3193_vm15 = vcmp.eq.f32.partialorder %v7622_v16, inf  ;;  %v3196_v56 = vand.u32 2147483648, %v7622_v16  ;;  %v9299_v41 = vld [vmem:[#allocation124_spill] sm:$0xff]  ;;  %v9304_v22 = vld [vmem:[#allocation149_spill] sm:$0xff] }
 0x32b   :  { %v3199_v23 = vmax.f32 %v7914_v38, 1e-12  ;;  %v2268_v40 = vmul.f32 %v9291_v9, %v9291_v9  ;;  %v2269_v26 = vmul.f32 %v9292_v7, %v9292_v7  ;;  %vm3195_vm1 = vcmp.eq.f32.partialorder %v7622_v16, 0.0  ;;  %v7966_v9 = vpop.xlane.xlu0 %1483  ;;  %v9306_v7 = vld [vmem:[#allocation136_spill] sm:$0xff] }
 0x32c   :  { %v3823_v28 = vpop.eup %3822  ;;  %2966 = vadd.xlane.f32.xlu0 %v9290_v11  ;;  %v3194_v53 = vsel %vm3193_vm15, %v7622_v16, %v3192_v3  ;;  %v2298_v45 = vmul.f32 %v2266_v5, %v9295_v49  ;;  %v2299_v27 = vmul.f32 %v2267_v33, %v9296_v42  ;;  %vm3172_vm2 = vcmp.eq.f32.partialorder %v9270_v17, inf  ;;  %v9303_v5 = vld [vmem:[#allocation142_spill] sm:$0xff]  ;;  %9305 = vst [vmem:[#allocation60_spill] sm:$0xff] %v7966_v9  ;;  %v9308_v42 = vld [vmem:[#allocation89_spill] sm:$0xff]  ;;  %v9345_v9 = vld [vmem:[#allocation95_spill] sm:$0xff] }
 0x32d   :  { %2972 = vadd.xlane.f32.xlu1 %v9294_v46  ;;  %v7936_v43 = vsel %vm3195_vm1, %v3196_v56, %v3194_v53  ;;  %v3171_v15 = vmul.f32 %v3823_v28, %v9270_v17  ;;  %3838 = vrcp.f32 %v3199_v23  ;;  %v3175_v21 = vand.u32 2147483648, %v9270_v17  ;;  %v7962_v23 = vpop.xlane.xlu1 %2416  ;;  %v9307_v53 = vld [vmem:[#allocation163_spill] sm:$0xff] }
 0x32e   :  { %v3205_v24 = vmax.f32 %v7936_v43, 1e-12  ;;  %v7942_v16 = vpop.eup %3824  ;;  %v907_v18 = vmax.f32 %v875_v50, 1e-06  ;;  %vm3174_vm4 = vcmp.eq.f32.partialorder %v9270_v17, 0.0  ;;  %v2283_v59 = vmul.f32 %v9297_v61, %v9297_v61  ;;  %v9310_v61 = vld [vmem:[#allocation131_spill] sm:$0xff] }
 0x32f   :  { %v3173_v52 = vsel %vm3172_vm2, %v9270_v17, %v3171_v15  ;;  %v2300_v29 = vmul.f32 %v2268_v40, %v9299_v41  ;;  %v2301_v32 = vmul.f32 %v2269_v26, %v9300_v34  ;;  %v2270_v17 = vmul.f32 %v9303_v5, %v9303_v5  ;;  %v9313_v5 = vld [vmem:[#allocation37_spill] sm:$0xff] }
 0x330   :  { %v3827_v14 = vpop.eup %3826  ;;  %2970 = vadd.xlane.f32.xlu0 %v9298_v58  ;;  %3840 = vrcp.f32 %v3205_v24  ;;  %v7951_v13 = vsel %vm3174_vm4, %v3175_v21, %v3173_v52  ;;  %v2282_v62 = vmul.f32 %v9304_v22, %v9304_v22  ;;  %v2330_v3 = vmax.f32 %v2298_v45, 1e-06  ;;  %v9309_v52 = vld [vmem:[#allocation96_spill] sm:$0xff] }
 0x331   :  { %v7953_v36 = vpop.eup %3828  ;;  %2976 = vadd.xlane.f32.xlu1 %v9302_v57  ;;  %v3185_v1 = vmul.f32 %v3827_v14, %v7607_v37  ;;  %v3198_v33 = vmax.f32 %v7951_v13, 1e-12  ;;  %v2331_v56 = vmax.f32 %v2299_v27, 1e-06  ;;  %vm3186_vm5 = vcmp.eq.f32.partialorder %v7607_v37, inf  ;;  %v9311_v14 = vld [vmem:[#allocation137_spill] sm:$0xff] }
 0x332   :  { %9301 = vst [vmem:[#allocation115_spill] sm:$0xff] %v7953_v36  ;;  %v3831_v50 = vpop.eup %3830  ;;  %v3189_v28 = vand.u32 2147483648, %v7607_v37  ;;  %vm3188_vm6 = vcmp.eq.f32.partialorder %v7607_v37, 0.0  ;;  %v2315_v26 = vmul.f32 %v2283_v59, %v9306_v7  ;;  %v2284_v46 = vmul.f32 %v9307_v53, %v9307_v53 }
 0x333   :  { %v3833_v11 = vpop.eup %3832  ;;  %v3187_v40 = vsel %vm3186_vm5, %v7607_v37, %v3185_v1  ;;  %v1323_v45 = vadd.f32 1.0, %v907_v18  ;;  %v2332_v27 = vmax.f32 %v2300_v29, 1e-06  ;;  %v2333_v15 = vmax.f32 %v2301_v32, 1e-06  ;;  %v9312_v32 = vld [vmem:[#allocation138_spill] sm:$0xff] }
 0x334   :  { %v7973_v49 = vpop.eup %3834  ;;  %2974 = vadd.xlane.f32.xlu0 %v9308_v42  ;;  %v7976_v24 = vsel %vm3188_vm6, %v3189_v28, %v3187_v40  ;;  %v2302_v37 = vmul.f32 %v2270_v17, %v9310_v61  ;;  %3842 = vrcp.f32 %v3198_v33  ;;  %v2314_v58 = vmul.f32 %v2282_v62, %v9311_v14  ;;  %v9314_v17 = vld [vmem:[#allocation32_spill] sm:$0xff]  ;;  %v9315_v62 = vld [vmem:[#allocation33_spill] sm:$0xff]  ;;  %v7996_v40 = vpop.xlane.xlu0 %2413  ;;  %v9320_v61 = vld [vmem:[#allocation35_spill] sm:$0xff] }
 0x335   :  { %v7978_v21 = vpop.eup %3836  ;;  %2980 = vadd.xlane.f32.xlu1 %v9309_v52  ;;  %v3204_v59 = vmax.f32 %v7976_v24, 1e-12  ;;  %v1375_v41 = vmul.f32 0.6931472, %v3831_v50  ;;  %3844 = vlog2.f32 %v7911_v30  ;;  %v2746_v18 = vadd.f32 1.0, %v2330_v3  ;;  %v7993_v30 = vpop.xlane.xlu1 %2422  ;;  %v9316_v3 = vld [vmem:[#allocation72_spill] sm:$0xff] }
 0x336   :  { %v2747_v34 = vadd.f32 1.0, %v2331_v56  ;;  %v2347_v29 = vmax.f32 %v2315_v26, 1e-06  ;;  %v2316_v57 = vmul.f32 %v2284_v46, %v9312_v32  ;;  %v2285_v1 = vmul.f32 %v9313_v5, %v9313_v5  ;;  %v9317_v26 = vld [vmem:[#allocation15_spill] sm:$0xff]  ;;  %v9319_v46 = vld [vmem:[#allocation41_spill] sm:$0xff] }
 0x337   :  { %3846 = vrcp.f32 %v3204_v59  ;;  %v1413_v22 = vmul.f32 %v1375_v41, %v7886_v51  ;;  %v2748_v33 = vadd.f32 1.0, %v2332_v27  ;;  %v2271_v50 = vmul.f32 %v9315_v62, %v9315_v62  ;;  %v9321_v14 = vld [vmem:[#allocation17_spill] sm:$0xff] }
 0x338   :  { %3848 = vlog2.f32 %v7917_v47  ;;  %2978 = vadd.xlane.f32.xlu0 %v9314_v17  ;;  %v2749_v56 = vadd.f32 1.0, %v2333_v15  ;;  %v2334_v28 = vmax.f32 %v2302_v37, 1e-06  ;;  %v2346_v7 = vmax.f32 %v2314_v58, 1e-06  ;;  %v9318_v47 = vld [vmem:[#allocation67_spill] sm:$0xff]  ;;  %v8020_v62 = vpop.xlane.xlu0 %2419 }
 0x339   :  { %3850 = vlog2.f32 %v1323_v45  ;;  %2986 = vadd.xlane.f32.xlu1 %v9316_v3  ;;  %v7999_v51 = vmul.f32 0.015625, %v9317_v26  ;;  %v8002_v53 = vmul.f32 0.015625, %v9318_v47  ;;  %v2286_v42 = vmul.f32 %v9319_v46, %v9319_v46  ;;  %v9322_v58 = vld [vmem:[#allocation132_spill] sm:$0xff]  ;;  %v9324_v17 = vld [vmem:[#allocation130_spill] sm:$0xff]  ;;  %v9327_v26 = vld [vmem:[#allocation105_spill] sm:$0xff] }
 0x33a   :  { %3852 = vlog2.f32 %v2747_v34  ;;  %v3839_v27 = vpop.eup %3838  ;;  %v2763_v45 = vadd.f32 1.0, %v2347_v29  ;;  %v2348_v52 = vmax.f32 %v2316_v57, 1e-06  ;;  %v2317_v15 = vmul.f32 %v2285_v1, %v9320_v61  ;;  %v9323_v34 = vld [vmem:[#allocation26_spill] sm:$0xff] }
 0x33b   :  { %3854 = vlog2.f32 %v2746_v18  ;;  %v8008_v37 = vadd.f32 %v7899_v8, %v1413_v22  ;;  %v1377_v59 = vmul.f32 0.6931472, %v3833_v11  ;;  %v2303_v41 = vmul.f32 %v2271_v50, %v9322_v58  ;;  %v8017_v11 = vpop.xlane.xlu1 %2443  ;;  %v9325_v22 = vld [vmem:[#allocation80_spill] sm:$0xff]  ;;  %v9331_v61 = vld [vmem:[#allocation38_spill] sm:$0xff] }
 0x33c   :  { %2982 = vadd.xlane.f32.xlu0 %v9321_v14  ;;  %3856 = vlog2.f32 %v2748_v33  ;;  %v2750_v5 = vadd.f32 1.0, %v2334_v28  ;;  %v2272_v18 = vmul.f32 %v9324_v17, %v9324_v17  ;;  %v2762_v29 = vadd.f32 1.0, %v2346_v7  ;;  %v9332_v17 = vld [vmem:[#allocation127_spill] sm:$0xff] }
 0x33d   :  { %v3841_v32 = vpop.eup %3840  ;;  %2990 = vadd.xlane.f32.xlu1 %v9323_v34  ;;  %3858 = vlog2.f32 %v2749_v56  ;;  %v3215_v1 = vmul.f32 %v3839_v27, %v7914_v38  ;;  %v2318_v33 = vmul.f32 %v2286_v42, %v9325_v22  ;;  %v2764_v50 = vadd.f32 1.0, %v2348_v52  ;;  %v9326_v56 = vld [vmem:[#allocation11_spill] sm:$0xff] }
 0x33e   :  { %v3211_v57 = vmul.f32 %v3841_v32, %v3839_v27  ;;  %v3217_v8 = vmul.f32 %v3841_v32, %v7936_v43  ;;  %3860 = vlog2.f32 %v2763_v45  ;;  %v2349_v3 = vmax.f32 %v2317_v15, 1e-06  ;;  %v9328_v43 = vld [vmem:[#allocation61_spill] sm:$0xff] }
 0x33f   :  { %v2287_v28 = vmul.f32 %v9326_v56, %v9326_v56  ;;  %v2335_v7 = vmax.f32 %v2303_v41, 1e-06  ;;  %v2273_v46 = vmul.f32 %v9328_v43, %v9328_v43  ;;  %v8031_v42 = vmul.f32 %v1377_v59, %v7894_v0  ;;  %v9329_v27 = vld [vmem:[#allocation77_spill] sm:$0xff]  ;;  %v8045_v59 = vpop.xlane.xlu0 %2425  ;;  %v9336_v56 = vld [vmem:[#allocation28_spill] sm:$0xff] }
 0x340   :  { %2988 = vadd.xlane.f32.xlu0 %v9327_v26  ;;  %v8026_v47 = vmul.f32 %v3211_v57, %v7782_v39  ;;  %v3219_v38 = vmul.f32 %v3217_v8, %v3215_v1  ;;  %v9330_v45 = vld [vmem:[#allocation25_spill] sm:$0xff]  ;;  %3862 = vlog2.f32 %v2762_v29  ;;  %v2288_v15 = vmul.f32 %v9331_v61, %v9331_v61  ;;  %v9333_v57 = vld [vmem:[#allocation70_spill] sm:$0xff]  ;;  %v9337_v26 = vld [vmem:[#allocation144_spill] sm:$0xff] }
 0x341   :  { %2994 = vadd.xlane.f32.xlu1 %v9329_v27  ;;  %v2304_v52 = vmul.f32 %v2272_v18, %v9330_v45  ;;  %v8037_v14 = vpop.eup %3842  ;;  %v8040_v39 = vmul.f32 0.6931472, %v7973_v49  ;;  %3864 = vlog2.f32 %v2750_v5  ;;  %v2350_v41 = vmax.f32 %v2318_v33, 1e-06  ;;  %v9334_v49 = vld [vmem:[#allocation135_spill] sm:$0xff]  ;;  %v9335_v8 = vld [vmem:[#allocation146_spill] sm:$0xff]  ;;  %v8054_v33 = vpop.xlane.xlu1 %2449 }
 0x342   :  { %v3221_v58 = vmax.f32 %v3219_v38, 1e-08  ;;  %v8042_v32 = vpop.eup %3844  ;;  %v2490_v0 = vmul.f32 0.015625, %v7871_v63  ;;  %3866 = vlog2.f32 %v2764_v50  ;;  %v2765_v34 = vadd.f32 1.0, %v2349_v3 }
 0x343   :  { %v2319_v18 = vmul.f32 %v2287_v28, %v9332_v17  ;;  %v2751_v1 = vadd.f32 1.0, %v2335_v7  ;;  %v2305_v5 = vmul.f32 %v2273_v46, %v9334_v49  ;;  %v2274_v22 = vmul.f32 %v9335_v8, %v9335_v8  ;;  %v9341_v8 = vld [vmem:[#allocation107_spill] sm:$0xff] }
 0x344   :  { %v8048_v29 = vpop.eup %3846  ;;  %2992 = vadd.xlane.f32.xlu0 %v9333_v57  ;;  %3868 = vrcp.f32 %v3221_v58  ;;  %v2336_v50 = vmax.f32 %v2304_v52, 1e-06  ;;  %v3214_v3 = vmul.f32 %v8037_v14, %v7951_v13  ;;  %v2320_v7 = vmul.f32 %v2288_v15, %v9337_v26  ;;  %v9338_v13 = vld [vmem:[#allocation58_spill] sm:$0xff]  ;;  %v9339_v57 = vld [vmem:[#allocation73_spill] sm:$0xff] }
 0x345   :  { %v8056_v63 = vpop.eup %3848  ;;  %2998 = vadd.xlane.f32.xlu1 %v9336_v56  ;;  %v3216_v28 = vmul.f32 %v8048_v29, %v7976_v24  ;;  %v2491_v43 = vmul.f32 0.015625, %v7850_v55  ;;  %v2492_v46 = vmul.f32 0.015625, %v7896_v48  ;;  %v8069_v27 = vmul.f32 0.015625, %v7865_v31  ;;  %v9340_v31 = vld [vmem:[#allocation29_spill] sm:$0xff]  ;;  %v2447_v56 = vpop.xlane.xlu0 %2446 }
 0x346   :  { %v8064_v38 = vpop.eup %3850  ;;  %v2766_v45 = vadd.f32 1.0, %v2350_v41  ;;  %3870 = vlog2.f32 %v2765_v34  ;;  %v2351_v58 = vmax.f32 %v2319_v18, 1e-06  ;;  %v2289_v17 = vmul.f32 %v9338_v13, %v9338_v13 }
 0x347   :  { %v3853_v61 = vpop.eup %3852  ;;  %v3218_v52 = vmul.f32 %v3216_v28, %v3214_v3  ;;  %v8075_v15 = vmul.f32 0.015625, %v7934_v25  ;;  %v8078_v55 = vmul.f32 0.015625, %v7891_v44  ;;  %v2337_v48 = vmax.f32 %v2305_v5, 1e-06  ;;  %v8085_v25 = vpop.xlane.xlu1 %2455  ;;  %v9342_v44 = vld [vmem:[#allocation39_spill] sm:$0xff] }
 0x348   :  { %v3855_v24 = vpop.eup %3854  ;;  %2996 = vadd.xlane.f32.xlu0 %v9339_v57  ;;  %v2306_v49 = vmul.f32 %v2274_v22, %v9340_v31  ;;  %3872 = vlog2.f32 %v2751_v1  ;;  %v2752_v34 = vadd.f32 1.0, %v2336_v50  ;;  %v2352_v3 = vmax.f32 %v2320_v7, 1e-06  ;;  %v9343_v31 = vld [vmem:[#allocation145_spill] sm:$0xff] }
 0x349   :  { %v3857_v41 = vpop.eup %3856  ;;  %3002 = vadd.xlane.f32.xlu1 %v9341_v8  ;;  %v3220_v18 = vmax.f32 %v3218_v52, 1e-08  ;;  %v2781_v26 = vmul.f32 0.6931472, %v3853_v61  ;;  %v8083_v13 = vmul.f32 0.015625, %v7996_v40  ;;  %3874 = vlog2.f32 %v2766_v45  ;;  %v9344_v8 = vld [vmem:[#allocation152_spill] sm:$0xff] }
 0x34a   :  { %v3859_v28 = vpop.eup %3858  ;;  %v2290_v5 = vmul.f32 %v9342_v44, %v9342_v44  ;;  %v2779_v22 = vmul.f32 0.6931472, %v3855_v24  ;;  %v2767_v57 = vadd.f32 1.0, %v2351_v58  ;;  %v2321_v1 = vmul.f32 %v2289_v17, %v9343_v31  ;;  %v9347_v31 = vld [vmem:[#allocation88_spill] sm:$0xff] }
 0x34b   :  { %3876 = vrcp.f32 %v3220_v18  ;;  %v3861_v50 = vpop.eup %3860  ;;  %v2843_v52 = vmul.f32 %v2781_v26, %v2491_v43  ;;  %v2753_v7 = vadd.f32 1.0, %v2337_v48  ;;  %v8092_v61 = vmul.f32 0.015625, %v7962_v23 }
 0x34c   :  { %3000 = vadd.xlane.f32.xlu0 %v9344_v8  ;;  %v2338_v40 = vmax.f32 %v2306_v49, 1e-06  ;;  %v2842_v45 = vmul.f32 %v2779_v22, %v2490_v0  ;;  %3878 = vlog2.f32 %v2752_v34  ;;  %v2507_v20 = vmul.f32 0.015625, %v2447_v56  ;;  %v2453_v8 = vpop.xlane.xlu0 %2452  ;;  %v9348_v56 = vld [vmem:[#allocation91_spill] sm:$0xff] }
 0x34d   :  { %3006 = vadd.xlane.f32.xlu1 %v9345_v9  ;;  %v2768_v44 = vadd.f32 1.0, %v2352_v3  ;;  %v3863_v24 = vpop.eup %3862  ;;  %v2783_v18 = vmul.f32 0.6931472, %v3857_v41  ;;  %v2785_v58 = vmul.f32 0.6931472, %v3859_v28  ;;  %v2322_v17 = vmul.f32 %v2290_v5, %v9346_v19  ;;  %v8100_v3 = vpop.xlane.xlu1 %2461  ;;  %v9349_v28 = vld [vmem:[#allocation114_spill] sm:$0xff] }
 0x34e   :  { %v2291_v43 = vmul.f32 %v9347_v31, %v9347_v31  ;;  %v3865_v26 = vpop.eup %3864  ;;  %v2506_v48 = vmul.f32 0.015625, %v8017_v11  ;;  %v2813_v23 = vmul.f32 0.6931472, %v3861_v50  ;;  %3880 = vlog2.f32 %v2767_v57  ;;  %v9350_v50 = vld [vmem:[#allocation64_spill] sm:$0xff] }
 0x34f   :  { %v2353_v0 = vmax.f32 %v2321_v1, 1e-06  ;;  %v3867_v49 = vpop.eup %3866  ;;  %v2874_v9 = vadd.f32 %v2843_v52, %v2842_v45  ;;  %v2844_v34 = vmul.f32 %v2783_v18, %v2492_v46  ;;  %3882 = vlog2.f32 %v2753_v7  ;;  %v9351_v46 = vld [vmem:[#allocation94_spill] sm:$0xff] }
 0x350   :  { %3004 = vadd.xlane.f32.xlu0 %v9348_v56  ;;  %v2754_v41 = vadd.f32 1.0, %v2338_v40  ;;  %v2811_v5 = vmul.f32 0.6931472, %v3863_v24  ;;  %v2859_v22 = vmul.f32 %v2813_v23, %v2507_v20  ;;  %v2508_v11 = vmul.f32 0.015625, %v8054_v33  ;;  %v9352_v33 = vld [vmem:[#allocation36_spill] sm:$0xff] }
 0x351   :  { %v3869_v19 = vpop.eup %3868  ;;  %3010 = vadd.xlane.f32.xlu1 %v9349_v28  ;;  %3884 = vlog2.f32 %v2768_v44  ;;  %v2354_v1 = vmax.f32 %v2322_v17, 1e-06  ;;  %v2323_v52 = vmul.f32 %v2291_v43, %v9350_v50  ;;  %v2292_v45 = vmul.f32 %v9351_v46, %v9351_v46  ;;  %v9357_v50 = vld [vmem:[#allocation158_spill] sm:$0xff] }
 0x352   :  { %v3225_v57 = vmul.f32 %v3869_v19, %v8026_v47  ;;  %v3210_v7 = vmul.f32 %v8048_v29, %v8037_v14  ;;  %v2858_v40 = vmul.f32 %v2811_v5, %v2506_v48  ;;  %v2815_v18 = vmul.f32 0.6931472, %v3867_v49  ;;  %v9353_v47 = vld [vmem:[#allocation66_spill] sm:$0xff]  ;;  %v2459_v14 = vpop.xlane.xlu0 %2458  ;;  %v9354_v48 = vld [vmem:[#allocation147_spill] sm:$0xff] }
 0x353   :  { %v2769_v31 = vadd.f32 1.0, %v2353_v0  ;;  %v3871_v56 = vpop.eup %3870  ;;  %v2875_v24 = vadd.f32 %v2874_v9, %v2844_v34  ;;  %v2845_v20 = vmul.f32 %v2785_v58, %v8069_v27  ;;  %3886 = vlog2.f32 %v2754_v41  ;;  %v8117_v9 = vpop.xlane.xlu1 %2467  ;;  %v9355_v58 = vld [vmem:[#allocation90_spill] sm:$0xff] }
 0x354   :  { %3008 = vadd.xlane.f32.xlu0 %v9352_v33  ;;  %v2275_v44 = vmul.f32 %v9353_v47, %v9353_v47  ;;  %v2787_v17 = vmul.f32 0.6931472, %v3865_v26  ;;  %v2895_v43 = vadd.f32 %v2859_v22, %v2858_v40  ;;  %v2860_v23 = vmul.f32 %v2815_v18, %v2508_v11 }
 0x355   :  { %3014 = vadd.xlane.f32.xlu1 %v7528_v35  ;;  %v2509_v19 = vmul.f32 0.015625, %v2453_v8  ;;  %v3873_v29 = vpop.eup %3872  ;;  %v2276_v0 = vmul.f32 %v9354_v48, %v9354_v48  ;;  %v2770_v49 = vadd.f32 1.0, %v2354_v1  ;;  %v2355_v27 = vmax.f32 %v2323_v52, 1e-06  ;;  %v9356_v35 = vld [vmem:[#allocation102_spill] sm:$0xff]  ;;  %v9358_v1 = vld [vmem:[#allocation139_spill] sm:$0xff] }
 0x356   :  { %v2324_v34 = vmul.f32 %v2292_v45, %v9355_v58  ;;  %v3875_v41 = vpop.eup %3874  ;;  %v3212_v28 = vmul.f32 %v3210_v7, %v7686_v4  ;;  %v2817_v26 = vmul.f32 0.6931472, %v3871_v56  ;;  %3888 = vlog2.f32 %v2769_v31  ;;  %v9359_v7 = vld [vmem:[#allocation71_spill] sm:$0xff]  ;;  %v2465_v47 = vpop.xlane.xlu0 %2464 }
 0x357   :  { %v2293_v5 = vmul.f32 %v9356_v35, %v9356_v35  ;;  %v8123_v22 = vadd.f32 %v2875_v24, %v2845_v20  ;;  %v3229_v11 = vsel %vm139_vm0, %v3225_v57, 0.0  ;;  %v2307_v46 = vmul.f32 %v2275_v44, %v9358_v1  ;;  %v9361_v48 = vld [vmem:[#allocation59_spill] sm:$0xff] }
 0x358   :  { %v3877_v8 = vpop.eup %3876  ;;  %3012 = vadd.xlane.f32.xlu0 %v9357_v50  ;;  %v2510_v52 = vmul.f32 0.015625, %v8085_v25  ;;  %v2896_v40 = vadd.f32 %v2895_v43, %v2860_v23  ;;  %v2861_v4 = vmul.f32 %v2817_v26, %v2509_v19  ;;  %v2294_v18 = vmul.f32 %v9359_v7, %v9359_v7  ;;  %v9360_v25 = vld [vmem:[#allocation148_spill] sm:$0xff]  ;;  %v9363_v26 = vld [vmem:[#allocation155_spill] sm:$0xff] }
 0x359   :  { %3230 = vadd.xlane.f32.xlu1 %v3229_v11  ;;  %v3223_v45 = vmul.f32 %v3877_v8, %v3212_v28  ;;  %v8131_v31 = vpop.eup %3878  ;;  %v8134_v56 = vmul.f32 %v2787_v17, %v8075_v15  ;;  %3890 = vlog2.f32 %v2770_v49  ;;  %v2771_v57 = vadd.f32 1.0, %v2355_v27  ;;  %v8142_v15 = vpop.xlane.xlu1 %2473  ;;  %v9362_v17 = vld [vmem:[#allocation98_spill] sm:$0xff] }
 0x35a   :  { %v2356_v24 = vmax.f32 %v2324_v34, 1e-06  ;;  %v2819_v33 = vmul.f32 0.6931472, %v3875_v41  ;;  %v2325_v44 = vmul.f32 %v2293_v5, %v9360_v25  ;;  %v2295_v43 = vmul.f32 %v9361_v48, %v9361_v48  ;;  %v9364_v5 = vld [vmem:[#allocation63_spill] sm:$0xff]  ;;  %v9368_v48 = vld [vmem:[#allocation12_spill] sm:$0xff] }
 0x35b   :  { %v3226_v20 = vsel %vm139_vm0, %v3223_v45, 0.0  ;;  %v3881_v23 = vpop.eup %3880  ;;  %v8140_v19 = vmul.f32 0.6931472, %v3873_v29  ;;  %v2339_v58 = vmax.f32 %v2307_v46, 1e-06  ;;  %v2511_v28 = vmul.f32 0.015625, %v2459_v14 }
 0x35c   :  { %3227 = vadd.xlane.f32.xlu0 %v3226_v20  ;;  %v2277_v49 = vmul.f32 %v9362_v17, %v9362_v17  ;;  %v8146_v27 = vpop.eup %3882  ;;  %v2897_v34 = vadd.f32 %v2896_v40, %v2861_v4  ;;  %v2862_v41 = vmul.f32 %v2819_v33, %v2510_v52  ;;  %v2326_v35 = vmul.f32 %v2294_v18, %v9363_v26  ;;  %v9365_v29 = vld [vmem:[#allocation143_spill] sm:$0xff]  ;;  %v9367_v20 = vld [vmem:[#allocation9_spill] sm:$0xff]  ;;  %v9369_v18 = vld [vmem:[#allocation154_spill] sm:$0xff] }
 0x35d   :  { %v2296_v8 = vmul.f32 %v9364_v5, %v9364_v5  ;;  %v2308_v50 = vmul.f32 %v2276_v0, %v9365_v29  ;;  %3892 = vlog2.f32 %v2771_v57  ;;  %v2772_v1 = vadd.f32 1.0, %v2356_v24  ;;  %v9366_v14 = vld [vmem:[#allocation51_spill] sm:$0xff]  ;;  %v2471_v5 = vpop.xlane.xlu0 %2470 }
 0x35e   :  { %v3885_v11 = vpop.eup %3884  ;;  %v2278_v46 = vmul.f32 %v9366_v14, %v9366_v14  ;;  %v2821_v45 = vmul.f32 0.6931472, %v3881_v23  ;;  %v2357_v7 = vmax.f32 %v2325_v44, 1e-06  ;;  %v2327_v25 = vmul.f32 %v2295_v43, %v9367_v20  ;;  %v9370_v17 = vld [vmem:[#allocation27_spill] sm:$0xff]  ;;  %v9371_v44 = vld [vmem:[#allocation166_spill] sm:$0xff]  ;;  %v8164_v20 = vpop.xlane.xlu1 %2476 }
 0x35f   :  { %v2297_v52 = vmul.f32 %v9368_v48, %v9368_v48  ;;  %v2755_v40 = vadd.f32 1.0, %v2339_v58  ;;  %v2512_v4 = vmul.f32 0.015625, %v8100_v3  ;;  %v2309_v33 = vmul.f32 %v2277_v49, %v9369_v18  ;;  %v9372_v58 = vld [vmem:[#allocation157_spill] sm:$0xff]  ;;  %v9373_v3 = vld [vmem:[#allocation78_spill] sm:$0xff] }
 0x360   :  { %v2279_v0 = vmul.f32 %v9370_v17, %v9370_v17  ;;  %v8161_v57 = vpop.eup %3886  ;;  %v2898_v24 = vadd.f32 %v2897_v34, %v2862_v41  ;;  %v2863_v26 = vmul.f32 %v2821_v45, %v2511_v28  ;;  %v2358_v23 = vmax.f32 %v2326_v35, 1e-06  ;;  %v9375_v35 = vld [vmem:[#allocation162_spill] sm:$0xff] }
 0x361   :  { %v2328_v29 = vmul.f32 %v2296_v8, %v9371_v44  ;;  %v2340_v43 = vmax.f32 %v2308_v50, 1e-06  ;;  %v2823_v14 = vmul.f32 0.6931472, %v3885_v11  ;;  %v2310_v48 = vmul.f32 %v2278_v46, %v9372_v58  ;;  %v9376_v8 = vld [vmem:[#allocation113_spill] sm:$0xff] }
 0x362   :  { %v2280_v49 = vmul.f32 %v9373_v3, %v9373_v3  ;;  %3894 = vlog2.f32 %v2772_v1  ;;  %v2773_v18 = vadd.f32 1.0, %v2357_v7  ;;  %v2359_v17 = vmax.f32 %v2327_v25, 1e-06  ;;  %v9377_v1 = vld [vmem:[#allocation10_spill] sm:$0xff] }
 0x363   :  { %v2329_v12 = vmul.f32 %v2297_v52, %v9374_v2  ;;  %v3889_v34 = vpop.eup %3888  ;;  %v2513_v28 = vmul.f32 0.015625, %v2465_v47  ;;  %v2341_v41 = vmax.f32 %v2309_v33, 1e-06  ;;  %v2311_v45 = vmul.f32 %v2279_v0, %v9375_v35  ;;  %v8174_v2 = vpop.xlane.xlu0 %2428 }
 0x364   :  { %v2281_v11 = vmul.f32 %v9376_v8, %v9376_v8  ;;  %v2899_v50 = vadd.f32 %v2898_v24, %v2863_v26  ;;  %v2864_v44 = vmul.f32 %v2823_v14, %v2512_v4  ;;  %v2774_v36 = vadd.f32 1.0, %v2358_v23  ;;  %v8177_v35 = vpop.xlane.xlu1 %2479  ;;  %v9378_v24 = vld [vmem:[#allocation46_spill] sm:$0xff] }
 0x365   :  { %v2360_v46 = vmax.f32 %v2328_v29, 1e-06  ;;  %3896 = vlog2.f32 %v2755_v40  ;;  %v2756_v58 = vadd.f32 1.0, %v2340_v43  ;;  %v2342_v3 = vmax.f32 %v2310_v48, 1e-06 }
 0x366   :  { %v2312_v7 = vmul.f32 %v2280_v49, %v9377_v1  ;;  %v3891_v25 = vpop.eup %3890  ;;  %v2825_v10 = vmul.f32 0.6931472, %v3889_v34  ;;  %3898 = vlog2.f32 %v2773_v18  ;;  %v2775_v47 = vadd.f32 1.0, %v2359_v17 }
 0x367   :  { %v2361_v52 = vmax.f32 %v2329_v12, 1e-06  ;;  %v2514_v33 = vmul.f32 0.015625, %v8117_v9  ;;  %v2757_v0 = vadd.f32 1.0, %v2341_v41  ;;  %v2343_v4 = vmax.f32 %v2311_v45, 1e-06  ;;  %v8185_v45 = vpop.xlane.xlu0 %2431 }
 0x368   :  { %v2313_v26 = vmul.f32 %v2281_v11, %v9378_v24  ;;  %v2900_v40 = vadd.f32 %v2899_v50, %v2864_v44  ;;  %v2865_v23 = vmul.f32 %v2825_v10, %v2513_v28  ;;  %3900 = vlog2.f32 %v2774_v36 }
 0x369   :  { %v2776_v29 = vadd.f32 1.0, %v2360_v46  ;;  %v2877_v43 = vadd.f32 %v8123_v22, %v8134_v56  ;;  %3902 = vlog2.f32 %v2756_v58  ;;  %v2758_v14 = vadd.f32 1.0, %v2342_v3 }
 0x36a   :  { %v2344_v48 = vmax.f32 %v2312_v7, 1e-06  ;;  %v3893_v49 = vpop.eup %3892  ;;  %v2847_v12 = vmul.f32 %v8140_v19, %v8078_v55  ;;  %v2827_v9 = vmul.f32 0.6931472, %v3891_v25  ;;  %3904 = vlog2.f32 %v2775_v47  ;;  %v2483_v55 = vpop.xlane.xlu1 %2482 }
 0x36b   :  { %v2777_v18 = vadd.f32 1.0, %v2361_v52  ;;  %v2791_v17 = vmul.f32 0.6931472, %v8131_v31  ;;  %3906 = vlog2.f32 %v2757_v0  ;;  %v2759_v34 = vadd.f32 1.0, %v2343_v4  ;;  %v2435_v52 = vpop.xlane.xlu0 %2434 }
 0x36c   :  { %v2345_v10 = vmax.f32 %v2313_v26, 1e-06  ;;  %v2901_v36 = vadd.f32 %v2900_v40, %v2865_v23  ;;  %v2866_v28 = vmul.f32 %v2827_v9, %v2514_v33  ;;  %v2515_v41 = vmul.f32 0.015625, %v2471_v5 }
 0x36d   :  { %3908 = vlog2.f32 %v2776_v29  ;;  %v2848_v22 = vmul.f32 %v2791_v17, %v8083_v13  ;;  %v2793_v56 = vmul.f32 0.6931472, %v8146_v27  ;;  %v2760_v19 = vadd.f32 1.0, %v2344_v48 }
 0x36e   :  { %3910 = vlog2.f32 %v2758_v14  ;;  %v1450_v8 = vadd.f32 %v8008_v37, %v8031_v42  ;;  %v1415_v31 = vmul.f32 %v8040_v39, %v7999_v51  ;;  %v2829_v11 = vmul.f32 0.6931472, %v3893_v49  ;;  %v2486_v4 = vpop.xlane.xlu1 %2485  ;;  %v9380_v49 = vld [vmem:[#allocation97_spill] sm:$0xff] }
 0x36f   :  { %3912 = vlog2.f32 %v2777_v18  ;;  %v3895_v50 = vpop.eup %3894  ;;  %v2878_v5 = vadd.f32 %v2877_v43, %v2847_v12  ;;  %v2849_v44 = vmul.f32 %v2793_v56, %v8092_v61  ;;  %v2761_v46 = vadd.f32 1.0, %v2345_v10  ;;  %v9379_v61 = vld [vmem:[#allocation172_spill] sm:$0xff] }
 0x370   :  { %3914 = vlog2.f32 %v2759_v34  ;;  %v1381_v13 = vmul.f32 0.6931472, %v7978_v21  ;;  %v2902_v27 = vadd.f32 %v2901_v36, %v2866_v28  ;;  %v2867_v58 = vmul.f32 %v2829_v11, %v2515_v41  ;;  %v2438_v36 = vpop.xlane.xlu0 %2437 }
 0x371   :  { %v2516_v3 = vmul.f32 0.015625, %v8142_v15  ;;  %v1401_v37 = vmul.f32 %v7883_v60, %v7846_v54  ;;  %v2879_v42 = vadd.f32 %v2878_v5, %v2848_v22  ;;  %v2498_v51 = vmul.f32 0.015625, %v8020_v62  ;;  %v9381_v22 = vld [vmem:[#allocation48_spill] sm:$0xff] }
 0x372   :  { %3916 = vlog2.f32 %v2760_v19  ;;  %v3897_v39 = vpop.eup %3896  ;;  %v1451_v1 = vadd.f32 %v1450_v8, %v1415_v31  ;;  %v1416_v7 = vmul.f32 %v1381_v13, %v8002_v53  ;;  %v1065_v25 = vmul.f32 0.015625, %v9379_v61  ;;  %v2489_v8 = vpop.xlane.xlu1 %2488 }
 0x373   :  { %v2831_v47 = vmul.f32 0.6931472, %v3895_v50  ;;  %v3899_v21 = vpop.eup %3898  ;;  %v2880_v33 = vadd.f32 %v2879_v42, %v2849_v44  ;;  %v2795_v0 = vmul.f32 0.6931472, %v8161_v57  ;;  %v2499_v15 = vmul.f32 0.015625, %v7993_v30 }
 0x374   :  { %3918 = vlog2.f32 %v2761_v46  ;;  %v1383_v54 = vmul.f32 0.6931472, %v8042_v32  ;;  %v2903_v60 = vadd.f32 %v2902_v27, %v2867_v58  ;;  %v2517_v24 = vmul.f32 0.015625, %v8164_v20 }
 0x375   :  { %v2868_v62 = vmul.f32 %v2831_v47, %v2516_v3  ;;  %v3901_v26 = vpop.eup %3900  ;;  %v8206_v53 = vadd.f32 %v7881_v6, %v1401_v37  ;;  %v8209_v40 = vmul.f32 0.6931472, %v7942_v16  ;;  %v2850_v23 = vmul.f32 %v2795_v0, %v2498_v51 }
 0x376   :  { %v2797_v29 = vmul.f32 0.6931472, %v3897_v39  ;;  %v3903_v57 = vpop.eup %3902  ;;  %v1452_v43 = vadd.f32 %v1451_v1, %v1416_v7  ;;  %v1417_v30 = vmul.f32 %v1383_v54, %v1065_v25  ;;  %v2833_v14 = vmul.f32 0.6931472, %v3899_v21  ;;  %v2441_v21 = vpop.xlane.xlu0 %2440 }
 0x377   :  { %v2518_v48 = vmul.f32 0.015625, %v8177_v35  ;;  %v3905_v32 = vpop.eup %3904  ;;  %v1066_v12 = vmul.f32 0.015625, %v9380_v49  ;;  %v2881_v9 = vadd.f32 %v2880_v33, %v2850_v23  ;;  %v2500_v18 = vmul.f32 0.015625, %v8045_v59 }
 0x378   :  { %v2851_v20 = vmul.f32 %v2797_v29, %v2499_v15  ;;  %v3907_v6 = vpop.eup %3906  ;;  %v2904_v17 = vadd.f32 %v2903_v60, %v2868_v62  ;;  %v2869_v34 = vmul.f32 %v2833_v14, %v2517_v24  ;;  %v2835_v16 = vmul.f32 0.6931472, %v3901_v26 }
 0x379   :  { %v2519_v10 = vmul.f32 0.015625, %v2483_v55  ;;  %v1385_v41 = vmul.f32 0.6931472, %v8056_v63  ;;  %v1067_v56 = vmul.f32 0.015625, %v9381_v22  ;;  %v2799_v19 = vmul.f32 0.6931472, %v3903_v57 }
 0x37a   :  { %v3909_v28 = vpop.eup %3908  ;;  %v2501_v35 = vmul.f32 0.015625, %v8174_v2  ;;  %v1453_v11 = vadd.f32 %v1452_v43, %v1417_v30  ;;  %v2870_v50 = vmul.f32 %v2835_v16, %v2518_v48  ;;  %v2837_v5 = vmul.f32 0.6931472, %v3905_v32  ;;  %v9382_v43 = vld [vmem:[#allocation18_spill] sm:$0xff]  ;;  %v9383_v30 = vld [vmem:[#allocation115_spill] sm:$0xff] }
 0x37b   :  { %v3911_v31 = vpop.eup %3910  ;;  %v2520_v59 = vmul.f32 0.015625, %v2486_v4  ;;  %v2882_v46 = vadd.f32 %v2881_v9, %v2851_v20  ;;  %v2852_v13 = vmul.f32 %v2799_v19, %v2500_v18  ;;  %v2801_v27 = vmul.f32 0.6931472, %v3907_v6  ;;  %v9384_v20 = vld [vmem:[#allocation3_spill] sm:$0xff] }
 0x37c   :  { %v3913_v44 = vpop.eup %3912  ;;  %v2502_v55 = vmul.f32 0.015625, %v8185_v45  ;;  %v2905_v3 = vadd.f32 %v2904_v17, %v2869_v34  ;;  %v2871_v63 = vmul.f32 %v2837_v5, %v2519_v10  ;;  %v2839_v37 = vmul.f32 0.6931472, %v3909_v28 }
 0x37d   :  { %v3915_v58 = vpop.eup %3914  ;;  %v2521_v42 = vmul.f32 0.015625, %v2489_v8  ;;  %v1418_v51 = vmul.f32 %v1385_v41, %v1066_v12  ;;  %v2853_v39 = vmul.f32 %v2801_v27, %v2501_v35  ;;  %v2803_v2 = vmul.f32 0.6931472, %v3911_v31  ;;  %v9385_v31 = vld [vmem:[#allocation92_spill] sm:$0xff] }
 0x37e   :  { %v2503_v1 = vmul.f32 0.015625, %v2435_v52  ;;  %v1387_v61 = vmul.f32 0.6931472, %v8064_v38  ;;  %v2906_v25 = vadd.f32 %v2905_v3, %v2870_v50  ;;  %v2872_v47 = vmul.f32 %v2839_v37, %v2520_v59 }
 0x37f   :  { %v3917_v7 = vpop.eup %3916  ;;  %v2841_v33 = vmul.f32 0.6931472, %v3913_v44  ;;  %v2883_v0 = vadd.f32 %v2882_v46, %v2852_v13  ;;  %v2854_v15 = vmul.f32 %v2803_v2, %v2502_v55  ;;  %v2805_v4 = vmul.f32 0.6931472, %v3915_v58  ;;  %v2951_v13 = vpop.xlane.xlu1 %2950 }
 0x380   :  { %v2504_v45 = vmul.f32 0.015625, %v2438_v36  ;;  %v1454_v60 = vadd.f32 %v1453_v11, %v1418_v51  ;;  %v1419_v62 = vmul.f32 %v1387_v61, %v1067_v56  ;;  %v2907_v24 = vadd.f32 %v2906_v25, %v2871_v63  ;;  %v9386_v63 = vld [vmem:[#allocation86_spill] sm:$0xff] }
 0x381   :  { %v3919_v54 = vpop.eup %3918  ;;  %v2873_v26 = vmul.f32 %v2841_v33, %v2521_v42  ;;  %v2884_v23 = vadd.f32 %v2883_v0, %v2853_v39  ;;  %v2855_v29 = vmul.f32 %v2805_v4, %v2503_v1  ;;  %v2807_v57 = vmul.f32 0.6931472, %v3917_v7  ;;  %v9387_v0 = vld [vmem:[#allocation19_spill] sm:$0xff] }
 0x382   :  { %v2505_v52 = vmul.f32 0.015625, %v2441_v21  ;;  %v1402_v38 = vmul.f32 %v8209_v40, %v9382_v43  ;;  %v1355_v14 = vmul.f32 0.6931472, %v9383_v30  ;;  %v2908_v48 = vadd.f32 %v2907_v24, %v2872_v47  ;;  %v2948_v40 = vpop.xlane.xlu0 %2947 }
 0x383   :  { %v2885_v32 = vadd.f32 %v2884_v23, %v2854_v15  ;;  %v2856_v49 = vmul.f32 %v2807_v57, %v2504_v45  ;;  %v2809_v12 = vmul.f32 0.6931472, %v3919_v54  ;;  %v1455_v17 = vadd.f32 %v1454_v60, %v1419_v62 }
 0x384   :  { %v1433_v9 = vadd.f32 %v8206_v53, %v1402_v38  ;;  %v1403_v18 = vmul.f32 %v1355_v14, %v9384_v20  ;;  %v2909_v6 = vadd.f32 %v2908_v48, %v2873_v26  ;;  %v3160_v11 = vadd.f32 %v2948_v40, %v9385_v31 }
 0x385   :  { %v2886_v34 = vadd.f32 %v2885_v32, %v2855_v29  ;;  %v2857_v16 = vmul.f32 %v2809_v12, %v2505_v52  ;;  %v1456_v41 = vrot.slane %v1455_v17, 4  ;;  %v3161_v37 = vadd.f32 %v2951_v13, %v9386_v63  ;;  %v9388_v29 = vld [vmem:[#allocation60_spill] sm:$0xff] }
 0x386   :  { %v1434_v36 = vadd.f32 %v1433_v9, %v1403_v18  ;;  %v2910_v28 = vrot.slane %v2909_v6, 4  ;;  %v1489_v15 = vmul.f32 0.015625, %v9387_v0  ;;  %vm3300_vm0 = vcmask 15368  }
 0x387   :  { %v2887_v10 = vadd.f32 %v2886_v34, %v2856_v49  ;;  %v1457_v35 = vadd.f32 %v1456_v41, %v1455_v17  ;;  %v1488_v57 = vmul.f32 0.015625, %v9388_v29  ;;  %vm3333_vm7 = vcmask 16400  }
 0x388   :  { %v1435_v56 = vrot.slane %v1434_v36, 4  ;;  %v2911_v19 = vadd.f32 %v2910_v28, %v2909_v6  ;;  %vm3336_vm8 = vcmask 24600   ;;  %vm3339_vm9 = vcmask 32800  }
 0x389   :  { %v2888_v22 = vadd.f32 %v2887_v10, %v2857_v16  ;;  %v1458_v44 = vrot.slane %v1457_v35, 2  ;;  %vm3342_vm10 = vcmask 41000  }
 0x38a   :  { %v1436_v53 = vadd.f32 %v1435_v56, %v1434_v36  ;;  %v2912_v5 = vrot.slane %v2911_v19, 2 }
 0x38b   :  { %v2889_v8 = vrot.slane %v2888_v22, 4  ;;  %v1459_v58 = vadd.f32 %v1458_v44, %v1457_v35 }
 0x38c   :  { %v1437_v27 = vrot.slane %v1436_v53, 2  ;;  %v2913_v55 = vadd.f32 %v2912_v5, %v2911_v19 }
 0x38d   :  { %v2890_v46 = vadd.f32 %v2889_v8, %v2888_v22  ;;  %v1460_v1 = vrot.slane %v1459_v58, 1 }
 0x38e   :  { %v1438_v51 = vadd.f32 %v1437_v27, %v1436_v53  ;;  %v2914_v2 = vrot.slane %v2913_v55, 1 }
 0x38f   :  { %v3156_v50 = vpop.xlane.xlu0 %3155  ;;  %v2891_v3 = vrot.slane %v2890_v46, 2  ;;  %v1461_v47 = vadd.f32 %v1460_v1, %v1459_v58 }
 0x390   :  { %v3162_v59 = vsub.f32 %v3160_v11, %v3156_v50  ;;  %v1439_v61 = vrot.slane %v1438_v51, 1  ;;  %v2915_v25 = vadd.f32 %v2914_v2, %v2913_v55 }
 0x391   :  { %v2892_v7 = vadd.f32 %v2891_v3, %v2890_v46  ;;  %v1463_v24 = vmul.f32 0.0078125, %v1461_v47 }
 0x392   :  { %3920 = vrcp.f32 %v3162_v59  ;;  %v1440_v4 = vadd.f32 %v1439_v61, %v1438_v51  ;;  %v2917_v45 = vmul.f32 0.0078125, %v2915_v25 }
 0x393   :  { %v2893_v33 = vrot.slane %v2892_v7, 1  ;;  %v1491_v43 = vmul.f32 %v1489_v15, %v1463_v24 }
 0x394   :  { %v1462_v30 = vmul.f32 0.0078125, %v1440_v4 }
 0x395   :  { %v2894_v23 = vadd.f32 %v2893_v33, %v2892_v7 }
 0x396   :  { %v1490_v20 = vmul.f32 %v1488_v57, %v1462_v30 }
 0x397   :  { %v2916_v49 = vmul.f32 0.0078125, %v2894_v23 }
 0x398   :  { %v3159_v42 = vpop.xlane.xlu1 %3158 }
 0x399   :  { %v3163_v39 = vsub.f32 %v3161_v37, %v3159_v42 }
 0x39b   :  { %3922 = vrcp.f32 %v3163_v39 }
 0x39e   :  { %v2941_v21 = vpop.xlane.xlu1 %2940 }
 0x39f   :  { %v2943_v54 = vmul.f32 0.015625, %v2941_v21  ;;  %v3921_v62 = vpop.eup %3920 }
 0x3a0   :  { %v3165_v14 = vmul.f32 %v3921_v62, %v3156_v50 }
 0x3a1   :  { %v2938_v60 = vpop.xlane.xlu0 %2937  ;;  %v2945_v48 = vmul.f32 %v2943_v54, %v2917_v45 }
 0x3a2   :  { %v2985_v26 = vpop.xlane.xlu1 %2984  ;;  %v2942_v38 = vmul.f32 0.015625, %v2938_v60  ;;  %v3168_v34 = vsub.f32 1.0, %v3165_v14 }
 0x3a3   :  { %v3032_v52 = vmul.f32 0.015625, %v2985_v26 }
 0x3a4   :  { %v2944_v17 = vmul.f32 %v2942_v38, %v2916_v49 }
 0x3a5   :  { %3317 = vst.msk [vmem:[%s8386_s2 + $0x80] sm:$0xff] %vm3300_vm0, %v3032_v52  ;;  %v2953_v32 = vpop.xlane.xlu0 %2952 }
 0x3a6   :  { %3335 = vst.msk [vmem:[%s8386_s2 + $0x80] sm:$0x1] %vm3333_vm7, %v1491_v43  ;;  %v2957_v12 = vpop.xlane.xlu1 %2956  ;;  %v3016_v9 = vmul.f32 0.015625, %v2953_v32 }
 0x3a7   :  { %v3018_v18 = vmul.f32 0.015625, %v2957_v12  ;;  %3338 = vst.msk [vmem:[%s8386_s2 + $0x80] sm:$0x1] %vm3336_vm8, %v2945_v48 }
 0x3a8   :  { %v3923_v6 = vpop.eup %3922  ;;  %3301 = vst.msk [vmem:[%s8386_s2] sm:$0xff] %vm3300_vm0, %v3016_v9 }
 0x3a9   :  { %v3167_v16 = vmul.f32 %v3923_v6, %v3159_v42  ;;  %3303 = vst.msk [vmem:[%s8386_s2 + $0x10] sm:$0xff] %vm3300_vm0, %v3018_v18  ;;  %v2955_v10 = vpop.xlane.xlu0 %2954 }
 0x3aa   :  { %3334 = vst.msk [vmem:[%s8386_s2] sm:$0x1] %vm3333_vm7, %v1490_v20  ;;  %v2961_v36 = vpop.xlane.xlu1 %2960  ;;  %v3017_v28 = vmul.f32 0.015625, %v2955_v10 }
 0x3ab   :  { %3337 = vst.msk [vmem:[%s8386_s2] sm:$0x1] %vm3336_vm8, %v2944_v17  ;;  %v3169_v41 = vsub.f32 1.0, %v3167_v16  ;;  %v3020_v22 = vmul.f32 0.015625, %v2961_v36 }
 0x3ac   :  { %3340 = vst.msk [vmem:[%s8386_s2] sm:$0x1] %vm3339_vm9, %v3168_v34 }
 0x3ad   :  { %3302 = vst.msk [vmem:[%s8386_s2 + $0x8] sm:$0xff] %vm3300_vm0, %v3017_v28  ;;  %3305 = vst.msk [vmem:[%s8386_s2 + $0x20] sm:$0xff] %vm3300_vm0, %v3020_v22  ;;  %v2959_v40 = vpop.xlane.xlu0 %2958 }
 0x3ae   :  { %3341 = vst.msk [vmem:[%s8386_s2 + $0x80] sm:$0x1] %vm3339_vm9, %v3169_v41  ;;  %v2965_v56 = vpop.xlane.xlu1 %2964  ;;  %v3019_v19 = vmul.f32 0.015625, %v2959_v40 }
 0x3af   :  { %v3022_v35 = vmul.f32 0.015625, %v2965_v56 }
 0x3b0   :  { %3304 = vst.msk [vmem:[%s8386_s2 + $0x18] sm:$0xff] %vm3300_vm0, %v3019_v19 }
 0x3b1   :  { %3307 = vst.msk [vmem:[%s8386_s2 + $0x30] sm:$0xff] %vm3300_vm0, %v3022_v35  ;;  %v2963_v8 = vpop.xlane.xlu0 %2962 }
 0x3b2   :  { %v2969_v31 = vpop.xlane.xlu1 %2968  ;;  %v3021_v11 = vmul.f32 0.015625, %v2963_v8 }
 0x3b3   :  { %v3024_v50 = vmul.f32 0.015625, %v2969_v31 }
 0x3b4   :  { %3306 = vst.msk [vmem:[%s8386_s2 + $0x28] sm:$0xff] %vm3300_vm0, %v3021_v11 }
 0x3b5   :  { %3309 = vst.msk [vmem:[%s8386_s2 + $0x40] sm:$0xff] %vm3300_vm0, %v3024_v50  ;;  %v2967_v53 = vpop.xlane.xlu0 %2966 }
 0x3b6   :  { %v2973_v5 = vpop.xlane.xlu1 %2972  ;;  %v3023_v59 = vmul.f32 0.015625, %v2967_v53 }
 0x3b7   :  { %v3026_v44 = vmul.f32 0.015625, %v2973_v5 }
 0x3b8   :  { %3308 = vst.msk [vmem:[%s8386_s2 + $0x38] sm:$0xff] %vm3300_vm0, %v3023_v59 }
 0x3b9   :  { %3311 = vst.msk [vmem:[%s8386_s2 + $0x50] sm:$0xff] %vm3300_vm0, %v3026_v44  ;;  %v2971_v46 = vpop.xlane.xlu0 %2970 }
 0x3ba   :  { %v2977_v13 = vpop.xlane.xlu1 %2976  ;;  %v3025_v27 = vmul.f32 0.015625, %v2971_v46 }
 0x3bb   :  { %v3028_v55 = vmul.f32 0.015625, %v2977_v13 }
 0x3bc   :  { %3310 = vst.msk [vmem:[%s8386_s2 + $0x48] sm:$0xff] %vm3300_vm0, %v3025_v27 }
 0x3bd   :  { %3313 = vst.msk [vmem:[%s8386_s2 + $0x60] sm:$0xff] %vm3300_vm0, %v3028_v55  ;;  %v2975_v58 = vpop.xlane.xlu0 %2974 }
 0x3be   :  { %v2981_v3 = vpop.xlane.xlu1 %2980  ;;  %v3027_v63 = vmul.f32 0.015625, %v2975_v58 }
 0x3bf   :  { %v3030_v37 = vmul.f32 0.015625, %v2981_v3 }
 0x3c0   :  { %3312 = vst.msk [vmem:[%s8386_s2 + $0x58] sm:$0xff] %vm3300_vm0, %v3027_v63 }
 0x3c1   :  { %3315 = vst.msk [vmem:[%s8386_s2 + $0x70] sm:$0xff] %vm3300_vm0, %v3030_v37  ;;  %v2979_v42 = vpop.xlane.xlu0 %2978 }
 0x3c2   :  { %v2987_v51 = vpop.xlane.xlu1 %2986  ;;  %v3029_v39 = vmul.f32 0.015625, %v2979_v42 }
 0x3c3   :  { %v3033_v2 = vmul.f32 0.015625, %v2987_v51 }
 0x3c4   :  { %3314 = vst.msk [vmem:[%s8386_s2 + $0x68] sm:$0xff] %vm3300_vm0, %v3029_v39 }
 0x3c5   :  { %3318 = vst.msk [vmem:[%s8386_s2 + $0x88] sm:$0xff] %vm3300_vm0, %v3033_v2  ;;  %v2983_v1 = vpop.xlane.xlu0 %2982 }
 0x3c6   :  { %v2991_v7 = vpop.xlane.xlu1 %2990  ;;  %v3031_v61 = vmul.f32 0.015625, %v2983_v1 }
 0x3c7   :  { %v3035_v25 = vmul.f32 0.015625, %v2991_v7 }
 0x3c8   :  { %3316 = vst.msk [vmem:[%s8386_s2 + $0x78] sm:$0xff] %vm3300_vm0, %v3031_v61 }
 0x3c9   :  { %3320 = vst.msk [vmem:[%s8386_s2 + $0x98] sm:$0xff] %vm3300_vm0, %v3035_v25  ;;  %v2989_v47 = vpop.xlane.xlu0 %2988 }
 0x3ca   :  { %v2995_v21 = vpop.xlane.xlu1 %2994  ;;  %v3034_v33 = vmul.f32 0.015625, %v2989_v47 }
 0x3cb   :  { %v3037_v0 = vmul.f32 0.015625, %v2995_v21 }
 0x3cc   :  { %3319 = vst.msk [vmem:[%s8386_s2 + $0x90] sm:$0xff] %vm3300_vm0, %v3034_v33 }
 0x3cd   :  { %3322 = vst.msk [vmem:[%s8386_s2 + $0xa8] sm:$0xff] %vm3300_vm0, %v3037_v0  ;;  %v2993_v15 = vpop.xlane.xlu0 %2992 }
 0x3ce   :  { %v2999_v4 = vpop.xlane.xlu1 %2998  ;;  %v3036_v45 = vmul.f32 0.015625, %v2993_v15 }
 0x3cf   :  { %v3039_v54 = vmul.f32 0.015625, %v2999_v4 }
 0x3d0   :  { %3321 = vst.msk [vmem:[%s8386_s2 + $0xa0] sm:$0xff] %vm3300_vm0, %v3036_v45 }
 0x3d1   :  { %3324 = vst.msk [vmem:[%s8386_s2 + $0xb8] sm:$0xff] %vm3300_vm0, %v3039_v54  ;;  %v2997_v60 = vpop.xlane.xlu0 %2996 }
 0x3d2   :  { %v3003_v62 = vpop.xlane.xlu1 %3002  ;;  %v3038_v24 = vmul.f32 0.015625, %v2997_v60 }
 0x3d3   :  { %v3041_v26 = vmul.f32 0.015625, %v3003_v62 }
 0x3d4   :  { %3323 = vst.msk [vmem:[%s8386_s2 + $0xb0] sm:$0xff] %vm3300_vm0, %v3038_v24 }
 0x3d5   :  { %3326 = vst.msk [vmem:[%s8386_s2 + $0xc8] sm:$0xff] %vm3300_vm0, %v3041_v26  ;;  %v3001_v23 = vpop.xlane.xlu0 %3000 }
 0x3d6   :  { %v3007_v29 = vpop.xlane.xlu1 %3006  ;;  %v3040_v57 = vmul.f32 0.015625, %v3001_v23 }
 0x3d7   :  { %v3043_v52 = vmul.f32 0.015625, %v3007_v29 }
 0x3d8   :  { %3325 = vst.msk [vmem:[%s8386_s2 + $0xc0] sm:$0xff] %vm3300_vm0, %v3040_v57 }
 0x3d9   :  { %3328 = vst.msk [vmem:[%s8386_s2 + $0xd8] sm:$0xff] %vm3300_vm0, %v3043_v52  ;;  %v3005_v43 = vpop.xlane.xlu0 %3004 }
 0x3da   :  { %v3011_v38 = vpop.xlane.xlu1 %3010  ;;  %v3042_v30 = vmul.f32 0.015625, %v3005_v43 }
 0x3db   :  { %v3045_v14 = vmul.f32 0.015625, %v3011_v38 }
 0x3dc   :  { %3327 = vst.msk [vmem:[%s8386_s2 + $0xd0] sm:$0xff] %vm3300_vm0, %v3042_v30 }
 0x3dd   :  { %3330 = vst.msk [vmem:[%s8386_s2 + $0xe8] sm:$0xff] %vm3300_vm0, %v3045_v14  ;;  %v3009_v48 = vpop.xlane.xlu0 %3008 }
 0x3de   :  { %v3015_v32 = vpop.xlane.xlu1 %3014  ;;  %v3044_v49 = vmul.f32 0.015625, %v3009_v48 }
 0x3df   :  { %v3047_v12 = vmul.f32 0.015625, %v3015_v32 }
 0x3e0   :  { %3329 = vst.msk [vmem:[%s8386_s2 + $0xe0] sm:$0xff] %vm3300_vm0, %v3044_v49 }
 0x3e1   :  { %3332 = vst.msk [vmem:[%s8386_s2 + $0xf8] sm:$0xff] %vm3300_vm0, %v3047_v12  ;;  %v3013_v9 = vpop.xlane.xlu0 %3012 }
 0x3e2   :  { %v3231_v20 = vpop.xlane.xlu1 %3230  ;;  %v3046_v18 = vmul.f32 0.015625, %v3013_v9 }
 0x3e3   :  { %v3233_v6 = vmul.f32 0.015625, %v3231_v20 }
 0x3e4   :  { %3331 = vst.msk [vmem:[%s8386_s2 + $0xf0] sm:$0xff] %vm3300_vm0, %v3046_v18 }
 0x3e5   :  { %3344 = vst.msk [vmem:[%s8386_s2 + $0x80] sm:$0x1] %vm3342_vm10, %v3233_v6  ;;  %v3228_v17 = vpop.xlane.xlu0 %3227 }
 0x3e6   :  { %v3232_v34 = vmul.f32 0.015625, %v3228_v17 }
 0x3e8   :  { %3343 = vst.msk [vmem:[%s8386_s2] sm:$0x1] %vm3342_vm10, %v3232_v34 }

</bundles_post_ra>
